<compile_context>
chip_gen: v6e
topology: v6e:2x2x1
jax: 0.10.0
libtpu: 0.0.40
codegen_flags: <defaults>
</compile_context>

<pallas_src>
import functools
import math

import jax
import jax.numpy as jnp
from jax.experimental import pallas as pl
from jax.experimental.pallas import tpu as pltpu

EPS = 1e-6
NEG_INF = -1e9

# Tile bounds (K-tiling keeps per-step VMEM bounded, so tiles can be large).
TM_MAX = 512    # row tile      (sublane axis, multiple of 8)
TN_MAX = 1024   # out-col tile  (lane axis, multiple of 256 for the 256-wide MXU)
TK_MAX = 512    # contraction tile (multiple of 128)


def _pick_tile(dim, max_tile, unit):
    """Largest tile <= max_tile that divides `dim` and is a multiple of `unit`;
    falls back to the full dim (full-extent blocks are always legal).
    TODO(synk): pad instead of falling back for prime-ish dims."""
    if dim <= max_tile:
        return dim
    t = (max_tile // unit) * unit
    while t >= unit:
        if dim % t == 0:
            return t
        t -= unit
    return dim


@functools.lru_cache(maxsize=None)
def _vmem_limit_bytes():
    """Per-generation scoped-VMEM limit with headroom:
    v5e/v6e (128 MiB physical) -> ~112 MiB, v7x (64 MiB) -> 48 MiB."""
    try:
        cap = int(pltpu.get_tpu_info().vmem_capacity_bytes)
    except Exception:
        cap = 64 << 20      # conservative (v7x-sized) fallback
    return max(cap - (16 << 20), 32 << 20)


def _mosaic_params(dimension_semantics):
    return pltpu.CompilerParams(dimension_semantics=dimension_semantics,
                                vmem_limit_bytes=_vmem_limit_bytes())


# ----------------------------- Pallas kernels ------------------------------

def _ln_linear_kernel(x_ref, a_ref, b_ref, w_ref, bias_ref, o_ref,
                      xn_ref, acc_ref, *, activation):
    """LayerNorm (full K, computed once per row tile) -> K-tiled matmul -> bias.
    Grid = (rows, out-cols, K); x block and the normalized scratch are resident
    across the inner (j, k) axes, so LN reductions and the x DMA are not
    repeated per output-column tile."""
    j = pl.program_id(1)
    k = pl.program_id(2)
    num_k = xn_ref.shape[0]
    tk = xn_ref.shape[2]

    @pl.when(jnp.logical_and(j == 0, k == 0))
    def _():
        x = x_ref[...].astype(jnp.float32)                    # (tm, K)
        d = x.shape[-1]
        mean = jnp.mean(x, axis=-1, keepdims=True)
        diff = x - mean
        # torch.Tensor.std is unbiased (N-1); eps is added to std (reference).
        std = jnp.sqrt(jnp.sum(diff * diff, axis=-1, keepdims=True) * (1.0 / (d - 1)))
        xn = (a_ref[...].astype(jnp.float32) * (diff / (std + EPS))
              + b_ref[...].astype(jnp.float32)).astype(xn_ref.dtype)
        for kk in range(num_k):                               # static unroll
            xn_ref[kk] = xn[:, kk * tk:(kk + 1) * tk]

    @pl.when(k == 0)
    def _():
        acc_ref[...] = jnp.zeros_like(acc_ref)

    # Native-dtype MXU feed (bf16 in production); f32 accumulation.
    acc_ref[...] += jnp.dot(xn_ref[k], w_ref[...],
                            preferred_element_type=jnp.float32)

    @pl.when(k == pl.num_programs(2) - 1)
    def _():
        y = acc_ref[...] + bias_ref[...].astype(jnp.float32)
        if activation == "relu":
            y = jnp.maximum(y, 0.0)
        o_ref[...] = y.astype(o_ref.dtype)


def _linear_kernel(x_ref, w_ref, bias_ref, o_ref, acc_ref, *, activation):
    k = pl.program_id(2)

    @pl.when(k == 0)
    def _():
        acc_ref[...] = jnp.zeros_like(acc_ref)

    acc_ref[...] += jnp.dot(x_ref[...], w_ref[...],
                            preferred_element_type=jnp.float32)

    @pl.when(k == pl.num_programs(2) - 1)
    def _():
        y = acc_ref[...] + bias_ref[...].astype(jnp.float32)
        if activation == "relu":
            y = jnp.maximum(y, 0.0)
        o_ref[...] = y.astype(o_ref.dtype)


def _linear_residual_kernel(x_ref, w_ref, bias_ref, res_ref, o_ref, acc_ref):
    """K-tiled matmul -> bias -> residual add (sublayer epilogue); residual is
    added in f32 at the final K step."""
    k = pl.program_id(2)

    @pl.when(k == 0)
    def _():
        acc_ref[...] = jnp.zeros_like(acc_ref)

    acc_ref[...] += jnp.dot(x_ref[...], w_ref[...],
                            preferred_element_type=jnp.float32)

    @pl.when(k == pl.num_programs(2) - 1)
    def _():
        y = (acc_ref[...] + bias_ref[...].astype(jnp.float32)
             + res_ref[...].astype(jnp.float32))
        o_ref[...] = y.astype(o_ref.dtype)


def _attn_heads(q, k, v, bias, n_heads, out_dtype):
    """Shared attention body. q:(Tq,D) k,v:(Tk,D) bias:(1|Tq,Tk) additive f32.
    Per-head outputs are concatenated so the caller stores ONE lane-dense
    (Tq, D) block (no masked vst.msk partial stores)."""
    D = q.shape[-1]
    dk = D // n_heads
    outs = []
    for h in range(n_heads):                                  # static unroll
        sl = slice(h * dk, (h + 1) * dk)
        qh, kh, vh = q[:, sl], k[:, sl], v[:, sl]
        # q @ k^T without materializing a transpose; f32 scores.
        s = jax.lax.dot_general(qh, kh, (((1,), (1,)), ((), ())),
                                preferred_element_type=jnp.float32)
        s = s + bias
        s = s - jnp.max(s, axis=-1, keepdims=True)
        p = jnp.exp(s)
        inv = pl.reciprocal(jnp.sum(p, axis=-1, keepdims=True), approx=True)
        outs.append(jnp.dot((p * inv).astype(vh.dtype), vh,
                            preferred_element_type=jnp.float32))
    return jnp.concatenate(outs, axis=-1).astype(out_dtype)


def _self_attn_kernel(qkv_ref, mask_ref, o_ref, *, n_heads, d_model):
    """One batch per grid step. qkv_ref: (1, T, 3D) packed projection output;
    Q/K/V are static column windows (no wrapper-side slicing copies)."""
    D = d_model
    qkv = qkv_ref[0]
    bias = jnp.where(mask_ref[0] == 0, NEG_INF, 0.0)          # hoisted out of head loop
    o_ref[0] = _attn_heads(qkv[:, :D], qkv[:, D:2 * D], qkv[:, 2 * D:],
                           bias, n_heads, o_ref.dtype)


def _cross_attn_kernel(q_ref, kv_ref, mask_ref, o_ref, *, n_heads, d_model):
    """q_ref: (1, Tq, D); kv_ref: (1, S, 2D) packed memory projection."""
    D = d_model
    kv = kv_ref[0]
    bias = jnp.where(mask_ref[0] == 0, NEG_INF, 0.0)
    o_ref[0] = _attn_heads(q_ref[0], kv[:, :D], kv[:, D:],
                           bias, n_heads, o_ref.dtype)


# --------------------------- pallas_call wrappers ---------------------------

def ln_linear(x2d, a2, b2, w, bias, activation=None):
    n, d = x2d.shape
    dout = w.shape[1]
    tm = _pick_tile(n, TM_MAX, 8)
    tn = _pick_tile(dout, TN_MAX, 128)
    tk = _pick_tile(d, TK_MAX, 128)
    num_k = d // tk
    grid = (n // tm, dout // tn, num_k)
    return pl.pallas_call(
        functools.partial(_ln_linear_kernel, activation=activation),
        out_shape=jax.ShapeDtypeStruct((n, dout), x2d.dtype),
        grid=grid,
        in_specs=[pl.BlockSpec((tm, d), lambda i, j, k: (i, 0)),   # resident across j,k
                  pl.BlockSpec((1, d), lambda i, j, k: (0, 0)),
                  pl.BlockSpec((1, d), lambda i, j, k: (0, 0)),
                  pl.BlockSpec((tk, tn), lambda i, j, k: (k, j)),
                  pl.BlockSpec((1, tn), lambda i, j, k: (0, j))],
        out_specs=pl.BlockSpec((tm, tn), lambda i, j, k: (i, j)),
        scratch_shapes=[pltpu.VMEM((num_k, tm, tk), x2d.dtype),    # LN result, reused
                        pltpu.VMEM((tm, tn), jnp.float32)],        # f32 accumulator
        # j carries the LN scratch across column tiles -> must not be split by
        # megacore; rows stay "parallel".
        compiler_params=_mosaic_params(("parallel", "arbitrary", "arbitrary")),
    )(x2d, a2.reshape(1, d), b2.reshape(1, d), w, bias.reshape(1, dout))


def linear(x2d, w, bias, activation=None):
    n, d = x2d.shape
    dout = w.shape[1]
    tm = _pick_tile(n, TM_MAX, 8)
    tn = _pick_tile(dout, TN_MAX, 128)
    tk = _pick_tile(d, TK_MAX, 128)
    grid = (n // tm, dout // tn, d // tk)
    return pl.pallas_call(
        functools.partial(_linear_kernel, activation=activation),
        out_shape=jax.ShapeDtypeStruct((n, dout), x2d.dtype),
        grid=grid,
        in_specs=[pl.BlockSpec((tm, tk), lambda i, j, k: (i, k)),
                  pl.BlockSpec((tk, tn), lambda i, j, k: (k, j)),
                  pl.BlockSpec((1, tn), lambda i, j, k: (0, j))],
        out_specs=pl.BlockSpec((tm, tn), lambda i, j, k: (i, j)),
        scratch_shapes=[pltpu.VMEM((tm, tn), jnp.float32)],
        compiler_params=_mosaic_params(("parallel", "parallel", "arbitrary")),
    )(x2d, w, bias.reshape(1, dout))


def linear_residual(x2d, w, bias, res2d):
    n, d = x2d.shape
    dout = w.shape[1]
    tm = _pick_tile(n, TM_MAX, 8)
    tn = _pick_tile(dout, TN_MAX, 128)
    tk = _pick_tile(d, TK_MAX, 128)
    grid = (n // tm, dout // tn, d // tk)
    return pl.pallas_call(
        _linear_residual_kernel,
        out_shape=jax.ShapeDtypeStruct((n, dout), res2d.dtype),
        grid=grid,
        in_specs=[pl.BlockSpec((tm, tk), lambda i, j, k: (i, k)),
                  pl.BlockSpec((tk, tn), lambda i, j, k: (k, j)),
                  pl.BlockSpec((1, tn), lambda i, j, k: (0, j)),
                  pl.BlockSpec((tm, tn), lambda i, j, k: (i, j))],
        out_specs=pl.BlockSpec((tm, tn), lambda i, j, k: (i, j)),
        scratch_shapes=[pltpu.VMEM((tm, tn), jnp.float32)],
        compiler_params=_mosaic_params(("parallel", "parallel", "arbitrary")),
    )(x2d, w, bias.reshape(1, dout), res2d)


def self_attention(qkv, mask, n_heads, d_model):
    """qkv: (B, Tq, 3D) packed Q|K|V projection;  mask: (B or 1, Tq or 1, Tq)."""
    B, Tq, threeD = qkv.shape
    mask = jnp.asarray(mask, jnp.int32)
    mB, mq, mTk = mask.shape
    mask_map = (lambda b: (0, 0, 0)) if mB == 1 else (lambda b: (b, 0, 0))
    return pl.pallas_call(
        functools.partial(_self_attn_kernel, n_heads=n_heads, d_model=d_model),
        out_shape=jax.ShapeDtypeStruct((B, Tq, d_model), qkv.dtype),
        grid=(B,),
        in_specs=[pl.BlockSpec((1, Tq, threeD), lambda b: (b, 0, 0)),
                  pl.BlockSpec((1, mq, mTk), mask_map)],
        out_specs=pl.BlockSpec((1, Tq, d_model), lambda b: (b, 0, 0)),
        compiler_params=_mosaic_params(("parallel",)),
    )(qkv, mask)


def cross_attention(q, kv, mask, n_heads, d_model):
    """q: (B, Tq, D);  kv: (B, S, 2D) packed K|V;  mask: (B or 1, Tq or 1, S)."""
    B, Tq, D = q.shape
    S, twoD = kv.shape[1], kv.shape[2]
    mask = jnp.asarray(mask, jnp.int32)
    mB, mq, mS = mask.shape
    mask_map = (lambda b: (0, 0, 0)) if mB == 1 else (lambda b: (b, 0, 0))
    return pl.pallas_call(
        functools.partial(_cross_attn_kernel, n_heads=n_heads, d_model=d_model),
        out_shape=jax.ShapeDtypeStruct((B, Tq, D), q.dtype),
        grid=(B,),
        in_specs=[pl.BlockSpec((1, Tq, D), lambda b: (b, 0, 0)),
                  pl.BlockSpec((1, S, twoD), lambda b: (b, 0, 0)),
                  pl.BlockSpec((1, mq, mS), mask_map)],
        out_specs=pl.BlockSpec((1, Tq, D), lambda b: (b, 0, 0)),
        compiler_params=_mosaic_params(("parallel",)),
    )(q, kv, mask)


# ------------------------------- parameters --------------------------------

def init_params(key, d_model, d_ff):
    def w(k, shape):
        return jax.random.normal(k, shape, jnp.float32) * 0.02

    def attn_params(k):
        k1, k2, k3, k4 = jax.random.split(k, 4)
        z = jnp.zeros((d_model,), jnp.float32)
        return {"wq": w(k1, (d_model, d_model)), "bq": z,
                "wk": w(k2, (d_model, d_model)), "bk": z,
                "wv": w(k3, (d_model, d_model)), "bv": z,
                "wo": w(k4, (d_model, d_model)), "bo": z}

    def ln_params():
        return {"a2": jnp.ones((d_model,), jnp.float32),
                "b2": jnp.zeros((d_model,), jnp.float32)}

    ka, kb, kc, kd = jax.random.split(key, 4)
    return {
        "self_attn": attn_params(ka),
        "src_attn": attn_params(kb),
        "ff": {"w1": w(kc, (d_model, d_ff)), "b1": jnp.zeros((d_ff,), jnp.float32),
               "w2": w(kd, (d_ff, d_model)), "b2": jnp.zeros((d_model,), jnp.float32)},
        "ln0": ln_params(), "ln1": ln_params(), "ln2": ln_params(),
    }


def prepare_params(params, n_heads):
    """One-time weight preprocessing (hoisted out of the forward pass):
    fuse Q/K/V and K/V projections and fold 1/sqrt(dk) into the Q weights."""
    D = params["self_attn"]["wq"].shape[0]
    scale = 1.0 / math.sqrt(D // n_heads)
    sa, ca = params["self_attn"], params["src_attn"]
    return {
        "ln0": params["ln0"], "ln1": params["ln1"], "ln2": params["ln2"],
        "self_wqkv": jnp.concatenate([sa["wq"] * scale, sa["wk"], sa["wv"]], axis=1),
        "self_bqkv": jnp.concatenate([sa["bq"] * scale, sa["bk"], sa["bv"]]),
        "self_wo": sa["wo"], "self_bo": sa["bo"],
        "src_wq": ca["wq"] * scale, "src_bq": ca["bq"] * scale,
        "src_wkv": jnp.concatenate([ca["wk"], ca["wv"]], axis=1),
        "src_bkv": jnp.concatenate([ca["bk"], ca["bv"]]),
        "src_wo": ca["wo"], "src_bo": ca["bo"],
        "ff_w1": params["ff"]["w1"], "ff_b1": params["ff"]["b1"],
        "ff_w2": params["ff"]["w2"], "ff_b2": params["ff"]["b2"],
    }


# ----------------------------- decoder layer --------------------------------

def decoder_layer(prep, x, memory, src_mask, tgt_mask, n_heads):
    B, T, D = x.shape
    S = memory.shape[1]
    x2 = x.reshape(B * T, D)

    # ---- sublayer 0: self-attention (pre-LN, residual; dropout = identity) ----
    qkv = ln_linear(x2, prep["ln0"]["a2"], prep["ln0"]["b2"],
                    prep["self_wqkv"], prep["self_bqkv"]).reshape(B, T, 3 * D)
    ctx = self_attention(qkv, tgt_mask, n_heads, D)
    x2 = linear_residual(ctx.reshape(B * T, D), prep["self_wo"], prep["self_bo"], x2)

    # ---- sublayer 1: cross-attention over memory ----
    # TODO(synk): the reference snippet passes `src_attn` (a module) as the mask,
    # which is a bug; canonical DecoderLayer uses `src_mask`, which we do here.
    q = ln_linear(x2, prep["ln1"]["a2"], prep["ln1"]["b2"],
                  prep["src_wq"], prep["src_bq"]).reshape(B, T, D)
    kv = linear(memory.reshape(B * S, D),
                prep["src_wkv"], prep["src_bkv"]).reshape(B, S, 2 * D)
    ctx = cross_attention(q, kv, src_mask, n_heads, D)
    x2 = linear_residual(ctx.reshape(B * T, D), prep["src_wo"], prep["src_bo"], x2)

    # ---- sublayer 2: feed-forward ----
    h = ln_linear(x2, prep["ln2"]["a2"], prep["ln2"]["b2"],
                  prep["ff_w1"], prep["ff_b1"], activation="relu")
    x2 = linear_residual(h, prep["ff_w2"], prep["ff_b2"], x2)

    return x2.reshape(B, T, D)


# ------------------------- plain-JAX reference check ------------------------

def reference(params, x, memory, src_mask, tgt_mask, n_heads):
    def ln(x, p):
        mean = jnp.mean(x, -1, keepdims=True)
        std = jnp.std(x, -1, keepdims=True, ddof=1)
        return p["a2"] * (x - mean) / (std + EPS) + p["b2"]

    def mha(p, q, k, v, mask):
        B, Tq, D = q.shape
        Tk = k.shape[1]
        dk = D // n_heads
        qh = (q @ p["wq"] + p["bq"]).reshape(B, Tq, n_heads, dk).transpose(0, 2, 1, 3)
        kh = (k @ p["wk"] + p["bk"]).reshape(B, Tk, n_heads, dk).transpose(0, 2, 1, 3)
        vh = (v @ p["wv"] + p["bv"]).reshape(B, Tk, n_heads, dk).transpose(0, 2, 1, 3)
        scores = jnp.einsum("bhqd,bhkd->bhqk", qh, kh) / math.sqrt(dk)
        m4 = jnp.asarray(mask, jnp.float32)[:, None, :, :]
        scores = jnp.where(m4 == 0, NEG_INF, scores)
        attn = jax.nn.softmax(scores, axis=-1)
        ctx = jnp.einsum("bhqk,bhkd->bhqd", attn, vh)
        ctx = ctx.transpose(0, 2, 1, 3).reshape(B, Tq, D)
        return ctx @ p["wo"] + p["bo"]

    def ff(p, x):
        return jnp.maximum(x @ p["w1"] + p["b1"], 0.0) @ p["w2"] + p["b2"]

    m = memory
    x = x + mha(params["self_attn"], ln(x, params["ln0"]), ln(x, params["ln0"]),
                ln(x, params["ln0"]), tgt_mask)
    x = x + mha(params["src_attn"], ln(x, params["ln1"]), m, m, src_mask)
    x = x + ff(params["ff"], ln(x, params["ln2"]))
    return x


# ----------------------------------- main -----------------------------------

if __name__ == "__main__":
    # Small but non-trivial shapes so that the multi-column-tile (LN scratch
    # reuse) and multi-K-tile (accumulator) grid paths are actually exercised.
    B, T, S, D, H, DFF = 2, 16, 16, 256, 8, 2048
    key = jax.random.PRNGKey(0)
    kx, km, kp = jax.random.split(key, 3)

    x = jax.random.normal(kx, (B, T, D), jnp.float32)
    memory = jax.random.normal(km, (B, S, D), jnp.float32)
    tgt_mask = jnp.tril(jnp.ones((1, T, T), jnp.int32))   # causal mask for self-attn
    src_mask = jnp.ones((B, 1, S), jnp.int32)             # all-valid source mask

    params = init_params(kp, D, DFF)
    prep = prepare_params(params, H)                      # one-time weight fusion

    fwd = jax.jit(functools.partial(decoder_layer, n_heads=H))
    out = jax.block_until_ready(fwd(prep, x, memory, src_mask, tgt_mask))

    ref = reference(params, x, memory, src_mask, tgt_mask, H)
    assert out.shape == (B, T, D)
    # Tolerance accounts for the approximate EUP reciprocal used in the softmax
    # normalization (pl.reciprocal(approx=True)); real bugs are O(0.1+).
    err = float(jnp.max(jnp.abs(out - ref)))
    assert jnp.allclose(out, ref, rtol=5e-3, atol=5e-3), err
    print("KERNEL_OK")
</pallas_src>

<mosaic_0001>
module attributes {stable_mosaic.version = 11 : i64} {
  func.func @_linear_kernel(%arg0: i32, %arg1: i32, %arg2: i32, %arg3: memref<32x256xf32, #tpu.memory_space<vmem>>, %arg4: memref<256x512xf32, #tpu.memory_space<vmem>>, %arg5: memref<1x512xf32, #tpu.memory_space<vmem>>, %arg6: memref<32x512xf32, #tpu.memory_space<vmem>>, %arg7: memref<32x512xf32, #tpu.memory_space<vmem>>) attributes {dimension_semantics = [#tpu.dimension_semantics<parallel>, #tpu.dimension_semantics<parallel>, #tpu.dimension_semantics<arbitrary>], iteration_bounds = array<i64: 1, 1, 1>, scalar_prefetch = 0 : i64, scratch_operands = 1 : i64, tpu.core_type = #tpu.core_type<tc>, window_params = [{transform_indices = @transform_0, window_bounds = array<i64: 32, 256>}, {transform_indices = @transform_1, window_bounds = array<i64: 256, 512>}, {transform_indices = @transform_2, window_bounds = array<i64: 1, 512>}, {transform_indices = @transform_3, window_bounds = array<i64: 32, 512>}]} {
    %c0_i32 = arith.constant 0 : i32
    %0 = arith.cmpi eq, %arg2, %c0_i32 : i32
    %1 = arith.extui %0 : i1 to i32
    %c0_i32_0 = arith.constant 0 : i32
    %2 = arith.cmpi ne, %1, %c0_i32_0 : i32
    scf.if %2 {
      %cst_10 = arith.constant 0.000000e+00 : f32
      %12 = vector.broadcast %cst_10 : f32 to vector<32x512xf32>
      %c0_11 = arith.constant 0 : index
      %c0_12 = arith.constant 0 : index
      %13 = vector.load %arg7[%c0_11, %c0_12] : memref<32x512xf32, #tpu.memory_space<vmem>>, vector<32x512xf32>
      tpu.vector_store %arg7[%c0_11, %c0_12], %12 {strides = array<i32>} : memref<32x512xf32, #tpu.memory_space<vmem>>, vector<32x512xf32>,
    } else {
    }
    %c0 = arith.constant 0 : index
    %c0_1 = arith.constant 0 : index
    %3 = vector.load %arg7[%c0, %c0_1] : memref<32x512xf32, #tpu.memory_space<vmem>>, vector<32x512xf32>
    %c0_2 = arith.constant 0 : index
    %c0_3 = arith.constant 0 : index
    %4 = vector.load %arg3[%c0_2, %c0_3] : memref<32x256xf32, #tpu.memory_space<vmem>>, vector<32x256xf32>
    %c0_4 = arith.constant 0 : index
    %c0_5 = arith.constant 0 : index
    %5 = vector.load %arg4[%c0_4, %c0_5] : memref<256x512xf32, #tpu.memory_space<vmem>>, vector<256x512xf32>
    %cst = arith.constant dense<0.000000e+00> : vector<32x512xf32>
    %6 = tpu.matmul %4, %5, %cst {dimension_numbers = #tpu.dot_dimension_numbers<[1], [0], [0], [1], [0, 0, 1, 1], [], []>} : vector<32x256xf32>, vector<256x512xf32>, vector<32x512xf32> -> vector<32x512xf32>
    %7 = arith.addf %3, %6 : vector<32x512xf32>
    %c0_6 = arith.constant 0 : index
    %c0_7 = arith.constant 0 : index
    %8 = vector.load %arg7[%c0_6, %c0_7] : memref<32x512xf32, #tpu.memory_space<vmem>>, vector<32x512xf32>
    tpu.vector_store %arg7[%c0_6, %c0_7], %7 {strides = array<i32>} : memref<32x512xf32, #tpu.memory_space<vmem>>, vector<32x512xf32>,
    %c0_i32_8 = arith.constant 0 : i32
    %9 = arith.cmpi eq, %arg2, %c0_i32_8 : i32
    %10 = arith.extui %9 : i1 to i32
    %c0_i32_9 = arith.constant 0 : i32
    %11 = arith.cmpi ne, %10, %c0_i32_9 : i32
    scf.if %11 {
      %c0_10 = arith.constant 0 : index
      %c0_11 = arith.constant 0 : index
      %12 = vector.load %arg7[%c0_10, %c0_11] : memref<32x512xf32, #tpu.memory_space<vmem>>, vector<32x512xf32>
      %c0_12 = arith.constant 0 : index
      %c0_13 = arith.constant 0 : index
      %13 = vector.load %arg5[%c0_12, %c0_13] : memref<1x512xf32, #tpu.memory_space<vmem>>, vector<1x512xf32>
      %14 = vector.broadcast %13 : vector<1x512xf32> to vector<32x512xf32>
      %15 = arith.addf %12, %14 : vector<32x512xf32>
      %c0_14 = arith.constant 0 : index
      %c0_15 = arith.constant 0 : index
      %16 = vector.load %arg6[%c0_14, %c0_15] : memref<32x512xf32, #tpu.memory_space<vmem>>, vector<32x512xf32>
      tpu.vector_store %arg6[%c0_14, %c0_15], %15 {strides = array<i32>} : memref<32x512xf32, #tpu.memory_space<vmem>>, vector<32x512xf32>,
    } else {
    }
    return
  }
  func.func @transform_0(%arg0: i32, %arg1: i32, %arg2: i32) -> (i32, i32) {
    %c0_i32 = arith.constant 0 : i32
    return %arg0, %arg2 : i32, i32
  }
  func.func @transform_1(%arg0: i32, %arg1: i32, %arg2: i32) -> (i32, i32) {
    %c0_i32 = arith.constant 0 : i32
    return %arg2, %arg1 : i32, i32
  }
  func.func @transform_2(%arg0: i32, %arg1: i32, %arg2: i32) -> (i32, i32) {
    %c0_i32 = arith.constant 0 : i32
    %c0_i32_0 = arith.constant 0 : i32
    return %c0_i32, %arg1 : i32, i32
  }
  func.func @transform_3(%arg0: i32, %arg1: i32, %arg2: i32) -> (i32, i32) {
    %c0_i32 = arith.constant 0 : i32
    return %arg0, %arg1 : i32, i32
  }
}

module attributes {stable_mosaic.version = 11 : i64} {
  func.func @_self_attn_kernel(%arg0: i32, %arg1: memref<1x16x768xf32, #tpu.memory_space<vmem>>, %arg2: memref<1x16x16xi32, #tpu.memory_space<vmem>>, %arg3: memref<1x16x256xf32, #tpu.memory_space<vmem>>) attributes {dimension_semantics = [#tpu.dimension_semantics<parallel>], iteration_bounds = array<i64: 2>, scalar_prefetch = 0 : i64, scratch_operands = 0 : i64, tpu.core_type = #tpu.core_type<tc>, window_params = [{transform_indices = @transform_0, window_bounds = array<i64: 1, 16, 768>}, {pipeline_mode = #tpu.pipeline_mode<synchronous>, transform_indices = @transform_1, window_bounds = array<i64: 1, 16, 16>}, {transform_indices = @transform_2, window_bounds = array<i64: 1, 16, 256>}]} {
    %c0 = arith.constant 0 : index
    %c0_0 = arith.constant 0 : index
    %c0_1 = arith.constant 0 : index
    %0 = vector.load %arg1[%c0, %c0_0, %c0_1] : memref<1x16x768xf32, #tpu.memory_space<vmem>>, vector<1x16x768xf32>
    %1 = vector.shape_cast %0 : vector<1x16x768xf32> to vector<16x768xf32>
    %c0_2 = arith.constant 0 : index
    %c0_3 = arith.constant 0 : index
    %c0_4 = arith.constant 0 : index
    %2 = vector.load %arg2[%c0_2, %c0_3, %c0_4] : memref<1x16x16xi32, #tpu.memory_space<vmem>>, vector<1x16x16xi32>
    %3 = vector.shape_cast %2 : vector<1x16x16xi32> to vector<16x16xi32>
    %c0_i32 = arith.constant 0 : i32
    %4 = vector.broadcast %c0_i32 : i32 to vector<16x16xi32>
    %5 = arith.cmpi eq, %3, %4 : vector<16x16xi32>
    %cst = arith.constant -1.000000e+09 : f32
    %cst_5 = arith.constant 0.000000e+00 : f32
    %6 = vector.broadcast %cst : f32 to vector<16x16xf32>
    %7 = vector.broadcast %cst_5 : f32 to vector<16x16xf32>
    %8 = arith.select %5, %6, %7 : vector<16x16xi1>, vector<16x16xf32>
    %9 = vector.extract_strided_slice %1 {offsets = [0, 0], sizes = [16, 256], strides = [1, 1]} : vector<16x768xf32> to vector<16x256xf32>
    %10 = vector.extract_strided_slice %1 {offsets = [0, 256], sizes = [16, 256], strides = [1, 1]} : vector<16x768xf32> to vector<16x256xf32>
    %11 = vector.extract_strided_slice %1 {offsets = [0, 512], sizes = [16, 256], strides = [1, 1]} : vector<16x768xf32> to vector<16x256xf32>
    %12 = vector.extract_strided_slice %9 {offsets = [0, 0], sizes = [16, 32], strides = [1, 1]} : vector<16x256xf32> to vector<16x32xf32>
    %13 = vector.extract_strided_slice %10 {offsets = [0, 0], sizes = [16, 32], strides = [1, 1]} : vector<16x256xf32> to vector<16x32xf32>
    %14 = vector.extract_strided_slice %11 {offsets = [0, 0], sizes = [16, 32], strides = [1, 1]} : vector<16x256xf32> to vector<16x32xf32>
    %cst_6 = arith.constant dense<0.000000e+00> : vector<16x16xf32>
    %15 = tpu.matmul %12, %13, %cst_6 {dimension_numbers = #tpu.dot_dimension_numbers<[1], [1], [0], [0], [0, 0, 1, 0], [], []>} : vector<16x32xf32>, vector<16x32xf32>, vector<16x16xf32> -> vector<16x16xf32>
    %16 = arith.addf %15, %8 : vector<16x16xf32>
    %cst_7 = arith.constant dense<0xFF800000> : vector<16xf32>
    %17 = vector.multi_reduction <maximumf>, %16, %cst_7 [1] : vector<16x16xf32> to vector<16xf32>
    %18 = vector.shape_cast %17 : vector<16xf32> to vector<16x1xf32>
    %19 = vector.broadcast %18 : vector<16x1xf32> to vector<16x16xf32>
    %20 = arith.subf %16, %19 : vector<16x16xf32>
    %21 = math.exp %20 : vector<16x16xf32>
    %cst_8 = arith.constant dense<0.000000e+00> : vector<16xf32>
    %22 = vector.multi_reduction <add>, %21, %cst_8 [1] : vector<16x16xf32> to vector<16xf32>
    %23 = vector.shape_cast %22 : vector<16xf32> to vector<16x1xf32>
    %24 = tpu.reciprocal %23 {approx = true} : vector<16x1xf32> -> vector<16x1xf32>
    %25 = vector.broadcast %24 : vector<16x1xf32> to vector<16x16xf32>
    %26 = arith.mulf %21, %25 : vector<16x16xf32>
    %cst_9 = arith.constant dense<0.000000e+00> : vector<16x32xf32>
    %27 = tpu.matmul %26, %14, %cst_9 {dimension_numbers = #tpu.dot_dimension_numbers<[1], [0], [0], [1], [0, 0, 1, 1], [], []>} : vector<16x16xf32>, vector<16x32xf32>, vector<16x32xf32> -> vector<16x32xf32>
    %28 = vector.extract_strided_slice %9 {offsets = [0, 32], sizes = [16, 32], strides = [1, 1]} : vector<16x256xf32> to vector<16x32xf32>
    %29 = vector.extract_strided_slice %10 {offsets = [0, 32], sizes = [16, 32], strides = [1, 1]} : vector<16x256xf32> to vector<16x32xf32>
    %30 = vector.extract_strided_slice %11 {offsets = [0, 32], sizes = [16, 32], strides = [1, 1]} : vector<16x256xf32> to vector<16x32xf32>
    %cst_10 = arith.constant dense<0.000000e+00> : vector<16x16xf32>
    %31 = tpu.matmul %28, %29, %cst_10 {dimension_numbers = #tpu.dot_dimension_numbers<[1], [1], [0], [0], [0, 0, 1, 0], [], []>} : vector<16x32xf32>, vector<16x32xf32>, vector<16x16xf32> -> vector<16x16xf32>
    %32 = arith.addf %31, %8 : vector<16x16xf32>
    %cst_11 = arith.constant dense<0xFF800000> : vector<16xf32>
    %33 = vector.multi_reduction <maximumf>, %32, %cst_11 [1] : vector<16x16xf32> to vector<16xf32>
    %34 = vector.shape_cast %33 : vector<16xf32> to vector<16x1xf32>
    %35 = vector.broadcast %34 : vector<16x1xf32> to vector<16x16xf32>
    %36 = arith.subf %32, %35 : vector<16x16xf32>
    %37 = math.exp %36 : vector<16x16xf32>
    %cst_12 = arith.constant dense<0.000000e+00> : vector<16xf32>
    %38 = vector.multi_reduction <add>, %37, %cst_12 [1] : vector<16x16xf32> to vector<16xf32>
    %39 = vector.shape_cast %38 : vector<16xf32> to vector<16x1xf32>
    %40 = tpu.reciprocal %39 {approx = true} : vector<16x1xf32> -> vector<16x1xf32>
    %41 = vector.broadcast %40 : vector<16x1xf32> to vector<16x16xf32>
    %42 = arith.mulf %37, %41 : vector<16x16xf32>
    %cst_13 = arith.constant dense<0.000000e+00> : vector<16x32xf32>
    %43 = tpu.matmul %42, %30, %cst_13 {dimension_numbers = #tpu.dot_dimension_numbers<[1], [0], [0], [1], [0, 0, 1, 1], [], []>} : vector<16x16xf32>, vector<16x32xf32>, vector<16x32xf32> -> vector<16x32xf32>
    %44 = vector.extract_strided_slice %9 {offsets = [0, 64], sizes = [16, 32], strides = [1, 1]} : vector<16x256xf32> to vector<16x32xf32>
    %45 = vector.extract_strided_slice %10 {offsets = [0, 64], sizes = [16, 32], strides = [1, 1]} : vector<16x256xf32> to vector<16x32xf32>
    %46 = vector.extract_strided_slice %11 {offsets = [0, 64], sizes = [16, 32], strides = [1, 1]} : vector<16x256xf32> to vector<16x32xf32>
    %cst_14 = arith.constant dense<0.000000e+00> : vector<16x16xf32>
    %47 = tpu.matmul %44, %45, %cst_14 {dimension_numbers = #tpu.dot_dimension_numbers<[1], [1], [0], [0], [0, 0, 1, 0], [], []>} : vector<16x32xf32>, vector<16x32xf32>, vector<16x16xf32> -> vector<16x16xf32>
    %48 = arith.addf %47, %8 : vector<16x16xf32>
    %cst_15 = arith.constant dense<0xFF800000> : vector<16xf32>
    %49 = vector.multi_reduction <maximumf>, %48, %cst_15 [1] : vector<16x16xf32> to vector<16xf32>
    %50 = vector.shape_cast %49 : vector<16xf32> to vector<16x1xf32>
    %51 = vector.broadcast %50 : vector<16x1xf32> to vector<16x16xf32>
    %52 = arith.subf %48, %51 : vector<16x16xf32>
    %53 = math.exp %52 : vector<16x16xf32>
    %cst_16 = arith.constant dense<0.000000e+00> : vector<16xf32>
    %54 = vector.multi_reduction <add>, %53, %cst_16 [1] : vector<16x16xf32> to vector<16xf32>
    %55 = vector.shape_cast %54 : vector<16xf32> to vector<16x1xf32>
    %56 = tpu.reciprocal %55 {approx = true} : vector<16x1xf32> -> vector<16x1xf32>
    %57 = vector.broadcast %56 : vector<16x1xf32> to vector<16x16xf32>
    %58 = arith.mulf %53, %57 : vector<16x16xf32>
    %cst_17 = arith.constant dense<0.000000e+00> : vector<16x32xf32>
    %59 = tpu.matmul %58, %46, %cst_17 {dimension_numbers = #tpu.dot_dimension_numbers<[1], [0], [0], [1], [0, 0, 1, 1], [], []>} : vector<16x16xf32>, vector<16x32xf32>, vector<16x32xf32> -> vector<16x32xf32>
    %60 = vector.extract_strided_slice %9 {offsets = [0, 96], sizes = [16, 32], strides = [1, 1]} : vector<16x256xf32> to vector<16x32xf32>
    %61 = vector.extract_strided_slice %10 {offsets = [0, 96], sizes = [16, 32], strides = [1, 1]} : vector<16x256xf32> to vector<16x32xf32>
    %62 = vector.extract_strided_slice %11 {offsets = [0, 96], sizes = [16, 32], strides = [1, 1]} : vector<16x256xf32> to vector<16x32xf32>
    %cst_18 = arith.constant dense<0.000000e+00> : vector<16x16xf32>
    %63 = tpu.matmul %60, %61, %cst_18 {dimension_numbers = #tpu.dot_dimension_numbers<[1], [1], [0], [0], [0, 0, 1, 0], [], []>} : vector<16x32xf32>, vector<16x32xf32>, vector<16x16xf32> -> vector<16x16xf32>
    %64 = arith.addf %63, %8 : vector<16x16xf32>
    %cst_19 = arith.constant dense<0xFF800000> : vector<16xf32>
    %65 = vector.multi_reduction <maximumf>, %64, %cst_19 [1] : vector<16x16xf32> to vector<16xf32>
    %66 = vector.shape_cast %65 : vector<16xf32> to vector<16x1xf32>
    %67 = vector.broadcast %66 : vector<16x1xf32> to vector<16x16xf32>
    %68 = arith.subf %64, %67 : vector<16x16xf32>
    %69 = math.exp %68 : vector<16x16xf32>
    %cst_20 = arith.constant dense<0.000000e+00> : vector<16xf32>
    %70 = vector.multi_reduction <add>, %69, %cst_20 [1] : vector<16x16xf32> to vector<16xf32>
    %71 = vector.shape_cast %70 : vector<16xf32> to vector<16x1xf32>
    %72 = tpu.reciprocal %71 {approx = true} : vector<16x1xf32> -> vector<16x1xf32>
    %73 = vector.broadcast %72 : vector<16x1xf32> to vector<16x16xf32>
    %74 = arith.mulf %69, %73 : vector<16x16xf32>
    %cst_21 = arith.constant dense<0.000000e+00> : vector<16x32xf32>
    %75 = tpu.matmul %74, %62, %cst_21 {dimension_numbers = #tpu.dot_dimension_numbers<[1], [0], [0], [1], [0, 0, 1, 1], [], []>} : vector<16x16xf32>, vector<16x32xf32>, vector<16x32xf32> -> vector<16x32xf32>
    %76 = vector.extract_strided_slice %9 {offsets = [0, 128], sizes = [16, 32], strides = [1, 1]} : vector<16x256xf32> to vector<16x32xf32>
    %77 = vector.extract_strided_slice %10 {offsets = [0, 128], sizes = [16, 32], strides = [1, 1]} : vector<16x256xf32> to vector<16x32xf32>
    %78 = vector.extract_strided_slice %11 {offsets = [0, 128], sizes = [16, 32], strides = [1, 1]} : vector<16x256xf32> to vector<16x32xf32>
    %cst_22 = arith.constant dense<0.000000e+00> : vector<16x16xf32>
    %79 = tpu.matmul %76, %77, %cst_22 {dimension_numbers = #tpu.dot_dimension_numbers<[1], [1], [0], [0], [0, 0, 1, 0], [], []>} : vector<16x32xf32>, vector<16x32xf32>, vector<16x16xf32> -> vector<16x16xf32>
    %80 = arith.addf %79, %8 : vector<16x16xf32>
    %cst_23 = arith.constant dense<0xFF800000> : vector<16xf32>
    %81 = vector.multi_reduction <maximumf>, %80, %cst_23 [1] : vector<16x16xf32> to vector<16xf32>
    %82 = vector.shape_cast %81 : vector<16xf32> to vector<16x1xf32>
    %83 = vector.broadcast %82 : vector<16x1xf32> to vector<16x16xf32>
    %84 = arith.subf %80, %83 : vector<16x16xf32>
    %85 = math.exp %84 : vector<16x16xf32>
    %cst_24 = arith.constant dense<0.000000e+00> : vector<16xf32>
    %86 = vector.multi_reduction <add>, %85, %cst_24 [1] : vector<16x16xf32> to vector<16xf32>
    %87 = vector.shape_cast %86 : vector<16xf32> to vector<16x1xf32>
    %88 = tpu.reciprocal %87 {approx = true} : vector<16x1xf32> -> vector<16x1xf32>
    %89 = vector.broadcast %88 : vector<16x1xf32> to vector<16x16xf32>
    %90 = arith.mulf %85, %89 : vector<16x16xf32>
    %cst_25 = arith.constant dense<0.000000e+00> : vector<16x32xf32>
    %91 = tpu.matmul %90, %78, %cst_25 {dimension_numbers = #tpu.dot_dimension_numbers<[1], [0], [0], [1], [0, 0, 1, 1], [], []>} : vector<16x16xf32>, vector<16x32xf32>, vector<16x32xf32> -> vector<16x32xf32>
    %92 = vector.extract_strided_slice %9 {offsets = [0, 160], sizes = [16, 32], strides = [1, 1]} : vector<16x256xf32> to vector<16x32xf32>
    %93 = vector.extract_strided_slice %10 {offsets = [0, 160], sizes = [16, 32], strides = [1, 1]} : vector<16x256xf32> to vector<16x32xf32>
    %94 = vector.extract_strided_slice %11 {offsets = [0, 160], sizes = [16, 32], strides = [1, 1]} : vector<16x256xf32> to vector<16x32xf32>
    %cst_26 = arith.constant dense<0.000000e+00> : vector<16x16xf32>
    %95 = tpu.matmul %92, %93, %cst_26 {dimension_numbers = #tpu.dot_dimension_numbers<[1], [1], [0], [0], [0, 0, 1, 0], [], []>} : vector<16x32xf32>, vector<16x32xf32>, vector<16x16xf32> -> vector<16x16xf32>
    %96 = arith.addf %95, %8 : vector<16x16xf32>
    %cst_27 = arith.constant dense<0xFF800000> : vector<16xf32>
    %97 = vector.multi_reduction <maximumf>, %96, %cst_27 [1] : vector<16x16xf32> to vector<16xf32>
    %98 = vector.shape_cast %97 : vector<16xf32> to vector<16x1xf32>
    %99 = vector.broadcast %98 : vector<16x1xf32> to vector<16x16xf32>
    %100 = arith.subf %96, %99 : vector<16x16xf32>
    %101 = math.exp %100 : vector<16x16xf32>
    %cst_28 = arith.constant dense<0.000000e+00> : vector<16xf32>
    %102 = vector.multi_reduction <add>, %101, %cst_28 [1] : vector<16x16xf32> to vector<16xf32>
    %103 = vector.shape_cast %102 : vector<16xf32> to vector<16x1xf32>
    %104 = tpu.reciprocal %103 {approx = true} : vector<16x1xf32> -> vector<16x1xf32>
    %105 = vector.broadcast %104 : vector<16x1xf32> to vector<16x16xf32>
    %106 = arith.mulf %101, %105 : vector<16x16xf32>
    %cst_29 = arith.constant dense<0.000000e+00> : vector<16x32xf32>
    %107 = tpu.matmul %106, %94, %cst_29 {dimension_numbers = #tpu.dot_dimension_numbers<[1], [0], [0], [1], [0, 0, 1, 1], [], []>} : vector<16x16xf32>, vector<16x32xf32>, vector<16x32xf32> -> vector<16x32xf32>
    %108 = vector.extract_strided_slice %9 {offsets = [0, 192], sizes = [16, 32], strides = [1, 1]} : vector<16x256xf32> to vector<16x32xf32>
    %109 = vector.extract_strided_slice %10 {offsets = [0, 192], sizes = [16, 32], strides = [1, 1]} : vector<16x256xf32> to vector<16x32xf32>
    %110 = vector.extract_strided_slice %11 {offsets = [0, 192], sizes = [16, 32], strides = [1, 1]} : vector<16x256xf32> to vector<16x32xf32>
    %cst_30 = arith.constant dense<0.000000e+00> : vector<16x16xf32>
    %111 = tpu.matmul %108, %109, %cst_30 {dimension_numbers = #tpu.dot_dimension_numbers<[1], [1], [0], [0], [0, 0, 1, 0], [], []>} : vector<16x32xf32>, vector<16x32xf32>, vector<16x16xf32> -> vector<16x16xf32>
    %112 = arith.addf %111, %8 : vector<16x16xf32>
    %cst_31 = arith.constant dense<0xFF800000> : vector<16xf32>
    %113 = vector.multi_reduction <maximumf>, %112, %cst_31 [1] : vector<16x16xf32> to vector<16xf32>
    %114 = vector.shape_cast %113 : vector<16xf32> to vector<16x1xf32>
    %115 = vector.broadcast %114 : vector<16x1xf32> to vector<16x16xf32>
    %116 = arith.subf %112, %115 : vector<16x16xf32>
    %117 = math.exp %116 : vector<16x16xf32>
    %cst_32 = arith.constant dense<0.000000e+00> : vector<16xf32>
    %118 = vector.multi_reduction <add>, %117, %cst_32 [1] : vector<16x16xf32> to vector<16xf32>
    %119 = vector.shape_cast %118 : vector<16xf32> to vector<16x1xf32>
    %120 = tpu.reciprocal %119 {approx = true} : vector<16x1xf32> -> vector<16x1xf32>
    %121 = vector.broadcast %120 : vector<16x1xf32> to vector<16x16xf32>
    %122 = arith.mulf %117, %121 : vector<16x16xf32>
    %cst_33 = arith.constant dense<0.000000e+00> : vector<16x32xf32>
    %123 = tpu.matmul %122, %110, %cst_33 {dimension_numbers = #tpu.dot_dimension_numbers<[1], [0], [0], [1], [0, 0, 1, 1], [], []>} : vector<16x16xf32>, vector<16x32xf32>, vector<16x32xf32> -> vector<16x32xf32>
    %124 = vector.extract_strided_slice %9 {offsets = [0, 224], sizes = [16, 32], strides = [1, 1]} : vector<16x256xf32> to vector<16x32xf32>
    %125 = vector.extract_strided_slice %10 {offsets = [0, 224], sizes = [16, 32], strides = [1, 1]} : vector<16x256xf32> to vector<16x32xf32>
    %126 = vector.extract_strided_slice %11 {offsets = [0, 224], sizes = [16, 32], strides = [1, 1]} : vector<16x256xf32> to vector<16x32xf32>
    %cst_34 = arith.constant dense<0.000000e+00> : vector<16x16xf32>
    %127 = tpu.matmul %124, %125, %cst_34 {dimension_numbers = #tpu.dot_dimension_numbers<[1], [1], [0], [0], [0, 0, 1, 0], [], []>} : vector<16x32xf32>, vector<16x32xf32>, vector<16x16xf32> -> vector<16x16xf32>
    %128 = arith.addf %127, %8 : vector<16x16xf32>
    %cst_35 = arith.constant dense<0xFF800000> : vector<16xf32>
    %129 = vector.multi_reduction <maximumf>, %128, %cst_35 [1] : vector<16x16xf32> to vector<16xf32>
    %130 = vector.shape_cast %129 : vector<16xf32> to vector<16x1xf32>
    %131 = vector.broadcast %130 : vector<16x1xf32> to vector<16x16xf32>
    %132 = arith.subf %128, %131 : vector<16x16xf32>
    %133 = math.exp %132 : vector<16x16xf32>
    %cst_36 = arith.constant dense<0.000000e+00> : vector<16xf32>
    %134 = vector.multi_reduction <add>, %133, %cst_36 [1] : vector<16x16xf32> to vector<16xf32>
    %135 = vector.shape_cast %134 : vector<16xf32> to vector<16x1xf32>
    %136 = tpu.reciprocal %135 {approx = true} : vector<16x1xf32> -> vector<16x1xf32>
    %137 = vector.broadcast %136 : vector<16x1xf32> to vector<16x16xf32>
    %138 = arith.mulf %133, %137 : vector<16x16xf32>
    %cst_37 = arith.constant dense<0.000000e+00> : vector<16x32xf32>
    %139 = tpu.matmul %138, %126, %cst_37 {dimension_numbers = #tpu.dot_dimension_numbers<[1], [0], [0], [1], [0, 0, 1, 1], [], []>} : vector<16x16xf32>, vector<16x32xf32>, vector<16x32xf32> -> vector<16x32xf32>
    %140 = tpu.concatenate %27, %43, %59, %75, %91, %107, %123, %139 in 1 : vector<16x32xf32>, vector<16x32xf32>, vector<16x32xf32>, vector<16x32xf32>, vector<16x32xf32>, vector<16x32xf32>, vector<16x32xf32>, vector<16x32xf32> -> vector<16x256xf32>
    %c0_38 = arith.constant 0 : index
    %c0_39 = arith.constant 0 : index
    %c0_40 = arith.constant 0 : index
    %141 = vector.load %arg3[%c0_38, %c0_39, %c0_40] : memref<1x16x256xf32, #tpu.memory_space<vmem>>, vector<1x16x256xf32>
    %142 = vector.shape_cast %141 : vector<1x16x256xf32> to vector<16x256xf32>
    %143 = vector.shape_cast %140 : vector<16x256xf32> to vector<1x16x256xf32>
    tpu.vector_store %arg3[%c0_38, %c0_39, %c0_40], %143 {strides = array<i32>} : memref<1x16x256xf32, #tpu.memory_space<vmem>>, vector<1x16x256xf32>,
    return
  }
  func.func @transform_0(%arg0: i32) -> (i32, i32, i32) {
    %c0_i32 = arith.constant 0 : i32
    %c0_i32_0 = arith.constant 0 : i32
    %c0_i32_1 = arith.constant 0 : i32
    return %arg0, %c0_i32, %c0_i32_0 : i32, i32, i32
  }
  func.func @transform_1(%arg0: i32) -> (i32, i32, i32) {
    %c0_i32 = arith.constant 0 : i32
    %c0_i32_0 = arith.constant 0 : i32
    %c0_i32_1 = arith.constant 0 : i32
    %c0_i32_2 = arith.constant 0 : i32
    return %c0_i32, %c0_i32_0, %c0_i32_1 : i32, i32, i32
  }
  func.func @transform_2(%arg0: i32) -> (i32, i32, i32) {
    %c0_i32 = arith.constant 0 : i32
    %c0_i32_0 = arith.constant 0 : i32
    %c0_i32_1 = arith.constant 0 : i32
    return %arg0, %c0_i32, %c0_i32_0 : i32, i32, i32
  }
}

module attributes {stable_mosaic.version = 11 : i64} {
  func.func @_ln_linear_kernel(%arg0: i32, %arg1: i32, %arg2: i32, %arg3: memref<32x256xf32, #tpu.memory_space<vmem>>, %arg4: memref<1x256xf32, #tpu.memory_space<vmem>>, %arg5: memref<1x256xf32, #tpu.memory_space<vmem>>, %arg6: memref<256x768xf32, #tpu.memory_space<vmem>>, %arg7: memref<1x768xf32, #tpu.memory_space<vmem>>, %arg8: memref<32x768xf32, #tpu.memory_space<vmem>>, %arg9: memref<1x32x256xf32, #tpu.memory_space<vmem>>, %arg10: memref<32x768xf32, #tpu.memory_space<vmem>>) attributes {dimension_semantics = [#tpu.dimension_semantics<parallel>, #tpu.dimension_semantics<arbitrary>, #tpu.dimension_semantics<arbitrary>], iteration_bounds = array<i64: 1, 1, 1>, scalar_prefetch = 0 : i64, scratch_operands = 2 : i64, tpu.core_type = #tpu.core_type<tc>, window_params = [{transform_indices = @transform_0, window_bounds = array<i64: 32, 256>}, {pipeline_mode = #tpu.pipeline_mode<synchronous>, transform_indices = @transform_1, window_bounds = array<i64: 1, 256>}, {pipeline_mode = #tpu.pipeline_mode<synchronous>, transform_indices = @transform_2, window_bounds = array<i64: 1, 256>}, {transform_indices = @transform_3, window_bounds = array<i64: 256, 768>}, {transform_indices = @transform_4, window_bounds = array<i64: 1, 768>}, {transform_indices = @transform_5, window_bounds = array<i64: 32, 768>}]} {
    %c0_i32 = arith.constant 0 : i32
    %0 = arith.cmpi eq, %arg1, %c0_i32 : i32
    %c0_i32_0 = arith.constant 0 : i32
    %1 = arith.cmpi eq, %arg2, %c0_i32_0 : i32
    %2 = arith.andi %0, %1 : i1
    %3 = arith.extui %2 : i1 to i32
    %c0_i32_1 = arith.constant 0 : i32
    %4 = arith.cmpi ne, %3, %c0_i32_1 : i32
    scf.if %4 {
      %c0_13 = arith.constant 0 : index
      %c0_14 = arith.constant 0 : index
      %19 = vector.load %arg3[%c0_13, %c0_14] : memref<32x256xf32, #tpu.memory_space<vmem>>, vector<32x256xf32>
      %cst_15 = arith.constant dense<0.000000e+00> : vector<32xf32>
      %20 = vector.multi_reduction <add>, %19, %cst_15 [1] : vector<32x256xf32> to vector<32xf32>
      %21 = vector.shape_cast %20 : vector<32xf32> to vector<32x1xf32>
      %cst_16 = arith.constant 2.560000e+02 : f32
      %22 = vector.broadcast %cst_16 : f32 to vector<32x1xf32>
      %23 = arith.divf %21, %22 : vector<32x1xf32>
      %24 = vector.broadcast %23 : vector<32x1xf32> to vector<32x256xf32>
      %25 = arith.subf %19, %24 : vector<32x256xf32>
      %26 = arith.mulf %25, %25 : vector<32x256xf32>
      %cst_17 = arith.constant dense<0.000000e+00> : vector<32xf32>
      %27 = vector.multi_reduction <add>, %26, %cst_17 [1] : vector<32x256xf32> to vector<32xf32>
      %28 = vector.shape_cast %27 : vector<32xf32> to vector<32x1xf32>
      %cst_18 = arith.constant 0.00392156886 : f32
      %29 = vector.broadcast %cst_18 : f32 to vector<32x1xf32>
      %30 = arith.mulf %28, %29 : vector<32x1xf32>
      %31 = math.sqrt %30 : vector<32x1xf32>
      %c0_19 = arith.constant 0 : index
      %c0_20 = arith.constant 0 : index
      %32 = vector.load %arg4[%c0_19, %c0_20] : memref<1x256xf32, #tpu.memory_space<vmem>>, vector<1x256xf32>
      %cst_21 = arith.constant 9.99999997E-7 : f32
      %33 = vector.broadcast %cst_21 : f32 to vector<32x1xf32>
      %34 = arith.addf %31, %33 : vector<32x1xf32>
      %35 = vector.broadcast %34 : vector<32x1xf32> to vector<32x256xf32>
      %36 = arith.divf %25, %35 : vector<32x256xf32>
      %37 = vector.broadcast %32 : vector<1x256xf32> to vector<32x256xf32>
      %38 = arith.mulf %37, %36 : vector<32x256xf32>
      %c0_22 = arith.constant 0 : index
      %c0_23 = arith.constant 0 : index
      %39 = vector.load %arg5[%c0_22, %c0_23] : memref<1x256xf32, #tpu.memory_space<vmem>>, vector<1x256xf32>
      %40 = vector.broadcast %39 : vector<1x256xf32> to vector<32x256xf32>
      %41 = arith.addf %38, %40 : vector<32x256xf32>
      %c0_24 = arith.constant 0 : index
      %c0_25 = arith.constant 0 : index
      %c0_26 = arith.constant 0 : index
      %42 = vector.load %arg9[%c0_24, %c0_25, %c0_26] : memref<1x32x256xf32, #tpu.memory_space<vmem>>, vector<1x32x256xf32>
      %43 = vector.shape_cast %42 : vector<1x32x256xf32> to vector<32x256xf32>
      %44 = vector.shape_cast %41 : vector<32x256xf32> to vector<1x32x256xf32>
      tpu.vector_store %arg9[%c0_24, %c0_25, %c0_26], %44 {strides = array<i32>} : memref<1x32x256xf32, #tpu.memory_space<vmem>>, vector<1x32x256xf32>,
    } else {
    }
    %c0_i32_2 = arith.constant 0 : i32
    %5 = arith.cmpi eq, %arg2, %c0_i32_2 : i32
    %6 = arith.extui %5 : i1 to i32
    %c0_i32_3 = arith.constant 0 : i32
    %7 = arith.cmpi ne, %6, %c0_i32_3 : i32
    scf.if %7 {
      %cst_13 = arith.constant 0.000000e+00 : f32
      %19 = vector.broadcast %cst_13 : f32 to vector<32x768xf32>
      %c0_14 = arith.constant 0 : index
      %c0_15 = arith.constant 0 : index
      %20 = vector.load %arg10[%c0_14, %c0_15] : memref<32x768xf32, #tpu.memory_space<vmem>>, vector<32x768xf32>
      tpu.vector_store %arg10[%c0_14, %c0_15], %19 {strides = array<i32>} : memref<32x768xf32, #tpu.memory_space<vmem>>, vector<32x768xf32>,
    } else {
    }
    %c0 = arith.constant 0 : index
    %c0_4 = arith.constant 0 : index
    %8 = vector.load %arg10[%c0, %c0_4] : memref<32x768xf32, #tpu.memory_space<vmem>>, vector<32x768xf32>
    %9 = arith.index_cast %arg2 : i32 to index
    %c0_5 = arith.constant 0 : index
    %c0_6 = arith.constant 0 : index
    %10 = vector.load %arg9[%9, %c0_5, %c0_6] : memref<1x32x256xf32, #tpu.memory_space<vmem>>, vector<1x32x256xf32>
    %11 = vector.shape_cast %10 : vector<1x32x256xf32> to vector<32x256xf32>
    %c0_7 = arith.constant 0 : index
    %c0_8 = arith.constant 0 : index
    %12 = vector.load %arg6[%c0_7, %c0_8] : memref<256x768xf32, #tpu.memory_space<vmem>>, vector<256x768xf32>
    %cst = arith.constant dense<0.000000e+00> : vector<32x768xf32>
    %13 = tpu.matmul %11, %12, %cst {dimension_numbers = #tpu.dot_dimension_numbers<[1], [0], [0], [1], [0, 0, 1, 1], [], []>} : vector<32x256xf32>, vector<256x768xf32>, vector<32x768xf32> -> vector<32x768xf32>
    %14 = arith.addf %8, %13 : vector<32x768xf32>
    %c0_9 = arith.constant 0 : index
    %c0_10 = arith.constant 0 : index
    %15 = vector.load %arg10[%c0_9, %c0_10] : memref<32x768xf32, #tpu.memory_space<vmem>>, vector<32x768xf32>
    tpu.vector_store %arg10[%c0_9, %c0_10], %14 {strides = array<i32>} : memref<32x768xf32, #tpu.memory_space<vmem>>, vector<32x768xf32>,
    %c0_i32_11 = arith.constant 0 : i32
    %16 = arith.cmpi eq, %arg2, %c0_i32_11 : i32
    %17 = arith.extui %16 : i1 to i32
    %c0_i32_12 = arith.constant 0 : i32
    %18 = arith.cmpi ne, %17, %c0_i32_12 : i32
    scf.if %18 {
      %c0_13 = arith.constant 0 : index
      %c0_14 = arith.constant 0 : index
      %19 = vector.load %arg10[%c0_13, %c0_14] : memref<32x768xf32, #tpu.memory_space<vmem>>, vector<32x768xf32>
      %c0_15 = arith.constant 0 : index
      %c0_16 = arith.constant 0 : index
      %20 = vector.load %arg7[%c0_15, %c0_16] : memref<1x768xf32, #tpu.memory_space<vmem>>, vector<1x768xf32>
      %21 = vector.broadcast %20 : vector<1x768xf32> to vector<32x768xf32>
      %22 = arith.addf %19, %21 : vector<32x768xf32>
      %c0_17 = arith.constant 0 : index
      %c0_18 = arith.constant 0 : index
      %23 = vector.load %arg8[%c0_17, %c0_18] : memref<32x768xf32, #tpu.memory_space<vmem>>, vector<32x768xf32>
      tpu.vector_store %arg8[%c0_17, %c0_18], %22 {strides = array<i32>} : memref<32x768xf32, #tpu.memory_space<vmem>>, vector<32x768xf32>,
    } else {
    }
    return
  }
  func.func @transform_0(%arg0: i32, %arg1: i32, %arg2: i32) -> (i32, i32) {
    %c0_i32 = arith.constant 0 : i32
    %c0_i32_0 = arith.constant 0 : i32
    return %arg0, %c0_i32 : i32, i32
  }
  func.func @transform_1(%arg0: i32, %arg1: i32, %arg2: i32) -> (i32, i32) {
    %c0_i32 = arith.constant 0 : i32
    %c0_i32_0 = arith.constant 0 : i32
    %c0_i32_1 = arith.constant 0 : i32
    return %c0_i32, %c0_i32_0 : i32, i32
  }
  func.func @transform_2(%arg0: i32, %arg1: i32, %arg2: i32) -> (i32, i32) {
    %c0_i32 = arith.constant 0 : i32
    %c0_i32_0 = arith.constant 0 : i32
    %c0_i32_1 = arith.constant 0 : i32
    return %c0_i32, %c0_i32_0 : i32, i32
  }
  func.func @transform_3(%arg0: i32, %arg1: i32, %arg2: i32) -> (i32, i32) {
    %c0_i32 = arith.constant 0 : i32
    return %arg2, %arg1 : i32, i32
  }
  func.func @transform_4(%arg0: i32, %arg1: i32, %arg2: i32) -> (i32, i32) {
    %c0_i32 = arith.constant 0 : i32
    %c0_i32_0 = arith.constant 0 : i32
    return %c0_i32, %arg1 : i32, i32
  }
  func.func @transform_5(%arg0: i32, %arg1: i32, %arg2: i32) -> (i32, i32) {
    %c0_i32 = arith.constant 0 : i32
    return %arg0, %arg1 : i32, i32
  }
}

module attributes {stable_mosaic.version = 11 : i64} {
  func.func @_linear_residual_kernel(%arg0: i32, %arg1: i32, %arg2: i32, %arg3: memref<32x256xf32, #tpu.memory_space<vmem>>, %arg4: memref<256x256xf32, #tpu.memory_space<vmem>>, %arg5: memref<1x256xf32, #tpu.memory_space<vmem>>, %arg6: memref<32x256xf32, #tpu.memory_space<vmem>>, %arg7: memref<32x256xf32, #tpu.memory_space<vmem>>, %arg8: memref<32x256xf32, #tpu.memory_space<vmem>>) attributes {dimension_semantics = [#tpu.dimension_semantics<parallel>, #tpu.dimension_semantics<parallel>, #tpu.dimension_semantics<arbitrary>], iteration_bounds = array<i64: 1, 1, 1>, scalar_prefetch = 0 : i64, scratch_operands = 1 : i64, tpu.core_type = #tpu.core_type<tc>, window_params = [{transform_indices = @transform_0, window_bounds = array<i64: 32, 256>}, {transform_indices = @transform_1, window_bounds = array<i64: 256, 256>}, {transform_indices = @transform_2, window_bounds = array<i64: 1, 256>}, {transform_indices = @transform_3, window_bounds = array<i64: 32, 256>}, {transform_indices = @transform_4, window_bounds = array<i64: 32, 256>}]} {
    %c0_i32 = arith.constant 0 : i32
    %0 = arith.cmpi eq, %arg2, %c0_i32 : i32
    %1 = arith.extui %0 : i1 to i32
    %c0_i32_0 = arith.constant 0 : i32
    %2 = arith.cmpi ne, %1, %c0_i32_0 : i32
    scf.if %2 {
      %cst_10 = arith.constant 0.000000e+00 : f32
      %12 = vector.broadcast %cst_10 : f32 to vector<32x256xf32>
      %c0_11 = arith.constant 0 : index
      %c0_12 = arith.constant 0 : index
      %13 = vector.load %arg8[%c0_11, %c0_12] : memref<32x256xf32, #tpu.memory_space<vmem>>, vector<32x256xf32>
      tpu.vector_store %arg8[%c0_11, %c0_12], %12 {strides = array<i32>} : memref<32x256xf32, #tpu.memory_space<vmem>>, vector<32x256xf32>,
    } else {
    }
    %c0 = arith.constant 0 : index
    %c0_1 = arith.constant 0 : index
    %3 = vector.load %arg8[%c0, %c0_1] : memref<32x256xf32, #tpu.memory_space<vmem>>, vector<32x256xf32>
    %c0_2 = arith.constant 0 : index
    %c0_3 = arith.constant 0 : index
    %4 = vector.load %arg3[%c0_2, %c0_3] : memref<32x256xf32, #tpu.memory_space<vmem>>, vector<32x256xf32>
    %c0_4 = arith.constant 0 : index
    %c0_5 = arith.constant 0 : index
    %5 = vector.load %arg4[%c0_4, %c0_5] : memref<256x256xf32, #tpu.memory_space<vmem>>, vector<256x256xf32>
    %cst = arith.constant dense<0.000000e+00> : vector<32x256xf32>
    %6 = tpu.matmul %4, %5, %cst {dimension_numbers = #tpu.dot_dimension_numbers<[1], [0], [0], [1], [0, 0, 1, 1], [], []>} : vector<32x256xf32>, vector<256x256xf32>, vector<32x256xf32> -> vector<32x256xf32>
    %7 = arith.addf %3, %6 : vector<32x256xf32>
    %c0_6 = arith.constant 0 : index
    %c0_7 = arith.constant 0 : index
    %8 = vector.load %arg8[%c0_6, %c0_7] : memref<32x256xf32, #tpu.memory_space<vmem>>, vector<32x256xf32>
    tpu.vector_store %arg8[%c0_6, %c0_7], %7 {strides = array<i32>} : memref<32x256xf32, #tpu.memory_space<vmem>>, vector<32x256xf32>,
    %c0_i32_8 = arith.constant 0 : i32
    %9 = arith.cmpi eq, %arg2, %c0_i32_8 : i32
    %10 = arith.extui %9 : i1 to i32
    %c0_i32_9 = arith.constant 0 : i32
    %11 = arith.cmpi ne, %10, %c0_i32_9 : i32
    scf.if %11 {
      %c0_10 = arith.constant 0 : index
      %c0_11 = arith.constant 0 : index
      %12 = vector.load %arg8[%c0_10, %c0_11] : memref<32x256xf32, #tpu.memory_space<vmem>>, vector<32x256xf32>
      %c0_12 = arith.constant 0 : index
      %c0_13 = arith.constant 0 : index
      %13 = vector.load %arg5[%c0_12, %c0_13] : memref<1x256xf32, #tpu.memory_space<vmem>>, vector<1x256xf32>
      %14 = vector.broadcast %13 : vector<1x256xf32> to vector<32x256xf32>
      %15 = arith.addf %12, %14 : vector<32x256xf32>
      %c0_14 = arith.constant 0 : index
      %c0_15 = arith.constant 0 : index
      %16 = vector.load %arg6[%c0_14, %c0_15] : memref<32x256xf32, #tpu.memory_space<vmem>>, vector<32x256xf32>
      %17 = arith.addf %15, %16 : vector<32x256xf32>
      %c0_16 = arith.constant 0 : index
      %c0_17 = arith.constant 0 : index
      %18 = vector.load %arg7[%c0_16, %c0_17] : memref<32x256xf32, #tpu.memory_space<vmem>>, vector<32x256xf32>
      tpu.vector_store %arg7[%c0_16, %c0_17], %17 {strides = array<i32>} : memref<32x256xf32, #tpu.memory_space<vmem>>, vector<32x256xf32>,
    } else {
    }
    return
  }
  func.func @transform_0(%arg0: i32, %arg1: i32, %arg2: i32) -> (i32, i32) {
    %c0_i32 = arith.constant 0 : i32
    return %arg0, %arg2 : i32, i32
  }
  func.func @transform_1(%arg0: i32, %arg1: i32, %arg2: i32) -> (i32, i32) {
    %c0_i32 = arith.constant 0 : i32
    return %arg2, %arg1 : i32, i32
  }
  func.func @transform_2(%arg0: i32, %arg1: i32, %arg2: i32) -> (i32, i32) {
    %c0_i32 = arith.constant 0 : i32
    %c0_i32_0 = arith.constant 0 : i32
    return %c0_i32, %arg1 : i32, i32
  }
  func.func @transform_3(%arg0: i32, %arg1: i32, %arg2: i32) -> (i32, i32) {
    %c0_i32 = arith.constant 0 : i32
    return %arg0, %arg1 : i32, i32
  }
  func.func @transform_4(%arg0: i32, %arg1: i32, %arg2: i32) -> (i32, i32) {
    %c0_i32 = arith.constant 0 : i32
    return %arg0, %arg1 : i32, i32
  }
}

module attributes {stable_mosaic.version = 11 : i64} {
  func.func @_cross_attn_kernel(%arg0: i32, %arg1: memref<1x16x256xf32, #tpu.memory_space<vmem>>, %arg2: memref<1x16x512xf32, #tpu.memory_space<vmem>>, %arg3: memref<1x1x16xi32, #tpu.memory_space<vmem>>, %arg4: memref<1x16x256xf32, #tpu.memory_space<vmem>>) attributes {dimension_semantics = [#tpu.dimension_semantics<parallel>], iteration_bounds = array<i64: 2>, scalar_prefetch = 0 : i64, scratch_operands = 0 : i64, tpu.core_type = #tpu.core_type<tc>, window_params = [{transform_indices = @transform_0, window_bounds = array<i64: 1, 16, 256>}, {transform_indices = @transform_1, window_bounds = array<i64: 1, 16, 512>}, {transform_indices = @transform_2, window_bounds = array<i64: 1, 1, 16>}, {transform_indices = @transform_3, window_bounds = array<i64: 1, 16, 256>}]} {
    %c0 = arith.constant 0 : index
    %c0_0 = arith.constant 0 : index
    %c0_1 = arith.constant 0 : index
    %0 = vector.load %arg2[%c0, %c0_0, %c0_1] : memref<1x16x512xf32, #tpu.memory_space<vmem>>, vector<1x16x512xf32>
    %1 = vector.shape_cast %0 : vector<1x16x512xf32> to vector<16x512xf32>
    %c0_2 = arith.constant 0 : index
    %c0_3 = arith.constant 0 : index
    %c0_4 = arith.constant 0 : index
    %2 = vector.load %arg3[%c0_2, %c0_3, %c0_4] : memref<1x1x16xi32, #tpu.memory_space<vmem>>, vector<1x1x16xi32>
    %3 = vector.shape_cast %2 : vector<1x1x16xi32> to vector<1x16xi32>
    %c0_i32 = arith.constant 0 : i32
    %4 = vector.broadcast %c0_i32 : i32 to vector<1x16xi32>
    %5 = arith.cmpi eq, %3, %4 : vector<1x16xi32>
    %cst = arith.constant -1.000000e+09 : f32
    %cst_5 = arith.constant 0.000000e+00 : f32
    %6 = vector.broadcast %cst : f32 to vector<1x16xf32>
    %7 = vector.broadcast %cst_5 : f32 to vector<1x16xf32>
    %8 = arith.select %5, %6, %7 : vector<1x16xi1>, vector<1x16xf32>
    %c0_6 = arith.constant 0 : index
    %c0_7 = arith.constant 0 : index
    %c0_8 = arith.constant 0 : index
    %9 = vector.load %arg1[%c0_6, %c0_7, %c0_8] : memref<1x16x256xf32, #tpu.memory_space<vmem>>, vector<1x16x256xf32>
    %10 = vector.shape_cast %9 : vector<1x16x256xf32> to vector<16x256xf32>
    %11 = vector.extract_strided_slice %1 {offsets = [0, 0], sizes = [16, 256], strides = [1, 1]} : vector<16x512xf32> to vector<16x256xf32>
    %12 = vector.extract_strided_slice %1 {offsets = [0, 256], sizes = [16, 256], strides = [1, 1]} : vector<16x512xf32> to vector<16x256xf32>
    %13 = vector.extract_strided_slice %10 {offsets = [0, 0], sizes = [16, 32], strides = [1, 1]} : vector<16x256xf32> to vector<16x32xf32>
    %14 = vector.extract_strided_slice %11 {offsets = [0, 0], sizes = [16, 32], strides = [1, 1]} : vector<16x256xf32> to vector<16x32xf32>
    %15 = vector.extract_strided_slice %12 {offsets = [0, 0], sizes = [16, 32], strides = [1, 1]} : vector<16x256xf32> to vector<16x32xf32>
    %cst_9 = arith.constant dense<0.000000e+00> : vector<16x16xf32>
    %16 = tpu.matmul %13, %14, %cst_9 {dimension_numbers = #tpu.dot_dimension_numbers<[1], [1], [0], [0], [0, 0, 1, 0], [], []>} : vector<16x32xf32>, vector<16x32xf32>, vector<16x16xf32> -> vector<16x16xf32>
    %17 = vector.broadcast %8 : vector<1x16xf32> to vector<16x16xf32>
    %18 = arith.addf %16, %17 : vector<16x16xf32>
    %cst_10 = arith.constant dense<0xFF800000> : vector<16xf32>
    %19 = vector.multi_reduction <maximumf>, %18, %cst_10 [1] : vector<16x16xf32> to vector<16xf32>
    %20 = vector.shape_cast %19 : vector<16xf32> to vector<16x1xf32>
    %21 = vector.broadcast %20 : vector<16x1xf32> to vector<16x16xf32>
    %22 = arith.subf %18, %21 : vector<16x16xf32>
    %23 = math.exp %22 : vector<16x16xf32>
    %cst_11 = arith.constant dense<0.000000e+00> : vector<16xf32>
    %24 = vector.multi_reduction <add>, %23, %cst_11 [1] : vector<16x16xf32> to vector<16xf32>
    %25 = vector.shape_cast %24 : vector<16xf32> to vector<16x1xf32>
    %26 = tpu.reciprocal %25 {approx = true} : vector<16x1xf32> -> vector<16x1xf32>
    %27 = vector.broadcast %26 : vector<16x1xf32> to vector<16x16xf32>
    %28 = arith.mulf %23, %27 : vector<16x16xf32>
    %cst_12 = arith.constant dense<0.000000e+00> : vector<16x32xf32>
    %29 = tpu.matmul %28, %15, %cst_12 {dimension_numbers = #tpu.dot_dimension_numbers<[1], [0], [0], [1], [0, 0, 1, 1], [], []>} : vector<16x16xf32>, vector<16x32xf32>, vector<16x32xf32> -> vector<16x32xf32>
    %30 = vector.extract_strided_slice %10 {offsets = [0, 32], sizes = [16, 32], strides = [1, 1]} : vector<16x256xf32> to vector<16x32xf32>
    %31 = vector.extract_strided_slice %11 {offsets = [0, 32], sizes = [16, 32], strides = [1, 1]} : vector<16x256xf32> to vector<16x32xf32>
    %32 = vector.extract_strided_slice %12 {offsets = [0, 32], sizes = [16, 32], strides = [1, 1]} : vector<16x256xf32> to vector<16x32xf32>
    %cst_13 = arith.constant dense<0.000000e+00> : vector<16x16xf32>
    %33 = tpu.matmul %30, %31, %cst_13 {dimension_numbers = #tpu.dot_dimension_numbers<[1], [1], [0], [0], [0, 0, 1, 0], [], []>} : vector<16x32xf32>, vector<16x32xf32>, vector<16x16xf32> -> vector<16x16xf32>
    %34 = vector.broadcast %8 : vector<1x16xf32> to vector<16x16xf32>
    %35 = arith.addf %33, %34 : vector<16x16xf32>
    %cst_14 = arith.constant dense<0xFF800000> : vector<16xf32>
    %36 = vector.multi_reduction <maximumf>, %35, %cst_14 [1] : vector<16x16xf32> to vector<16xf32>
    %37 = vector.shape_cast %36 : vector<16xf32> to vector<16x1xf32>
    %38 = vector.broadcast %37 : vector<16x1xf32> to vector<16x16xf32>
    %39 = arith.subf %35, %38 : vector<16x16xf32>
    %40 = math.exp %39 : vector<16x16xf32>
    %cst_15 = arith.constant dense<0.000000e+00> : vector<16xf32>
    %41 = vector.multi_reduction <add>, %40, %cst_15 [1] : vector<16x16xf32> to vector<16xf32>
    %42 = vector.shape_cast %41 : vector<16xf32> to vector<16x1xf32>
    %43 = tpu.reciprocal %42 {approx = true} : vector<16x1xf32> -> vector<16x1xf32>
    %44 = vector.broadcast %43 : vector<16x1xf32> to vector<16x16xf32>
    %45 = arith.mulf %40, %44 : vector<16x16xf32>
    %cst_16 = arith.constant dense<0.000000e+00> : vector<16x32xf32>
    %46 = tpu.matmul %45, %32, %cst_16 {dimension_numbers = #tpu.dot_dimension_numbers<[1], [0], [0], [1], [0, 0, 1, 1], [], []>} : vector<16x16xf32>, vector<16x32xf32>, vector<16x32xf32> -> vector<16x32xf32>
    %47 = vector.extract_strided_slice %10 {offsets = [0, 64], sizes = [16, 32], strides = [1, 1]} : vector<16x256xf32> to vector<16x32xf32>
    %48 = vector.extract_strided_slice %11 {offsets = [0, 64], sizes = [16, 32], strides = [1, 1]} : vector<16x256xf32> to vector<16x32xf32>
    %49 = vector.extract_strided_slice %12 {offsets = [0, 64], sizes = [16, 32], strides = [1, 1]} : vector<16x256xf32> to vector<16x32xf32>
    %cst_17 = arith.constant dense<0.000000e+00> : vector<16x16xf32>
    %50 = tpu.matmul %47, %48, %cst_17 {dimension_numbers = #tpu.dot_dimension_numbers<[1], [1], [0], [0], [0, 0, 1, 0], [], []>} : vector<16x32xf32>, vector<16x32xf32>, vector<16x16xf32> -> vector<16x16xf32>
    %51 = vector.broadcast %8 : vector<1x16xf32> to vector<16x16xf32>
    %52 = arith.addf %50, %51 : vector<16x16xf32>
    %cst_18 = arith.constant dense<0xFF800000> : vector<16xf32>
    %53 = vector.multi_reduction <maximumf>, %52, %cst_18 [1] : vector<16x16xf32> to vector<16xf32>
    %54 = vector.shape_cast %53 : vector<16xf32> to vector<16x1xf32>
    %55 = vector.broadcast %54 : vector<16x1xf32> to vector<16x16xf32>
    %56 = arith.subf %52, %55 : vector<16x16xf32>
    %57 = math.exp %56 : vector<16x16xf32>
    %cst_19 = arith.constant dense<0.000000e+00> : vector<16xf32>
    %58 = vector.multi_reduction <add>, %57, %cst_19 [1] : vector<16x16xf32> to vector<16xf32>
    %59 = vector.shape_cast %58 : vector<16xf32> to vector<16x1xf32>
    %60 = tpu.reciprocal %59 {approx = true} : vector<16x1xf32> -> vector<16x1xf32>
    %61 = vector.broadcast %60 : vector<16x1xf32> to vector<16x16xf32>
    %62 = arith.mulf %57, %61 : vector<16x16xf32>
    %cst_20 = arith.constant dense<0.000000e+00> : vector<16x32xf32>
    %63 = tpu.matmul %62, %49, %cst_20 {dimension_numbers = #tpu.dot_dimension_numbers<[1], [0], [0], [1], [0, 0, 1, 1], [], []>} : vector<16x16xf32>, vector<16x32xf32>, vector<16x32xf32> -> vector<16x32xf32>
    %64 = vector.extract_strided_slice %10 {offsets = [0, 96], sizes = [16, 32], strides = [1, 1]} : vector<16x256xf32> to vector<16x32xf32>
    %65 = vector.extract_strided_slice %11 {offsets = [0, 96], sizes = [16, 32], strides = [1, 1]} : vector<16x256xf32> to vector<16x32xf32>
    %66 = vector.extract_strided_slice %12 {offsets = [0, 96], sizes = [16, 32], strides = [1, 1]} : vector<16x256xf32> to vector<16x32xf32>
    %cst_21 = arith.constant dense<0.000000e+00> : vector<16x16xf32>
    %67 = tpu.matmul %64, %65, %cst_21 {dimension_numbers = #tpu.dot_dimension_numbers<[1], [1], [0], [0], [0, 0, 1, 0], [], []>} : vector<16x32xf32>, vector<16x32xf32>, vector<16x16xf32> -> vector<16x16xf32>
    %68 = vector.broadcast %8 : vector<1x16xf32> to vector<16x16xf32>
    %69 = arith.addf %67, %68 : vector<16x16xf32>
    %cst_22 = arith.constant dense<0xFF800000> : vector<16xf32>
    %70 = vector.multi_reduction <maximumf>, %69, %cst_22 [1] : vector<16x16xf32> to vector<16xf32>
    %71 = vector.shape_cast %70 : vector<16xf32> to vector<16x1xf32>
    %72 = vector.broadcast %71 : vector<16x1xf32> to vector<16x16xf32>
    %73 = arith.subf %69, %72 : vector<16x16xf32>
    %74 = math.exp %73 : vector<16x16xf32>
    %cst_23 = arith.constant dense<0.000000e+00> : vector<16xf32>
    %75 = vector.multi_reduction <add>, %74, %cst_23 [1] : vector<16x16xf32> to vector<16xf32>
    %76 = vector.shape_cast %75 : vector<16xf32> to vector<16x1xf32>
    %77 = tpu.reciprocal %76 {approx = true} : vector<16x1xf32> -> vector<16x1xf32>
    %78 = vector.broadcast %77 : vector<16x1xf32> to vector<16x16xf32>
    %79 = arith.mulf %74, %78 : vector<16x16xf32>
    %cst_24 = arith.constant dense<0.000000e+00> : vector<16x32xf32>
    %80 = tpu.matmul %79, %66, %cst_24 {dimension_numbers = #tpu.dot_dimension_numbers<[1], [0], [0], [1], [0, 0, 1, 1], [], []>} : vector<16x16xf32>, vector<16x32xf32>, vector<16x32xf32> -> vector<16x32xf32>
    %81 = vector.extract_strided_slice %10 {offsets = [0, 128], sizes = [16, 32], strides = [1, 1]} : vector<16x256xf32> to vector<16x32xf32>
    %82 = vector.extract_strided_slice %11 {offsets = [0, 128], sizes = [16, 32], strides = [1, 1]} : vector<16x256xf32> to vector<16x32xf32>
    %83 = vector.extract_strided_slice %12 {offsets = [0, 128], sizes = [16, 32], strides = [1, 1]} : vector<16x256xf32> to vector<16x32xf32>
    %cst_25 = arith.constant dense<0.000000e+00> : vector<16x16xf32>
    %84 = tpu.matmul %81, %82, %cst_25 {dimension_numbers = #tpu.dot_dimension_numbers<[1], [1], [0], [0], [0, 0, 1, 0], [], []>} : vector<16x32xf32>, vector<16x32xf32>, vector<16x16xf32> -> vector<16x16xf32>
    %85 = vector.broadcast %8 : vector<1x16xf32> to vector<16x16xf32>
    %86 = arith.addf %84, %85 : vector<16x16xf32>
    %cst_26 = arith.constant dense<0xFF800000> : vector<16xf32>
    %87 = vector.multi_reduction <maximumf>, %86, %cst_26 [1] : vector<16x16xf32> to vector<16xf32>
    %88 = vector.shape_cast %87 : vector<16xf32> to vector<16x1xf32>
    %89 = vector.broadcast %88 : vector<16x1xf32> to vector<16x16xf32>
    %90 = arith.subf %86, %89 : vector<16x16xf32>
    %91 = math.exp %90 : vector<16x16xf32>
    %cst_27 = arith.constant dense<0.000000e+00> : vector<16xf32>
    %92 = vector.multi_reduction <add>, %91, %cst_27 [1] : vector<16x16xf32> to vector<16xf32>
    %93 = vector.shape_cast %92 : vector<16xf32> to vector<16x1xf32>
    %94 = tpu.reciprocal %93 {approx = true} : vector<16x1xf32> -> vector<16x1xf32>
    %95 = vector.broadcast %94 : vector<16x1xf32> to vector<16x16xf32>
    %96 = arith.mulf %91, %95 : vector<16x16xf32>
    %cst_28 = arith.constant dense<0.000000e+00> : vector<16x32xf32>
    %97 = tpu.matmul %96, %83, %cst_28 {dimension_numbers = #tpu.dot_dimension_numbers<[1], [0], [0], [1], [0, 0, 1, 1], [], []>} : vector<16x16xf32>, vector<16x32xf32>, vector<16x32xf32> -> vector<16x32xf32>
    %98 = vector.extract_strided_slice %10 {offsets = [0, 160], sizes = [16, 32], strides = [1, 1]} : vector<16x256xf32> to vector<16x32xf32>
    %99 = vector.extract_strided_slice %11 {offsets = [0, 160], sizes = [16, 32], strides = [1, 1]} : vector<16x256xf32> to vector<16x32xf32>
    %100 = vector.extract_strided_slice %12 {offsets = [0, 160], sizes = [16, 32], strides = [1, 1]} : vector<16x256xf32> to vector<16x32xf32>
    %cst_29 = arith.constant dense<0.000000e+00> : vector<16x16xf32>
    %101 = tpu.matmul %98, %99, %cst_29 {dimension_numbers = #tpu.dot_dimension_numbers<[1], [1], [0], [0], [0, 0, 1, 0], [], []>} : vector<16x32xf32>, vector<16x32xf32>, vector<16x16xf32> -> vector<16x16xf32>
    %102 = vector.broadcast %8 : vector<1x16xf32> to vector<16x16xf32>
    %103 = arith.addf %101, %102 : vector<16x16xf32>
    %cst_30 = arith.constant dense<0xFF800000> : vector<16xf32>
    %104 = vector.multi_reduction <maximumf>, %103, %cst_30 [1] : vector<16x16xf32> to vector<16xf32>
    %105 = vector.shape_cast %104 : vector<16xf32> to vector<16x1xf32>
    %106 = vector.broadcast %105 : vector<16x1xf32> to vector<16x16xf32>
    %107 = arith.subf %103, %106 : vector<16x16xf32>
    %108 = math.exp %107 : vector<16x16xf32>
    %cst_31 = arith.constant dense<0.000000e+00> : vector<16xf32>
    %109 = vector.multi_reduction <add>, %108, %cst_31 [1] : vector<16x16xf32> to vector<16xf32>
    %110 = vector.shape_cast %109 : vector<16xf32> to vector<16x1xf32>
    %111 = tpu.reciprocal %110 {approx = true} : vector<16x1xf32> -> vector<16x1xf32>
    %112 = vector.broadcast %111 : vector<16x1xf32> to vector<16x16xf32>
    %113 = arith.mulf %108, %112 : vector<16x16xf32>
    %cst_32 = arith.constant dense<0.000000e+00> : vector<16x32xf32>
    %114 = tpu.matmul %113, %100, %cst_32 {dimension_numbers = #tpu.dot_dimension_numbers<[1], [0], [0], [1], [0, 0, 1, 1], [], []>} : vector<16x16xf32>, vector<16x32xf32>, vector<16x32xf32> -> vector<16x32xf32>
    %115 = vector.extract_strided_slice %10 {offsets = [0, 192], sizes = [16, 32], strides = [1, 1]} : vector<16x256xf32> to vector<16x32xf32>
    %116 = vector.extract_strided_slice %11 {offsets = [0, 192], sizes = [16, 32], strides = [1, 1]} : vector<16x256xf32> to vector<16x32xf32>
    %117 = vector.extract_strided_slice %12 {offsets = [0, 192], sizes = [16, 32], strides = [1, 1]} : vector<16x256xf32> to vector<16x32xf32>
    %cst_33 = arith.constant dense<0.000000e+00> : vector<16x16xf32>
    %118 = tpu.matmul %115, %116, %cst_33 {dimension_numbers = #tpu.dot_dimension_numbers<[1], [1], [0], [0], [0, 0, 1, 0], [], []>} : vector<16x32xf32>, vector<16x32xf32>, vector<16x16xf32> -> vector<16x16xf32>
    %119 = vector.broadcast %8 : vector<1x16xf32> to vector<16x16xf32>
    %120 = arith.addf %118, %119 : vector<16x16xf32>
    %cst_34 = arith.constant dense<0xFF800000> : vector<16xf32>
    %121 = vector.multi_reduction <maximumf>, %120, %cst_34 [1] : vector<16x16xf32> to vector<16xf32>
    %122 = vector.shape_cast %121 : vector<16xf32> to vector<16x1xf32>
    %123 = vector.broadcast %122 : vector<16x1xf32> to vector<16x16xf32>
    %124 = arith.subf %120, %123 : vector<16x16xf32>
    %125 = math.exp %124 : vector<16x16xf32>
    %cst_35 = arith.constant dense<0.000000e+00> : vector<16xf32>
    %126 = vector.multi_reduction <add>, %125, %cst_35 [1] : vector<16x16xf32> to vector<16xf32>
    %127 = vector.shape_cast %126 : vector<16xf32> to vector<16x1xf32>
    %128 = tpu.reciprocal %127 {approx = true} : vector<16x1xf32> -> vector<16x1xf32>
    %129 = vector.broadcast %128 : vector<16x1xf32> to vector<16x16xf32>
    %130 = arith.mulf %125, %129 : vector<16x16xf32>
    %cst_36 = arith.constant dense<0.000000e+00> : vector<16x32xf32>
    %131 = tpu.matmul %130, %117, %cst_36 {dimension_numbers = #tpu.dot_dimension_numbers<[1], [0], [0], [1], [0, 0, 1, 1], [], []>} : vector<16x16xf32>, vector<16x32xf32>, vector<16x32xf32> -> vector<16x32xf32>
    %132 = vector.extract_strided_slice %10 {offsets = [0, 224], sizes = [16, 32], strides = [1, 1]} : vector<16x256xf32> to vector<16x32xf32>
    %133 = vector.extract_strided_slice %11 {offsets = [0, 224], sizes = [16, 32], strides = [1, 1]} : vector<16x256xf32> to vector<16x32xf32>
    %134 = vector.extract_strided_slice %12 {offsets = [0, 224], sizes = [16, 32], strides = [1, 1]} : vector<16x256xf32> to vector<16x32xf32>
    %cst_37 = arith.constant dense<0.000000e+00> : vector<16x16xf32>
    %135 = tpu.matmul %132, %133, %cst_37 {dimension_numbers = #tpu.dot_dimension_numbers<[1], [1], [0], [0], [0, 0, 1, 0], [], []>} : vector<16x32xf32>, vector<16x32xf32>, vector<16x16xf32> -> vector<16x16xf32>
    %136 = vector.broadcast %8 : vector<1x16xf32> to vector<16x16xf32>
    %137 = arith.addf %135, %136 : vector<16x16xf32>
    %cst_38 = arith.constant dense<0xFF800000> : vector<16xf32>
    %138 = vector.multi_reduction <maximumf>, %137, %cst_38 [1] : vector<16x16xf32> to vector<16xf32>
    %139 = vector.shape_cast %138 : vector<16xf32> to vector<16x1xf32>
    %140 = vector.broadcast %139 : vector<16x1xf32> to vector<16x16xf32>
    %141 = arith.subf %137, %140 : vector<16x16xf32>
    %142 = math.exp %141 : vector<16x16xf32>
    %cst_39 = arith.constant dense<0.000000e+00> : vector<16xf32>
    %143 = vector.multi_reduction <add>, %142, %cst_39 [1] : vector<16x16xf32> to vector<16xf32>
    %144 = vector.shape_cast %143 : vector<16xf32> to vector<16x1xf32>
    %145 = tpu.reciprocal %144 {approx = true} : vector<16x1xf32> -> vector<16x1xf32>
    %146 = vector.broadcast %145 : vector<16x1xf32> to vector<16x16xf32>
    %147 = arith.mulf %142, %146 : vector<16x16xf32>
    %cst_40 = arith.constant dense<0.000000e+00> : vector<16x32xf32>
    %148 = tpu.matmul %147, %134, %cst_40 {dimension_numbers = #tpu.dot_dimension_numbers<[1], [0], [0], [1], [0, 0, 1, 1], [], []>} : vector<16x16xf32>, vector<16x32xf32>, vector<16x32xf32> -> vector<16x32xf32>
    %149 = tpu.concatenate %29, %46, %63, %80, %97, %114, %131, %148 in 1 : vector<16x32xf32>, vector<16x32xf32>, vector<16x32xf32>, vector<16x32xf32>, vector<16x32xf32>, vector<16x32xf32>, vector<16x32xf32>, vector<16x32xf32> -> vector<16x256xf32>
    %c0_41 = arith.constant 0 : index
    %c0_42 = arith.constant 0 : index
    %c0_43 = arith.constant 0 : index
    %150 = vector.load %arg4[%c0_41, %c0_42, %c0_43] : memref<1x16x256xf32, #tpu.memory_space<vmem>>, vector<1x16x256xf32>
    %151 = vector.shape_cast %150 : vector<1x16x256xf32> to vector<16x256xf32>
    %152 = vector.shape_cast %149 : vector<16x256xf32> to vector<1x16x256xf32>
    tpu.vector_store %arg4[%c0_41, %c0_42, %c0_43], %152 {strides = array<i32>} : memref<1x16x256xf32, #tpu.memory_space<vmem>>, vector<1x16x256xf32>,
    return
  }
  func.func @transform_0(%arg0: i32) -> (i32, i32, i32) {
    %c0_i32 = arith.constant 0 : i32
    %c0_i32_0 = arith.constant 0 : i32
    %c0_i32_1 = arith.constant 0 : i32
    return %arg0, %c0_i32, %c0_i32_0 : i32, i32, i32
  }
  func.func @transform_1(%arg0: i32) -> (i32, i32, i32) {
    %c0_i32 = arith.constant 0 : i32
    %c0_i32_0 = arith.constant 0 : i32
    %c0_i32_1 = arith.constant 0 : i32
    return %arg0, %c0_i32, %c0_i32_0 : i32, i32, i32
  }
  func.func @transform_2(%arg0: i32) -> (i32, i32, i32) {
    %c0_i32 = arith.constant 0 : i32
    %c0_i32_0 = arith.constant 0 : i32
    %c0_i32_1 = arith.constant 0 : i32
    return %arg0, %c0_i32, %c0_i32_0 : i32, i32, i32
  }
  func.func @transform_3(%arg0: i32) -> (i32, i32, i32) {
    %c0_i32 = arith.constant 0 : i32
    %c0_i32_0 = arith.constant 0 : i32
    %c0_i32_1 = arith.constant 0 : i32
    return %arg0, %c0_i32, %c0_i32_0 : i32, i32, i32
  }
}

module attributes {stable_mosaic.version = 11 : i64} {
  func.func @_ln_linear_kernel(%arg0: i32, %arg1: i32, %arg2: i32, %arg3: memref<32x256xf32, #tpu.memory_space<vmem>>, %arg4: memref<1x256xf32, #tpu.memory_space<vmem>>, %arg5: memref<1x256xf32, #tpu.memory_space<vmem>>, %arg6: memref<256x256xf32, #tpu.memory_space<vmem>>, %arg7: memref<1x256xf32, #tpu.memory_space<vmem>>, %arg8: memref<32x256xf32, #tpu.memory_space<vmem>>, %arg9: memref<1x32x256xf32, #tpu.memory_space<vmem>>, %arg10: memref<32x256xf32, #tpu.memory_space<vmem>>) attributes {dimension_semantics = [#tpu.dimension_semantics<parallel>, #tpu.dimension_semantics<arbitrary>, #tpu.dimension_semantics<arbitrary>], iteration_bounds = array<i64: 1, 1, 1>, scalar_prefetch = 0 : i64, scratch_operands = 2 : i64, tpu.core_type = #tpu.core_type<tc>, window_params = [{transform_indices = @transform_0, window_bounds = array<i64: 32, 256>}, {pipeline_mode = #tpu.pipeline_mode<synchronous>, transform_indices = @transform_1, window_bounds = array<i64: 1, 256>}, {pipeline_mode = #tpu.pipeline_mode<synchronous>, transform_indices = @transform_2, window_bounds = array<i64: 1, 256>}, {transform_indices = @transform_3, window_bounds = array<i64: 256, 256>}, {transform_indices = @transform_4, window_bounds = array<i64: 1, 256>}, {transform_indices = @transform_5, window_bounds = array<i64: 32, 256>}]} {
    %c0_i32 = arith.constant 0 : i32
    %0 = arith.cmpi eq, %arg1, %c0_i32 : i32
    %c0_i32_0 = arith.constant 0 : i32
    %1 = arith.cmpi eq, %arg2, %c0_i32_0 : i32
    %2 = arith.andi %0, %1 : i1
    %3 = arith.extui %2 : i1 to i32
    %c0_i32_1 = arith.constant 0 : i32
    %4 = arith.cmpi ne, %3, %c0_i32_1 : i32
    scf.if %4 {
      %c0_13 = arith.constant 0 : index
      %c0_14 = arith.constant 0 : index
      %19 = vector.load %arg3[%c0_13, %c0_14] : memref<32x256xf32, #tpu.memory_space<vmem>>, vector<32x256xf32>
      %cst_15 = arith.constant dense<0.000000e+00> : vector<32xf32>
      %20 = vector.multi_reduction <add>, %19, %cst_15 [1] : vector<32x256xf32> to vector<32xf32>
      %21 = vector.shape_cast %20 : vector<32xf32> to vector<32x1xf32>
      %cst_16 = arith.constant 2.560000e+02 : f32
      %22 = vector.broadcast %cst_16 : f32 to vector<32x1xf32>
      %23 = arith.divf %21, %22 : vector<32x1xf32>
      %24 = vector.broadcast %23 : vector<32x1xf32> to vector<32x256xf32>
      %25 = arith.subf %19, %24 : vector<32x256xf32>
      %26 = arith.mulf %25, %25 : vector<32x256xf32>
      %cst_17 = arith.constant dense<0.000000e+00> : vector<32xf32>
      %27 = vector.multi_reduction <add>, %26, %cst_17 [1] : vector<32x256xf32> to vector<32xf32>
      %28 = vector.shape_cast %27 : vector<32xf32> to vector<32x1xf32>
      %cst_18 = arith.constant 0.00392156886 : f32
      %29 = vector.broadcast %cst_18 : f32 to vector<32x1xf32>
      %30 = arith.mulf %28, %29 : vector<32x1xf32>
      %31 = math.sqrt %30 : vector<32x1xf32>
      %c0_19 = arith.constant 0 : index
      %c0_20 = arith.constant 0 : index
      %32 = vector.load %arg4[%c0_19, %c0_20] : memref<1x256xf32, #tpu.memory_space<vmem>>, vector<1x256xf32>
      %cst_21 = arith.constant 9.99999997E-7 : f32
      %33 = vector.broadcast %cst_21 : f32 to vector<32x1xf32>
      %34 = arith.addf %31, %33 : vector<32x1xf32>
      %35 = vector.broadcast %34 : vector<32x1xf32> to vector<32x256xf32>
      %36 = arith.divf %25, %35 : vector<32x256xf32>
      %37 = vector.broadcast %32 : vector<1x256xf32> to vector<32x256xf32>
      %38 = arith.mulf %37, %36 : vector<32x256xf32>
      %c0_22 = arith.constant 0 : index
      %c0_23 = arith.constant 0 : index
      %39 = vector.load %arg5[%c0_22, %c0_23] : memref<1x256xf32, #tpu.memory_space<vmem>>, vector<1x256xf32>
      %40 = vector.broadcast %39 : vector<1x256xf32> to vector<32x256xf32>
      %41 = arith.addf %38, %40 : vector<32x256xf32>
      %c0_24 = arith.constant 0 : index
      %c0_25 = arith.constant 0 : index
      %c0_26 = arith.constant 0 : index
      %42 = vector.load %arg9[%c0_24, %c0_25, %c0_26] : memref<1x32x256xf32, #tpu.memory_space<vmem>>, vector<1x32x256xf32>
      %43 = vector.shape_cast %42 : vector<1x32x256xf32> to vector<32x256xf32>
      %44 = vector.shape_cast %41 : vector<32x256xf32> to vector<1x32x256xf32>
      tpu.vector_store %arg9[%c0_24, %c0_25, %c0_26], %44 {strides = array<i32>} : memref<1x32x256xf32, #tpu.memory_space<vmem>>, vector<1x32x256xf32>,
    } else {
    }
    %c0_i32_2 = arith.constant 0 : i32
    %5 = arith.cmpi eq, %arg2, %c0_i32_2 : i32
    %6 = arith.extui %5 : i1 to i32
    %c0_i32_3 = arith.constant 0 : i32
    %7 = arith.cmpi ne, %6, %c0_i32_3 : i32
    scf.if %7 {
      %cst_13 = arith.constant 0.000000e+00 : f32
      %19 = vector.broadcast %cst_13 : f32 to vector<32x256xf32>
      %c0_14 = arith.constant 0 : index
      %c0_15 = arith.constant 0 : index
      %20 = vector.load %arg10[%c0_14, %c0_15] : memref<32x256xf32, #tpu.memory_space<vmem>>, vector<32x256xf32>
      tpu.vector_store %arg10[%c0_14, %c0_15], %19 {strides = array<i32>} : memref<32x256xf32, #tpu.memory_space<vmem>>, vector<32x256xf32>,
    } else {
    }
    %c0 = arith.constant 0 : index
    %c0_4 = arith.constant 0 : index
    %8 = vector.load %arg10[%c0, %c0_4] : memref<32x256xf32, #tpu.memory_space<vmem>>, vector<32x256xf32>
    %9 = arith.index_cast %arg2 : i32 to index
    %c0_5 = arith.constant 0 : index
    %c0_6 = arith.constant 0 : index
    %10 = vector.load %arg9[%9, %c0_5, %c0_6] : memref<1x32x256xf32, #tpu.memory_space<vmem>>, vector<1x32x256xf32>
    %11 = vector.shape_cast %10 : vector<1x32x256xf32> to vector<32x256xf32>
    %c0_7 = arith.constant 0 : index
    %c0_8 = arith.constant 0 : index
    %12 = vector.load %arg6[%c0_7, %c0_8] : memref<256x256xf32, #tpu.memory_space<vmem>>, vector<256x256xf32>
    %cst = arith.constant dense<0.000000e+00> : vector<32x256xf32>
    %13 = tpu.matmul %11, %12, %cst {dimension_numbers = #tpu.dot_dimension_numbers<[1], [0], [0], [1], [0, 0, 1, 1], [], []>} : vector<32x256xf32>, vector<256x256xf32>, vector<32x256xf32> -> vector<32x256xf32>
    %14 = arith.addf %8, %13 : vector<32x256xf32>
    %c0_9 = arith.constant 0 : index
    %c0_10 = arith.constant 0 : index
    %15 = vector.load %arg10[%c0_9, %c0_10] : memref<32x256xf32, #tpu.memory_space<vmem>>, vector<32x256xf32>
    tpu.vector_store %arg10[%c0_9, %c0_10], %14 {strides = array<i32>} : memref<32x256xf32, #tpu.memory_space<vmem>>, vector<32x256xf32>,
    %c0_i32_11 = arith.constant 0 : i32
    %16 = arith.cmpi eq, %arg2, %c0_i32_11 : i32
    %17 = arith.extui %16 : i1 to i32
    %c0_i32_12 = arith.constant 0 : i32
    %18 = arith.cmpi ne, %17, %c0_i32_12 : i32
    scf.if %18 {
      %c0_13 = arith.constant 0 : index
      %c0_14 = arith.constant 0 : index
      %19 = vector.load %arg10[%c0_13, %c0_14] : memref<32x256xf32, #tpu.memory_space<vmem>>, vector<32x256xf32>
      %c0_15 = arith.constant 0 : index
      %c0_16 = arith.constant 0 : index
      %20 = vector.load %arg7[%c0_15, %c0_16] : memref<1x256xf32, #tpu.memory_space<vmem>>, vector<1x256xf32>
      %21 = vector.broadcast %20 : vector<1x256xf32> to vector<32x256xf32>
      %22 = arith.addf %19, %21 : vector<32x256xf32>
      %c0_17 = arith.constant 0 : index
      %c0_18 = arith.constant 0 : index
      %23 = vector.load %arg8[%c0_17, %c0_18] : memref<32x256xf32, #tpu.memory_space<vmem>>, vector<32x256xf32>
      tpu.vector_store %arg8[%c0_17, %c0_18], %22 {strides = array<i32>} : memref<32x256xf32, #tpu.memory_space<vmem>>, vector<32x256xf32>,
    } else {
    }
    return
  }
  func.func @transform_0(%arg0: i32, %arg1: i32, %arg2: i32) -> (i32, i32) {
    %c0_i32 = arith.constant 0 : i32
    %c0_i32_0 = arith.constant 0 : i32
    return %arg0, %c0_i32 : i32, i32
  }
  func.func @transform_1(%arg0: i32, %arg1: i32, %arg2: i32) -> (i32, i32) {
    %c0_i32 = arith.constant 0 : i32
    %c0_i32_0 = arith.constant 0 : i32
    %c0_i32_1 = arith.constant 0 : i32
    return %c0_i32, %c0_i32_0 : i32, i32
  }
  func.func @transform_2(%arg0: i32, %arg1: i32, %arg2: i32) -> (i32, i32) {
    %c0_i32 = arith.constant 0 : i32
    %c0_i32_0 = arith.constant 0 : i32
    %c0_i32_1 = arith.constant 0 : i32
    return %c0_i32, %c0_i32_0 : i32, i32
  }
  func.func @transform_3(%arg0: i32, %arg1: i32, %arg2: i32) -> (i32, i32) {
    %c0_i32 = arith.constant 0 : i32
    return %arg2, %arg1 : i32, i32
  }
  func.func @transform_4(%arg0: i32, %arg1: i32, %arg2: i32) -> (i32, i32) {
    %c0_i32 = arith.constant 0 : i32
    %c0_i32_0 = arith.constant 0 : i32
    return %c0_i32, %arg1 : i32, i32
  }
  func.func @transform_5(%arg0: i32, %arg1: i32, %arg2: i32) -> (i32, i32) {
    %c0_i32 = arith.constant 0 : i32
    return %arg0, %arg1 : i32, i32
  }
}

module attributes {stable_mosaic.version = 11 : i64} {
  func.func @_linear_residual_kernel(%arg0: i32, %arg1: i32, %arg2: i32, %arg3: memref<32x256xf32, #tpu.memory_space<vmem>>, %arg4: memref<256x256xf32, #tpu.memory_space<vmem>>, %arg5: memref<1x256xf32, #tpu.memory_space<vmem>>, %arg6: memref<32x256xf32, #tpu.memory_space<vmem>>, %arg7: memref<32x256xf32, #tpu.memory_space<vmem>>, %arg8: memref<32x256xf32, #tpu.memory_space<vmem>>) attributes {dimension_semantics = [#tpu.dimension_semantics<parallel>, #tpu.dimension_semantics<parallel>, #tpu.dimension_semantics<arbitrary>], iteration_bounds = array<i64: 1, 1, 1>, scalar_prefetch = 0 : i64, scratch_operands = 1 : i64, tpu.core_type = #tpu.core_type<tc>, window_params = [{transform_indices = @transform_0, window_bounds = array<i64: 32, 256>}, {transform_indices = @transform_1, window_bounds = array<i64: 256, 256>}, {transform_indices = @transform_2, window_bounds = array<i64: 1, 256>}, {transform_indices = @transform_3, window_bounds = array<i64: 32, 256>}, {transform_indices = @transform_4, window_bounds = array<i64: 32, 256>}]} {
    %c0_i32 = arith.constant 0 : i32
    %0 = arith.cmpi eq, %arg2, %c0_i32 : i32
    %1 = arith.extui %0 : i1 to i32
    %c0_i32_0 = arith.constant 0 : i32
    %2 = arith.cmpi ne, %1, %c0_i32_0 : i32
    scf.if %2 {
      %cst_10 = arith.constant 0.000000e+00 : f32
      %12 = vector.broadcast %cst_10 : f32 to vector<32x256xf32>
      %c0_11 = arith.constant 0 : index
      %c0_12 = arith.constant 0 : index
      %13 = vector.load %arg8[%c0_11, %c0_12] : memref<32x256xf32, #tpu.memory_space<vmem>>, vector<32x256xf32>
      tpu.vector_store %arg8[%c0_11, %c0_12], %12 {strides = array<i32>} : memref<32x256xf32, #tpu.memory_space<vmem>>, vector<32x256xf32>,
    } else {
    }
    %c0 = arith.constant 0 : index
    %c0_1 = arith.constant 0 : index
    %3 = vector.load %arg8[%c0, %c0_1] : memref<32x256xf32, #tpu.memory_space<vmem>>, vector<32x256xf32>
    %c0_2 = arith.constant 0 : index
    %c0_3 = arith.constant 0 : index
    %4 = vector.load %arg3[%c0_2, %c0_3] : memref<32x256xf32, #tpu.memory_space<vmem>>, vector<32x256xf32>
    %c0_4 = arith.constant 0 : index
    %c0_5 = arith.constant 0 : index
    %5 = vector.load %arg4[%c0_4, %c0_5] : memref<256x256xf32, #tpu.memory_space<vmem>>, vector<256x256xf32>
    %cst = arith.constant dense<0.000000e+00> : vector<32x256xf32>
    %6 = tpu.matmul %4, %5, %cst {dimension_numbers = #tpu.dot_dimension_numbers<[1], [0], [0], [1], [0, 0, 1, 1], [], []>} : vector<32x256xf32>, vector<256x256xf32>, vector<32x256xf32> -> vector<32x256xf32>
    %7 = arith.addf %3, %6 : vector<32x256xf32>
    %c0_6 = arith.constant 0 : index
    %c0_7 = arith.constant 0 : index
    %8 = vector.load %arg8[%c0_6, %c0_7] : memref<32x256xf32, #tpu.memory_space<vmem>>, vector<32x256xf32>
    tpu.vector_store %arg8[%c0_6, %c0_7], %7 {strides = array<i32>} : memref<32x256xf32, #tpu.memory_space<vmem>>, vector<32x256xf32>,
    %c0_i32_8 = arith.constant 0 : i32
    %9 = arith.cmpi eq, %arg2, %c0_i32_8 : i32
    %10 = arith.extui %9 : i1 to i32
    %c0_i32_9 = arith.constant 0 : i32
    %11 = arith.cmpi ne, %10, %c0_i32_9 : i32
    scf.if %11 {
      %c0_10 = arith.constant 0 : index
      %c0_11 = arith.constant 0 : index
      %12 = vector.load %arg8[%c0_10, %c0_11] : memref<32x256xf32, #tpu.memory_space<vmem>>, vector<32x256xf32>
      %c0_12 = arith.constant 0 : index
      %c0_13 = arith.constant 0 : index
      %13 = vector.load %arg5[%c0_12, %c0_13] : memref<1x256xf32, #tpu.memory_space<vmem>>, vector<1x256xf32>
      %14 = vector.broadcast %13 : vector<1x256xf32> to vector<32x256xf32>
      %15 = arith.addf %12, %14 : vector<32x256xf32>
      %c0_14 = arith.constant 0 : index
      %c0_15 = arith.constant 0 : index
      %16 = vector.load %arg6[%c0_14, %c0_15] : memref<32x256xf32, #tpu.memory_space<vmem>>, vector<32x256xf32>
      %17 = arith.addf %15, %16 : vector<32x256xf32>
      %c0_16 = arith.constant 0 : index
      %c0_17 = arith.constant 0 : index
      %18 = vector.load %arg7[%c0_16, %c0_17] : memref<32x256xf32, #tpu.memory_space<vmem>>, vector<32x256xf32>
      tpu.vector_store %arg7[%c0_16, %c0_17], %17 {strides = array<i32>} : memref<32x256xf32, #tpu.memory_space<vmem>>, vector<32x256xf32>,
    } else {
    }
    return
  }
  func.func @transform_0(%arg0: i32, %arg1: i32, %arg2: i32) -> (i32, i32) {
    %c0_i32 = arith.constant 0 : i32
    return %arg0, %arg2 : i32, i32
  }
  func.func @transform_1(%arg0: i32, %arg1: i32, %arg2: i32) -> (i32, i32) {
    %c0_i32 = arith.constant 0 : i32
    return %arg2, %arg1 : i32, i32
  }
  func.func @transform_2(%arg0: i32, %arg1: i32, %arg2: i32) -> (i32, i32) {
    %c0_i32 = arith.constant 0 : i32
    %c0_i32_0 = arith.constant 0 : i32
    return %c0_i32, %arg1 : i32, i32
  }
  func.func @transform_3(%arg0: i32, %arg1: i32, %arg2: i32) -> (i32, i32) {
    %c0_i32 = arith.constant 0 : i32
    return %arg0, %arg1 : i32, i32
  }
  func.func @transform_4(%arg0: i32, %arg1: i32, %arg2: i32) -> (i32, i32) {
    %c0_i32 = arith.constant 0 : i32
    return %arg0, %arg1 : i32, i32
  }
}

module attributes {stable_mosaic.version = 11 : i64} {
  func.func @_ln_linear_kernel(%arg0: i32, %arg1: i32, %arg2: i32, %arg3: memref<32x256xf32, #tpu.memory_space<vmem>>, %arg4: memref<1x256xf32, #tpu.memory_space<vmem>>, %arg5: memref<1x256xf32, #tpu.memory_space<vmem>>, %arg6: memref<256x1024xf32, #tpu.memory_space<vmem>>, %arg7: memref<1x1024xf32, #tpu.memory_space<vmem>>, %arg8: memref<32x1024xf32, #tpu.memory_space<vmem>>, %arg9: memref<1x32x256xf32, #tpu.memory_space<vmem>>, %arg10: memref<32x1024xf32, #tpu.memory_space<vmem>>) attributes {dimension_semantics = [#tpu.dimension_semantics<parallel>, #tpu.dimension_semantics<arbitrary>, #tpu.dimension_semantics<arbitrary>], iteration_bounds = array<i64: 1, 2, 1>, scalar_prefetch = 0 : i64, scratch_operands = 2 : i64, tpu.core_type = #tpu.core_type<tc>, window_params = [{transform_indices = @transform_0, window_bounds = array<i64: 32, 256>}, {pipeline_mode = #tpu.pipeline_mode<synchronous>, transform_indices = @transform_1, window_bounds = array<i64: 1, 256>}, {pipeline_mode = #tpu.pipeline_mode<synchronous>, transform_indices = @transform_2, window_bounds = array<i64: 1, 256>}, {transform_indices = @transform_3, window_bounds = array<i64: 256, 1024>}, {transform_indices = @transform_4, window_bounds = array<i64: 1, 1024>}, {transform_indices = @transform_5, window_bounds = array<i64: 32, 1024>}]} {
    %c0_i32 = arith.constant 0 : i32
    %0 = arith.cmpi eq, %arg1, %c0_i32 : i32
    %c0_i32_0 = arith.constant 0 : i32
    %1 = arith.cmpi eq, %arg2, %c0_i32_0 : i32
    %2 = arith.andi %0, %1 : i1
    %3 = arith.extui %2 : i1 to i32
    %c0_i32_1 = arith.constant 0 : i32
    %4 = arith.cmpi ne, %3, %c0_i32_1 : i32
    scf.if %4 {
      %c0_13 = arith.constant 0 : index
      %c0_14 = arith.constant 0 : index
      %19 = vector.load %arg3[%c0_13, %c0_14] : memref<32x256xf32, #tpu.memory_space<vmem>>, vector<32x256xf32>
      %cst_15 = arith.constant dense<0.000000e+00> : vector<32xf32>
      %20 = vector.multi_reduction <add>, %19, %cst_15 [1] : vector<32x256xf32> to vector<32xf32>
      %21 = vector.shape_cast %20 : vector<32xf32> to vector<32x1xf32>
      %cst_16 = arith.constant 2.560000e+02 : f32
      %22 = vector.broadcast %cst_16 : f32 to vector<32x1xf32>
      %23 = arith.divf %21, %22 : vector<32x1xf32>
      %24 = vector.broadcast %23 : vector<32x1xf32> to vector<32x256xf32>
      %25 = arith.subf %19, %24 : vector<32x256xf32>
      %26 = arith.mulf %25, %25 : vector<32x256xf32>
      %cst_17 = arith.constant dense<0.000000e+00> : vector<32xf32>
      %27 = vector.multi_reduction <add>, %26, %cst_17 [1] : vector<32x256xf32> to vector<32xf32>
      %28 = vector.shape_cast %27 : vector<32xf32> to vector<32x1xf32>
      %cst_18 = arith.constant 0.00392156886 : f32
      %29 = vector.broadcast %cst_18 : f32 to vector<32x1xf32>
      %30 = arith.mulf %28, %29 : vector<32x1xf32>
      %31 = math.sqrt %30 : vector<32x1xf32>
      %c0_19 = arith.constant 0 : index
      %c0_20 = arith.constant 0 : index
      %32 = vector.load %arg4[%c0_19, %c0_20] : memref<1x256xf32, #tpu.memory_space<vmem>>, vector<1x256xf32>
      %cst_21 = arith.constant 9.99999997E-7 : f32
      %33 = vector.broadcast %cst_21 : f32 to vector<32x1xf32>
      %34 = arith.addf %31, %33 : vector<32x1xf32>
      %35 = vector.broadcast %34 : vector<32x1xf32> to vector<32x256xf32>
      %36 = arith.divf %25, %35 : vector<32x256xf32>
      %37 = vector.broadcast %32 : vector<1x256xf32> to vector<32x256xf32>
      %38 = arith.mulf %37, %36 : vector<32x256xf32>
      %c0_22 = arith.constant 0 : index
      %c0_23 = arith.constant 0 : index
      %39 = vector.load %arg5[%c0_22, %c0_23] : memref<1x256xf32, #tpu.memory_space<vmem>>, vector<1x256xf32>
      %40 = vector.broadcast %39 : vector<1x256xf32> to vector<32x256xf32>
      %41 = arith.addf %38, %40 : vector<32x256xf32>
      %c0_24 = arith.constant 0 : index
      %c0_25 = arith.constant 0 : index
      %c0_26 = arith.constant 0 : index
      %42 = vector.load %arg9[%c0_24, %c0_25, %c0_26] : memref<1x32x256xf32, #tpu.memory_space<vmem>>, vector<1x32x256xf32>
      %43 = vector.shape_cast %42 : vector<1x32x256xf32> to vector<32x256xf32>
      %44 = vector.shape_cast %41 : vector<32x256xf32> to vector<1x32x256xf32>
      tpu.vector_store %arg9[%c0_24, %c0_25, %c0_26], %44 {strides = array<i32>} : memref<1x32x256xf32, #tpu.memory_space<vmem>>, vector<1x32x256xf32>,
    } else {
    }
    %c0_i32_2 = arith.constant 0 : i32
    %5 = arith.cmpi eq, %arg2, %c0_i32_2 : i32
    %6 = arith.extui %5 : i1 to i32
    %c0_i32_3 = arith.constant 0 : i32
    %7 = arith.cmpi ne, %6, %c0_i32_3 : i32
    scf.if %7 {
      %cst_13 = arith.constant 0.000000e+00 : f32
      %19 = vector.broadcast %cst_13 : f32 to vector<32x1024xf32>
      %c0_14 = arith.constant 0 : index
      %c0_15 = arith.constant 0 : index
      %20 = vector.load %arg10[%c0_14, %c0_15] : memref<32x1024xf32, #tpu.memory_space<vmem>>, vector<32x1024xf32>
      tpu.vector_store %arg10[%c0_14, %c0_15], %19 {strides = array<i32>} : memref<32x1024xf32, #tpu.memory_space<vmem>>, vector<32x1024xf32>,
    } else {
    }
    %c0 = arith.constant 0 : index
    %c0_4 = arith.constant 0 : index
    %8 = vector.load %arg10[%c0, %c0_4] : memref<32x1024xf32, #tpu.memory_space<vmem>>, vector<32x1024xf32>
    %9 = arith.index_cast %arg2 : i32 to index
    %c0_5 = arith.constant 0 : index
    %c0_6 = arith.constant 0 : index
    %10 = vector.load %arg9[%9, %c0_5, %c0_6] : memref<1x32x256xf32, #tpu.memory_space<vmem>>, vector<1x32x256xf32>
    %11 = vector.shape_cast %10 : vector<1x32x256xf32> to vector<32x256xf32>
    %c0_7 = arith.constant 0 : index
    %c0_8 = arith.constant 0 : index
    %12 = vector.load %arg6[%c0_7, %c0_8] : memref<256x1024xf32, #tpu.memory_space<vmem>>, vector<256x1024xf32>
    %cst = arith.constant dense<0.000000e+00> : vector<32x1024xf32>
    %13 = tpu.matmul %11, %12, %cst {dimension_numbers = #tpu.dot_dimension_numbers<[1], [0], [0], [1], [0, 0, 1, 1], [], []>} : vector<32x256xf32>, vector<256x1024xf32>, vector<32x1024xf32> -> vector<32x1024xf32>
    %14 = arith.addf %8, %13 : vector<32x1024xf32>
    %c0_9 = arith.constant 0 : index
    %c0_10 = arith.constant 0 : index
    %15 = vector.load %arg10[%c0_9, %c0_10] : memref<32x1024xf32, #tpu.memory_space<vmem>>, vector<32x1024xf32>
    tpu.vector_store %arg10[%c0_9, %c0_10], %14 {strides = array<i32>} : memref<32x1024xf32, #tpu.memory_space<vmem>>, vector<32x1024xf32>,
    %c0_i32_11 = arith.constant 0 : i32
    %16 = arith.cmpi eq, %arg2, %c0_i32_11 : i32
    %17 = arith.extui %16 : i1 to i32
    %c0_i32_12 = arith.constant 0 : i32
    %18 = arith.cmpi ne, %17, %c0_i32_12 : i32
    scf.if %18 {
      %c0_13 = arith.constant 0 : index
      %c0_14 = arith.constant 0 : index
      %19 = vector.load %arg10[%c0_13, %c0_14] : memref<32x1024xf32, #tpu.memory_space<vmem>>, vector<32x1024xf32>
      %c0_15 = arith.constant 0 : index
      %c0_16 = arith.constant 0 : index
      %20 = vector.load %arg7[%c0_15, %c0_16] : memref<1x1024xf32, #tpu.memory_space<vmem>>, vector<1x1024xf32>
      %21 = vector.broadcast %20 : vector<1x1024xf32> to vector<32x1024xf32>
      %22 = arith.addf %19, %21 : vector<32x1024xf32>
      %cst_17 = arith.constant 0.000000e+00 : f32
      %23 = vector.broadcast %cst_17 : f32 to vector<32x1024xf32>
      %24 = arith.maximumf %22, %23 : vector<32x1024xf32>
      %c0_18 = arith.constant 0 : index
      %c0_19 = arith.constant 0 : index
      %25 = vector.load %arg8[%c0_18, %c0_19] : memref<32x1024xf32, #tpu.memory_space<vmem>>, vector<32x1024xf32>
      tpu.vector_store %arg8[%c0_18, %c0_19], %24 {strides = array<i32>} : memref<32x1024xf32, #tpu.memory_space<vmem>>, vector<32x1024xf32>,
    } else {
    }
    return
  }
  func.func @transform_0(%arg0: i32, %arg1: i32, %arg2: i32) -> (i32, i32) {
    %c0_i32 = arith.constant 0 : i32
    %c0_i32_0 = arith.constant 0 : i32
    return %arg0, %c0_i32 : i32, i32
  }
  func.func @transform_1(%arg0: i32, %arg1: i32, %arg2: i32) -> (i32, i32) {
    %c0_i32 = arith.constant 0 : i32
    %c0_i32_0 = arith.constant 0 : i32
    %c0_i32_1 = arith.constant 0 : i32
    return %c0_i32, %c0_i32_0 : i32, i32
  }
  func.func @transform_2(%arg0: i32, %arg1: i32, %arg2: i32) -> (i32, i32) {
    %c0_i32 = arith.constant 0 : i32
    %c0_i32_0 = arith.constant 0 : i32
    %c0_i32_1 = arith.constant 0 : i32
    return %c0_i32, %c0_i32_0 : i32, i32
  }
  func.func @transform_3(%arg0: i32, %arg1: i32, %arg2: i32) -> (i32, i32) {
    %c0_i32 = arith.constant 0 : i32
    return %arg2, %arg1 : i32, i32
  }
  func.func @transform_4(%arg0: i32, %arg1: i32, %arg2: i32) -> (i32, i32) {
    %c0_i32 = arith.constant 0 : i32
    %c0_i32_0 = arith.constant 0 : i32
    return %c0_i32, %arg1 : i32, i32
  }
  func.func @transform_5(%arg0: i32, %arg1: i32, %arg2: i32) -> (i32, i32) {
    %c0_i32 = arith.constant 0 : i32
    return %arg0, %arg1 : i32, i32
  }
}

module attributes {stable_mosaic.version = 11 : i64} {
  func.func @_linear_residual_kernel(%arg0: i32, %arg1: i32, %arg2: i32, %arg3: memref<32x512xf32, #tpu.memory_space<vmem>>, %arg4: memref<512x256xf32, #tpu.memory_space<vmem>>, %arg5: memref<1x256xf32, #tpu.memory_space<vmem>>, %arg6: memref<32x256xf32, #tpu.memory_space<vmem>>, %arg7: memref<32x256xf32, #tpu.memory_space<vmem>>, %arg8: memref<32x256xf32, #tpu.memory_space<vmem>>) attributes {dimension_semantics = [#tpu.dimension_semantics<parallel>, #tpu.dimension_semantics<parallel>, #tpu.dimension_semantics<arbitrary>], iteration_bounds = array<i64: 1, 1, 4>, scalar_prefetch = 0 : i64, scratch_operands = 1 : i64, tpu.core_type = #tpu.core_type<tc>, window_params = [{transform_indices = @transform_0, window_bounds = array<i64: 32, 512>}, {transform_indices = @transform_1, window_bounds = array<i64: 512, 256>}, {transform_indices = @transform_2, window_bounds = array<i64: 1, 256>}, {transform_indices = @transform_3, window_bounds = array<i64: 32, 256>}, {transform_indices = @transform_4, window_bounds = array<i64: 32, 256>}]} {
    %c0_i32 = arith.constant 0 : i32
    %0 = arith.cmpi eq, %arg2, %c0_i32 : i32
    %1 = arith.extui %0 : i1 to i32
    %c0_i32_0 = arith.constant 0 : i32
    %2 = arith.cmpi ne, %1, %c0_i32_0 : i32
    scf.if %2 {
      %cst_9 = arith.constant 0.000000e+00 : f32
      %12 = vector.broadcast %cst_9 : f32 to vector<32x256xf32>
      %c0_10 = arith.constant 0 : index
      %c0_11 = arith.constant 0 : index
      %13 = vector.load %arg8[%c0_10, %c0_11] : memref<32x256xf32, #tpu.memory_space<vmem>>, vector<32x256xf32>
      tpu.vector_store %arg8[%c0_10, %c0_11], %12 {strides = array<i32>} : memref<32x256xf32, #tpu.memory_space<vmem>>, vector<32x256xf32>,
    } else {
    }
    %c0 = arith.constant 0 : index
    %c0_1 = arith.constant 0 : index
    %3 = vector.load %arg8[%c0, %c0_1] : memref<32x256xf32, #tpu.memory_space<vmem>>, vector<32x256xf32>
    %c0_2 = arith.constant 0 : index
    %c0_3 = arith.constant 0 : index
    %4 = vector.load %arg3[%c0_2, %c0_3] : memref<32x512xf32, #tpu.memory_space<vmem>>, vector<32x512xf32>
    %c0_4 = arith.constant 0 : index
    %c0_5 = arith.constant 0 : index
    %5 = vector.load %arg4[%c0_4, %c0_5] : memref<512x256xf32, #tpu.memory_space<vmem>>, vector<512x256xf32>
    %cst = arith.constant dense<0.000000e+00> : vector<32x256xf32>
    %6 = tpu.matmul %4, %5, %cst {dimension_numbers = #tpu.dot_dimension_numbers<[1], [0], [0], [1], [0, 0, 1, 1], [], []>} : vector<32x512xf32>, vector<512x256xf32>, vector<32x256xf32> -> vector<32x256xf32>
    %7 = arith.addf %3, %6 : vector<32x256xf32>
    %c0_6 = arith.constant 0 : index
    %c0_7 = arith.constant 0 : index
    %8 = vector.load %arg8[%c0_6, %c0_7] : memref<32x256xf32, #tpu.memory_space<vmem>>, vector<32x256xf32>
    tpu.vector_store %arg8[%c0_6, %c0_7], %7 {strides = array<i32>} : memref<32x256xf32, #tpu.memory_space<vmem>>, vector<32x256xf32>,
    %c3_i32 = arith.constant 3 : i32
    %9 = arith.cmpi eq, %arg2, %c3_i32 : i32
    %10 = arith.extui %9 : i1 to i32
    %c0_i32_8 = arith.constant 0 : i32
    %11 = arith.cmpi ne, %10, %c0_i32_8 : i32
    scf.if %11 {
      %c0_9 = arith.constant 0 : index
      %c0_10 = arith.constant 0 : index
      %12 = vector.load %arg8[%c0_9, %c0_10] : memref<32x256xf32, #tpu.memory_space<vmem>>, vector<32x256xf32>
      %c0_11 = arith.constant 0 : index
      %c0_12 = arith.constant 0 : index
      %13 = vector.load %arg5[%c0_11, %c0_12] : memref<1x256xf32, #tpu.memory_space<vmem>>, vector<1x256xf32>
      %14 = vector.broadcast %13 : vector<1x256xf32> to vector<32x256xf32>
      %15 = arith.addf %12, %14 : vector<32x256xf32>
      %c0_13 = arith.constant 0 : index
      %c0_14 = arith.constant 0 : index
      %16 = vector.load %arg6[%c0_13, %c0_14] : memref<32x256xf32, #tpu.memory_space<vmem>>, vector<32x256xf32>
      %17 = arith.addf %15, %16 : vector<32x256xf32>
      %c0_15 = arith.constant 0 : index
      %c0_16 = arith.constant 0 : index
      %18 = vector.load %arg7[%c0_15, %c0_16] : memref<32x256xf32, #tpu.memory_space<vmem>>, vector<32x256xf32>
      tpu.vector_store %arg7[%c0_15, %c0_16], %17 {strides = array<i32>} : memref<32x256xf32, #tpu.memory_space<vmem>>, vector<32x256xf32>,
    } else {
    }
    return
  }
  func.func @transform_0(%arg0: i32, %arg1: i32, %arg2: i32) -> (i32, i32) {
    %c0_i32 = arith.constant 0 : i32
    return %arg0, %arg2 : i32, i32
  }
  func.func @transform_1(%arg0: i32, %arg1: i32, %arg2: i32) -> (i32, i32) {
    %c0_i32 = arith.constant 0 : i32
    return %arg2, %arg1 : i32, i32
  }
  func.func @transform_2(%arg0: i32, %arg1: i32, %arg2: i32) -> (i32, i32) {
    %c0_i32 = arith.constant 0 : i32
    %c0_i32_0 = arith.constant 0 : i32
    return %c0_i32, %arg1 : i32, i32
  }
  func.func @transform_3(%arg0: i32, %arg1: i32, %arg2: i32) -> (i32, i32) {
    %c0_i32 = arith.constant 0 : i32
    return %arg0, %arg1 : i32, i32
  }
  func.func @transform_4(%arg0: i32, %arg1: i32, %arg2: i32) -> (i32, i32) {
    %c0_i32 = arith.constant 0 : i32
    return %arg0, %arg1 : i32, i32
  }
}

</mosaic_0001>

<bundles_post_ra>
// kernel: decoder_layer.11
= control target key start
LH: loop header
LB: loop body
LE: loop exit
PB: predicated region body
PF: predicated region fallthrough
CT: control target
= control target key end

     0   :  { %9 = vsyncpa [#allocation4], 0  ;;  %s534_s0 = inlined_call_operand.vmem [shape: f32[32,256], index: 0, kind: input, shape index: {}]   ;;  %s535_s1 = inlined_call_operand.hbm [shape: f32[256,256], index: 1, kind: input, shape index: {}]   ;;  %s536_s2 = inlined_call_operand.hbm [shape: f32[1,256], index: 2, kind: input, shape index: {}]   ;;  %s537_s3 = inlined_call_operand.hbm [shape: f32[32,256], index: 3, kind: input, shape index: {}]   ;;  %s538_s4 = inlined_call_operand.vmem [shape: f32[32,256], index: 4, kind: output, shape index: {}]  }
   0x1   :  { %10 = vsyncpa [#allocation6], 0  ;;  %s447_s15 = smov [#allocation5]   ;;  %s448_s17 = smov [#allocation3]  }
   0x2   :  { %s31_s16 = sshll.u32 %s447_s15, 4  ;;  %s18_s18 = sshll.u32 %s448_s17, 4  ;;  %s32_s16 = int_to_ptr.vmem [resolvable:$true] %s31_s16  ;;  %s19_s18 = int_to_ptr.vmem [resolvable:$true] %s18_s18 }
   0x3   :  { %s391_s19 = scalar_lea.vmem %s32_s16, 32  ;;  %p396_p1 = scmp.lt.s32.totalorder %s32_s16, %s32_s16 }
   0x4   :  { %p392_p0 = scmp.ne.s32.totalorder %s32_s16, %s391_s19  ;;  %p397_p2 = scmp.lt.s32.totalorder %s391_s19, %s391_s19 }
   0x6   :  { %p398_p3 = por %p397_p2, %p396_p1 }
   0x8   :  { %p399_p4 = pnand %p398_p3, %p392_p0 }
   0xa   :  { %402 = shalt.err (!%p399_p4)
}
   0xb   :  { %34 = dma.hbm_to_vmem [thread:$0]  %s536_s2, 32, %s32_s16, [#allocation6]  }
   0xc   :  { %s411_s22 = scalar_lea.vmem %s19_s18, 8192  ;;  %p416_p6 = scmp.lt.s32.totalorder %s19_s18, %s19_s18 }
   0xd   :  { %p412_p5 = scmp.ne.s32.totalorder %s19_s18, %s411_s22  ;;  %p417_p7 = scmp.lt.s32.totalorder %s411_s22, %s411_s22 }
   0xf   :  { %p418_p8 = por %p417_p7, %p416_p6 }
  0x11   :  { %p419_p9 = pnand %p418_p8, %p412_p5 }
  0x13   :  { %422 = shalt.err (!%p419_p9)
}
  0x14   :  { %s449_s23 = smov 256   ;;  %s450_s24 = smov 16  }
  0x15   :  { %24 = dma.hbm_to_vmem [thread:$0]  %s535_s1, 8192, %s19_s18, [#allocation4], %s449_s23, %s449_s23, %s450_s24  }
  0x16   :  { %s451_s27 = smov [#allocation7]  }
  0x17   :  { %s40_s28 = sshll.u32 %s451_s27, 4  ;;  %s41_s28 = int_to_ptr.vmem [resolvable:$true] %s40_s28 }
  0x18   :  { %s431_s29 = scalar_lea.vmem %s41_s28, 1024  ;;  %p436_p11 = scmp.lt.s32.totalorder %s41_s28, %s41_s28 }
  0x19   :  { %p432_p10 = scmp.ne.s32.totalorder %s41_s28, %s431_s29  ;;  %p437_p12 = scmp.lt.s32.totalorder %s431_s29, %s431_s29 }
  0x1b   :  { %p438_p13 = por %p437_p12, %p436_p11 }
  0x1d   :  { %p439_p0 = pnand %p438_p13, %p432_p10 }
  0x1f   :  { %442 = shalt.err (!%p439_p0)
}
  0x20   :  { %46 = dma.hbm_to_vmem [thread:$0]  %s537_s3, 1024, %s41_s28, [#allocation6], %s449_s23, %s449_s23, %s450_s24  }
  0x21   :  { %443 = dma.done.wait [#allocation4], 8192  }
  0x22   :  { %444 = vsyncadd [#allocation4], 4294959104 }
  0x23   :  { %445 = dma.done.wait [#allocation6], 1056  }
  0x24   :  { %446 = vsyncadd [#allocation6], 4294966240  ;;  %v115_v0 = vld [vmem:[#allocation3 + $0xf8] sm:$0xff]  ;;  %v114_v1 = vld [vmem:[#allocation3 + $0xf0] sm:$0xff] }
  0x25   :  { %v113_v2 = vld [vmem:[#allocation3 + $0xe8] sm:$0xff]  ;;  %148 = vmatprep.subr.mxu0 %v115_v0  ;;  %314 = vmatprep.subr.mxu1 %v115_v0  ;;  %v112_v3 = vld [vmem:[#allocation3 + $0xe0] sm:$0xff]  ;;  %v111_v4 = vld [vmem:[#allocation3 + $0xd8] sm:$0xff] }
  0x26   :  { %149 = vmatpush1.msra.mxu0 %v114_v1  ;;  %346 = vmatpush1.msra.mxu1 %v114_v1  ;;  %v110_v5 = vld [vmem:[#allocation3 + $0xd0] sm:$0xff]  ;;  %v109_v6 = vld [vmem:[#allocation3 + $0xc8] sm:$0xff]  ;;  %v108_v7 = vld [vmem:[#allocation3 + $0xc0] sm:$0xff] }
  0x27   :  { %150 = vmatprep.subr.mxu0 %v113_v2  ;;  %315 = vmatprep.subr.mxu1 %v113_v2  ;;  %v107_v8 = vld [vmem:[#allocation3 + $0xb8] sm:$0xff]  ;;  %v106_v9 = vld [vmem:[#allocation3 + $0xb0] sm:$0xff]  ;;  %v105_v10 = vld [vmem:[#allocation3 + $0xa8] sm:$0xff] }
  0x28   :  { %151 = vmatpush1.msra.mxu0 %v112_v3  ;;  %347 = vmatpush1.msra.mxu1 %v112_v3  ;;  %v104_v11 = vld [vmem:[#allocation3 + $0xa0] sm:$0xff]  ;;  %v103_v12 = vld [vmem:[#allocation3 + $0x98] sm:$0xff]  ;;  %v102_v13 = vld [vmem:[#allocation3 + $0x90] sm:$0xff] }
  0x29   :  { %152 = vmatprep.subr.mxu0 %v111_v4  ;;  %316 = vmatprep.subr.mxu1 %v111_v4  ;;  %v101_v14 = vld [vmem:[#allocation3 + $0x88] sm:$0xff]  ;;  %v100_v15 = vld [vmem:[#allocation3 + $0x80] sm:$0xff]  ;;  %v99_v16 = vld [vmem:[#allocation3 + $0x78] sm:$0xff] }
  0x2a   :  { %153 = vmatpush1.msra.mxu0 %v110_v5  ;;  %348 = vmatpush1.msra.mxu1 %v110_v5  ;;  %v98_v17 = vld [vmem:[#allocation3 + $0x70] sm:$0xff]  ;;  %v97_v18 = vld [vmem:[#allocation3 + $0x68] sm:$0xff]  ;;  %v96_v19 = vld [vmem:[#allocation3 + $0x60] sm:$0xff] }
  0x2b   :  { %154 = vmatprep.subr.mxu0 %v109_v6  ;;  %317 = vmatprep.subr.mxu1 %v109_v6  ;;  %v95_v20 = vld [vmem:[#allocation3 + $0x58] sm:$0xff]  ;;  %v94_v21 = vld [vmem:[#allocation3 + $0x50] sm:$0xff]  ;;  %v93_v22 = vld [vmem:[#allocation3 + $0x48] sm:$0xff] }
  0x2c   :  { %155 = vmatpush1.msra.mxu0 %v108_v7  ;;  %349 = vmatpush1.msra.mxu1 %v108_v7  ;;  %v92_v23 = vld [vmem:[#allocation3 + $0x40] sm:$0xff]  ;;  %v91_v24 = vld [vmem:[#allocation3 + $0x38] sm:$0xff]  ;;  %v90_v25 = vld [vmem:[#allocation3 + $0x30] sm:$0xff] }
  0x2d   :  { %156 = vmatprep.subr.mxu0 %v107_v8  ;;  %318 = vmatprep.subr.mxu1 %v107_v8  ;;  %v89_v26 = vld [vmem:[#allocation3 + $0x28] sm:$0xff]  ;;  %v88_v27 = vld [vmem:[#allocation3 + $0x20] sm:$0xff]  ;;  %v87_v28 = vld [vmem:[#allocation3 + $0x18] sm:$0xff]  ;;  %v266_v8 = vlaneseq }
  0x2e   :  { %157 = vmatpush1.msra.mxu0 %v106_v9  ;;  %350 = vmatpush1.msra.mxu1 %v106_v9  ;;  %v86_v29 = vld [vmem:[#allocation3 + $0x10] sm:$0xff]  ;;  %v85_v30 = vld [vmem:[#allocation3 + $0x8] sm:$0xff]  ;;  %v84_v31 = vld [vmem:[#allocation3] sm:$0xff] }
  0x2f   :  { %158 = vmatprep.subr.mxu0 %v105_v10  ;;  %319 = vmatprep.subr.mxu1 %v105_v10  ;;  %v147_v32 = vld [vmem:[#allocation3 + $0x1f8] sm:$0xff]  ;;  %v146_v33 = vld [vmem:[#allocation3 + $0x1f0] sm:$0xff]  ;;  %v145_v34 = vld [vmem:[#allocation3 + $0x1e8] sm:$0xff]  ;;  %v267_v9 = vshrl.u32 %v266_v8, 7 }
  0x30   :  { %159 = vmatpush1.msra.mxu0 %v104_v11  ;;  %351 = vmatpush1.msra.mxu1 %v104_v11  ;;  %v144_v35 = vld [vmem:[#allocation3 + $0x1e0] sm:$0xff]  ;;  %v143_v36 = vld [vmem:[#allocation3 + $0x1d8] sm:$0xff]  ;;  %v142_v37 = vld [vmem:[#allocation3 + $0x1d0] sm:$0xff] }
  0x31   :  { %160 = vmatprep.subr.mxu0 %v103_v12  ;;  %320 = vmatprep.subr.mxu1 %v103_v12  ;;  %v141_v38 = vld [vmem:[#allocation3 + $0x1c8] sm:$0xff]  ;;  %v140_v39 = vld [vmem:[#allocation3 + $0x1c0] sm:$0xff]  ;;  %v139_v40 = vld [vmem:[#allocation3 + $0x1b8] sm:$0xff]  ;;  %v268_v10 = vsub.s32 0, %v267_v9  ;;  %v272_v12 = vsub.s32 1, %v267_v9 }
  0x32   :  { %161 = vmatpush1.msra.mxu0 %v102_v13  ;;  %352 = vmatpush1.msra.mxu1 %v102_v13  ;;  %v138_v41 = vld [vmem:[#allocation3 + $0x1b0] sm:$0xff]  ;;  %v137_v42 = vld [vmem:[#allocation3 + $0x1a8] sm:$0xff]  ;;  %v136_v43 = vld [vmem:[#allocation3 + $0x1a0] sm:$0xff] }
  0x33   :  { %162 = vmatprep.subr.mxu0 %v101_v14  ;;  %321 = vmatprep.subr.mxu1 %v101_v14  ;;  %v135_v44 = vld [vmem:[#allocation3 + $0x198] sm:$0xff]  ;;  %v134_v45 = vld [vmem:[#allocation3 + $0x190] sm:$0xff]  ;;  %v133_v46 = vld [vmem:[#allocation3 + $0x188] sm:$0xff] }
  0x34   :  { %163 = vmatpush1.msra.mxu0 %v100_v15  ;;  %353 = vmatpush1.msra.mxu1 %v100_v15  ;;  %v132_v47 = vld [vmem:[#allocation3 + $0x180] sm:$0xff]  ;;  %v131_v48 = vld [vmem:[#allocation3 + $0x178] sm:$0xff]  ;;  %v130_v49 = vld [vmem:[#allocation3 + $0x170] sm:$0xff] }
  0x35   :  { %164 = vmatprep.subr.mxu0 %v99_v16  ;;  %322 = vmatprep.subr.mxu1 %v99_v16  ;;  %v129_v50 = vld [vmem:[#allocation3 + $0x168] sm:$0xff]  ;;  %v128_v51 = vld [vmem:[#allocation3 + $0x160] sm:$0xff]  ;;  %v127_v52 = vld [vmem:[#allocation3 + $0x158] sm:$0xff] }
  0x36   :  { %165 = vmatpush1.msra.mxu0 %v98_v17  ;;  %354 = vmatpush1.msra.mxu1 %v98_v17  ;;  %v126_v53 = vld [vmem:[#allocation3 + $0x150] sm:$0xff]  ;;  %v125_v54 = vld [vmem:[#allocation3 + $0x148] sm:$0xff]  ;;  %v124_v55 = vld [vmem:[#allocation3 + $0x140] sm:$0xff] }
  0x37   :  { %166 = vmatprep.subr.mxu0 %v97_v18  ;;  %323 = vmatprep.subr.mxu1 %v97_v18  ;;  %v123_v56 = vld [vmem:[#allocation3 + $0x138] sm:$0xff]  ;;  %v122_v57 = vld [vmem:[#allocation3 + $0x130] sm:$0xff]  ;;  %v121_v58 = vld [vmem:[#allocation3 + $0x128] sm:$0xff] }
  0x38   :  { %167 = vmatpush1.msra.mxu0 %v96_v19  ;;  %355 = vmatpush1.msra.mxu1 %v96_v19  ;;  %v120_v59 = vld [vmem:[#allocation3 + $0x120] sm:$0xff]  ;;  %v119_v60 = vld [vmem:[#allocation3 + $0x118] sm:$0xff]  ;;  %v118_v61 = vld [vmem:[#allocation3 + $0x110] sm:$0xff] }
  0x39   :  { %168 = vmatprep.subr.mxu0 %v95_v20  ;;  %324 = vmatprep.subr.mxu1 %v95_v20  ;;  %v117_v62 = vld [vmem:[#allocation3 + $0x108] sm:$0xff]  ;;  %v116_v63 = vld [vmem:[#allocation3 + $0x100] sm:$0xff]  ;;  %v79_v4 = vld [vmem:[%s534_s0 + $0x18] sm:$0xff] }
  0x3a   :  { %169 = vmatpush1.msra.mxu0 %v94_v21  ;;  %356 = vmatpush1.msra.mxu1 %v94_v21  ;;  %v77_v0 = vld [vmem:[%s534_s0 + $0x8] sm:$0xff]  ;;  %v76_v2 = vld [vmem:[%s534_s0] sm:$0xff]  ;;  %v83_v5 = vld [vmem:[%s534_s0 + $0x38] sm:$0xff] }
  0x3b   :  { %170 = vmatprep.subr.mxu0 %v93_v22  ;;  %325 = vmatprep.subr.mxu1 %v93_v22  ;;  %v81_v1 = vld [vmem:[%s534_s0 + $0x28] sm:$0xff]  ;;  %v80_v3 = vld [vmem:[%s534_s0 + $0x20] sm:$0xff]  ;;  %v78_v6 = vld [vmem:[%s534_s0 + $0x10] sm:$0xff] }
  0x3c   :  { %171 = vmatpush1.msra.mxu0 %v92_v23  ;;  %357 = vmatpush1.msra.mxu1 %v92_v23  ;;  %v82_v7 = vld [vmem:[%s534_s0 + $0x30] sm:$0xff]  ;;  %v264_v11 = vld [vmem:[#allocation5] sm:$0x3]  ;;  %v284_v16 = vld [vmem:[#allocation7] sm:$0xff] }
  0x3d   :  { %172 = vmatprep.subr.mxu0 %v91_v24  ;;  %326 = vmatprep.subr.mxu1 %v91_v24  ;;  %v269_v13 = vrot.slane %v264_v11, %v268_v10  ;;  %v273_v14 = vrot.slane %v264_v11, %v272_v12  ;;  %v288_v18 = vld [vmem:[#allocation7 + $0x20] sm:$0xff]  ;;  %v285_v22 = vld [vmem:[#allocation7 + $0x8] sm:$0xff] }
  0x3e   :  { %173 = vmatpush1.msra.mxu0 %v90_v25  ;;  %358 = vmatpush1.msra.mxu1 %v90_v25  ;;  %v289_v24 = vld [vmem:[#allocation7 + $0x28] sm:$0xff] }
  0x3f   :  { %174 = vmatprep.subr.mxu0 %v89_v26  ;;  %327 = vmatprep.subr.mxu1 %v89_v26 }
  0x40   :  { %175 = vmatpush1.msra.mxu0 %v88_v27  ;;  %359 = vmatpush1.msra.mxu1 %v88_v27 }
  0x41   :  { %176 = vmatprep.subr.mxu0 %v87_v28  ;;  %328 = vmatprep.subr.mxu1 %v87_v28 }
  0x42   :  { %177 = vmatpush1.msra.mxu0 %v86_v29  ;;  %360 = vmatpush1.msra.mxu1 %v86_v29 }
  0x43   :  { %178 = vmatprep.subr.mxu0 %v85_v30  ;;  %329 = vmatprep.subr.mxu1 %v85_v30  ;;  %v286_v30 = vld [vmem:[#allocation7 + $0x10] sm:$0xff] }
  0x44   :  { %179 = vmatpush1.msra.mxu0 %v84_v31  ;;  %361 = vmatpush1.msra.mxu1 %v84_v31 }
  0x45   :  { %180 = vmatprep.subr.mxu0 %v147_v32  ;;  %330 = vmatprep.subr.mxu1 %v147_v32  ;;  %v290_v32 = vld [vmem:[#allocation7 + $0x30] sm:$0xff] }
  0x46   :  { %181 = vmatpush2.msra.mxu0 %v146_v33  ;;  %362 = vmatpush2.msra.mxu1 %v146_v33 }
  0x47   :  { %182 = vmatprep.subr.mxu0 %v145_v34  ;;  %331 = vmatprep.subr.mxu1 %v145_v34 }
  0x48   :  { %183 = vmatpush2.msra.mxu0 %v144_v35  ;;  %363 = vmatpush2.msra.mxu1 %v144_v35 }
  0x49   :  { %184 = vmatprep.subr.mxu0 %v143_v36  ;;  %332 = vmatprep.subr.mxu1 %v143_v36 }
  0x4a   :  { %185 = vmatpush2.msra.mxu0 %v142_v37  ;;  %364 = vmatpush2.msra.mxu1 %v142_v37 }
  0x4b   :  { %186 = vmatprep.subr.mxu0 %v141_v38  ;;  %333 = vmatprep.subr.mxu1 %v141_v38  ;;  %v287_v38 = vld [vmem:[#allocation7 + $0x18] sm:$0xff] }
  0x4c   :  { %187 = vmatpush2.msra.mxu0 %v140_v39  ;;  %365 = vmatpush2.msra.mxu1 %v140_v39 }
  0x4d   :  { %188 = vmatprep.subr.mxu0 %v139_v40  ;;  %334 = vmatprep.subr.mxu1 %v139_v40  ;;  %v291_v40 = vld [vmem:[#allocation7 + $0x38] sm:$0xff] }
  0x4e   :  { %189 = vmatpush2.msra.mxu0 %v138_v41  ;;  %366 = vmatpush2.msra.mxu1 %v138_v41 }
  0x4f   :  { %190 = vmatprep.subr.mxu0 %v137_v42  ;;  %335 = vmatprep.subr.mxu1 %v137_v42 }
  0x50   :  { %191 = vmatpush2.msra.mxu0 %v136_v43  ;;  %367 = vmatpush2.msra.mxu1 %v136_v43 }
  0x51   :  { %192 = vmatprep.subr.mxu0 %v135_v44  ;;  %336 = vmatprep.subr.mxu1 %v135_v44 }
  0x52   :  { %193 = vmatpush2.msra.mxu0 %v134_v45  ;;  %368 = vmatpush2.msra.mxu1 %v134_v45 }
  0x53   :  { %194 = vmatprep.subr.mxu0 %v133_v46  ;;  %337 = vmatprep.subr.mxu1 %v133_v46 }
  0x54   :  { %195 = vmatpush2.msra.mxu0 %v132_v47  ;;  %369 = vmatpush2.msra.mxu1 %v132_v47 }
  0x55   :  { %196 = vmatprep.subr.mxu0 %v131_v48  ;;  %338 = vmatprep.subr.mxu1 %v131_v48 }
  0x56   :  { %197 = vmatpush2.msra.mxu0 %v130_v49  ;;  %370 = vmatpush2.msra.mxu1 %v130_v49 }
  0x57   :  { %198 = vmatprep.subr.mxu0 %v129_v50  ;;  %339 = vmatprep.subr.mxu1 %v129_v50 }
  0x58   :  { %199 = vmatpush2.msra.mxu0 %v128_v51  ;;  %371 = vmatpush2.msra.mxu1 %v128_v51 }
  0x59   :  { %200 = vmatprep.subr.mxu0 %v127_v52  ;;  %340 = vmatprep.subr.mxu1 %v127_v52 }
  0x5a   :  { %201 = vmatpush2.msra.mxu0 %v126_v53  ;;  %372 = vmatpush2.msra.mxu1 %v126_v53 }
  0x5b   :  { %202 = vmatprep.subr.mxu0 %v125_v54  ;;  %341 = vmatprep.subr.mxu1 %v125_v54 }
  0x5c   :  { %203 = vmatpush2.msra.mxu0 %v124_v55  ;;  %373 = vmatpush2.msra.mxu1 %v124_v55 }
  0x5d   :  { %204 = vmatprep.subr.mxu0 %v123_v56  ;;  %342 = vmatprep.subr.mxu1 %v123_v56 }
  0x5e   :  { %205 = vmatpush2.msra.mxu0 %v122_v57  ;;  %374 = vmatpush2.msra.mxu1 %v122_v57 }
  0x5f   :  { %206 = vmatprep.subr.mxu0 %v121_v58  ;;  %343 = vmatprep.subr.mxu1 %v121_v58 }
  0x60   :  { %207 = vmatpush2.msra.mxu0 %v120_v59  ;;  %375 = vmatpush2.msra.mxu1 %v120_v59 }
  0x61   :  { %208 = vmatprep.subr.mxu0 %v119_v60  ;;  %344 = vmatprep.subr.mxu1 %v119_v60 }
  0x62   :  { %209 = vmatpush2.msra.mxu0 %v118_v61  ;;  %376 = vmatpush2.msra.mxu1 %v118_v61 }
  0x63   :  { %210 = vmatprep.subr.mxu0 %v117_v62  ;;  %345 = vmatprep.subr.mxu1 %v117_v62 }
  0x64   :  { %211 = vmatpush2.msra.mxu0 %v116_v63  ;;  %377 = vmatpush2.msra.mxu1 %v116_v63 }
  0x65   :  { %212 = vmatprep.mubr.f32.mxu0 %v77_v0  ;;  %224 = vmatprep.mubr.f32.mxu1 %v81_v1 }
  0x66   :  { %213 = vmatmul.mubr.f32.vlgmr.msra.gmra.mxu0 %v76_v2  ;;  %225 = vmatmul.mubr.f32.vlgmr.msra.gmra.mxu1 %v80_v3 }
  0x67   :  { %218 = vmatprep.mubr.f32.mxu0 %v79_v4  ;;  %230 = vmatprep.mubr.f32.mxu1 %v83_v5 }
  0x6a   :  { %219 = vmatmul.mubr.f32.gmra.mxu0 %v78_v6  ;;  %231 = vmatmul.mubr.f32.gmra.mxu1 %v82_v7 }
 0x126   :  { %v214_v15 = vpop.f32.mrf.mxu0  ;;  %v226_v17 = vpop.f32.mrf.mxu1 }
 0x127   :  { %v276_v19 = vadd.f32 %v269_v13, %v214_v15  ;;  %v280_v20 = vadd.f32 %v269_v13, %v226_v17 }
 0x128   :  { %v216_v21 = vpop.f32.mrf.mxu0  ;;  %v228_v23 = vpop.f32.mrf.mxu1 }
 0x129   :  { %v292_v25 = vadd.f32 %v284_v16, %v276_v19  ;;  %v296_v26 = vadd.f32 %v288_v18, %v280_v20  ;;  %v277_v27 = vadd.f32 %v273_v14, %v216_v21  ;;  %v281_v28 = vadd.f32 %v273_v14, %v228_v23 }
 0x12a   :  { %v220_v29 = vpop.f32.mrf.mxu0  ;;  %v232_v31 = vpop.f32.mrf.mxu1 }
 0x12b   :  { %300 = vst [vmem:[%s538_s4] sm:$0xff] %v292_v25  ;;  %304 = vst [vmem:[%s538_s4 + $0x20] sm:$0xff] %v296_v26  ;;  %v293_v33 = vadd.f32 %v285_v22, %v277_v27  ;;  %v297_v34 = vadd.f32 %v289_v24, %v281_v28  ;;  %v278_v35 = vadd.f32 %v269_v13, %v220_v29 }
 0x12c   :  { %v282_v36 = vadd.f32 %v269_v13, %v232_v31  ;;  %v222_v37 = vpop.f32.mrf.mxu0  ;;  %v234_v39 = vpop.f32.mrf.mxu1 }
 0x12d   :  { %301 = vst [vmem:[%s538_s4 + $0x8] sm:$0xff] %v293_v33  ;;  %305 = vst [vmem:[%s538_s4 + $0x28] sm:$0xff] %v297_v34  ;;  %v294_v41 = vadd.f32 %v286_v30, %v278_v35  ;;  %v279_v43 = vadd.f32 %v273_v14, %v222_v37  ;;  %v283_v44 = vadd.f32 %v273_v14, %v234_v39 }
 0x12e   :  { %v298_v42 = vadd.f32 %v290_v32, %v282_v36 }
 0x12f   :  { %302 = vst [vmem:[%s538_s4 + $0x10] sm:$0xff] %v294_v41  ;;  %v295_v45 = vadd.f32 %v287_v38, %v279_v43  ;;  %v299_v46 = vadd.f32 %v291_v40, %v283_v44 }
 0x130   :  { %306 = vst [vmem:[%s538_s4 + $0x30] sm:$0xff] %v298_v42 }
 0x131   :  { %303 = vst [vmem:[%s538_s4 + $0x18] sm:$0xff] %v295_v45  ;;  %307 = vst [vmem:[%s538_s4 + $0x38] sm:$0xff] %v299_v46 }
 0x132   :  { %312 = vsyncpa [#allocation4], 1 }
 0x133   :  { %313 = vsyncpa [#allocation6], 1 }

// kernel: decoder_layer.13
= control target key start
LH: loop header
LB: loop body
LE: loop exit
PB: predicated region body
PF: predicated region fallthrough
CT: control target
= control target key end

     0   :  { %8 = vsyncpa [#allocation4], 0  ;;  %s669_s0 = inlined_call_operand.hbm [shape: f32[32,256], index: 0, kind: input, shape index: {}]   ;;  %s670_s1 = inlined_call_operand.hbm [shape: f32[256,512], index: 1, kind: input, shape index: {}]   ;;  %s671_s2 = inlined_call_operand.hbm [shape: f32[1,512], index: 2, kind: input, shape index: {}]   ;;  %s672_s3 = inlined_call_operand.vmem [shape: f32[32,512], index: 3, kind: output, shape index: {}]  }
   0x1   :  { %9 = vsyncpa [#allocation6], 0  ;;  %s585_s12 = smov [#allocation5]  }
   0x2   :  { %s27_s13 = sshll.u32 %s585_s12, 4  ;;  %s28_s13 = int_to_ptr.vmem [resolvable:$true] %s27_s13 }
   0x3   :  { %s529_s14 = scalar_lea.vmem %s28_s13, 16384  ;;  %p534_p1 = scmp.lt.s32.totalorder %s28_s13, %s28_s13 }
   0x4   :  { %p530_p0 = scmp.ne.s32.totalorder %s28_s13, %s529_s14  ;;  %p535_p2 = scmp.lt.s32.totalorder %s529_s14, %s529_s14 }
   0x6   :  { %p536_p3 = por %p535_p2, %p534_p1 }
   0x8   :  { %p537_p4 = pnand %p536_p3, %p530_p0 }
   0xa   :  { %540 = shalt.err (!%p537_p4)
}
   0xb   :  { %s586_s15 = smov 512   ;;  %s587_s16 = smov 32  }
   0xc   :  { %33 = dma.hbm_to_vmem [thread:$0]  %s670_s1, 16384, %s28_s13, [#allocation6], %s586_s15, %s586_s15, %s587_s16  }
   0xd   :  { %s588_s19 = smov [#allocation3]  }
   0xe   :  { %s15_s20 = sshll.u32 %s588_s19, 4  ;;  %s16_s20 = int_to_ptr.vmem [resolvable:$true] %s15_s20 }
   0xf   :  { %s549_s21 = scalar_lea.vmem %s16_s20, 1024  ;;  %p554_p6 = scmp.lt.s32.totalorder %s16_s20, %s16_s20 }
  0x10   :  { %p550_p5 = scmp.ne.s32.totalorder %s16_s20, %s549_s21  ;;  %p555_p7 = scmp.lt.s32.totalorder %s549_s21, %s549_s21 }
  0x12   :  { %p556_p8 = por %p555_p7, %p554_p6 }
  0x14   :  { %p557_p9 = pnand %p556_p8, %p550_p5 }
  0x16   :  { %560 = shalt.err (!%p557_p9)
}
  0x17   :  { %s589_s22 = smov 256   ;;  %s590_s23 = smov 16  }
  0x18   :  { %21 = dma.hbm_to_vmem [thread:$0]  %s669_s0, 1024, %s16_s20, [#allocation4], %s589_s22, %s589_s22, %s590_s23  }
  0x19   :  { %s591_s26 = smov [#allocation7]  }
  0x1a   :  { %s40_s27 = sshll.u32 %s591_s26, 4  ;;  %s41_s27 = int_to_ptr.vmem [resolvable:$true] %s40_s27 }
  0x1b   :  { %s569_s1 = scalar_lea.vmem %s41_s27, 64  ;;  %p574_p11 = scmp.lt.s32.totalorder %s41_s27, %s41_s27 }
  0x1c   :  { %p570_p10 = scmp.ne.s32.totalorder %s41_s27, %s569_s1  ;;  %p575_p12 = scmp.lt.s32.totalorder %s569_s1, %s569_s1 }
  0x1e   :  { %p576_p13 = por %p575_p12, %p574_p11 }
  0x20   :  { %p577_p0 = pnand %p576_p13, %p570_p10 }
  0x22   :  { %580 = shalt.err (!%p577_p0)
}
  0x23   :  { %43 = dma.hbm_to_vmem [thread:$0]  %s671_s2, 64, %s41_s27, [#allocation6]  }
  0x24   :  { %581 = dma.done.wait [#allocation4], 1024  }
  0x25   :  { %582 = vsyncadd [#allocation4], 4294966272 }
  0x26   :  { %583 = dma.done.wait [#allocation6], 16448  }
  0x27   :  { %584 = vsyncadd [#allocation6], 4294950848  ;;  %v158_v0 = vld [vmem:[#allocation5 + $0x1e8] sm:$0xff]  ;;  %v160_v1 = vld [vmem:[#allocation5 + $0x1f8] sm:$0xff] }
  0x28   :  { %v157_v2 = vld [vmem:[#allocation5 + $0x1e0] sm:$0xff]  ;;  %225 = vmatprep.subr.mxu0 %v158_v0  ;;  %314 = vmatprep.subr.mxu1 %v160_v1  ;;  %v159_v3 = vld [vmem:[#allocation5 + $0x1f0] sm:$0xff]  ;;  %v154_v4 = vld [vmem:[#allocation5 + $0x1c8] sm:$0xff] }
  0x29   :  { %v156_v5 = vld [vmem:[#allocation5 + $0x1d8] sm:$0xff]  ;;  %226 = vmatpush1.msra.mxu0 %v157_v2  ;;  %315 = vmatpush1.msra.mxu1 %v159_v3  ;;  %v153_v6 = vld [vmem:[#allocation5 + $0x1c0] sm:$0xff]  ;;  %v155_v7 = vld [vmem:[#allocation5 + $0x1d0] sm:$0xff] }
  0x2a   :  { %v150_v8 = vld [vmem:[#allocation5 + $0x1a8] sm:$0xff]  ;;  %227 = vmatprep.subr.mxu0 %v154_v4  ;;  %316 = vmatprep.subr.mxu1 %v156_v5  ;;  %v152_v9 = vld [vmem:[#allocation5 + $0x1b8] sm:$0xff]  ;;  %v149_v10 = vld [vmem:[#allocation5 + $0x1a0] sm:$0xff] }
  0x2b   :  { %v151_v11 = vld [vmem:[#allocation5 + $0x1b0] sm:$0xff]  ;;  %228 = vmatpush1.msra.mxu0 %v153_v6  ;;  %317 = vmatpush1.msra.mxu1 %v155_v7  ;;  %v146_v12 = vld [vmem:[#allocation5 + $0x188] sm:$0xff]  ;;  %v148_v13 = vld [vmem:[#allocation5 + $0x198] sm:$0xff] }
  0x2c   :  { %229 = vmatprep.subr.mxu0 %v150_v8  ;;  %318 = vmatprep.subr.mxu1 %v152_v9  ;;  %v145_v14 = vld [vmem:[#allocation5 + $0x180] sm:$0xff]  ;;  %v147_v15 = vld [vmem:[#allocation5 + $0x190] sm:$0xff]  ;;  %v142_v16 = vld [vmem:[#allocation5 + $0x168] sm:$0xff] }
  0x2d   :  { %230 = vmatpush1.msra.mxu0 %v149_v10  ;;  %319 = vmatpush1.msra.mxu1 %v151_v11  ;;  %v144_v17 = vld [vmem:[#allocation5 + $0x178] sm:$0xff]  ;;  %v141_v18 = vld [vmem:[#allocation5 + $0x160] sm:$0xff]  ;;  %v143_v19 = vld [vmem:[#allocation5 + $0x170] sm:$0xff] }
  0x2e   :  { %231 = vmatprep.subr.mxu0 %v146_v12  ;;  %320 = vmatprep.subr.mxu1 %v148_v13  ;;  %v138_v20 = vld [vmem:[#allocation5 + $0x148] sm:$0xff]  ;;  %v140_v21 = vld [vmem:[#allocation5 + $0x158] sm:$0xff]  ;;  %v137_v22 = vld [vmem:[#allocation5 + $0x140] sm:$0xff] }
  0x2f   :  { %232 = vmatpush1.msra.mxu0 %v145_v14  ;;  %321 = vmatpush1.msra.mxu1 %v147_v15  ;;  %v139_v23 = vld [vmem:[#allocation5 + $0x150] sm:$0xff]  ;;  %v134_v24 = vld [vmem:[#allocation5 + $0x128] sm:$0xff]  ;;  %v136_v25 = vld [vmem:[#allocation5 + $0x138] sm:$0xff] }
  0x30   :  { %233 = vmatprep.subr.mxu0 %v142_v16  ;;  %322 = vmatprep.subr.mxu1 %v144_v17  ;;  %v133_v26 = vld [vmem:[#allocation5 + $0x120] sm:$0xff]  ;;  %v135_v27 = vld [vmem:[#allocation5 + $0x130] sm:$0xff]  ;;  %v130_v28 = vld [vmem:[#allocation5 + $0x108] sm:$0xff] }
  0x31   :  { %234 = vmatpush1.msra.mxu0 %v141_v18  ;;  %323 = vmatpush1.msra.mxu1 %v143_v19  ;;  %v132_v29 = vld [vmem:[#allocation5 + $0x118] sm:$0xff]  ;;  %v129_v30 = vld [vmem:[#allocation5 + $0x100] sm:$0xff]  ;;  %v131_v31 = vld [vmem:[#allocation5 + $0x110] sm:$0xff] }
  0x32   :  { %235 = vmatprep.subr.mxu0 %v138_v20  ;;  %324 = vmatprep.subr.mxu1 %v140_v21  ;;  %v126_v32 = vld [vmem:[#allocation5 + $0xe8] sm:$0xff]  ;;  %v128_v33 = vld [vmem:[#allocation5 + $0xf8] sm:$0xff]  ;;  %v125_v34 = vld [vmem:[#allocation5 + $0xe0] sm:$0xff] }
  0x33   :  { %236 = vmatpush1.msra.mxu0 %v137_v22  ;;  %325 = vmatpush1.msra.mxu1 %v139_v23  ;;  %v127_v35 = vld [vmem:[#allocation5 + $0xf0] sm:$0xff]  ;;  %v122_v36 = vld [vmem:[#allocation5 + $0xc8] sm:$0xff]  ;;  %v124_v37 = vld [vmem:[#allocation5 + $0xd8] sm:$0xff] }
  0x34   :  { %237 = vmatprep.subr.mxu0 %v134_v24  ;;  %326 = vmatprep.subr.mxu1 %v136_v25  ;;  %v121_v38 = vld [vmem:[#allocation5 + $0xc0] sm:$0xff]  ;;  %v123_v39 = vld [vmem:[#allocation5 + $0xd0] sm:$0xff]  ;;  %v118_v40 = vld [vmem:[#allocation5 + $0xa8] sm:$0xff] }
  0x35   :  { %238 = vmatpush1.msra.mxu0 %v133_v26  ;;  %327 = vmatpush1.msra.mxu1 %v135_v27  ;;  %v120_v41 = vld [vmem:[#allocation5 + $0xb8] sm:$0xff]  ;;  %v117_v42 = vld [vmem:[#allocation5 + $0xa0] sm:$0xff]  ;;  %v119_v43 = vld [vmem:[#allocation5 + $0xb0] sm:$0xff] }
  0x36   :  { %239 = vmatprep.subr.mxu0 %v130_v28  ;;  %328 = vmatprep.subr.mxu1 %v132_v29  ;;  %v114_v44 = vld [vmem:[#allocation5 + $0x88] sm:$0xff]  ;;  %v116_v45 = vld [vmem:[#allocation5 + $0x98] sm:$0xff]  ;;  %v113_v46 = vld [vmem:[#allocation5 + $0x80] sm:$0xff] }
  0x37   :  { %240 = vmatpush1.msra.mxu0 %v129_v30  ;;  %329 = vmatpush1.msra.mxu1 %v131_v31  ;;  %v115_v47 = vld [vmem:[#allocation5 + $0x90] sm:$0xff]  ;;  %v110_v48 = vld [vmem:[#allocation5 + $0x68] sm:$0xff]  ;;  %v112_v49 = vld [vmem:[#allocation5 + $0x78] sm:$0xff] }
  0x38   :  { %241 = vmatprep.subr.mxu0 %v126_v32  ;;  %330 = vmatprep.subr.mxu1 %v128_v33  ;;  %v109_v50 = vld [vmem:[#allocation5 + $0x60] sm:$0xff]  ;;  %v111_v51 = vld [vmem:[#allocation5 + $0x70] sm:$0xff]  ;;  %v106_v52 = vld [vmem:[#allocation5 + $0x48] sm:$0xff] }
  0x39   :  { %242 = vmatpush1.msra.mxu0 %v125_v34  ;;  %331 = vmatpush1.msra.mxu1 %v127_v35  ;;  %v108_v53 = vld [vmem:[#allocation5 + $0x58] sm:$0xff]  ;;  %v105_v54 = vld [vmem:[#allocation5 + $0x40] sm:$0xff]  ;;  %v107_v55 = vld [vmem:[#allocation5 + $0x50] sm:$0xff] }
  0x3a   :  { %243 = vmatprep.subr.mxu0 %v122_v36  ;;  %332 = vmatprep.subr.mxu1 %v124_v37  ;;  %v102_v56 = vld [vmem:[#allocation5 + $0x28] sm:$0xff]  ;;  %v104_v57 = vld [vmem:[#allocation5 + $0x38] sm:$0xff]  ;;  %v101_v58 = vld [vmem:[#allocation5 + $0x20] sm:$0xff] }
  0x3b   :  { %244 = vmatpush1.msra.mxu0 %v121_v38  ;;  %333 = vmatpush1.msra.mxu1 %v123_v39  ;;  %v103_v59 = vld [vmem:[#allocation5 + $0x30] sm:$0xff]  ;;  %v98_v60 = vld [vmem:[#allocation5 + $0x8] sm:$0xff]  ;;  %v100_v61 = vld [vmem:[#allocation5 + $0x18] sm:$0xff] }
  0x3c   :  { %245 = vmatprep.subr.mxu0 %v118_v40  ;;  %334 = vmatprep.subr.mxu1 %v120_v41  ;;  %v97_v62 = vld [vmem:[#allocation5] sm:$0xff]  ;;  %v99_v63 = vld [vmem:[#allocation5 + $0x10] sm:$0xff]  ;;  %v222_v0 = vld [vmem:[#allocation5 + $0x3e8] sm:$0xff] }
  0x3d   :  { %246 = vmatpush1.msra.mxu0 %v117_v42  ;;  %335 = vmatpush1.msra.mxu1 %v119_v43  ;;  %v224_v1 = vld [vmem:[#allocation5 + $0x3f8] sm:$0xff]  ;;  %v221_v2 = vld [vmem:[#allocation5 + $0x3e0] sm:$0xff]  ;;  %v223_v3 = vld [vmem:[#allocation5 + $0x3f0] sm:$0xff] }
  0x3e   :  { %247 = vmatprep.subr.mxu0 %v114_v44  ;;  %336 = vmatprep.subr.mxu1 %v116_v45  ;;  %v218_v4 = vld [vmem:[#allocation5 + $0x3c8] sm:$0xff]  ;;  %v220_v5 = vld [vmem:[#allocation5 + $0x3d8] sm:$0xff]  ;;  %v217_v6 = vld [vmem:[#allocation5 + $0x3c0] sm:$0xff] }
  0x3f   :  { %248 = vmatpush1.msra.mxu0 %v113_v46  ;;  %337 = vmatpush1.msra.mxu1 %v115_v47  ;;  %v219_v7 = vld [vmem:[#allocation5 + $0x3d0] sm:$0xff]  ;;  %v214_v8 = vld [vmem:[#allocation5 + $0x3a8] sm:$0xff]  ;;  %v216_v9 = vld [vmem:[#allocation5 + $0x3b8] sm:$0xff] }
  0x40   :  { %249 = vmatprep.subr.mxu0 %v110_v48  ;;  %338 = vmatprep.subr.mxu1 %v112_v49  ;;  %v213_v10 = vld [vmem:[#allocation5 + $0x3a0] sm:$0xff]  ;;  %v215_v11 = vld [vmem:[#allocation5 + $0x3b0] sm:$0xff]  ;;  %v210_v12 = vld [vmem:[#allocation5 + $0x388] sm:$0xff] }
  0x41   :  { %250 = vmatpush1.msra.mxu0 %v109_v50  ;;  %339 = vmatpush1.msra.mxu1 %v111_v51  ;;  %v212_v13 = vld [vmem:[#allocation5 + $0x398] sm:$0xff]  ;;  %v209_v14 = vld [vmem:[#allocation5 + $0x380] sm:$0xff]  ;;  %v211_v15 = vld [vmem:[#allocation5 + $0x390] sm:$0xff] }
  0x42   :  { %251 = vmatprep.subr.mxu0 %v106_v52  ;;  %340 = vmatprep.subr.mxu1 %v108_v53  ;;  %v206_v16 = vld [vmem:[#allocation5 + $0x368] sm:$0xff]  ;;  %v208_v17 = vld [vmem:[#allocation5 + $0x378] sm:$0xff]  ;;  %v205_v18 = vld [vmem:[#allocation5 + $0x360] sm:$0xff] }
  0x43   :  { %252 = vmatpush1.msra.mxu0 %v105_v54  ;;  %341 = vmatpush1.msra.mxu1 %v107_v55  ;;  %v207_v19 = vld [vmem:[#allocation5 + $0x370] sm:$0xff]  ;;  %v202_v20 = vld [vmem:[#allocation5 + $0x348] sm:$0xff]  ;;  %v204_v21 = vld [vmem:[#allocation5 + $0x358] sm:$0xff] }
  0x44   :  { %253 = vmatprep.subr.mxu0 %v102_v56  ;;  %342 = vmatprep.subr.mxu1 %v104_v57  ;;  %v201_v22 = vld [vmem:[#allocation5 + $0x340] sm:$0xff]  ;;  %v203_v23 = vld [vmem:[#allocation5 + $0x350] sm:$0xff]  ;;  %v198_v24 = vld [vmem:[#allocation5 + $0x328] sm:$0xff] }
  0x45   :  { %254 = vmatpush1.msra.mxu0 %v101_v58  ;;  %343 = vmatpush1.msra.mxu1 %v103_v59  ;;  %v200_v25 = vld [vmem:[#allocation5 + $0x338] sm:$0xff]  ;;  %v197_v26 = vld [vmem:[#allocation5 + $0x320] sm:$0xff]  ;;  %v199_v27 = vld [vmem:[#allocation5 + $0x330] sm:$0xff] }
  0x46   :  { %255 = vmatprep.subr.mxu0 %v98_v60  ;;  %344 = vmatprep.subr.mxu1 %v100_v61  ;;  %v194_v28 = vld [vmem:[#allocation5 + $0x308] sm:$0xff]  ;;  %v196_v29 = vld [vmem:[#allocation5 + $0x318] sm:$0xff]  ;;  %v193_v30 = vld [vmem:[#allocation5 + $0x300] sm:$0xff] }
  0x47   :  { %256 = vmatpush1.msra.mxu0 %v97_v62  ;;  %345 = vmatpush1.msra.mxu1 %v99_v63  ;;  %v195_v31 = vld [vmem:[#allocation5 + $0x310] sm:$0xff]  ;;  %v190_v32 = vld [vmem:[#allocation5 + $0x2e8] sm:$0xff]  ;;  %v192_v33 = vld [vmem:[#allocation5 + $0x2f8] sm:$0xff] }
  0x48   :  { %257 = vmatprep.subr.mxu0 %v222_v0  ;;  %346 = vmatprep.subr.mxu1 %v224_v1  ;;  %v189_v34 = vld [vmem:[#allocation5 + $0x2e0] sm:$0xff]  ;;  %v191_v35 = vld [vmem:[#allocation5 + $0x2f0] sm:$0xff]  ;;  %v186_v36 = vld [vmem:[#allocation5 + $0x2c8] sm:$0xff] }
  0x49   :  { %258 = vmatpush2.msra.mxu0 %v221_v2  ;;  %347 = vmatpush2.msra.mxu1 %v223_v3  ;;  %v188_v37 = vld [vmem:[#allocation5 + $0x2d8] sm:$0xff]  ;;  %v185_v38 = vld [vmem:[#allocation5 + $0x2c0] sm:$0xff]  ;;  %v187_v39 = vld [vmem:[#allocation5 + $0x2d0] sm:$0xff] }
  0x4a   :  { %259 = vmatprep.subr.mxu0 %v218_v4  ;;  %348 = vmatprep.subr.mxu1 %v220_v5  ;;  %v182_v40 = vld [vmem:[#allocation5 + $0x2a8] sm:$0xff]  ;;  %v184_v41 = vld [vmem:[#allocation5 + $0x2b8] sm:$0xff]  ;;  %v181_v42 = vld [vmem:[#allocation5 + $0x2a0] sm:$0xff] }
  0x4b   :  { %260 = vmatpush2.msra.mxu0 %v217_v6  ;;  %349 = vmatpush2.msra.mxu1 %v219_v7  ;;  %v183_v43 = vld [vmem:[#allocation5 + $0x2b0] sm:$0xff]  ;;  %v178_v44 = vld [vmem:[#allocation5 + $0x288] sm:$0xff]  ;;  %v180_v45 = vld [vmem:[#allocation5 + $0x298] sm:$0xff] }
  0x4c   :  { %261 = vmatprep.subr.mxu0 %v214_v8  ;;  %350 = vmatprep.subr.mxu1 %v216_v9  ;;  %v177_v46 = vld [vmem:[#allocation5 + $0x280] sm:$0xff]  ;;  %v179_v47 = vld [vmem:[#allocation5 + $0x290] sm:$0xff]  ;;  %v174_v48 = vld [vmem:[#allocation5 + $0x268] sm:$0xff]  ;;  %v456_v8 = vlaneseq }
  0x4d   :  { %262 = vmatpush2.msra.mxu0 %v213_v10  ;;  %351 = vmatpush2.msra.mxu1 %v215_v11  ;;  %v176_v49 = vld [vmem:[#allocation5 + $0x278] sm:$0xff]  ;;  %v173_v50 = vld [vmem:[#allocation5 + $0x260] sm:$0xff]  ;;  %v175_v51 = vld [vmem:[#allocation5 + $0x270] sm:$0xff] }
  0x4e   :  { %263 = vmatprep.subr.mxu0 %v210_v12  ;;  %352 = vmatprep.subr.mxu1 %v212_v13  ;;  %v170_v52 = vld [vmem:[#allocation5 + $0x248] sm:$0xff]  ;;  %v172_v53 = vld [vmem:[#allocation5 + $0x258] sm:$0xff]  ;;  %v169_v54 = vld [vmem:[#allocation5 + $0x240] sm:$0xff]  ;;  %v457_v9 = vshrl.u32 %v456_v8, 7 }
  0x4f   :  { %264 = vmatpush2.msra.mxu0 %v209_v14  ;;  %353 = vmatpush2.msra.mxu1 %v211_v15  ;;  %v171_v55 = vld [vmem:[#allocation5 + $0x250] sm:$0xff]  ;;  %v166_v56 = vld [vmem:[#allocation5 + $0x228] sm:$0xff]  ;;  %v168_v57 = vld [vmem:[#allocation5 + $0x238] sm:$0xff] }
  0x50   :  { %265 = vmatprep.subr.mxu0 %v206_v16  ;;  %354 = vmatprep.subr.mxu1 %v208_v17  ;;  %v165_v58 = vld [vmem:[#allocation5 + $0x220] sm:$0xff]  ;;  %v167_v59 = vld [vmem:[#allocation5 + $0x230] sm:$0xff]  ;;  %v162_v60 = vld [vmem:[#allocation5 + $0x208] sm:$0xff]  ;;  %v458_v10 = vsub.s32 0, %v457_v9  ;;  %v466_v11 = vsub.s32 2, %v457_v9  ;;  %v462_v13 = vsub.s32 1, %v457_v9 }
  0x51   :  { %266 = vmatpush2.msra.mxu0 %v205_v18  ;;  %355 = vmatpush2.msra.mxu1 %v207_v19  ;;  %v164_v61 = vld [vmem:[#allocation5 + $0x218] sm:$0xff]  ;;  %v161_v62 = vld [vmem:[#allocation5 + $0x200] sm:$0xff]  ;;  %v90_v63 = vld [vmem:[#allocation3 + $0x8] sm:$0xff]  ;;  %v470_v14 = vsub.s32 3, %v457_v9 }
  0x52   :  { %267 = vmatprep.subr.mxu0 %v202_v20  ;;  %356 = vmatprep.subr.mxu1 %v204_v21  ;;  %v163_v0 = vld [vmem:[#allocation5 + $0x210] sm:$0xff]  ;;  %v89_v1 = vld [vmem:[#allocation3] sm:$0xff]  ;;  %v92_v2 = vld [vmem:[#allocation3 + $0x18] sm:$0xff] }
  0x53   :  { %268 = vmatpush2.msra.mxu0 %v201_v22  ;;  %357 = vmatpush2.msra.mxu1 %v203_v23  ;;  %v91_v3 = vld [vmem:[#allocation3 + $0x10] sm:$0xff]  ;;  %v94_v4 = vld [vmem:[#allocation3 + $0x28] sm:$0xff]  ;;  %v93_v5 = vld [vmem:[#allocation3 + $0x20] sm:$0xff] }
  0x54   :  { %269 = vmatprep.subr.mxu0 %v198_v24  ;;  %358 = vmatprep.subr.mxu1 %v200_v25  ;;  %v96_v6 = vld [vmem:[#allocation3 + $0x38] sm:$0xff]  ;;  %v95_v7 = vld [vmem:[#allocation3 + $0x30] sm:$0xff]  ;;  %v454_v12 = vld [vmem:[#allocation7] sm:$0xf] }
  0x55   :  { %270 = vmatpush2.msra.mxu0 %v197_v26  ;;  %359 = vmatpush2.msra.mxu1 %v199_v27  ;;  %v459_v15 = vrot.slane %v454_v12, %v458_v10  ;;  %v467_v16 = vrot.slane %v454_v12, %v466_v11  ;;  %v463_v17 = vrot.slane %v454_v12, %v462_v13 }
  0x56   :  { %271 = vmatprep.subr.mxu0 %v194_v28  ;;  %360 = vmatprep.subr.mxu1 %v196_v29  ;;  %v471_v18 = vrot.slane %v454_v12, %v470_v14 }
  0x57   :  { %272 = vmatpush2.msra.mxu0 %v193_v30  ;;  %361 = vmatpush2.msra.mxu1 %v195_v31 }
  0x58   :  { %273 = vmatprep.subr.mxu0 %v190_v32  ;;  %362 = vmatprep.subr.mxu1 %v192_v33 }
  0x59   :  { %274 = vmatpush2.msra.mxu0 %v189_v34  ;;  %363 = vmatpush2.msra.mxu1 %v191_v35 }
  0x5a   :  { %275 = vmatprep.subr.mxu0 %v186_v36  ;;  %364 = vmatprep.subr.mxu1 %v188_v37 }
  0x5b   :  { %276 = vmatpush2.msra.mxu0 %v185_v38  ;;  %365 = vmatpush2.msra.mxu1 %v187_v39 }
  0x5c   :  { %277 = vmatprep.subr.mxu0 %v182_v40  ;;  %366 = vmatprep.subr.mxu1 %v184_v41 }
  0x5d   :  { %278 = vmatpush2.msra.mxu0 %v181_v42  ;;  %367 = vmatpush2.msra.mxu1 %v183_v43 }
  0x5e   :  { %279 = vmatprep.subr.mxu0 %v178_v44  ;;  %368 = vmatprep.subr.mxu1 %v180_v45 }
  0x5f   :  { %280 = vmatpush2.msra.mxu0 %v177_v46  ;;  %369 = vmatpush2.msra.mxu1 %v179_v47 }
  0x60   :  { %281 = vmatprep.subr.mxu0 %v174_v48  ;;  %370 = vmatprep.subr.mxu1 %v176_v49 }
  0x61   :  { %282 = vmatpush2.msra.mxu0 %v173_v50  ;;  %371 = vmatpush2.msra.mxu1 %v175_v51 }
  0x62   :  { %283 = vmatprep.subr.mxu0 %v170_v52  ;;  %372 = vmatprep.subr.mxu1 %v172_v53 }
  0x63   :  { %284 = vmatpush2.msra.mxu0 %v169_v54  ;;  %373 = vmatpush2.msra.mxu1 %v171_v55 }
  0x64   :  { %285 = vmatprep.subr.mxu0 %v166_v56  ;;  %374 = vmatprep.subr.mxu1 %v168_v57 }
  0x65   :  { %286 = vmatpush2.msra.mxu0 %v165_v58  ;;  %375 = vmatpush2.msra.mxu1 %v167_v59 }
  0x66   :  { %287 = vmatprep.subr.mxu0 %v162_v60  ;;  %376 = vmatprep.subr.mxu1 %v164_v61 }
  0x67   :  { %288 = vmatpush2.msra.mxu0 %v161_v62  ;;  %289 = vmatprep.mubr.f32.mxu0 %v90_v63 }
  0x68   :  { %377 = vmatpush2.msra.mxu1 %v163_v0  ;;  %378 = vmatprep.mubr.f32.mxu1 %v90_v63 }
  0x69   :  { %290 = vmatmul.mubr.f32.vlgmr.msra.gmra.mxu0 %v89_v1  ;;  %379 = vmatmul.mubr.f32.vlgmr.msra.gmra.mxu1 %v89_v1 }
  0x6a   :  { %295 = vmatprep.mubr.f32.mxu0 %v92_v2  ;;  %384 = vmatprep.mubr.f32.mxu1 %v92_v2 }
  0x6d   :  { %296 = vmatmul.mubr.f32.gmra.mxu0 %v91_v3  ;;  %385 = vmatmul.mubr.f32.gmra.mxu1 %v91_v3 }
  0x6e   :  { %301 = vmatprep.mubr.f32.mxu0 %v94_v4  ;;  %390 = vmatprep.mubr.f32.mxu1 %v94_v4 }
  0x71   :  { %302 = vmatmul.mubr.f32.gmra.mxu0 %v93_v5  ;;  %391 = vmatmul.mubr.f32.gmra.mxu1 %v93_v5 }
  0x72   :  { %307 = vmatprep.mubr.f32.mxu0 %v96_v6  ;;  %396 = vmatprep.mubr.f32.mxu1 %v96_v6 }
  0x75   :  { %308 = vmatmul.mubr.f32.gmra.mxu0 %v95_v7  ;;  %397 = vmatmul.mubr.f32.gmra.mxu1 %v95_v7 }
 0x129   :  { %v291_v19 = vpop.f32.mrf.mxu0  ;;  %v380_v20 = vpop.f32.mrf.mxu1 }
 0x12a   :  { %v476_v21 = vadd.f32 %v459_v15, %v291_v19  ;;  %v478_v22 = vadd.f32 %v467_v16, %v380_v20 }
 0x12b   :  { %v293_v23 = vpop.f32.mrf.mxu0  ;;  %v382_v24 = vpop.f32.mrf.mxu1 }
 0x12c   :  { %492 = vst [vmem:[%s672_s3] sm:$0xff] %v476_v21  ;;  %494 = vst [vmem:[%s672_s3 + $0x10] sm:$0xff] %v478_v22  ;;  %v477_v25 = vadd.f32 %v463_v17, %v293_v23  ;;  %v479_v26 = vadd.f32 %v471_v18, %v382_v24 }
 0x12d   :  { %v297_v27 = vpop.f32.mrf.mxu0  ;;  %v386_v28 = vpop.f32.mrf.mxu1 }
 0x12e   :  { %493 = vst [vmem:[%s672_s3 + $0x8] sm:$0xff] %v477_v25  ;;  %495 = vst [vmem:[%s672_s3 + $0x18] sm:$0xff] %v479_v26  ;;  %v480_v29 = vadd.f32 %v459_v15, %v297_v27  ;;  %v482_v30 = vadd.f32 %v467_v16, %v386_v28 }
 0x12f   :  { %v299_v31 = vpop.f32.mrf.mxu0  ;;  %v388_v32 = vpop.f32.mrf.mxu1 }
 0x130   :  { %496 = vst [vmem:[%s672_s3 + $0x20] sm:$0xff] %v480_v29  ;;  %498 = vst [vmem:[%s672_s3 + $0x30] sm:$0xff] %v482_v30  ;;  %v481_v33 = vadd.f32 %v463_v17, %v299_v31  ;;  %v483_v34 = vadd.f32 %v471_v18, %v388_v32 }
 0x131   :  { %v303_v35 = vpop.f32.mrf.mxu0  ;;  %v392_v36 = vpop.f32.mrf.mxu1 }
 0x132   :  { %497 = vst [vmem:[%s672_s3 + $0x28] sm:$0xff] %v481_v33  ;;  %499 = vst [vmem:[%s672_s3 + $0x38] sm:$0xff] %v483_v34  ;;  %v484_v37 = vadd.f32 %v459_v15, %v303_v35  ;;  %v486_v38 = vadd.f32 %v467_v16, %v392_v36 }
 0x133   :  { %v305_v39 = vpop.f32.mrf.mxu0  ;;  %v394_v40 = vpop.f32.mrf.mxu1 }
 0x134   :  { %500 = vst [vmem:[%s672_s3 + $0x40] sm:$0xff] %v484_v37  ;;  %502 = vst [vmem:[%s672_s3 + $0x50] sm:$0xff] %v486_v38  ;;  %v485_v41 = vadd.f32 %v463_v17, %v305_v39  ;;  %v487_v42 = vadd.f32 %v471_v18, %v394_v40 }
 0x135   :  { %v309_v43 = vpop.f32.mrf.mxu0  ;;  %v398_v44 = vpop.f32.mrf.mxu1 }
 0x136   :  { %501 = vst [vmem:[%s672_s3 + $0x48] sm:$0xff] %v485_v41  ;;  %503 = vst [vmem:[%s672_s3 + $0x58] sm:$0xff] %v487_v42  ;;  %v488_v45 = vadd.f32 %v459_v15, %v309_v43  ;;  %v490_v46 = vadd.f32 %v467_v16, %v398_v44 }
 0x137   :  { %v311_v47 = vpop.f32.mrf.mxu0  ;;  %v400_v48 = vpop.f32.mrf.mxu1 }
 0x138   :  { %504 = vst [vmem:[%s672_s3 + $0x60] sm:$0xff] %v488_v45  ;;  %506 = vst [vmem:[%s672_s3 + $0x70] sm:$0xff] %v490_v46  ;;  %v489_v49 = vadd.f32 %v463_v17, %v311_v47  ;;  %v491_v50 = vadd.f32 %v471_v18, %v400_v48 }
 0x13a   :  { %505 = vst [vmem:[%s672_s3 + $0x68] sm:$0xff] %v489_v49  ;;  %507 = vst [vmem:[%s672_s3 + $0x78] sm:$0xff] %v491_v50 }
 0x13b   :  { %512 = vsyncpa [#allocation4], 1 }
 0x13c   :  { %513 = vsyncpa [#allocation6], 1 }

// kernel: decoder_layer.10
= control target key start
LH: loop header
LB: loop body
LE: loop exit
PB: predicated region body
PF: predicated region fallthrough
CT: control target
= control target key end

     0   :  { %7 = vsyncpa [#allocation3], 0  ;;  %s2283_s9 = smov 0   ;;  %s2630_s0 = inlined_call_operand.vmem [shape: f32[2,16,768], index: 0, kind: input, shape index: {}]   ;;  %s2631_s1 = inlined_call_operand.hbm [shape: s32[1,16,16], index: 1, kind: input, shape index: {}]   ;;  %s2632_s2 = inlined_call_operand.vmem [shape: f32[2,16,256], index: 2, kind: output, shape index: {}]  }
   0x1 LB: > { %s1896_s10 = sadd.s32 4294967295, %s2259_s9   ;;  %p1898_p0 = scmp.ge.s32.totalorder %s2259_s9, 1  ;;  %s2259_s9 = sphi %s2283_s9, %s13_s9  }
   0x2   : > { %p91_p1 = scmp.lt.s32.totalorder %s2259_s9, 3  ;;  %s2261_s11 = smov [#allocation2]  }
   0x3   : > { %s103_s12 = sshll.u32 %s2261_s11, 4  ;;  %p2142_p3 = scmp.eq.s32.totalorder %s1896_s10, 0  ;;  %s104_s12 = int_to_ptr.vmem [resolvable:$true] %s103_s12 }
   0x4   : > { %p2291_p2 = pnand %p1898_p0, %p91_p1  ;;  %s2234_s14 = scalar_lea.vmem %s104_s12, 256 }
   0x5   : > { %p2235_p7 = scmp.ne.s32.totalorder %s104_s12, %s2234_s14  ;;  %p2242_p10 = scmp.lt.s32.totalorder %s104_s12, %s104_s12 }
   0x6   : > { %p2138_p4 = pneg %p2291_p2  ;;  %p2243_p11 = scmp.lt.s32.totalorder %s2234_s14, %s2234_s14 }
   0x8   : > { %p2139_p5 = pnand %p2142_p3, %p2138_p4  ;;  %p2244_p12 = por %p2243_p11, %p2242_p10 }
   0xa   : > { %p2225_p6 = pneg %p2139_p5 }
   0xc   : > { %p2237_p8 = pnand %p2235_p7, %p2225_p6 }
   0xe   : > { %p2238_p9 = pneg %p2237_p8 }
  0x10   : > { %p2245_p13 = pnand %p2244_p12, %p2238_p9 }
  0x12   : > { %2248 = shalt.err (!%p2245_p13)
}
  0x13   : > { %s2262_s15 = smov 128   ;;  %s2263_s16 = smov 8  }
  0x14   : > { %2141 = dma.hbm_to_vmem [thread:$0]  (!%p2139_p5), %s2631_s1, 256, %s104_s12, [#allocation3], %s2262_s15, %s2262_s15, %s2263_s16  }
  0x15   : > { %127 = sbr.rel (%p2291_p2) target bundleno = 4510 (0x119e), region = 28 }
  0x1a   : > { %2254 = dma.done.wait (%p2142_p3), [#allocation3], 256  }
  0x1b   : > { %2256 = vsyncadd (%p2142_p3), [#allocation3], 4294967040  ;;  %p149_p0 = scmp.lt.s32.totalorder %s1896_s10, 1  ;;  %vm177_vm0 = vcmask 261120   ;;  %s2264_s23 = smov 96   ;;  %v171_v4 = vld [vmem:[#allocation2] sm:$0xff] }
  0x1c   : > { %v172_v5 = vld [vmem:[#allocation2 + $0x8] sm:$0xff]  ;;  %vm173_vm1 = vcmp.eq.s32.totalorder %v171_v4, 0  ;;  %v2265_v7 = vmov 0.0   ;;  %vm265_vm3 = vcmask 130048   ;;  %s2266_s24 = smov 64   ;;  %s2267_s25 = smov 32  }
  0x1d   : > { %s2635_s10 = smov (!%p149_p0, %s1896_s10), 1  ;;  %vm174_vm2 = vcmp.eq.s32.totalorder %v172_v5, 0  ;;  %v2341_v8 = vsel %vm173_vm1, -1e+09, %v2265_v7  ;;  %vm1813_vm4 = vcmask 523264   ;;  %vm1816_vm5 = vcmask 785408  }
  0x1e   : > { %s2133_s19 = smul.u32 96, %s2635_s10  ;;  %v2343_v9 = vsel %vm174_vm2, -1e+09, %v2265_v7  ;;  %s1956_s26 = sshll.u32 %s2635_s10, 5 }
  0x1f   : > { %s2597_s29 = scalar_lea.vmem %s2632_s2, %s1956_s26 }
  0x20   : > { %s2311_s22 = scalar_lea.vmem %s2630_s0, %s2133_s19 }
  0x21   : > { %v2314_v0 = vld [vmem:[%s2311_s22 + $0x40] sm:$0xff]  ;;  %v2317_v1 = vld [vmem:[%s2311_s22 + $0x10] sm:$0xff] }
  0x22   : > { %v2320_v2 = vld [vmem:[%s2311_s22] sm:$0xff]  ;;  %2021 = vmatprep.subr.msk.mxu0 %vm177_vm0, %v2314_v0  ;;  %v2333_v3 = vld [vmem:[%s2311_s22 + $0x30] sm:$0xff]  ;;  %373 = vrot.lane.b32.xlu1 %v2317_v1, %s2264_s23 }
  0x23   : > { %2025 = vmatprep.mubr.msk.f32.mxu0 %vm177_vm0, %v2320_v2  ;;  %2022 = vmatpush3.xpose.msk.msra.mxu0 %vm177_vm0, %v2314_v0  ;;  %v2354_v25 = vld [vmem:[%s2311_s22 + $0x50] sm:$0xff]  ;;  %v2357_v26 = vld [vmem:[%s2311_s22 + $0x20] sm:$0xff] }
  0x24   : > { %2023 = vmatprep.subr.msk.mxu0 %vm177_vm0, %v2317_v1  ;;  %2028 = vmatprep.subr.mxu1 %v2354_v25 }
  0x25   : > { %2029 = vmatpush3.msra.mxu1 %v2354_v25 }
  0x26   : > { %369 = vrot.lane.b32.xlu1 %v2320_v2, %s2264_s23  ;;  %2030 = vmatprep.subr.mxu1 %v2357_v26 }
  0x27   : > { %2024 = vmatpush3.xpose.msk.msra.mxu0 %vm177_vm0, %v2317_v1  ;;  %2031 = vmatpush3.msra.mxu1 %v2357_v26 }
  0x2a   : > { %2026 = vmatmul.mubr.msk.f32.vlgmr.msra.gmra.mxu0 %vm177_vm0, %v2333_v3 }
  0x94   : > { %v374_v28 = vpop.permute.xlu1 %373 }
  0x98   : > { %v370_v29 = vpop.permute.xlu1 %369 }
  0xea   : > { %v2027_v6 = vpop.f32.mrf.mxu0 }
  0xeb   : > { %v262_v12 = vadd.f32 %v2027_v6, %v2343_v9 }
  0xec   : > { %v256_v10 = vpop.f32.mrf.mxu0 }
  0xed   : > { %v257_v11 = vadd.f32 %v256_v10, %v2341_v8  ;;  %v269_v14 = vsel %vm265_vm3, %v262_v12, -inf }
  0xef   : > { %v266_v13 = vsel %vm265_vm3, %v257_v11, -inf }
  0xf0   : > { %267 = vmax.xlane.f32.xlu0 %v266_v13 }
  0xf4   : > { %270 = vmax.xlane.f32.xlu0 %v269_v14 }
 0x10a   : > { %375 = vrot.lane.b32.xlu0 %v2314_v0, %s2264_s23 }
 0x179   : > { %v268_v15 = vpop.xlane.xlu0 %267 }
 0x17a   : > { %v272_v16 = vsub.f32 %v257_v11, %v268_v15 }
 0x17c   : > { %v274_v19 = vmul.f32 1.442695, %v272_v16 }
 0x17d   : > { %v271_v17 = vpop.xlane.xlu0 %270 }
 0x17e   : > { %v273_v18 = vsub.f32 %v262_v12, %v271_v17 }
 0x180   : > { %v276_v20 = vmul.f32 1.442695, %v273_v18 }
 0x181   : > { %v376_v27 = vpop.permute.xlu0 %375 }
 0x182   : > { %2159 = vpow2.f32 %v276_v20  ;;  %2035 = vmatprep.subr.msk.mxu1 %vm177_vm0, %v376_v27 }
 0x183   : > { %2161 = vpow2.f32 %v274_v19 }
 0x18f   : > { %v2160_v21 = vpop.eup %2159 }
 0x190   : > { %v281_v22 = vsel %vm265_vm3, %v2160_v21, 0.0  ;;  %v2162_v23 = vpop.eup %2161 }
 0x191   : > { %282 = vadd.xlane.f32.xlu1 %v281_v22  ;;  %v278_v24 = vsel %vm265_vm3, %v2162_v23, 0.0 }
 0x195   : > { %279 = vadd.xlane.f32.xlu1 %v278_v24 }
 0x1a6   : > { %371 = vrot.lane.b32.xlu1 %v2333_v3, %s2264_s23 }
 0x21a   : > { %v283_v30 = vpop.xlane.xlu1 %282 }
 0x21b   : > { %2163 = vrcp.f32 %v283_v30 }
 0x21e   : > { %v280_v31 = vpop.xlane.xlu1 %279 }
 0x21f   : > { %2165 = vrcp.f32 %v280_v31 }
 0x222   : > { %v372_v36 = vpop.permute.xlu1 %371 }
 0x228   : > { %v2164_v32 = vpop.eup %2163 }
 0x229   : > { %v287_v35 = vmul.f32 %v2164_v32, %v2160_v21 }
 0x22c   : > { %v2166_v33 = vpop.eup %2165 }
 0x22d   : > { %v286_v34 = vmul.f32 %v2166_v33, %v2162_v23 }
 0x22f   : > { %2032 = vmatprep.mubr.msk.f32.mxu1 %vm265_vm3, %v286_v34 }
 0x230   : > { %2033 = vmatmul.mubr.msk.f32.vlgmr.msra.gmra.mxu1 %vm265_vm3, %v287_v35 }
 0x231   : > { %2036 = vmatpush3.xpose.msk.msra.mxu1 %vm177_vm0, %v376_v27  ;;  %2039 = vmatprep.mubr.msk.f32.mxu1 %vm177_vm0, %v370_v29 }
 0x232   : > { %2037 = vmatprep.subr.msk.mxu1 %vm177_vm0, %v374_v28 }
 0x235   : > { %2038 = vmatpush3.xpose.msk.msra.mxu1 %vm177_vm0, %v374_v28 }
 0x238   : > { %2040 = vmatmul.mubr.msk.f32.vlgmr.msra.gmra.mxu1 %vm177_vm0, %v372_v36 }
 0x2f0   : > { %v2373_v37 = vpop.f32.mrf.mxu1 }
 0x2f2   : > { %v2375_v38 = vpop.f32.mrf.mxu1 }
 0x2f8   : > { %v2041_v39 = vpop.f32.mrf.mxu1 }
 0x2f9   : > { %v457_v40 = vadd.f32 %v2041_v39, %v2343_v9 }
 0x2fa   : > { %v451_v41 = vpop.f32.mrf.mxu1 }
 0x2fb   : > { %v452_v42 = vadd.f32 %v451_v41, %v2341_v8  ;;  %v463_v43 = vsel %vm265_vm3, %v457_v40, -inf }
 0x2fc   : > { %464 = vmax.xlane.f32.xlu1 %v463_v43 }
 0x2fd   : > { %v460_v44 = vsel %vm265_vm3, %v452_v42, -inf }
 0x2fe   : > { %461 = vmax.xlane.f32.xlu0 %v460_v44 }
 0x30d   : > { %484 = vrot.lane.b32.xlu1 %v2357_v26, %s2264_s23 }
 0x311   : > { %577 = vrot.lane.b32.xlu1 %v2314_v0, %s2266_s24 }
 0x315   : > { %575 = vrot.lane.b32.xlu1 %v2317_v1, %s2266_s24 }
 0x319   : > { %573 = vrot.lane.b32.xlu1 %v2333_v3, %s2266_s24 }
 0x385   : > { %v465_v45 = vpop.xlane.xlu1 %464 }
 0x386   : > { %v467_v46 = vsub.f32 %v457_v40, %v465_v45 }
 0x387   : > { %v462_v47 = vpop.xlane.xlu0 %461 }
 0x388   : > { %v470_v48 = vmul.f32 1.442695, %v467_v46  ;;  %v466_v49 = vsub.f32 %v452_v42, %v462_v47 }
 0x389   : > { %v485_v57 = vpop.permute.xlu1 %484 }
 0x38a   : > { %2167 = vpow2.f32 %v470_v48  ;;  %v468_v50 = vmul.f32 1.442695, %v466_v49 }
 0x38c   : > { %2169 = vpow2.f32 %v468_v50 }
 0x38d   : > { %v578_v59 = vpop.permute.xlu1 %577 }
 0x391   : > { %v576_v5 = vpop.permute.xlu1 %575 }
 0x395   : > { %v574_v6 = vpop.permute.xlu1 %573 }
 0x397   : > { %v2168_v51 = vpop.eup %2167 }
 0x398   : > { %v475_v52 = vsel %vm265_vm3, %v2168_v51, 0.0 }
 0x399   : > { %v2170_v53 = vpop.eup %2169  ;;  %476 = vadd.xlane.f32.xlu0 %v475_v52 }
 0x39a   : > { %v472_v54 = vsel %vm265_vm3, %v2170_v53, 0.0 }
 0x39d   : > { %473 = vadd.xlane.f32.xlu0 %v472_v54 }
 0x3b3   : > { %486 = vrot.lane.b32.xlu0 %v2354_v25, %s2264_s23 }
 0x3b7   : > { %571 = vrot.lane.b32.xlu0 %v2320_v2, %s2266_s24 }
 0x422   : > { %v477_v55 = vpop.xlane.xlu0 %476 }
 0x423   : > { %2171 = vrcp.f32 %v477_v55 }
 0x426   : > { %v474_v56 = vpop.xlane.xlu0 %473 }
 0x427   : > { %2173 = vrcp.f32 %v474_v56 }
 0x42a   : > { %v487_v58 = vpop.permute.xlu0 %486 }
 0x42b   : > { %2042 = vmatprep.subr.mxu0 %v487_v58 }
 0x42c   : > { %2043 = vmatpush3.msra.mxu0 %v487_v58 }
 0x42d   : > { %2044 = vmatprep.subr.mxu0 %v485_v57 }
 0x42e   : > { %2045 = vmatpush3.msra.mxu0 %v485_v57  ;;  %v572_v4 = vpop.permute.xlu0 %571 }
 0x42f   : > { %2049 = vmatprep.subr.msk.mxu0 %vm177_vm0, %v578_v59 }
 0x430   : > { %v2172_v60 = vpop.eup %2171 }
 0x431   : > { %v481_v63 = vmul.f32 %v2172_v60, %v2168_v51  ;;  %v2448_v60 = vld [vmem:[%s2311_s22 + $0x48] sm:$0xff] }
 0x434   : > { %v2174_v61 = vpop.eup %2173 }
 0x435   : > { %v480_v62 = vmul.f32 %v2174_v61, %v2170_v53 }
 0x437   : > { %2046 = vmatprep.mubr.msk.f32.mxu0 %vm265_vm3, %v480_v62 }
 0x438   : > { %2047 = vmatmul.mubr.msk.f32.vlgmr.msra.gmra.mxu0 %vm265_vm3, %v481_v63 }
 0x439   : > { %2050 = vmatpush3.xpose.msk.msra.mxu0 %vm177_vm0, %v578_v59  ;;  %2053 = vmatprep.mubr.msk.f32.mxu0 %vm177_vm0, %v572_v4  ;;  %v2453_v4 = vld [vmem:[%s2311_s22 + $0x8] sm:$0xff] }
 0x43a   : > { %2051 = vmatprep.subr.msk.mxu0 %vm177_vm0, %v576_v5 }
 0x43d   : > { %2052 = vmatpush3.xpose.msk.msra.mxu0 %vm177_vm0, %v576_v5  ;;  %v2457_v5 = vld [vmem:[%s2311_s22 + $0x18] sm:$0xff] }
 0x440   : > { %2054 = vmatmul.mubr.msk.f32.vlgmr.msra.gmra.mxu0 %vm177_vm0, %v574_v6  ;;  %v2469_v6 = vld [vmem:[%s2311_s22 + $0x38] sm:$0xff] }
 0x4f8   : > { %v2403_v7 = vpop.f32.mrf.mxu0 }
 0x4fa   : > { %v2405_v10 = vpop.f32.mrf.mxu0 }
 0x500   : > { %v2055_v11 = vpop.f32.mrf.mxu0 }
 0x501   : > { %v659_v12 = vadd.f32 %v2055_v11, %v2343_v9 }
 0x502   : > { %v653_v13 = vpop.f32.mrf.mxu0 }
 0x503   : > { %v654_v14 = vadd.f32 %v653_v13, %v2341_v8  ;;  %v665_v15 = vsel %vm265_vm3, %v659_v12, -inf }
 0x504   : > { %666 = vmax.xlane.f32.xlu1 %v665_v15 }
 0x505   : > { %v662_v16 = vsel %vm265_vm3, %v654_v14, -inf }
 0x506   : > { %663 = vmax.xlane.f32.xlu0 %v662_v16 }
 0x515   : > { %684 = vrot.lane.b32.xlu1 %v2357_v26, %s2266_s24 }
 0x519   : > { %777 = vrot.lane.b32.xlu1 %v2314_v0, %s2267_s25 }
 0x51d   : > { %775 = vrot.lane.b32.xlu1 %v2317_v1, %s2267_s25 }
 0x521   : > { %773 = vrot.lane.b32.xlu1 %v2333_v3, %s2267_s25 }
 0x58d   : > { %v667_v17 = vpop.xlane.xlu1 %666 }
 0x58e   : > { %v669_v18 = vsub.f32 %v659_v12, %v667_v17 }
 0x58f   : > { %v664_v19 = vpop.xlane.xlu0 %663 }
 0x590   : > { %v672_v20 = vmul.f32 1.442695, %v669_v18  ;;  %v668_v21 = vsub.f32 %v654_v14, %v664_v19 }
 0x591   : > { %v685_v28 = vpop.permute.xlu1 %684 }
 0x592   : > { %2175 = vpow2.f32 %v672_v20  ;;  %v670_v22 = vmul.f32 1.442695, %v668_v21 }
 0x594   : > { %2177 = vpow2.f32 %v670_v22 }
 0x595   : > { %v778_v30 = vpop.permute.xlu1 %777 }
 0x59f   : > { %v2176_v23 = vpop.eup %2175 }
 0x5a0   : > { %v677_v24 = vsel %vm265_vm3, %v2176_v23, 0.0 }
 0x5a1   : > { %v2178_v27 = vpop.eup %2177  ;;  %678 = vadd.xlane.f32.xlu0 %v677_v24 }
 0x5a2   : > { %v674_v0 = vsel %vm265_vm3, %v2178_v27, 0.0 }
 0x5a5   : > { %675 = vadd.xlane.f32.xlu0 %v674_v0 }
 0x5bb   : > { %686 = vrot.lane.b32.xlu0 %v2354_v25, %s2266_s24 }
 0x5bf   : > { %771 = vrot.lane.b32.xlu0 %v2320_v2, %s2267_s25  ;;  %v776_v2 = vpop.permute.xlu1 %775 }
 0x5c3   : > { %v774_v36 = vpop.permute.xlu1 %773 }
 0x62a   : > { %v679_v1 = vpop.xlane.xlu0 %678 }
 0x62b   : > { %2179 = vrcp.f32 %v679_v1 }
 0x62e   : > { %v676_v3 = vpop.xlane.xlu0 %675 }
 0x62f   : > { %2181 = vrcp.f32 %v676_v3 }
 0x632   : > { %v687_v29 = vpop.permute.xlu0 %686 }
 0x633   : > { %2056 = vmatprep.subr.mxu1 %v687_v29 }
 0x634   : > { %2057 = vmatpush3.msra.mxu1 %v687_v29  ;;  %v2487_v29 = vld [vmem:[%s2311_s22 + $0x28] sm:$0xff] }
 0x635   : > { %2058 = vmatprep.subr.mxu1 %v685_v28 }
 0x636   : > { %2059 = vmatpush3.msra.mxu1 %v685_v28  ;;  %v772_v35 = vpop.permute.xlu0 %771  ;;  %v2484_v28 = vld [vmem:[%s2311_s22 + $0x58] sm:$0xff] }
 0x637   : > { %2063 = vmatprep.subr.msk.mxu1 %vm177_vm0, %v778_v30 }
 0x638   : > { %v2180_v31 = vpop.eup %2179 }
 0x639   : > { %v683_v34 = vmul.f32 %v2180_v31, %v2176_v23 }
 0x63c   : > { %v2182_v32 = vpop.eup %2181 }
 0x63d   : > { %v682_v33 = vmul.f32 %v2182_v32, %v2178_v27 }
 0x63f   : > { %2060 = vmatprep.mubr.msk.f32.mxu1 %vm265_vm3, %v682_v33 }
 0x640   : > { %2061 = vmatmul.mubr.msk.f32.vlgmr.msra.gmra.mxu1 %vm265_vm3, %v683_v34 }
 0x641   : > { %2064 = vmatpush3.xpose.msk.msra.mxu1 %vm177_vm0, %v778_v30  ;;  %2067 = vmatprep.mubr.msk.f32.mxu1 %vm177_vm0, %v772_v35 }
 0x642   : > { %2065 = vmatprep.subr.msk.mxu1 %vm177_vm0, %v776_v2 }
 0x645   : > { %2066 = vmatpush3.xpose.msk.msra.mxu1 %vm177_vm0, %v776_v2 }
 0x646   : > { %2084 = vmatprep.subr.mxu1 %v2484_v28 }
 0x648   : > { %2068 = vmatmul.mubr.msk.f32.vlgmr.msra.gmra.mxu1 %vm177_vm0, %v774_v36 }
 0x649   : > { %2085 = vmatpush3.msra.mxu1 %v2484_v28 }
 0x64a   : > { %2086 = vmatprep.subr.mxu1 %v2487_v29 }
 0x64b   : > { %2087 = vmatpush3.msra.mxu1 %v2487_v29 }
 0x700   : > { %v2433_v39 = vpop.f32.mrf.mxu1 }
 0x702   : > { %v2435_v40 = vpop.f32.mrf.mxu1 }
 0x708   : > { %v2069_v41 = vpop.f32.mrf.mxu1 }
 0x709   : > { %v859_v42 = vadd.f32 %v2069_v41, %v2343_v9 }
 0x70a   : > { %v853_v43 = vpop.f32.mrf.mxu1 }
 0x70b   : > { %v854_v44 = vadd.f32 %v853_v43, %v2341_v8  ;;  %v865_v45 = vsel %vm265_vm3, %v859_v42, -inf }
 0x70c   : > { %866 = vmax.xlane.f32.xlu1 %v865_v45 }
 0x70d   : > { %v862_v46 = vsel %vm265_vm3, %v854_v44, -inf }
 0x70e   : > { %863 = vmax.xlane.f32.xlu0 %v862_v46 }
 0x71d   : > { %884 = vrot.lane.b32.xlu1 %v2357_v26, %s2267_s25 }
 0x795   : > { %v867_v47 = vpop.xlane.xlu1 %866 }
 0x796   : > { %v869_v48 = vsub.f32 %v859_v42, %v867_v47 }
 0x797   : > { %v864_v49 = vpop.xlane.xlu0 %863 }
 0x798   : > { %v872_v50 = vmul.f32 1.442695, %v869_v48  ;;  %v868_v51 = vsub.f32 %v854_v44, %v864_v49 }
 0x799   : > { %v885_v59 = vpop.permute.xlu1 %884 }
 0x79a   : > { %2183 = vpow2.f32 %v872_v50  ;;  %v870_v52 = vmul.f32 1.442695, %v868_v51 }
 0x79c   : > { %2185 = vpow2.f32 %v870_v52 }
 0x7a7   : > { %v2184_v53 = vpop.eup %2183 }
 0x7a8   : > { %v877_v54 = vsel %vm265_vm3, %v2184_v53, 0.0 }
 0x7a9   : > { %v2186_v55 = vpop.eup %2185  ;;  %878 = vadd.xlane.f32.xlu0 %v877_v54 }
 0x7aa   : > { %v874_v56 = vsel %vm265_vm3, %v2186_v55, 0.0 }
 0x7ad   : > { %875 = vadd.xlane.f32.xlu0 %v874_v56 }
 0x7c3   : > { %886 = vrot.lane.b32.xlu0 %v2354_v25, %s2267_s25 }
 0x832   : > { %v879_v26 = vpop.xlane.xlu0 %878 }
 0x833   : > { %2187 = vrcp.f32 %v879_v26 }
 0x836   : > { %v876_v57 = vpop.xlane.xlu0 %875 }
 0x837   : > { %2189 = vrcp.f32 %v876_v57 }
 0x83a   : > { %v887_v58 = vpop.permute.xlu0 %886 }
 0x83b   : > { %2070 = vmatprep.subr.mxu0 %v887_v58 }
 0x83c   : > { %2071 = vmatpush3.msra.mxu0 %v887_v58 }
 0x83d   : > { %2072 = vmatprep.subr.mxu0 %v885_v59 }
 0x83e   : > { %2073 = vmatpush3.msra.mxu0 %v885_v59 }
 0x83f   : > { %2077 = vmatprep.subr.msk.mxu0 %vm177_vm0, %v2448_v60 }
 0x840   : > { %v2188_v61 = vpop.eup %2187 }
 0x841   : > { %v883_v63 = vmul.f32 %v2188_v61, %v2184_v53 }
 0x844   : > { %v2190_v25 = vpop.eup %2189 }
 0x845   : > { %v882_v62 = vmul.f32 %v2190_v25, %v2186_v55 }
 0x847   : > { %2074 = vmatprep.mubr.msk.f32.mxu0 %vm265_vm3, %v882_v62 }
 0x848   : > { %2075 = vmatmul.mubr.msk.f32.vlgmr.msra.gmra.mxu0 %vm265_vm3, %v883_v63 }
 0x849   : > { %2078 = vmatpush3.xpose.msk.msra.mxu0 %vm177_vm0, %v2448_v60  ;;  %2081 = vmatprep.mubr.msk.f32.mxu0 %vm177_vm0, %v2453_v4 }
 0x84a   : > { %2079 = vmatprep.subr.msk.mxu0 %vm177_vm0, %v2457_v5 }
 0x84d   : > { %2080 = vmatpush3.xpose.msk.msra.mxu0 %vm177_vm0, %v2457_v5 }
 0x850   : > { %2082 = vmatmul.mubr.msk.f32.vlgmr.msra.gmra.mxu0 %vm177_vm0, %v2469_v6 }
 0x908   : > { %v2473_v11 = vpop.f32.mrf.mxu0 }
 0x90a   : > { %v2475_v12 = vpop.f32.mrf.mxu0 }
 0x910   : > { %v2083_v13 = vpop.f32.mrf.mxu0 }
 0x911   : > { %v1055_v14 = vadd.f32 %v2083_v13, %v2343_v9 }
 0x912   : > { %v1049_v15 = vpop.f32.mrf.mxu0 }
 0x913   : > { %v1050_v16 = vadd.f32 %v1049_v15, %v2341_v8  ;;  %v1061_v17 = vsel %vm265_vm3, %v1055_v14, -inf }
 0x914   : > { %1062 = vmax.xlane.f32.xlu0 %v1061_v17 }
 0x915   : > { %v1058_v18 = vsel %vm265_vm3, %v1050_v16, -inf }
 0x916   : > { %1059 = vmax.xlane.f32.xlu1 %v1058_v18 }
 0x99d   : > { %v1063_v19 = vpop.xlane.xlu0 %1062 }
 0x99e   : > { %v1065_v20 = vsub.f32 %v1055_v14, %v1063_v19 }
 0x99f   : > { %v1060_v21 = vpop.xlane.xlu1 %1059 }
 0x9a0   : > { %v1068_v22 = vmul.f32 1.442695, %v1065_v20  ;;  %v1064_v23 = vsub.f32 %v1050_v16, %v1060_v21 }
 0x9a2   : > { %2191 = vpow2.f32 %v1068_v22  ;;  %v1066_v24 = vmul.f32 1.442695, %v1064_v23 }
 0x9a4   : > { %2193 = vpow2.f32 %v1066_v24 }
 0x9af   : > { %v2192_v27 = vpop.eup %2191 }
 0x9b0   : > { %v1073_v0 = vsel %vm265_vm3, %v2192_v27, 0.0 }
 0x9b1   : > { %v2194_v1 = vpop.eup %2193  ;;  %1074 = vadd.xlane.f32.xlu1 %v1073_v0 }
 0x9b2   : > { %v1070_v3 = vsel %vm265_vm3, %v2194_v1, 0.0 }
 0x9b3   : > { %1071 = vadd.xlane.f32.xlu0 %v1070_v3 }
 0x9c2   : > { %1165 = vrot.lane.b32.xlu1 %v2457_v5, %s2264_s23 }
 0x9c6   : > { %1161 = vrot.lane.b32.xlu1 %v2453_v4, %s2264_s23 }
 0x9c9   : > { %1167 = vrot.lane.b32.xlu0 %v2448_v60, %s2264_s23 }
 0x9ca   : > { %1163 = vrot.lane.b32.xlu1 %v2469_v6, %s2264_s23 }
 0xa3a   : > { %v1075_v30 = vpop.xlane.xlu1 %1074 }
 0xa3b   : > { %2195 = vrcp.f32 %v1075_v30 }
 0xa3c   : > { %v1072_v31 = vpop.xlane.xlu0 %1071 }
 0xa3d   : > { %2197 = vrcp.f32 %v1072_v31 }
 0xa3e   : > { %v1166_v33 = vpop.permute.xlu1 %1165 }
 0xa40   : > { %v1168_v32 = vpop.permute.xlu0 %1167 }
 0xa41   : > { %2091 = vmatprep.subr.msk.mxu1 %vm177_vm0, %v1168_v32 }
 0xa42   : > { %v1162_v41 = vpop.permute.xlu1 %1161 }
 0xa46   : > { %v1164_v42 = vpop.permute.xlu1 %1163 }
 0xa48   : > { %v2196_v34 = vpop.eup %2195 }
 0xa49   : > { %v1079_v36 = vmul.f32 %v2196_v34, %v2192_v27 }
 0xa4a   : > { %v2198_v35 = vpop.eup %2197 }
 0xa4b   : > { %v1078_v2 = vmul.f32 %v2198_v35, %v2194_v1 }
 0xa4d   : > { %2088 = vmatprep.mubr.msk.f32.mxu1 %vm265_vm3, %v1078_v2 }
 0xa4e   : > { %2089 = vmatmul.mubr.msk.f32.vlgmr.msra.gmra.mxu1 %vm265_vm3, %v1079_v36 }
 0xa4f   : > { %2092 = vmatpush3.xpose.msk.msra.mxu1 %vm177_vm0, %v1168_v32  ;;  %2095 = vmatprep.mubr.msk.f32.mxu1 %vm177_vm0, %v1162_v41 }
 0xa50   : > { %2093 = vmatprep.subr.msk.mxu1 %vm177_vm0, %v1166_v33 }
 0xa53   : > { %2094 = vmatpush3.xpose.msk.msra.mxu1 %vm177_vm0, %v1166_v33 }
 0xa56   : > { %2096 = vmatmul.mubr.msk.f32.vlgmr.msra.gmra.mxu1 %vm177_vm0, %v1164_v42 }
 0xb0e   : > { %v2509_v43 = vpop.f32.mrf.mxu1 }
 0xb10   : > { %v2511_v44 = vpop.f32.mrf.mxu1 }
 0xb16   : > { %v2097_v45 = vpop.f32.mrf.mxu1 }
 0xb17   : > { %v1249_v46 = vadd.f32 %v2097_v45, %v2343_v9 }
 0xb18   : > { %v1243_v47 = vpop.f32.mrf.mxu1 }
 0xb19   : > { %v1244_v48 = vadd.f32 %v1243_v47, %v2341_v8  ;;  %v1255_v49 = vsel %vm265_vm3, %v1249_v46, -inf }
 0xb1a   : > { %1256 = vmax.xlane.f32.xlu1 %v1255_v49 }
 0xb1b   : > { %v1252_v50 = vsel %vm265_vm3, %v1244_v48, -inf }
 0xb1c   : > { %1253 = vmax.xlane.f32.xlu0 %v1252_v50 }
 0xb2b   : > { %1276 = vrot.lane.b32.xlu1 %v2487_v29, %s2264_s23 }
 0xb2f   : > { %1369 = vrot.lane.b32.xlu1 %v2448_v60, %s2266_s24 }
 0xb33   : > { %1367 = vrot.lane.b32.xlu1 %v2457_v5, %s2266_s24 }
 0xb37   : > { %1365 = vrot.lane.b32.xlu1 %v2469_v6, %s2266_s24 }
 0xba3   : > { %v1257_v51 = vpop.xlane.xlu1 %1256 }
 0xba4   : > { %v1259_v52 = vsub.f32 %v1249_v46, %v1257_v51 }
 0xba5   : > { %v1254_v53 = vpop.xlane.xlu0 %1253 }
 0xba6   : > { %v1262_v54 = vmul.f32 1.442695, %v1259_v52  ;;  %v1258_v55 = vsub.f32 %v1244_v48, %v1254_v53 }
 0xba7   : > { %v1277_v62 = vpop.permute.xlu1 %1276 }
 0xba8   : > { %2199 = vpow2.f32 %v1262_v54  ;;  %v1260_v56 = vmul.f32 1.442695, %v1258_v55 }
 0xbaa   : > { %2201 = vpow2.f32 %v1260_v56 }
 0xbab   : > { %v1370_v13 = vpop.permute.xlu1 %1369 }
 0xbaf   : > { %v1368_v19 = vpop.permute.xlu1 %1367 }
 0xbb3   : > { %v1366_v20 = vpop.permute.xlu1 %1365 }
 0xbb5   : > { %v2200_v26 = vpop.eup %2199 }
 0xbb6   : > { %v1267_v57 = vsel %vm265_vm3, %v2200_v26, 0.0 }
 0xbb7   : > { %v2202_v58 = vpop.eup %2201  ;;  %1268 = vadd.xlane.f32.xlu0 %v1267_v57 }
 0xbb8   : > { %v1264_v59 = vsel %vm265_vm3, %v2202_v58, 0.0 }
 0xbbb   : > { %1265 = vadd.xlane.f32.xlu0 %v1264_v59 }
 0xbd1   : > { %1278 = vrot.lane.b32.xlu0 %v2484_v28, %s2264_s23 }
 0xbd5   : > { %1363 = vrot.lane.b32.xlu0 %v2453_v4, %s2266_s24 }
 0xc40   : > { %v1269_v61 = vpop.xlane.xlu0 %1268 }
 0xc41   : > { %2203 = vrcp.f32 %v1269_v61 }
 0xc44   : > { %v1266_v25 = vpop.xlane.xlu0 %1265 }
 0xc45   : > { %2205 = vrcp.f32 %v1266_v25 }
 0xc48   : > { %v1279_v63 = vpop.permute.xlu0 %1278 }
 0xc49   : > { %2098 = vmatprep.subr.mxu0 %v1279_v63 }
 0xc4a   : > { %2099 = vmatpush3.msra.mxu0 %v1279_v63 }
 0xc4b   : > { %2100 = vmatprep.subr.mxu0 %v1277_v62 }
 0xc4c   : > { %2101 = vmatpush3.msra.mxu0 %v1277_v62  ;;  %v1364_v18 = vpop.permute.xlu0 %1363 }
 0xc4d   : > { %2105 = vmatprep.subr.msk.mxu0 %vm177_vm0, %v1370_v13 }
 0xc4e   : > { %v2204_v14 = vpop.eup %2203 }
 0xc4f   : > { %v1273_v17 = vmul.f32 %v2204_v14, %v2200_v26 }
 0xc52   : > { %v2206_v15 = vpop.eup %2205 }
 0xc53   : > { %v1272_v16 = vmul.f32 %v2206_v15, %v2202_v58 }
 0xc55   : > { %2102 = vmatprep.mubr.msk.f32.mxu0 %vm265_vm3, %v1272_v16 }
 0xc56   : > { %2103 = vmatmul.mubr.msk.f32.vlgmr.msra.gmra.mxu0 %vm265_vm3, %v1273_v17 }
 0xc57   : > { %2106 = vmatpush3.xpose.msk.msra.mxu0 %vm177_vm0, %v1370_v13  ;;  %2109 = vmatprep.mubr.msk.f32.mxu0 %vm177_vm0, %v1364_v18 }
 0xc58   : > { %2107 = vmatprep.subr.msk.mxu0 %vm177_vm0, %v1368_v19 }
 0xc5b   : > { %2108 = vmatpush3.xpose.msk.msra.mxu0 %vm177_vm0, %v1368_v19 }
 0xc5e   : > { %2110 = vmatmul.mubr.msk.f32.vlgmr.msra.gmra.mxu0 %vm177_vm0, %v1366_v20 }
 0xd16   : > { %v2539_v21 = vpop.f32.mrf.mxu0 }
 0xd18   : > { %v2541_v22 = vpop.f32.mrf.mxu0 }
 0xd1e   : > { %v2111_v23 = vpop.f32.mrf.mxu0 }
 0xd1f   : > { %v1451_v24 = vadd.f32 %v2111_v23, %v2343_v9 }
 0xd20   : > { %v1445_v27 = vpop.f32.mrf.mxu0 }
 0xd21   : > { %v1446_v0 = vadd.f32 %v1445_v27, %v2341_v8  ;;  %v1457_v1 = vsel %vm265_vm3, %v1451_v24, -inf }
 0xd22   : > { %1458 = vmax.xlane.f32.xlu1 %v1457_v1 }
 0xd23   : > { %v1454_v3 = vsel %vm265_vm3, %v1446_v0, -inf }
 0xd24   : > { %1455 = vmax.xlane.f32.xlu0 %v1454_v3 }
 0xd33   : > { %1476 = vrot.lane.b32.xlu1 %v2487_v29, %s2266_s24 }
 0xd37   : > { %1569 = vrot.lane.b32.xlu1 %v2448_v60, %s2267_s25 }
 0xd3b   : > { %1567 = vrot.lane.b32.xlu1 %v2457_v5, %s2267_s25 }
 0xd3f   : > { %1565 = vrot.lane.b32.xlu1 %v2469_v6, %s2267_s25 }
 0xdab   : > { %v1459_v30 = vpop.xlane.xlu1 %1458 }
 0xdac   : > { %v1461_v31 = vsub.f32 %v1451_v24, %v1459_v30 }
 0xdad   : > { %v1456_v32 = vpop.xlane.xlu0 %1455 }
 0xdae   : > { %v1464_v33 = vmul.f32 1.442695, %v1461_v31  ;;  %v1460_v34 = vsub.f32 %v1446_v0, %v1456_v32 }
 0xdaf   : > { %v1477_v42 = vpop.permute.xlu1 %1476 }
 0xdb0   : > { %2207 = vpow2.f32 %v1464_v33  ;;  %v1462_v35 = vmul.f32 1.442695, %v1460_v34 }
 0xdb2   : > { %2209 = vpow2.f32 %v1462_v35 }
 0xdb3   : > { %v1570_v46 = vpop.permute.xlu1 %1569 }
 0xdbd   : > { %v2208_v2 = vpop.eup %2207 }
 0xdbe   : > { %v1469_v36 = vsel %vm265_vm3, %v2208_v2, 0.0 }
 0xdbf   : > { %v2210_v41 = vpop.eup %2209  ;;  %1470 = vadd.xlane.f32.xlu0 %v1469_v36 }
 0xdc0   : > { %v1466_v60 = vsel %vm265_vm3, %v2210_v41, 0.0 }
 0xdc3   : > { %1467 = vadd.xlane.f32.xlu0 %v1466_v60 }
 0xdd9   : > { %1478 = vrot.lane.b32.xlu0 %v2484_v28, %s2266_s24 }
 0xddd   : > { %1563 = vrot.lane.b32.xlu0 %v2453_v4, %s2267_s25  ;;  %v1568_v4 = vpop.permute.xlu1 %1567 }
 0xde1   : > { %v1566_v52 = vpop.permute.xlu1 %1565 }
 0xe48   : > { %v1471_v5 = vpop.xlane.xlu0 %1470 }
 0xe49   : > { %2211 = vrcp.f32 %v1471_v5 }
 0xe4c   : > { %v1468_v6 = vpop.xlane.xlu0 %1467 }
 0xe4d   : > { %2213 = vrcp.f32 %v1468_v6 }
 0xe50   : > { %v1479_v45 = vpop.permute.xlu0 %1478 }
 0xe51   : > { %2112 = vmatprep.subr.mxu1 %v1479_v45 }
 0xe52   : > { %2113 = vmatpush3.msra.mxu1 %v1479_v45 }
 0xe53   : > { %2114 = vmatprep.subr.mxu1 %v1477_v42 }
 0xe54   : > { %2115 = vmatpush3.msra.mxu1 %v1477_v42  ;;  %v1564_v51 = vpop.permute.xlu0 %1563 }
 0xe55   : > { %2119 = vmatprep.subr.msk.mxu1 %vm177_vm0, %v1570_v46 }
 0xe56   : > { %v2212_v47 = vpop.eup %2211 }
 0xe57   : > { %v1475_v50 = vmul.f32 %v2212_v47, %v2208_v2 }
 0xe5a   : > { %v2214_v48 = vpop.eup %2213 }
 0xe5b   : > { %v1474_v49 = vmul.f32 %v2214_v48, %v2210_v41 }
 0xe5d   : > { %2116 = vmatprep.mubr.msk.f32.mxu1 %vm265_vm3, %v1474_v49 }
 0xe5e   : > { %2117 = vmatmul.mubr.msk.f32.vlgmr.msra.gmra.mxu1 %vm265_vm3, %v1475_v50 }
 0xe5f   : > { %2120 = vmatpush3.xpose.msk.msra.mxu1 %vm177_vm0, %v1570_v46  ;;  %2123 = vmatprep.mubr.msk.f32.mxu1 %vm177_vm0, %v1564_v51 }
 0xe60   : > { %2121 = vmatprep.subr.msk.mxu1 %vm177_vm0, %v1568_v4 }
 0xe63   : > { %2122 = vmatpush3.xpose.msk.msra.mxu1 %vm177_vm0, %v1568_v4 }
 0xe66   : > { %2124 = vmatmul.mubr.msk.f32.vlgmr.msra.gmra.mxu1 %vm177_vm0, %v1566_v52 }
 0xf1e   : > { %v2118_v53 = vpop.f32.mrf.mxu1 }
 0xf20   : > { %v1554_v54 = vpop.f32.mrf.mxu1 }
 0xf26   : > { %v2125_v55 = vpop.f32.mrf.mxu1 }
 0xf27   : > { %v1651_v56 = vadd.f32 %v2125_v55, %v2343_v9 }
 0xf28   : > { %v1645_v26 = vpop.f32.mrf.mxu1 }
 0xf29   : > { %v1646_v57 = vadd.f32 %v1645_v26, %v2341_v8  ;;  %v1657_v58 = vsel %vm265_vm3, %v1651_v56, -inf }
 0xf2a   : > { %1658 = vmax.xlane.f32.xlu1 %v1657_v58 }
 0xf2b   : > { %v1654_v59 = vsel %vm265_vm3, %v1646_v57, -inf }
 0xf2c   : > { %1655 = vmax.xlane.f32.xlu0 %v1654_v59 }
 0xf3b   : > { %1676 = vrot.lane.b32.xlu1 %v2487_v29, %s2267_s25 }
 0xf3f   : > { %1765 = vrot.lane.b32.xlu1 %v2405_v10, %s2267_s25 }
 0xf43   : > { %1767 = vrot.lane.b32.xlu1 %v2403_v7, %s2267_s25 }
 0xf47   : > { %1791 = vrot.lane.b32.xlu1 %v2539_v21, %s2267_s25 }
 0xf4b   : > { %1775 = vrot.lane.b32.xlu1 %v2433_v39, %s2266_s24 }
 0xf4f   : > { %1799 = vrot.lane.b32.xlu1 %v2118_v53, %s2266_s24 }
 0xf53   : > { %1783 = vrot.lane.b32.xlu1 %v2473_v11, %s2264_s23 }
 0xfb3   : > { %v1659_v8 = vpop.xlane.xlu1 %1658 }
 0xfb4   : > { %v1661_v9 = vsub.f32 %v1651_v56, %v1659_v8 }
 0xfb5   : > { %v1656_v29 = vpop.xlane.xlu0 %1655 }
 0xfb6   : > { %v1664_v61 = vmul.f32 1.442695, %v1661_v9  ;;  %v1660_v25 = vsub.f32 %v1646_v57, %v1656_v29 }
 0xfb7   : > { %v1677_v10 = vpop.permute.xlu1 %1676 }
 0xfb8   : > { %2215 = vpow2.f32 %v1664_v61  ;;  %v1662_v7 = vmul.f32 1.442695, %v1660_v25 }
 0xfba   : > { %2217 = vpow2.f32 %v1662_v7 }
 0xfbb   : > { %v1766_v62 = vpop.permute.xlu1 %1765 }
 0xfbc   : > { %v1811_v32 = vsel %vm177_vm0, %v2375_v38, %v1766_v62 }
 0xfbf   : > { %v1768_v63 = vpop.permute.xlu1 %1767 }
 0xfc0   : > { %v1812_v20 = vsel %vm177_vm0, %v2373_v37, %v1768_v63 }
 0xfc3   : > { %v1792_v13 = vpop.permute.xlu1 %1791 }
 0xfc4   : > { %v1820_v17 = vsel %vm177_vm0, %v2509_v43, %v1792_v13 }
 0xfc5   : > { %v2216_v14 = vpop.eup %2215 }
 0xfc6   : > { %v1669_v39 = vsel %vm265_vm3, %v2216_v14, 0.0 }
 0xfc7   : > { %v2218_v15 = vpop.eup %2217  ;;  %v1776_v16 = vpop.permute.xlu1 %1775  ;;  %1670 = vadd.xlane.f32.xlu0 %v1669_v39 }
 0xfc8   : > { %v1666_v11 = vsel %vm265_vm3, %v2218_v15, 0.0  ;;  %v1815_v21 = vsel %vm1813_vm4, %v1812_v20, %v1776_v16 }
 0xfcb   : > { %v1800_v18 = vpop.permute.xlu1 %1799  ;;  %1667 = vadd.xlane.f32.xlu0 %v1666_v11 }
 0xfcc   : > { %v1822_v19 = vsel %vm1813_vm4, %v1820_v17, %v1800_v18 }
 0xfcf   : > { %v1784_v23 = vpop.permute.xlu1 %1783 }
 0xfd0   : > { %v1818_v43 = vsel %vm1816_vm5, %v1815_v21, %v1784_v23 }
 0xfd1   : > { %1827 = vst [vmem:[%s2597_s29 + $0x10] sm:$0xff] %v1818_v43 }
 0xfe1   : > { %1678 = vrot.lane.b32.xlu0 %v2484_v28, %s2267_s25 }
 0xfe5   : > { %1789 = vrot.lane.b32.xlu0 %v2541_v22, %s2267_s25 }
 0xfe9   : > { %1773 = vrot.lane.b32.xlu0 %v2435_v40, %s2266_s24 }
 0xfed   : > { %1797 = vrot.lane.b32.xlu0 %v1554_v54, %s2266_s24 }
 0xff1   : > { %1781 = vrot.lane.b32.xlu0 %v2475_v12, %s2264_s23 }
0x1050   : > { %v1671_v37 = vpop.xlane.xlu0 %1670 }
0x1051   : > { %2219 = vrcp.f32 %v1671_v37 }
0x1054   : > { %v1668_v24 = vpop.xlane.xlu0 %1667 }
0x1055   : > { %2221 = vrcp.f32 %v1668_v24 }
0x1058   : > { %v1679_v27 = vpop.permute.xlu0 %1678 }
0x1059   : > { %2126 = vmatprep.subr.mxu0 %v1679_v27 }
0x105a   : > { %2127 = vmatpush3.msra.mxu0 %v1679_v27 }
0x105b   : > { %2128 = vmatprep.subr.mxu0 %v1677_v10 }
0x105c   : > { %v1790_v28 = vpop.permute.xlu0 %1789  ;;  %2129 = vmatpush3.msra.mxu0 %v1677_v10 }
0x105d   : > { %v1819_v3 = vsel %vm177_vm0, %v2511_v44, %v1790_v28 }
0x105e   : > { %v2220_v0 = vpop.eup %2219 }
0x105f   : > { %v1675_v12 = vmul.f32 %v2220_v0, %v2216_v14 }
0x1060   : > { %v1774_v22 = vpop.permute.xlu0 %1773 }
0x1061   : > { %v1814_v33 = vsel %vm1813_vm4, %v1811_v32, %v1774_v22 }
0x1062   : > { %v2222_v1 = vpop.eup %2221 }
0x1063   : > { %v1674_v40 = vmul.f32 %v2222_v1, %v2218_v15 }
0x1064   : > { %v1798_v30 = vpop.permute.xlu0 %1797 }
0x1065   : > { %v1821_v31 = vsel %vm1813_vm4, %v1819_v3, %v1798_v30  ;;  %2130 = vmatprep.mubr.msk.f32.mxu0 %vm265_vm3, %v1674_v40 }
0x1066   : > { %2131 = vmatmul.mubr.msk.f32.vlgmr.msra.gmra.mxu0 %vm265_vm3, %v1675_v12 }
0x1068   : > { %v1782_v34 = vpop.permute.xlu0 %1781 }
0x1069   : > { %v1817_v35 = vsel %vm1816_vm5, %v1814_v33, %v1782_v34 }
0x106a   : > { %1825 = vst [vmem:[%s2597_s29] sm:$0xff] %v1817_v35 }
0x1126   : > { %v2132_v44 = vpop.f32.mrf.mxu0 }
0x1127   : > { %1807 = vrot.lane.b32.xlu1 %v2132_v44, %s2264_s23 }
0x1128   : > { %v1754_v2 = vpop.f32.mrf.mxu0 }
0x1129   : > { %1805 = vrot.lane.b32.xlu0 %v1754_v2, %s2264_s23 }
0x1199   : > { %v1808_v36 = vpop.permute.xlu1 %1807 }
0x119a   : > { %v1824_v41 = vsel %vm1816_vm5, %v1822_v19, %v1808_v36 }
0x119b   : > { %1828 = vst [vmem:[%s2597_s29 + $0x18] sm:$0xff] %v1824_v41  ;;  %v1806_v60 = vpop.permute.xlu0 %1805 }
0x119c   : > { %v1823_v5 = vsel %vm1816_vm5, %v1821_v31, %v1806_v60 }
0x119d   : > { %1826 = vst [vmem:[%s2597_s29 + $0x8] sm:$0xff] %v1823_v5 }
0x119e PF: > { %s13_s9 = sadd.s32 1, %s2259_s9  }
0x119f   : > { %p10_p1 = scmp.ge.s32.totalorder %s13_s9, 4  }
0x11a1   :  { %12 = sbr.rel (!%p10_p1) target bundleno = 1 (0x1), region = 63 }
0x11a6   :  { %1850 = vsyncpa [#allocation3], 1 }
0x11a7   :  { %1852 = vsyncpa [#allocation3 + $0x1], 1 }

// kernel: decoder_layer.9
= control target key start
LH: loop header
LB: loop body
LE: loop exit
PB: predicated region body
PF: predicated region fallthrough
CT: control target
= control target key end

     0   :  { %10 = vsyncpa [#allocation5], 0  ;;  %s1345_s0 = inlined_call_operand.hbm [shape: f32[32,256], index: 0, kind: input, shape index: {}]   ;;  %s1346_s1 = inlined_call_operand.hbm [shape: f32[1,256], index: 1, kind: input, shape index: {}]   ;;  %s1347_s2 = inlined_call_operand.hbm [shape: f32[1,256], index: 2, kind: input, shape index: {}]   ;;  %s1348_s3 = inlined_call_operand.hbm [shape: f32[256,768], index: 3, kind: input, shape index: {}]   ;;  %s1349_s4 = inlined_call_operand.vmem [shape: f32[1,768], index: 4, kind: input, shape index: {}]   ;;  %s1350_s5 = inlined_call_operand.vmem [shape: f32[32,768], index: 5, kind: output, shape index: {}]  }
   0x1   :  { %11 = vsyncpa [#allocation7], 0 }
   0x2   :  { %12 = vsyncpa [#allocation10], 0  ;;  %s1083_s18 = smov [#allocation6]   ;;  %s1084_s20 = smov [#allocation4]  }
   0x3   :  { %s31_s19 = sshll.u32 %s1083_s18, 4  ;;  %s18_s21 = sshll.u32 %s1084_s20, 4  ;;  %s32_s19 = int_to_ptr.vmem [resolvable:$true] %s31_s19  ;;  %s19_s21 = int_to_ptr.vmem [resolvable:$true] %s18_s21 }
   0x4   :  { %s1005_s22 = scalar_lea.vmem %s32_s19, 32  ;;  %p1010_p1 = scmp.lt.s32.totalorder %s32_s19, %s32_s19 }
   0x5   :  { %p1006_p0 = scmp.ne.s32.totalorder %s32_s19, %s1005_s22  ;;  %p1011_p2 = scmp.lt.s32.totalorder %s1005_s22, %s1005_s22 }
   0x7   :  { %p1012_p3 = por %p1011_p2, %p1010_p1 }
   0x9   :  { %p1013_p4 = pnand %p1012_p3, %p1006_p0 }
   0xb   :  { %1016 = shalt.err (!%p1013_p4)
}
   0xc   :  { %34 = dma.hbm_to_vmem [thread:$0]  %s1346_s1, 32, %s32_s19, [#allocation7]  }
   0xd   :  { %s1025_s25 = scalar_lea.vmem %s19_s21, 1024  ;;  %p1030_p6 = scmp.lt.s32.totalorder %s19_s21, %s19_s21 }
   0xe   :  { %p1026_p5 = scmp.ne.s32.totalorder %s19_s21, %s1025_s25  ;;  %p1031_p7 = scmp.lt.s32.totalorder %s1025_s25, %s1025_s25 }
  0x10   :  { %p1032_p8 = por %p1031_p7, %p1030_p6 }
  0x12   :  { %p1033_p9 = pnand %p1032_p8, %p1026_p5 }
  0x14   :  { %1036 = shalt.err (!%p1033_p9)
}
  0x15   :  { %s1085_s26 = smov 256   ;;  %s1086_s27 = smov 16  }
  0x16   :  { %24 = dma.hbm_to_vmem [thread:$0]  %s1345_s0, 1024, %s19_s21, [#allocation5], %s1085_s26, %s1085_s26, %s1086_s27  }
  0x17   :  { %s1087_s30 = smov [#allocation8]   ;;  %s1088_s7 = smov [#allocation9]  }
  0x18   :  { %s41_s6 = sshll.u32 %s1087_s30, 4  ;;  %s50_s8 = sshll.u32 %s1088_s7, 4  ;;  %s42_s6 = int_to_ptr.vmem [resolvable:$true] %s41_s6  ;;  %s51_s8 = int_to_ptr.vmem [resolvable:$true] %s50_s8 }
  0x19   :  { %s1045_s1 = scalar_lea.vmem %s42_s6, 32  ;;  %p1050_p11 = scmp.lt.s32.totalorder %s42_s6, %s42_s6 }
  0x1a   :  { %p1046_p10 = scmp.ne.s32.totalorder %s42_s6, %s1045_s1  ;;  %p1051_p12 = scmp.lt.s32.totalorder %s1045_s1, %s1045_s1 }
  0x1c   :  { %p1052_p13 = por %p1051_p12, %p1050_p11 }
  0x1e   :  { %p1053_p0 = pnand %p1052_p13, %p1046_p10 }
  0x20   :  { %1056 = shalt.err (!%p1053_p0)
}
  0x21   :  { %44 = dma.hbm_to_vmem [thread:$0]  %s1347_s2, 32, %s42_s6, [#allocation7]  }
  0x22   :  { %s1065_s11 = scalar_lea.vmem %s51_s8, 24576  ;;  %p1070_p2 = scmp.lt.s32.totalorder %s51_s8, %s51_s8 }
  0x23   :  { %p1066_p1 = scmp.ne.s32.totalorder %s51_s8, %s1065_s11  ;;  %p1071_p3 = scmp.lt.s32.totalorder %s1065_s11, %s1065_s11 }
  0x25   :  { %p1072_p4 = por %p1071_p3, %p1070_p2 }
  0x27   :  { %p1073_p5 = pnand %p1072_p4, %p1066_p1 }
  0x29   :  { %1076 = shalt.err (!%p1073_p5)
}
  0x2a   :  { %s1089_s0 = smov 768   ;;  %s1090_s12 = smov 48  }
  0x2b   :  { %56 = dma.hbm_to_vmem [thread:$0]  %s1348_s3, 24576, %s51_s8, [#allocation10], %s1089_s0, %s1089_s0, %s1090_s12  }
  0x2c   :  { %1077 = dma.done.wait [#allocation5], 1024  }
  0x2d   :  { %1078 = vsyncadd [#allocation5], 4294966272 }
  0x2e   :  { %1079 = dma.done.wait [#allocation7], 64  }
  0x2f   :  { %1080 = vsyncadd [#allocation7], 4294967232 }
  0x30   :  { %1081 = dma.done.wait [#allocation10], 24576  }
  0x31   :  { %1082 = vsyncadd [#allocation10], 4294942720  ;;  %v1133_v0 = vld [vmem:[#allocation4] sm:$0xff]  ;;  %v1135_v1 = vld [vmem:[#allocation4 + $0x8] sm:$0xff] }
  0x32   :  { %v1137_v2 = vld [vmem:[#allocation4 + $0x20] sm:$0xff]  ;;  %v85_v3 = vadd.f32 %v1135_v1, %v1133_v0  ;;  %v1141_v4 = vld [vmem:[#allocation4 + $0x28] sm:$0xff]  ;;  %v1143_v5 = vld [vmem:[#allocation4 + $0x10] sm:$0xff] }
  0x33   :  { %v1145_v6 = vld [vmem:[#allocation4 + $0x18] sm:$0xff]  ;;  %v91_v7 = vadd.f32 %v1141_v4, %v1137_v2  ;;  %v1149_v8 = vld [vmem:[#allocation4 + $0x30] sm:$0xff]  ;;  %v380_v15 = vld [vmem:[#allocation9 + $0x2e0] sm:$0xff] }
  0x34   :  { %v1151_v9 = vld [vmem:[#allocation4 + $0x38] sm:$0xff]  ;;  %86 = vadd.xlane.f32.xlu0 %v85_v3  ;;  %v88_v10 = vadd.f32 %v1145_v6, %v1143_v5  ;;  %v381_v13 = vld [vmem:[#allocation9 + $0x2e8] sm:$0xff]  ;;  %v372_v18 = vld [vmem:[#allocation9 + $0x2a0] sm:$0xff] }
  0x35   :  { %92 = vadd.xlane.f32.xlu1 %v91_v7  ;;  %v94_v11 = vadd.f32 %v1151_v9, %v1149_v8  ;;  %v379_v12 = vld [vmem:[#allocation9 + $0x2d8] sm:$0xff]  ;;  %v378_v14 = vld [vmem:[#allocation9 + $0x2d0] sm:$0xff]  ;;  %569 = vmatprep.subr.mxu1 %v381_v13  ;;  %v373_v16 = vld [vmem:[#allocation9 + $0x2a8] sm:$0xff] }
  0x36   :  { %480 = vmatprep.subr.mxu0 %v379_v12  ;;  %v375_v17 = vld [vmem:[#allocation9 + $0x2b8] sm:$0xff]  ;;  %570 = vmatpush1.msra.mxu1 %v380_v15  ;;  %v374_v19 = vld [vmem:[#allocation9 + $0x2b0] sm:$0xff]  ;;  %v369_v21 = vld [vmem:[#allocation9 + $0x288] sm:$0xff] }
  0x37   :  { %481 = vmatpush1.msra.mxu0 %v378_v14  ;;  %v367_v20 = vld [vmem:[#allocation9 + $0x278] sm:$0xff]  ;;  %571 = vmatprep.subr.mxu1 %v375_v17  ;;  %v366_v22 = vld [vmem:[#allocation9 + $0x270] sm:$0xff]  ;;  %v368_v23 = vld [vmem:[#allocation9 + $0x280] sm:$0xff] }
  0x38   :  { %89 = vadd.xlane.f32.xlu0 %v88_v10  ;;  %482 = vmatprep.subr.mxu0 %v373_v16  ;;  %v361_v24 = vld [vmem:[#allocation9 + $0x248] sm:$0xff]  ;;  %v363_v25 = vld [vmem:[#allocation9 + $0x258] sm:$0xff]  ;;  %v360_v26 = vld [vmem:[#allocation9 + $0x240] sm:$0xff] }
  0x39   :  { %95 = vadd.xlane.f32.xlu1 %v94_v11  ;;  %483 = vmatpush1.msra.mxu0 %v372_v18  ;;  %v362_v27 = vld [vmem:[#allocation9 + $0x250] sm:$0xff]  ;;  %v355_v28 = vld [vmem:[#allocation9 + $0x218] sm:$0xff]  ;;  %v357_v29 = vld [vmem:[#allocation9 + $0x228] sm:$0xff] }
  0x3a   :  { %572 = vmatpush1.msra.mxu1 %v374_v19  ;;  %484 = vmatprep.subr.mxu0 %v367_v20  ;;  %v354_v30 = vld [vmem:[#allocation9 + $0x210] sm:$0xff]  ;;  %v356_v31 = vld [vmem:[#allocation9 + $0x220] sm:$0xff]  ;;  %v349_v32 = vld [vmem:[#allocation9 + $0x1e8] sm:$0xff] }
  0x3b   :  { %573 = vmatprep.subr.mxu1 %v369_v21  ;;  %485 = vmatpush1.msra.mxu0 %v366_v22  ;;  %v351_v33 = vld [vmem:[#allocation9 + $0x1f8] sm:$0xff]  ;;  %v348_v34 = vld [vmem:[#allocation9 + $0x1e0] sm:$0xff]  ;;  %v350_v35 = vld [vmem:[#allocation9 + $0x1f0] sm:$0xff] }
  0x3c   :  { %574 = vmatpush1.msra.mxu1 %v368_v23  ;;  %486 = vmatprep.subr.mxu0 %v361_v24  ;;  %v343_v36 = vld [vmem:[#allocation9 + $0x1b8] sm:$0xff]  ;;  %v345_v37 = vld [vmem:[#allocation9 + $0x1c8] sm:$0xff]  ;;  %v342_v38 = vld [vmem:[#allocation9 + $0x1b0] sm:$0xff] }
  0x3d   :  { %575 = vmatprep.subr.mxu1 %v363_v25  ;;  %487 = vmatpush1.msra.mxu0 %v360_v26  ;;  %v344_v39 = vld [vmem:[#allocation9 + $0x1c0] sm:$0xff]  ;;  %v337_v40 = vld [vmem:[#allocation9 + $0x188] sm:$0xff]  ;;  %v339_v41 = vld [vmem:[#allocation9 + $0x198] sm:$0xff] }
  0x3e   :  { %576 = vmatpush1.msra.mxu1 %v362_v27  ;;  %488 = vmatprep.subr.mxu0 %v355_v28  ;;  %v336_v42 = vld [vmem:[#allocation9 + $0x180] sm:$0xff]  ;;  %v338_v43 = vld [vmem:[#allocation9 + $0x190] sm:$0xff]  ;;  %v331_v44 = vld [vmem:[#allocation9 + $0x158] sm:$0xff] }
  0x3f   :  { %577 = vmatprep.subr.mxu1 %v357_v29  ;;  %489 = vmatpush1.msra.mxu0 %v354_v30  ;;  %v333_v45 = vld [vmem:[#allocation9 + $0x168] sm:$0xff]  ;;  %v330_v46 = vld [vmem:[#allocation9 + $0x150] sm:$0xff]  ;;  %v332_v47 = vld [vmem:[#allocation9 + $0x160] sm:$0xff] }
  0x40   :  { %578 = vmatpush1.msra.mxu1 %v356_v31  ;;  %490 = vmatprep.subr.mxu0 %v349_v32  ;;  %v325_v48 = vld [vmem:[#allocation9 + $0x128] sm:$0xff]  ;;  %v327_v49 = vld [vmem:[#allocation9 + $0x138] sm:$0xff]  ;;  %v324_v50 = vld [vmem:[#allocation9 + $0x120] sm:$0xff] }
  0x41   :  { %579 = vmatprep.subr.mxu1 %v351_v33  ;;  %491 = vmatpush1.msra.mxu0 %v348_v34  ;;  %v326_v51 = vld [vmem:[#allocation9 + $0x130] sm:$0xff]  ;;  %v319_v52 = vld [vmem:[#allocation9 + $0xf8] sm:$0xff]  ;;  %v321_v53 = vld [vmem:[#allocation9 + $0x108] sm:$0xff] }
  0x42   :  { %580 = vmatpush1.msra.mxu1 %v350_v35  ;;  %492 = vmatprep.subr.mxu0 %v343_v36  ;;  %v318_v54 = vld [vmem:[#allocation9 + $0xf0] sm:$0xff]  ;;  %v320_v55 = vld [vmem:[#allocation9 + $0x100] sm:$0xff]  ;;  %v315_v21 = vld [vmem:[#allocation9 + $0xd8] sm:$0xff] }
  0x43   :  { %581 = vmatprep.subr.mxu1 %v345_v37  ;;  %493 = vmatpush1.msra.mxu0 %v342_v38  ;;  %v312_v22 = vld [vmem:[#allocation9 + $0xc0] sm:$0xff]  ;;  %v314_v23 = vld [vmem:[#allocation9 + $0xd0] sm:$0xff]  ;;  %v307_v24 = vld [vmem:[#allocation9 + $0x98] sm:$0xff] }
  0x44   :  { %582 = vmatpush1.msra.mxu1 %v344_v39  ;;  %494 = vmatprep.subr.mxu0 %v337_v40  ;;  %v309_v25 = vld [vmem:[#allocation9 + $0xa8] sm:$0xff]  ;;  %v306_v26 = vld [vmem:[#allocation9 + $0x90] sm:$0xff]  ;;  %v308_v27 = vld [vmem:[#allocation9 + $0xa0] sm:$0xff] }
  0x45   :  { %583 = vmatprep.subr.mxu1 %v339_v41  ;;  %495 = vmatpush1.msra.mxu0 %v336_v42  ;;  %v301_v28 = vld [vmem:[#allocation9 + $0x68] sm:$0xff]  ;;  %v303_v29 = vld [vmem:[#allocation9 + $0x78] sm:$0xff]  ;;  %v300_v30 = vld [vmem:[#allocation9 + $0x60] sm:$0xff] }
  0x46   :  { %584 = vmatpush1.msra.mxu1 %v338_v43  ;;  %496 = vmatprep.subr.mxu0 %v331_v44  ;;  %v302_v31 = vld [vmem:[#allocation9 + $0x70] sm:$0xff]  ;;  %v295_v32 = vld [vmem:[#allocation9 + $0x38] sm:$0xff]  ;;  %v297_v33 = vld [vmem:[#allocation9 + $0x48] sm:$0xff] }
  0x47   :  { %585 = vmatprep.subr.mxu1 %v333_v45  ;;  %497 = vmatpush1.msra.mxu0 %v330_v46  ;;  %v294_v34 = vld [vmem:[#allocation9 + $0x30] sm:$0xff]  ;;  %v296_v35 = vld [vmem:[#allocation9 + $0x40] sm:$0xff]  ;;  %v289_v36 = vld [vmem:[#allocation9 + $0x8] sm:$0xff] }
  0x48   :  { %586 = vmatpush1.msra.mxu1 %v332_v47  ;;  %498 = vmatprep.subr.mxu0 %v325_v48  ;;  %v291_v37 = vld [vmem:[#allocation9 + $0x18] sm:$0xff]  ;;  %v288_v38 = vld [vmem:[#allocation9] sm:$0xff]  ;;  %v290_v39 = vld [vmem:[#allocation9 + $0x10] sm:$0xff] }
  0x49   :  { %587 = vmatprep.subr.mxu1 %v327_v49  ;;  %499 = vmatpush1.msra.mxu0 %v324_v50  ;;  %v475_v40 = vld [vmem:[#allocation9 + $0x5d8] sm:$0xff]  ;;  %v477_v41 = vld [vmem:[#allocation9 + $0x5e8] sm:$0xff]  ;;  %v474_v42 = vld [vmem:[#allocation9 + $0x5d0] sm:$0xff] }
  0x4a   :  { %588 = vmatpush1.msra.mxu1 %v326_v51  ;;  %500 = vmatprep.subr.mxu0 %v319_v52  ;;  %v476_v43 = vld [vmem:[#allocation9 + $0x5e0] sm:$0xff]  ;;  %v469_v44 = vld [vmem:[#allocation9 + $0x5a8] sm:$0xff]  ;;  %v471_v45 = vld [vmem:[#allocation9 + $0x5b8] sm:$0xff] }
  0x4b   :  { %589 = vmatprep.subr.mxu1 %v321_v53  ;;  %501 = vmatpush1.msra.mxu0 %v318_v54  ;;  %v468_v46 = vld [vmem:[#allocation9 + $0x5a0] sm:$0xff]  ;;  %v470_v47 = vld [vmem:[#allocation9 + $0x5b0] sm:$0xff]  ;;  %v463_v48 = vld [vmem:[#allocation9 + $0x578] sm:$0xff] }
  0x4c   :  { %590 = vmatpush1.msra.mxu1 %v320_v55  ;;  %v465_v49 = vld [vmem:[#allocation9 + $0x588] sm:$0xff]  ;;  %v462_v50 = vld [vmem:[#allocation9 + $0x570] sm:$0xff]  ;;  %v464_v51 = vld [vmem:[#allocation9 + $0x580] sm:$0xff] }
  0x4d   :  { %591 = vmatprep.subr.mxu1 %v315_v21  ;;  %v457_v52 = vld [vmem:[#allocation9 + $0x548] sm:$0xff]  ;;  %v459_v53 = vld [vmem:[#allocation9 + $0x558] sm:$0xff]  ;;  %v456_v54 = vld [vmem:[#allocation9 + $0x540] sm:$0xff] }
  0x4e   :  { %592 = vmatpush1.msra.mxu1 %v314_v23  ;;  %v458_v55 = vld [vmem:[#allocation9 + $0x550] sm:$0xff]  ;;  %v423_v21 = vld [vmem:[#allocation9 + $0x438] sm:$0xff] }
  0x4f   :  { %593 = vmatprep.subr.mxu1 %v309_v25  ;;  %v422_v23 = vld [vmem:[#allocation9 + $0x430] sm:$0xff]  ;;  %v417_v25 = vld [vmem:[#allocation9 + $0x408] sm:$0xff] }
  0x50   :  { %594 = vmatpush1.msra.mxu1 %v308_v27  ;;  %v416_v27 = vld [vmem:[#allocation9 + $0x400] sm:$0xff] }
  0x51   :  { %595 = vmatprep.subr.mxu1 %v303_v29  ;;  %v411_v29 = vld [vmem:[#allocation9 + $0x3d8] sm:$0xff] }
  0x52   :  { %596 = vmatpush1.msra.mxu1 %v302_v31  ;;  %v410_v31 = vld [vmem:[#allocation9 + $0x3d0] sm:$0xff] }
  0x53   :  { %597 = vmatprep.subr.mxu1 %v297_v33  ;;  %v405_v33 = vld [vmem:[#allocation9 + $0x3a8] sm:$0xff] }
  0x54   :  { %598 = vmatpush1.msra.mxu1 %v296_v35  ;;  %v404_v35 = vld [vmem:[#allocation9 + $0x3a0] sm:$0xff] }
  0x55   :  { %599 = vmatprep.subr.mxu1 %v291_v37  ;;  %v399_v37 = vld [vmem:[#allocation9 + $0x378] sm:$0xff] }
  0x56   :  { %600 = vmatpush1.msra.mxu1 %v290_v39  ;;  %v398_v39 = vld [vmem:[#allocation9 + $0x370] sm:$0xff] }
  0x57   :  { %601 = vmatprep.subr.mxu1 %v477_v41  ;;  %v393_v41 = vld [vmem:[#allocation9 + $0x348] sm:$0xff] }
  0x58   :  { %602 = vmatpush2.msra.mxu1 %v476_v43  ;;  %v392_v43 = vld [vmem:[#allocation9 + $0x340] sm:$0xff] }
  0x59   :  { %603 = vmatprep.subr.mxu1 %v471_v45  ;;  %v387_v45 = vld [vmem:[#allocation9 + $0x318] sm:$0xff] }
  0x5a   :  { %604 = vmatpush2.msra.mxu1 %v470_v47  ;;  %v386_v47 = vld [vmem:[#allocation9 + $0x310] sm:$0xff] }
  0x5b   :  { %605 = vmatprep.subr.mxu1 %v465_v49 }
  0x5c   :  { %606 = vmatpush2.msra.mxu1 %v464_v51 }
  0x5d   :  { %607 = vmatprep.subr.mxu1 %v459_v53 }
  0x5e   :  { %608 = vmatpush2.msra.mxu1 %v458_v55 }
  0xbd   :  { %v87_v56 = vpop.xlane.xlu0 %86 }
  0xbe   :  { %v98_v57 = vmul.f32 0.00390625, %v87_v56  ;;  %v93_v58 = vpop.xlane.xlu1 %92  ;;  %v451_v56 = vld [vmem:[#allocation9 + $0x518] sm:$0xff] }
  0xbf   :  { %v100_v59 = vmul.f32 0.00390625, %v93_v58  ;;  %v450_v58 = vld [vmem:[#allocation9 + $0x510] sm:$0xff] }
  0xc0   :  { %v1158_v60 = vsub.f32 %v1133_v0, %v98_v57  ;;  %v1161_v61 = vsub.f32 %v1135_v1, %v98_v57  ;;  %v453_v57 = vld [vmem:[#allocation9 + $0x528] sm:$0xff] }
  0xc1   :  { %v1164_v62 = vsub.f32 %v1137_v2, %v100_v59  ;;  %v1167_v63 = vsub.f32 %v1141_v4, %v100_v59  ;;  %v90_v3 = vpop.xlane.xlu0 %89  ;;  %609 = vmatprep.subr.mxu1 %v453_v57  ;;  %v452_v59 = vld [vmem:[#allocation9 + $0x520] sm:$0xff] }
  0xc2   :  { %v99_v7 = vmul.f32 0.00390625, %v90_v3  ;;  %v96_v10 = vpop.xlane.xlu1 %95  ;;  %v110_v11 = vmul.f32 %v1158_v60, %v1158_v60  ;;  %v111_v12 = vmul.f32 %v1161_v61, %v1161_v61  ;;  %610 = vmatpush2.msra.mxu1 %v452_v59  ;;  %v445_v3 = vld [vmem:[#allocation9 + $0x4e8] sm:$0xff] }
  0xc3   :  { %v101_v0 = vmul.f32 0.00390625, %v96_v10  ;;  %v114_v1 = vmul.f32 %v1164_v62, %v1164_v62  ;;  %v115_v2 = vmul.f32 %v1167_v63, %v1167_v63  ;;  %v444_v10 = vld [vmem:[#allocation9 + $0x4e0] sm:$0xff] }
  0xc4   :  { %v1178_v13 = vsub.f32 %v1143_v5, %v99_v7  ;;  %v1181_v4 = vsub.f32 %v1145_v6, %v99_v7  ;;  %v118_v14 = vadd.f32 %v111_v12, %v110_v11  ;;  %v447_v7 = vld [vmem:[#allocation9 + $0x4f8] sm:$0xff]  ;;  %v446_v11 = vld [vmem:[#allocation9 + $0x4f0] sm:$0xff] }
  0xc5   :  { %v1184_v15 = vsub.f32 %v1149_v8, %v101_v0  ;;  %v1187_v16 = vsub.f32 %v1151_v9, %v101_v0  ;;  %v124_v17 = vadd.f32 %v115_v2, %v114_v1  ;;  %v313_v9 = vld [vmem:[#allocation9 + $0xc8] sm:$0xff]  ;;  %611 = vmatprep.subr.mxu1 %v447_v7  ;;  %v439_v12 = vld [vmem:[#allocation9 + $0x4b8] sm:$0xff]  ;;  %v438_v1 = vld [vmem:[#allocation9 + $0x4b0] sm:$0xff] }
  0xc6   :  { %119 = vadd.xlane.f32.xlu0 %v118_v14  ;;  %v112_v18 = vmul.f32 %v1178_v13, %v1178_v13  ;;  %v113_v19 = vmul.f32 %v1181_v4, %v1181_v4  ;;  %502 = vmatprep.subr.mxu0 %v313_v9  ;;  %v441_v0 = vld [vmem:[#allocation9 + $0x4c8] sm:$0xff]  ;;  %v440_v2 = vld [vmem:[#allocation9 + $0x4c0] sm:$0xff] }
  0xc7   :  { %v116_v5 = vmul.f32 %v1184_v15, %v1184_v15  ;;  %v117_v6 = vmul.f32 %v1187_v16, %v1187_v16  ;;  %503 = vmatpush1.msra.mxu0 %v312_v22  ;;  %612 = vmatpush2.msra.mxu1 %v446_v11  ;;  %v433_v14 = vld [vmem:[#allocation9 + $0x488] sm:$0xff]  ;;  %v420_v22 = vld [vmem:[#allocation9 + $0x420] sm:$0xff] }
  0xc8   :  { %v121_v20 = vadd.f32 %v113_v19, %v112_v18  ;;  %504 = vmatprep.subr.mxu0 %v307_v24  ;;  %613 = vmatprep.subr.mxu1 %v441_v0  ;;  %v432_v18 = vld [vmem:[#allocation9 + $0x480] sm:$0xff]  ;;  %v434_v19 = vld [vmem:[#allocation9 + $0x490] sm:$0xff]  ;;  %v421_v9 = vld [vmem:[#allocation9 + $0x428] sm:$0xff] }
  0xc9   :  { %v127_v8 = vadd.f32 %v117_v6, %v116_v5  ;;  %505 = vmatpush1.msra.mxu0 %v306_v26  ;;  %614 = vmatpush2.msra.mxu1 %v440_v2  ;;  %v427_v5 = vld [vmem:[#allocation9 + $0x458] sm:$0xff]  ;;  %v429_v6 = vld [vmem:[#allocation9 + $0x468] sm:$0xff]  ;;  %v414_v26 = vld [vmem:[#allocation9 + $0x3f0] sm:$0xff] }
  0xca   :  { %125 = vadd.xlane.f32.xlu0 %v124_v17  ;;  %122 = vadd.xlane.f32.xlu1 %v121_v20  ;;  %v435_v17 = vld [vmem:[#allocation9 + $0x498] sm:$0xff]  ;;  %v426_v20 = vld [vmem:[#allocation9 + $0x450] sm:$0xff] }
  0xcb   :  { %506 = vmatprep.subr.mxu0 %v301_v28  ;;  %615 = vmatprep.subr.mxu1 %v435_v17  ;;  %v415_v24 = vld [vmem:[#allocation9 + $0x3f8] sm:$0xff]  ;;  %v409_v28 = vld [vmem:[#allocation9 + $0x3c8] sm:$0xff] }
  0xcc   :  { %507 = vmatpush1.msra.mxu0 %v300_v30  ;;  %616 = vmatpush2.msra.mxu1 %v434_v19  ;;  %v408_v30 = vld [vmem:[#allocation9 + $0x3c0] sm:$0xff] }
  0xcd   :  { %508 = vmatprep.subr.mxu0 %v295_v32  ;;  %617 = vmatprep.subr.mxu1 %v429_v6  ;;  %v403_v32 = vld [vmem:[#allocation9 + $0x398] sm:$0xff] }
  0xce   :  { %128 = vadd.xlane.f32.xlu1 %v127_v8  ;;  %509 = vmatpush1.msra.mxu0 %v294_v34  ;;  %v428_v8 = vld [vmem:[#allocation9 + $0x460] sm:$0xff]  ;;  %v402_v34 = vld [vmem:[#allocation9 + $0x390] sm:$0xff] }
  0xcf   :  { %510 = vmatprep.subr.mxu0 %v289_v36  ;;  %618 = vmatpush2.msra.mxu1 %v428_v8  ;;  %v397_v36 = vld [vmem:[#allocation9 + $0x368] sm:$0xff] }
  0xd0   :  { %511 = vmatpush1.msra.mxu0 %v288_v38  ;;  %619 = vmatprep.subr.mxu1 %v423_v21  ;;  %v396_v38 = vld [vmem:[#allocation9 + $0x360] sm:$0xff] }
  0xd1   :  { %512 = vmatprep.subr.mxu0 %v475_v40  ;;  %620 = vmatpush2.msra.mxu1 %v422_v23  ;;  %v391_v40 = vld [vmem:[#allocation9 + $0x338] sm:$0xff] }
  0xd2   :  { %513 = vmatpush2.msra.mxu0 %v474_v42  ;;  %621 = vmatprep.subr.mxu1 %v417_v25  ;;  %v390_v42 = vld [vmem:[#allocation9 + $0x330] sm:$0xff] }
  0xd3   :  { %514 = vmatprep.subr.mxu0 %v469_v44  ;;  %622 = vmatpush2.msra.mxu1 %v416_v27  ;;  %v385_v44 = vld [vmem:[#allocation9 + $0x308] sm:$0xff] }
  0xd4   :  { %515 = vmatpush2.msra.mxu0 %v468_v46  ;;  %623 = vmatprep.subr.mxu1 %v411_v29  ;;  %v384_v46 = vld [vmem:[#allocation9 + $0x300] sm:$0xff]  ;;  %v162_v29 = vld [vmem:[#allocation6] sm:$0x3] }
  0xd5   :  { %516 = vmatprep.subr.mxu0 %v463_v48  ;;  %624 = vmatpush2.msra.mxu1 %v410_v31  ;;  %v383_v48 = vld [vmem:[#allocation9 + $0x2f8] sm:$0xff] }
  0xd6   :  { %517 = vmatpush2.msra.mxu0 %v462_v50  ;;  %625 = vmatprep.subr.mxu1 %v405_v33 }
  0xd7   :  { %518 = vmatprep.subr.mxu0 %v457_v52  ;;  %626 = vmatpush2.msra.mxu1 %v404_v35 }
  0xd8   :  { %519 = vmatpush2.msra.mxu0 %v456_v54  ;;  %627 = vmatprep.subr.mxu1 %v399_v37 }
  0xd9   :  { %520 = vmatprep.subr.mxu0 %v451_v56  ;;  %628 = vmatpush2.msra.mxu1 %v398_v39 }
  0xda   :  { %521 = vmatpush2.msra.mxu0 %v450_v58  ;;  %629 = vmatprep.subr.mxu1 %v393_v41 }
  0xdb   :  { %522 = vmatprep.subr.mxu0 %v445_v3  ;;  %630 = vmatpush2.msra.mxu1 %v392_v43 }
  0xdc   :  { %523 = vmatpush2.msra.mxu0 %v444_v10  ;;  %631 = vmatprep.subr.mxu1 %v387_v45  ;;  %v382_v45 = vld [vmem:[#allocation9 + $0x2f0] sm:$0xff] }
  0xdd   :  { %524 = vmatprep.subr.mxu0 %v439_v12  ;;  %632 = vmatpush2.msra.mxu1 %v386_v47 }
  0xde   :  { %525 = vmatpush2.msra.mxu0 %v438_v1  ;;  %909 = vmatprep.subr.mxu1 %v383_v48 }
  0xdf   :  { %526 = vmatprep.subr.mxu0 %v433_v14 }
  0xe0   :  { %527 = vmatpush2.msra.mxu0 %v432_v18  ;;  %v180_v18 = vlaneseq }
  0xe1   :  { %528 = vmatprep.subr.mxu0 %v427_v5 }
  0xe2   :  { %529 = vmatpush2.msra.mxu0 %v426_v20 }
  0xe3   :  { %530 = vmatprep.subr.mxu0 %v421_v9 }
  0xe4   :  { %531 = vmatpush2.msra.mxu0 %v420_v22 }
  0xe5   :  { %532 = vmatprep.subr.mxu0 %v415_v24  ;;  %v1197_v24 = vshrl.u32 %v180_v18, 7  ;;  %v335_v18 = vld [vmem:[#allocation9 + $0x178] sm:$0xff] }
  0xe6   :  { %533 = vmatpush2.msra.mxu0 %v414_v26 }
  0xe7   :  { %534 = vmatprep.subr.mxu0 %v409_v28  ;;  %v1200_v27 = vsub.s32 1, %v1197_v24  ;;  %v1203_v28 = vsub.s32 0, %v1197_v24 }
  0xe8   :  { %535 = vmatpush2.msra.mxu0 %v408_v30  ;;  %v198_v30 = vld [vmem:[#allocation8] sm:$0x3] }
  0xe9   :  { %536 = vmatprep.subr.mxu0 %v403_v32  ;;  %v187_v31 = vrot.slane %v162_v29, %v1200_v27  ;;  %v1207_v32 = vrot.slane %v162_v29, %v1203_v28  ;;  %v207_v35 = vrot.slane %v198_v30, %v1200_v27  ;;  %v1213_v37 = vrot.slane %v198_v30, %v1203_v28  ;;  %v299_v29 = vld [vmem:[#allocation9 + $0x58] sm:$0xff]  ;;  %v298_v30 = vld [vmem:[#allocation9 + $0x50] sm:$0xff] }
  0xea   :  { %537 = vmatpush2.msra.mxu0 %v402_v34 }
  0xeb   :  { %538 = vmatprep.subr.mxu0 %v397_v36 }
  0xec   :  { %539 = vmatpush2.msra.mxu0 %v396_v38 }
  0xed   :  { %540 = vmatprep.subr.mxu0 %v391_v40 }
  0xee   :  { %541 = vmatpush2.msra.mxu0 %v390_v42 }
  0xef   :  { %542 = vmatprep.subr.mxu0 %v385_v44 }
  0xf0   :  { %543 = vmatpush2.msra.mxu0 %v384_v46  ;;  %v377_v46 = vld [vmem:[#allocation9 + $0x2c8] sm:$0xff] }
  0xf1   :  { %658 = vmatprep.subr.mxu0 %v383_v48 }
 0x14f   :  { %v120_v49 = vpop.xlane.xlu0 %119 }
 0x150   :  { %v130_v50 = vmul.f32 0.003921569, %v120_v49  ;;  %v376_v49 = vld [vmem:[#allocation9 + $0x2c0] sm:$0xff] }
 0x152   :  { %981 = vrsqrt.f32 %v130_v50  ;;  %vm136_vm0 = vcmp.eq.f32.partialorder %v130_v50, inf  ;;  %v139_v59 = vand.u32 2147483648, %v130_v50  ;;  %vm138_vm1 = vcmp.eq.f32.partialorder %v130_v50, 0.0 }
 0x153   :  { %v123_v51 = vpop.xlane.xlu1 %122  ;;  %v126_v52 = vpop.xlane.xlu0 %125 }
 0x154   :  { %v131_v53 = vmul.f32 0.003921569, %v123_v51  ;;  %v132_v54 = vmul.f32 0.003921569, %v126_v52 }
 0x156   :  { %983 = vrsqrt.f32 %v131_v53  ;;  %vm143_vm2 = vcmp.eq.f32.partialorder %v131_v53, inf  ;;  %vm145_vm3 = vcmp.eq.f32.partialorder %v131_v53, 0.0  ;;  %v146_v11 = vand.u32 2147483648, %v131_v53 }
 0x157   :  { %985 = vrsqrt.f32 %v132_v54  ;;  %v129_v55 = vpop.xlane.xlu1 %128  ;;  %vm150_vm4 = vcmp.eq.f32.partialorder %v132_v54, inf  ;;  %v153_v2 = vand.u32 2147483648, %v132_v54  ;;  %vm152_vm5 = vcmp.eq.f32.partialorder %v132_v54, 0.0 }
 0x158   :  { %v133_v56 = vmul.f32 0.003921569, %v129_v55 }
 0x15a   :  { %987 = vrsqrt.f32 %v133_v56  ;;  %vm157_vm6 = vcmp.eq.f32.partialorder %v133_v56, inf  ;;  %v160_v20 = vand.u32 2147483648, %v133_v56  ;;  %vm159_vm7 = vcmp.eq.f32.partialorder %v133_v56, 0.0 }
 0x15f   :  { %v982_v57 = vpop.eup %981 }
 0x160   :  { %v135_v58 = vmul.f32 %v982_v57, %v130_v50 }
 0x162   :  { %v137_v3 = vsel %vm136_vm0, %v130_v50, %v135_v58  ;;  %v359_v58 = vld [vmem:[#allocation9 + $0x238] sm:$0xff] }
 0x163   :  { %v984_v7 = vpop.eup %983  ;;  %v140_v10 = vsel %vm138_vm1, %v139_v59, %v137_v3 }
 0x164   :  { %v986_v12 = vpop.eup %985  ;;  %v163_v0 = vadd.f32 1e-06, %v140_v10  ;;  %v142_v1 = vmul.f32 %v984_v7, %v131_v53  ;;  %v358_v7 = vld [vmem:[#allocation9 + $0x230] sm:$0xff] }
 0x165   :  { %v149_v14 = vmul.f32 %v986_v12, %v132_v54 }
 0x166   :  { %989 = vrcp.f32 %v163_v0  ;;  %v144_v17 = vsel %vm143_vm2, %v131_v53, %v142_v1  ;;  %v370_v53 = vld [vmem:[#allocation9 + $0x290] sm:$0xff]  ;;  %v347_v0 = vld [vmem:[#allocation9 + $0x1d8] sm:$0xff] }
 0x167   :  { %v988_v19 = vpop.eup %987  ;;  %v147_v5 = vsel %vm145_vm3, %v146_v11, %v144_v17  ;;  %v151_v6 = vsel %vm150_vm4, %v132_v54, %v149_v14  ;;  %v353_v11 = vld [vmem:[#allocation9 + $0x208] sm:$0xff]  ;;  %v340_v17 = vld [vmem:[#allocation9 + $0x1a0] sm:$0xff] }
 0x168   :  { %v164_v8 = vadd.f32 1e-06, %v147_v5  ;;  %v154_v9 = vsel %vm152_vm5, %v153_v2, %v151_v6  ;;  %v156_v21 = vmul.f32 %v988_v19, %v133_v56  ;;  %v346_v2 = vld [vmem:[#allocation9 + $0x1d0] sm:$0xff]  ;;  %v341_v14 = vld [vmem:[#allocation9 + $0x1a8] sm:$0xff]  ;;  %v328_v6 = vld [vmem:[#allocation9 + $0x140] sm:$0xff] }
 0x169   :  { %v165_v22 = vadd.f32 1e-06, %v154_v9  ;;  %v334_v19 = vld [vmem:[#allocation9 + $0x170] sm:$0xff]  ;;  %v329_v5 = vld [vmem:[#allocation9 + $0x148] sm:$0xff] }
 0x16a   :  { %991 = vrcp.f32 %v164_v8  ;;  %v158_v23 = vsel %vm157_vm6, %v133_v56, %v156_v21  ;;  %v365_v56 = vld [vmem:[#allocation9 + $0x268] sm:$0xff]  ;;  %v322_v8 = vld [vmem:[#allocation9 + $0x110] sm:$0xff]  ;;  %v316_v21 = vld [vmem:[#allocation9 + $0xe0] sm:$0xff] }
 0x16b   :  { %993 = vrcp.f32 %v165_v22  ;;  %v161_v25 = vsel %vm159_vm7, %v160_v20, %v158_v23  ;;  %v323_v20 = vld [vmem:[#allocation9 + $0x118] sm:$0xff]  ;;  %v317_v9 = vld [vmem:[#allocation9 + $0xe8] sm:$0xff]  ;;  %v310_v23 = vld [vmem:[#allocation9 + $0xb0] sm:$0xff] }
 0x16c   :  { %v166_v26 = vadd.f32 1e-06, %v161_v25  ;;  %v311_v22 = vld [vmem:[#allocation9 + $0xb8] sm:$0xff]  ;;  %v305_v25 = vld [vmem:[#allocation9 + $0x88] sm:$0xff] }
 0x16e   :  { %995 = vrcp.f32 %v166_v26  ;;  %v304_v26 = vld [vmem:[#allocation9 + $0x80] sm:$0xff] }
 0x173   :  { %v990_v33 = vpop.eup %989 }
 0x174   :  { %v169_v34 = vmul.f32 %v990_v33, %v1161_v61  ;;  %v168_v36 = vmul.f32 %v990_v33, %v1158_v60  ;;  %v479_v33 = vld [vmem:[#allocation9 + $0x5f8] sm:$0xff] }
 0x176   :  { %v191_v38 = vmul.f32 %v187_v31, %v169_v34  ;;  %v190_v39 = vmul.f32 %v1207_v32, %v168_v36  ;;  %v478_v34 = vld [vmem:[#allocation9 + $0x5f0] sm:$0xff]  ;;  %v472_v36 = vld [vmem:[#allocation9 + $0x5c0] sm:$0xff] }
 0x177   :  { %v992_v40 = vpop.eup %991 }
 0x178   :  { %v994_v41 = vpop.eup %993  ;;  %v1216_v42 = vadd.f32 %v207_v35, %v191_v38  ;;  %v1219_v43 = vadd.f32 %v1213_v37, %v190_v39  ;;  %v172_v44 = vmul.f32 %v992_v40, %v1181_v4  ;;  %v171_v61 = vmul.f32 %v992_v40, %v1178_v13  ;;  %v466_v38 = vld [vmem:[#allocation9 + $0x590] sm:$0xff]  ;;  %v461_v39 = vld [vmem:[#allocation9 + $0x568] sm:$0xff]  ;;  %v460_v40 = vld [vmem:[#allocation9 + $0x560] sm:$0xff] }
 0x179   :  { %v175_v60 = vmul.f32 %v994_v41, %v1167_v63  ;;  %v371_v63 = vld [vmem:[#allocation9 + $0x298] sm:$0xff]  ;;  %v174_v52 = vmul.f32 %v994_v41, %v1164_v62  ;;  %v364_v62 = vld [vmem:[#allocation9 + $0x260] sm:$0xff] }
 0x17a   :  { %544 = vmatprep.mubr.f32.mxu0 %v1216_v42  ;;  %633 = vmatprep.mubr.f32.mxu1 %v1216_v42  ;;  %v193_v47 = vmul.f32 %v187_v31, %v172_v44  ;;  %v192_v48 = vmul.f32 %v1207_v32, %v171_v61  ;;  %v455_v41 = vld [vmem:[#allocation9 + $0x538] sm:$0xff]  ;;  %v449_v44 = vld [vmem:[#allocation9 + $0x508] sm:$0xff]  ;;  %v448_v61 = vld [vmem:[#allocation9 + $0x500] sm:$0xff] }
 0x17b   :  { %545 = vmatmul.mubr.f32.vlgmr.msra.gmra.mxu0 %v1219_v43  ;;  %634 = vmatmul.mubr.f32.vlgmr.msra.gmra.mxu1 %v1219_v43  ;;  %v996_v50 = vpop.eup %995  ;;  %v195_v51 = vmul.f32 %v187_v31, %v175_v60  ;;  %v194_v57 = vmul.f32 %v1207_v32, %v174_v52  ;;  %v442_v60 = vld [vmem:[#allocation9 + $0x4d0] sm:$0xff] }
 0x17c   :  { %659 = vmatpush1.msra.mxu0 %v382_v45  ;;  %941 = vmatpush1.msra.mxu1 %v382_v45  ;;  %v1229_v13 = vadd.f32 %v207_v35, %v193_v47  ;;  %v1232_v4 = vadd.f32 %v1213_v37, %v192_v48  ;;  %v178_v54 = vmul.f32 %v996_v50, %v1187_v16  ;;  %v443_v45 = vld [vmem:[#allocation9 + $0x4d8] sm:$0xff]  ;;  %v436_v47 = vld [vmem:[#allocation9 + $0x4a0] sm:$0xff]  ;;  %v418_v52 = vld [vmem:[#allocation9 + $0x410] sm:$0xff] }
 0x17d   :  { %660 = vmatprep.subr.mxu0 %v377_v46  ;;  %910 = vmatprep.subr.mxu1 %v377_v46  ;;  %v215_v55 = vadd.f32 %v207_v35, %v195_v51  ;;  %v177_v3 = vmul.f32 %v996_v50, %v1184_v15  ;;  %v1243_v16 = vadd.f32 %v1213_v37, %v194_v57  ;;  %v352_v15 = vld [vmem:[#allocation9 + $0x200] sm:$0xff]  ;;  %v437_v46 = vld [vmem:[#allocation9 + $0x4a8] sm:$0xff]  ;;  %v431_v48 = vld [vmem:[#allocation9 + $0x478] sm:$0xff] }
 0x17e   :  { %661 = vmatpush1.msra.mxu0 %v376_v49  ;;  %942 = vmatpush1.msra.mxu1 %v376_v49  ;;  %v197_v59 = vmul.f32 %v187_v31, %v178_v54  ;;  %v293_v31 = vld [vmem:[#allocation9 + $0x28] sm:$0xff]  ;;  %v430_v49 = vld [vmem:[#allocation9 + $0x470] sm:$0xff]  ;;  %v419_v51 = vld [vmem:[#allocation9 + $0x418] sm:$0xff] }
 0x17f   :  { %550 = vmatprep.mubr.f32.mxu0 %v1229_v13  ;;  %639 = vmatprep.mubr.f32.mxu1 %v1229_v13  ;;  %v196_v12 = vmul.f32 %v1207_v32, %v177_v3  ;;  %v292_v32 = vld [vmem:[#allocation9 + $0x20] sm:$0xff]  ;;  %v425_v50 = vld [vmem:[#allocation9 + $0x448] sm:$0xff] }
 0x180   :  { %662 = vmatprep.subr.mxu0 %v371_v63  ;;  %911 = vmatprep.subr.mxu1 %v371_v63  ;;  %v1247_v10 = vadd.f32 %v207_v35, %v197_v59  ;;  %v473_v35 = vld [vmem:[#allocation9 + $0x5c8] sm:$0xff]  ;;  %v424_v63 = vld [vmem:[#allocation9 + $0x440] sm:$0xff]  ;;  %v394_v59 = vld [vmem:[#allocation9 + $0x350] sm:$0xff] }
 0x181   :  { %551 = vmatmul.mubr.f32.gmra.mxu0 %v1232_v4  ;;  %640 = vmatmul.mubr.f32.gmra.mxu1 %v1232_v4  ;;  %v1253_v1 = vadd.f32 %v1213_v37, %v196_v12  ;;  %v467_v37 = vld [vmem:[#allocation9 + $0x598] sm:$0xff]  ;;  %v412_v54 = vld [vmem:[#allocation9 + $0x3e0] sm:$0xff]  ;;  %v401_v57 = vld [vmem:[#allocation9 + $0x388] sm:$0xff] }
 0x182   :  { %663 = vmatpush1.msra.mxu0 %v370_v53  ;;  %943 = vmatpush1.msra.mxu1 %v370_v53  ;;  %v413_v53 = vld [vmem:[#allocation9 + $0x3e8] sm:$0xff]  ;;  %v822_v12 = vld [vmem:[%s1349_s4] sm:$0x3f] }
 0x183   :  { %556 = vmatprep.mubr.f32.mxu0 %v215_v55  ;;  %645 = vmatprep.mubr.f32.mxu1 %v215_v55  ;;  %v389_v3 = vld [vmem:[#allocation9 + $0x328] sm:$0xff] }
 0x184   :  { %664 = vmatprep.subr.mxu0 %v365_v56  ;;  %912 = vmatprep.subr.mxu1 %v365_v56  ;;  %v406_v56 = vld [vmem:[#allocation9 + $0x3b0] sm:$0xff] }
 0x185   :  { %665 = vmatpush1.msra.mxu0 %v364_v62  ;;  %944 = vmatpush1.msra.mxu1 %v364_v62  ;;  %v400_v62 = vld [vmem:[#allocation9 + $0x380] sm:$0xff] }
 0x186   :  { %666 = vmatprep.subr.mxu0 %v359_v58  ;;  %913 = vmatprep.subr.mxu1 %v359_v58  ;;  %v395_v58 = vld [vmem:[#allocation9 + $0x358] sm:$0xff] }
 0x187   :  { %557 = vmatmul.mubr.f32.gmra.mxu0 %v1243_v16  ;;  %646 = vmatmul.mubr.f32.gmra.mxu1 %v1243_v16 }
 0x188   :  { %667 = vmatpush1.msra.mxu0 %v358_v7  ;;  %945 = vmatpush1.msra.mxu1 %v358_v7  ;;  %v388_v7 = vld [vmem:[#allocation9 + $0x320] sm:$0xff] }
 0x189   :  { %562 = vmatprep.mubr.f32.mxu0 %v1247_v10  ;;  %651 = vmatprep.mubr.f32.mxu1 %v1247_v10 }
 0x18a   :  { %668 = vmatprep.subr.mxu0 %v353_v11  ;;  %914 = vmatprep.subr.mxu1 %v353_v11  ;;  %v834_v11 = vsub.s32 2, %v1197_v24 }
 0x18b   :  { %669 = vmatpush1.msra.mxu0 %v352_v15  ;;  %946 = vmatpush1.msra.mxu1 %v352_v15  ;;  %v838_v15 = vsub.s32 3, %v1197_v24 }
 0x18c   :  { %670 = vmatprep.subr.mxu0 %v347_v0  ;;  %915 = vmatprep.subr.mxu1 %v347_v0  ;;  %v835_v0 = vrot.slane %v822_v12, %v834_v11 }
 0x18d   :  { %563 = vmatmul.mubr.f32.gmra.mxu0 %v1253_v1  ;;  %652 = vmatmul.mubr.f32.gmra.mxu1 %v1253_v1 }
 0x18e   :  { %671 = vmatpush1.msra.mxu0 %v346_v2  ;;  %947 = vmatpush1.msra.mxu1 %v346_v2 }
 0x18f   :  { %672 = vmatprep.subr.mxu0 %v341_v14  ;;  %916 = vmatprep.subr.mxu1 %v341_v14 }
 0x190   :  { %722 = vmatprep.mubr.f32.mxu0 %v1216_v42  ;;  %734 = vmatprep.mubr.f32.mxu1 %v215_v55  ;;  %v454_v42 = vld [vmem:[#allocation9 + $0x530] sm:$0xff]  ;;  %v407_v55 = vld [vmem:[#allocation9 + $0x3b8] sm:$0xff] }
 0x191   :  { %673 = vmatpush1.msra.mxu0 %v340_v17  ;;  %948 = vmatpush1.msra.mxu1 %v340_v17 }
 0x192   :  { %674 = vmatprep.subr.mxu0 %v335_v18  ;;  %917 = vmatprep.subr.mxu1 %v335_v18 }
 0x193   :  { %675 = vmatpush1.msra.mxu0 %v334_v19  ;;  %949 = vmatpush1.msra.mxu1 %v334_v19 }
 0x194   :  { %676 = vmatprep.subr.mxu0 %v329_v5  ;;  %918 = vmatprep.subr.mxu1 %v329_v5 }
 0x195   :  { %677 = vmatpush1.msra.mxu0 %v328_v6  ;;  %950 = vmatpush1.msra.mxu1 %v328_v6 }
 0x196   :  { %678 = vmatprep.subr.mxu0 %v323_v20  ;;  %919 = vmatprep.subr.mxu1 %v323_v20 }
 0x197   :  { %679 = vmatpush1.msra.mxu0 %v322_v8  ;;  %951 = vmatpush1.msra.mxu1 %v322_v8 }
 0x198   :  { %680 = vmatprep.subr.mxu0 %v317_v9  ;;  %920 = vmatprep.subr.mxu1 %v317_v9 }
 0x199   :  { %681 = vmatpush1.msra.mxu0 %v316_v21  ;;  %952 = vmatpush1.msra.mxu1 %v316_v21 }
 0x19a   :  { %682 = vmatprep.subr.mxu0 %v311_v22  ;;  %921 = vmatprep.subr.mxu1 %v311_v22 }
 0x19b   :  { %683 = vmatpush1.msra.mxu0 %v310_v23  ;;  %953 = vmatpush1.msra.mxu1 %v310_v23 }
 0x19c   :  { %684 = vmatprep.subr.mxu0 %v305_v25  ;;  %922 = vmatprep.subr.mxu1 %v305_v25 }
 0x19d   :  { %685 = vmatpush1.msra.mxu0 %v304_v26  ;;  %954 = vmatpush1.msra.mxu1 %v304_v26 }
 0x19e   :  { %686 = vmatprep.subr.mxu0 %v299_v29  ;;  %923 = vmatprep.subr.mxu1 %v299_v29 }
 0x19f   :  { %687 = vmatpush1.msra.mxu0 %v298_v30  ;;  %955 = vmatpush1.msra.mxu1 %v298_v30 }
 0x1a0   :  { %688 = vmatprep.subr.mxu0 %v293_v31  ;;  %924 = vmatprep.subr.mxu1 %v293_v31 }
 0x1a1   :  { %689 = vmatpush1.msra.mxu0 %v292_v32  ;;  %956 = vmatpush1.msra.mxu1 %v292_v32 }
 0x1a2   :  { %690 = vmatprep.subr.mxu0 %v479_v33  ;;  %925 = vmatprep.subr.mxu1 %v479_v33 }
 0x1a3   :  { %691 = vmatpush2.msra.mxu0 %v478_v34  ;;  %957 = vmatpush2.msra.mxu1 %v478_v34 }
 0x1a4   :  { %692 = vmatprep.subr.mxu0 %v473_v35  ;;  %926 = vmatprep.subr.mxu1 %v473_v35 }
 0x1a5   :  { %693 = vmatpush2.msra.mxu0 %v472_v36  ;;  %958 = vmatpush2.msra.mxu1 %v472_v36 }
 0x1a6   :  { %694 = vmatprep.subr.mxu0 %v467_v37  ;;  %927 = vmatprep.subr.mxu1 %v467_v37 }
 0x1a7   :  { %695 = vmatpush2.msra.mxu0 %v466_v38  ;;  %959 = vmatpush2.msra.mxu1 %v466_v38 }
 0x1a8   :  { %696 = vmatprep.subr.mxu0 %v461_v39  ;;  %928 = vmatprep.subr.mxu1 %v461_v39 }
 0x1a9   :  { %697 = vmatpush2.msra.mxu0 %v460_v40  ;;  %960 = vmatpush2.msra.mxu1 %v460_v40 }
 0x1aa   :  { %698 = vmatprep.subr.mxu0 %v455_v41  ;;  %929 = vmatprep.subr.mxu1 %v455_v41  ;;  %v842_v41 = vsub.s32 4, %v1197_v24 }
 0x1ab   :  { %699 = vmatpush2.msra.mxu0 %v454_v42  ;;  %961 = vmatpush2.msra.mxu1 %v454_v42  ;;  %v846_v42 = vsub.s32 5, %v1197_v24 }
 0x1ac   :  { %700 = vmatprep.subr.mxu0 %v449_v44  ;;  %930 = vmatprep.subr.mxu1 %v449_v44  ;;  %v843_v44 = vrot.slane %v822_v12, %v842_v41 }
 0x1ad   :  { %701 = vmatpush2.msra.mxu0 %v448_v61  ;;  %962 = vmatpush2.msra.mxu1 %v448_v61  ;;  %v847_v61 = vrot.slane %v822_v12, %v846_v42 }
 0x1ae   :  { %702 = vmatprep.subr.mxu0 %v443_v45  ;;  %931 = vmatprep.subr.mxu1 %v443_v45 }
 0x1af   :  { %703 = vmatpush2.msra.mxu0 %v442_v60  ;;  %963 = vmatpush2.msra.mxu1 %v442_v60 }
 0x1b0   :  { %704 = vmatprep.subr.mxu0 %v437_v46  ;;  %932 = vmatprep.subr.mxu1 %v437_v46 }
 0x1b1   :  { %705 = vmatpush2.msra.mxu0 %v436_v47  ;;  %964 = vmatpush2.msra.mxu1 %v436_v47 }
 0x1b2   :  { %706 = vmatprep.subr.mxu0 %v431_v48  ;;  %933 = vmatprep.subr.mxu1 %v431_v48 }
 0x1b3   :  { %707 = vmatpush2.msra.mxu0 %v430_v49  ;;  %965 = vmatpush2.msra.mxu1 %v430_v49 }
 0x1b4   :  { %708 = vmatprep.subr.mxu0 %v425_v50  ;;  %934 = vmatprep.subr.mxu1 %v425_v50 }
 0x1b5   :  { %709 = vmatpush2.msra.mxu0 %v424_v63  ;;  %966 = vmatpush2.msra.mxu1 %v424_v63 }
 0x1b6   :  { %710 = vmatprep.subr.mxu0 %v419_v51  ;;  %935 = vmatprep.subr.mxu1 %v419_v51 }
 0x1b7   :  { %711 = vmatpush2.msra.mxu0 %v418_v52  ;;  %967 = vmatpush2.msra.mxu1 %v418_v52 }
 0x1b8   :  { %712 = vmatprep.subr.mxu0 %v413_v53  ;;  %936 = vmatprep.subr.mxu1 %v413_v53 }
 0x1b9   :  { %713 = vmatpush2.msra.mxu0 %v412_v54  ;;  %968 = vmatpush2.msra.mxu1 %v412_v54 }
 0x1ba   :  { %714 = vmatprep.subr.mxu0 %v407_v55  ;;  %937 = vmatprep.subr.mxu1 %v407_v55 }
 0x1bb   :  { %715 = vmatpush2.msra.mxu0 %v406_v56  ;;  %969 = vmatpush2.msra.mxu1 %v406_v56 }
 0x1bc   :  { %716 = vmatprep.subr.mxu0 %v401_v57  ;;  %938 = vmatprep.subr.mxu1 %v401_v57 }
 0x1bd   :  { %717 = vmatpush2.msra.mxu0 %v400_v62  ;;  %970 = vmatpush2.msra.mxu1 %v400_v62 }
 0x1be   :  { %718 = vmatprep.subr.mxu0 %v395_v58  ;;  %939 = vmatprep.subr.mxu1 %v395_v58 }
 0x1bf   :  { %719 = vmatpush2.msra.mxu0 %v394_v59  ;;  %971 = vmatpush2.msra.mxu1 %v394_v59 }
 0x1c0   :  { %720 = vmatprep.subr.mxu0 %v389_v3  ;;  %940 = vmatprep.subr.mxu1 %v389_v3 }
 0x1c1   :  { %721 = vmatpush2.msra.mxu0 %v388_v7  ;;  %972 = vmatpush2.msra.mxu1 %v388_v7 }
 0x1c2   :  { %723 = vmatmul.mubr.f32.vlgmr.msra.gmra.mxu0 %v1219_v43  ;;  %735 = vmatmul.mubr.f32.vlgmr.msra.gmra.mxu1 %v1243_v16  ;;  %v827_v43 = vrot.slane %v822_v12, %v1203_v28  ;;  %v831_v16 = vrot.slane %v822_v12, %v1200_v27 }
 0x1c3   :  { %728 = vmatprep.mubr.f32.mxu0 %v1229_v13  ;;  %740 = vmatprep.mubr.f32.mxu1 %v1247_v10  ;;  %v839_v13 = vrot.slane %v822_v12, %v838_v15 }
 0x1c6   :  { %729 = vmatmul.mubr.f32.gmra.mxu0 %v1232_v4  ;;  %741 = vmatmul.mubr.f32.gmra.mxu1 %v1253_v1 }
 0x23b   :  { %v546_v2 = vpop.f32.mrf.mxu0  ;;  %v635_v10 = vpop.f32.mrf.mxu1 }
 0x23c   :  { %v854_v14 = vadd.f32 %v827_v43, %v546_v2  ;;  %v856_v4 = vadd.f32 %v835_v0, %v635_v10 }
 0x23d   :  { %v548_v17 = vpop.f32.mrf.mxu0  ;;  %v637_v1 = vpop.f32.mrf.mxu1 }
 0x23e   :  { %878 = vst [vmem:[%s1350_s5] sm:$0xff] %v854_v14  ;;  %880 = vst [vmem:[%s1350_s5 + $0x10] sm:$0xff] %v856_v4  ;;  %v855_v18 = vadd.f32 %v831_v16, %v548_v17  ;;  %v857_v28 = vadd.f32 %v839_v13, %v637_v1 }
 0x240   :  { %879 = vst [vmem:[%s1350_s5 + $0x8] sm:$0xff] %v855_v18  ;;  %881 = vst [vmem:[%s1350_s5 + $0x18] sm:$0xff] %v857_v28 }
 0x241   :  { %v552_v27 = vpop.f32.mrf.mxu0  ;;  %v641_v19 = vpop.f32.mrf.mxu1 }
 0x242   :  { %v860_v5 = vadd.f32 %v827_v43, %v552_v27  ;;  %v862_v6 = vadd.f32 %v835_v0, %v641_v19 }
 0x243   :  { %v554_v20 = vpop.f32.mrf.mxu0  ;;  %v643_v8 = vpop.f32.mrf.mxu1 }
 0x244   :  { %884 = vst [vmem:[%s1350_s5 + $0x30] sm:$0xff] %v860_v5  ;;  %886 = vst [vmem:[%s1350_s5 + $0x40] sm:$0xff] %v862_v6  ;;  %v861_v9 = vadd.f32 %v831_v16, %v554_v20  ;;  %v863_v21 = vadd.f32 %v839_v13, %v643_v8 }
 0x246   :  { %885 = vst [vmem:[%s1350_s5 + $0x38] sm:$0xff] %v861_v9  ;;  %887 = vst [vmem:[%s1350_s5 + $0x48] sm:$0xff] %v863_v21 }
 0x247   :  { %v558_v22 = vpop.f32.mrf.mxu0  ;;  %v647_v23 = vpop.f32.mrf.mxu1 }
 0x248   :  { %v866_v25 = vadd.f32 %v827_v43, %v558_v22  ;;  %v868_v26 = vadd.f32 %v835_v0, %v647_v23 }
 0x249   :  { %v560_v29 = vpop.f32.mrf.mxu0  ;;  %v649_v30 = vpop.f32.mrf.mxu1 }
 0x24a   :  { %890 = vst [vmem:[%s1350_s5 + $0x60] sm:$0xff] %v866_v25  ;;  %892 = vst [vmem:[%s1350_s5 + $0x70] sm:$0xff] %v868_v26  ;;  %v867_v31 = vadd.f32 %v831_v16, %v560_v29  ;;  %v869_v32 = vadd.f32 %v839_v13, %v649_v30 }
 0x24c   :  { %891 = vst [vmem:[%s1350_s5 + $0x68] sm:$0xff] %v867_v31  ;;  %893 = vst [vmem:[%s1350_s5 + $0x78] sm:$0xff] %v869_v32 }
 0x24d   :  { %v564_v33 = vpop.f32.mrf.mxu0  ;;  %v653_v34 = vpop.f32.mrf.mxu1 }
 0x24e   :  { %v872_v35 = vadd.f32 %v827_v43, %v564_v33  ;;  %v874_v36 = vadd.f32 %v835_v0, %v653_v34 }
 0x24f   :  { %v566_v37 = vpop.f32.mrf.mxu0  ;;  %v655_v38 = vpop.f32.mrf.mxu1 }
 0x250   :  { %896 = vst [vmem:[%s1350_s5 + $0x90] sm:$0xff] %v872_v35  ;;  %898 = vst [vmem:[%s1350_s5 + $0xa0] sm:$0xff] %v874_v36  ;;  %v873_v39 = vadd.f32 %v831_v16, %v566_v37  ;;  %v875_v40 = vadd.f32 %v839_v13, %v655_v38 }
 0x252   :  { %897 = vst [vmem:[%s1350_s5 + $0x98] sm:$0xff] %v873_v39  ;;  %899 = vst [vmem:[%s1350_s5 + $0xa8] sm:$0xff] %v875_v40 }
 0x282   :  { %v724_v45 = vpop.f32.mrf.mxu0  ;;  %v736_v60 = vpop.f32.mrf.mxu1 }
 0x283   :  { %v858_v46 = vadd.f32 %v843_v44, %v724_v45  ;;  %v870_v47 = vadd.f32 %v843_v44, %v736_v60 }
 0x284   :  { %v726_v48 = vpop.f32.mrf.mxu0  ;;  %v738_v49 = vpop.f32.mrf.mxu1 }
 0x285   :  { %882 = vst [vmem:[%s1350_s5 + $0x20] sm:$0xff] %v858_v46  ;;  %894 = vst [vmem:[%s1350_s5 + $0x80] sm:$0xff] %v870_v47  ;;  %v859_v50 = vadd.f32 %v847_v61, %v726_v48  ;;  %v871_v63 = vadd.f32 %v847_v61, %v738_v49 }
 0x286   :  { %v730_v51 = vpop.f32.mrf.mxu0  ;;  %v742_v24 = vpop.f32.mrf.mxu1 }
 0x287   :  { %883 = vst [vmem:[%s1350_s5 + $0x28] sm:$0xff] %v859_v50  ;;  %895 = vst [vmem:[%s1350_s5 + $0x88] sm:$0xff] %v871_v63  ;;  %v864_v52 = vadd.f32 %v843_v44, %v730_v51  ;;  %v876_v53 = vadd.f32 %v843_v44, %v742_v24 }
 0x288   :  { %v732_v54 = vpop.f32.mrf.mxu0  ;;  %v744_v55 = vpop.f32.mrf.mxu1 }
 0x289   :  { %888 = vst [vmem:[%s1350_s5 + $0x50] sm:$0xff] %v864_v52  ;;  %900 = vst [vmem:[%s1350_s5 + $0xb0] sm:$0xff] %v876_v53  ;;  %v865_v56 = vadd.f32 %v847_v61, %v732_v54  ;;  %v877_v57 = vadd.f32 %v847_v61, %v744_v55 }
 0x28b   :  { %889 = vst [vmem:[%s1350_s5 + $0x58] sm:$0xff] %v865_v56  ;;  %901 = vst [vmem:[%s1350_s5 + $0xb8] sm:$0xff] %v877_v57 }
 0x28c   :  { %906 = vsyncpa [#allocation5], 1 }
 0x28d   :  { %907 = vsyncpa [#allocation7], 1 }
 0x28e   :  { %908 = vsyncpa [#allocation10], 1 }

// kernel: decoder_layer.15
= control target key start
LH: loop header
LB: loop body
LE: loop exit
PB: predicated region body
PF: predicated region fallthrough
CT: control target
= control target key end

     0   :  { %s629_s1 = inlined_call_operand.vmem [shape: f32[256,256], index: 1, kind: input, shape index: {}]   ;;  %s630_s0 = inlined_call_operand.vmem [shape: f32[32,256], index: 0, kind: input, shape index: {}]   ;;  %s631_s2 = inlined_call_operand.vmem [shape: f32[1,256], index: 2, kind: input, shape index: {}]   ;;  %s632_s3 = inlined_call_operand.vmem [shape: f32[32,256], index: 3, kind: input, shape index: {}]   ;;  %s633_s4 = inlined_call_operand.vmem [shape: f32[32,256], index: 4, kind: output, shape index: {}]  }
   0x1   :  { %v76_v0 = vld [vmem:[%s629_s1 + $0xf8] sm:$0xff]  ;;  %v75_v1 = vld [vmem:[%s629_s1 + $0xf0] sm:$0xff]  ;;  %v74_v2 = vld [vmem:[%s629_s1 + $0xe8] sm:$0xff] }
   0x2   :  { %109 = vmatprep.subr.mxu0 %v76_v0  ;;  %273 = vmatprep.subr.mxu1 %v76_v0  ;;  %v73_v3 = vld [vmem:[%s629_s1 + $0xe0] sm:$0xff]  ;;  %v72_v4 = vld [vmem:[%s629_s1 + $0xd8] sm:$0xff]  ;;  %v71_v5 = vld [vmem:[%s629_s1 + $0xd0] sm:$0xff] }
   0x3   :  { %110 = vmatpush1.msra.mxu0 %v75_v1  ;;  %305 = vmatpush1.msra.mxu1 %v75_v1  ;;  %v70_v6 = vld [vmem:[%s629_s1 + $0xc8] sm:$0xff]  ;;  %v69_v7 = vld [vmem:[%s629_s1 + $0xc0] sm:$0xff]  ;;  %v68_v8 = vld [vmem:[%s629_s1 + $0xb8] sm:$0xff] }
   0x4   :  { %111 = vmatprep.subr.mxu0 %v74_v2  ;;  %274 = vmatprep.subr.mxu1 %v74_v2  ;;  %v67_v9 = vld [vmem:[%s629_s1 + $0xb0] sm:$0xff]  ;;  %v66_v10 = vld [vmem:[%s629_s1 + $0xa8] sm:$0xff]  ;;  %v65_v11 = vld [vmem:[%s629_s1 + $0xa0] sm:$0xff] }
   0x5   :  { %112 = vmatpush1.msra.mxu0 %v73_v3  ;;  %306 = vmatpush1.msra.mxu1 %v73_v3  ;;  %v64_v12 = vld [vmem:[%s629_s1 + $0x98] sm:$0xff]  ;;  %v63_v13 = vld [vmem:[%s629_s1 + $0x90] sm:$0xff]  ;;  %v62_v14 = vld [vmem:[%s629_s1 + $0x88] sm:$0xff] }
   0x6   :  { %113 = vmatprep.subr.mxu0 %v72_v4  ;;  %275 = vmatprep.subr.mxu1 %v72_v4  ;;  %v61_v15 = vld [vmem:[%s629_s1 + $0x80] sm:$0xff]  ;;  %v60_v16 = vld [vmem:[%s629_s1 + $0x78] sm:$0xff]  ;;  %v59_v17 = vld [vmem:[%s629_s1 + $0x70] sm:$0xff] }
   0x7   :  { %114 = vmatpush1.msra.mxu0 %v71_v5  ;;  %307 = vmatpush1.msra.mxu1 %v71_v5  ;;  %v58_v18 = vld [vmem:[%s629_s1 + $0x68] sm:$0xff]  ;;  %v57_v19 = vld [vmem:[%s629_s1 + $0x60] sm:$0xff]  ;;  %v56_v20 = vld [vmem:[%s629_s1 + $0x58] sm:$0xff] }
   0x8   :  { %115 = vmatprep.subr.mxu0 %v70_v6  ;;  %276 = vmatprep.subr.mxu1 %v70_v6  ;;  %v55_v21 = vld [vmem:[%s629_s1 + $0x50] sm:$0xff]  ;;  %v54_v22 = vld [vmem:[%s629_s1 + $0x48] sm:$0xff]  ;;  %v53_v23 = vld [vmem:[%s629_s1 + $0x40] sm:$0xff] }
   0x9   :  { %116 = vmatpush1.msra.mxu0 %v69_v7  ;;  %308 = vmatpush1.msra.mxu1 %v69_v7  ;;  %v52_v24 = vld [vmem:[%s629_s1 + $0x38] sm:$0xff]  ;;  %v51_v25 = vld [vmem:[%s629_s1 + $0x30] sm:$0xff]  ;;  %v50_v26 = vld [vmem:[%s629_s1 + $0x28] sm:$0xff] }
   0xa   :  { %117 = vmatprep.subr.mxu0 %v68_v8  ;;  %277 = vmatprep.subr.mxu1 %v68_v8  ;;  %v49_v27 = vld [vmem:[%s629_s1 + $0x20] sm:$0xff]  ;;  %v48_v28 = vld [vmem:[%s629_s1 + $0x18] sm:$0xff]  ;;  %v47_v29 = vld [vmem:[%s629_s1 + $0x10] sm:$0xff]  ;;  %v227_v8 = vlaneseq }
   0xb   :  { %118 = vmatpush1.msra.mxu0 %v67_v9  ;;  %309 = vmatpush1.msra.mxu1 %v67_v9  ;;  %v46_v30 = vld [vmem:[%s629_s1 + $0x8] sm:$0xff]  ;;  %v45_v31 = vld [vmem:[%s629_s1] sm:$0xff]  ;;  %v108_v32 = vld [vmem:[%s629_s1 + $0x1f8] sm:$0xff] }
   0xc   :  { %119 = vmatprep.subr.mxu0 %v66_v10  ;;  %278 = vmatprep.subr.mxu1 %v66_v10  ;;  %v107_v33 = vld [vmem:[%s629_s1 + $0x1f0] sm:$0xff]  ;;  %v106_v34 = vld [vmem:[%s629_s1 + $0x1e8] sm:$0xff]  ;;  %v105_v35 = vld [vmem:[%s629_s1 + $0x1e0] sm:$0xff]  ;;  %v228_v9 = vshrl.u32 %v227_v8, 7 }
   0xd   :  { %120 = vmatpush1.msra.mxu0 %v65_v11  ;;  %310 = vmatpush1.msra.mxu1 %v65_v11  ;;  %v104_v36 = vld [vmem:[%s629_s1 + $0x1d8] sm:$0xff]  ;;  %v103_v37 = vld [vmem:[%s629_s1 + $0x1d0] sm:$0xff]  ;;  %v102_v38 = vld [vmem:[%s629_s1 + $0x1c8] sm:$0xff] }
   0xe   :  { %121 = vmatprep.subr.mxu0 %v64_v12  ;;  %279 = vmatprep.subr.mxu1 %v64_v12  ;;  %v101_v39 = vld [vmem:[%s629_s1 + $0x1c0] sm:$0xff]  ;;  %v100_v40 = vld [vmem:[%s629_s1 + $0x1b8] sm:$0xff]  ;;  %v99_v41 = vld [vmem:[%s629_s1 + $0x1b0] sm:$0xff]  ;;  %v229_v10 = vsub.s32 0, %v228_v9  ;;  %v233_v12 = vsub.s32 1, %v228_v9 }
   0xf   :  { %122 = vmatpush1.msra.mxu0 %v63_v13  ;;  %311 = vmatpush1.msra.mxu1 %v63_v13  ;;  %v98_v42 = vld [vmem:[%s629_s1 + $0x1a8] sm:$0xff]  ;;  %v97_v43 = vld [vmem:[%s629_s1 + $0x1a0] sm:$0xff]  ;;  %v96_v44 = vld [vmem:[%s629_s1 + $0x198] sm:$0xff] }
  0x10   :  { %123 = vmatprep.subr.mxu0 %v62_v14  ;;  %280 = vmatprep.subr.mxu1 %v62_v14  ;;  %v95_v45 = vld [vmem:[%s629_s1 + $0x190] sm:$0xff]  ;;  %v94_v46 = vld [vmem:[%s629_s1 + $0x188] sm:$0xff]  ;;  %v93_v47 = vld [vmem:[%s629_s1 + $0x180] sm:$0xff] }
  0x11   :  { %124 = vmatpush1.msra.mxu0 %v61_v15  ;;  %312 = vmatpush1.msra.mxu1 %v61_v15  ;;  %v92_v48 = vld [vmem:[%s629_s1 + $0x178] sm:$0xff]  ;;  %v91_v49 = vld [vmem:[%s629_s1 + $0x170] sm:$0xff]  ;;  %v90_v50 = vld [vmem:[%s629_s1 + $0x168] sm:$0xff] }
  0x12   :  { %125 = vmatprep.subr.mxu0 %v60_v16  ;;  %281 = vmatprep.subr.mxu1 %v60_v16  ;;  %v89_v51 = vld [vmem:[%s629_s1 + $0x160] sm:$0xff]  ;;  %v88_v52 = vld [vmem:[%s629_s1 + $0x158] sm:$0xff]  ;;  %v87_v53 = vld [vmem:[%s629_s1 + $0x150] sm:$0xff] }
  0x13   :  { %126 = vmatpush1.msra.mxu0 %v59_v17  ;;  %313 = vmatpush1.msra.mxu1 %v59_v17  ;;  %v86_v54 = vld [vmem:[%s629_s1 + $0x148] sm:$0xff]  ;;  %v85_v55 = vld [vmem:[%s629_s1 + $0x140] sm:$0xff]  ;;  %v84_v56 = vld [vmem:[%s629_s1 + $0x138] sm:$0xff] }
  0x14   :  { %127 = vmatprep.subr.mxu0 %v58_v18  ;;  %282 = vmatprep.subr.mxu1 %v58_v18  ;;  %v83_v57 = vld [vmem:[%s629_s1 + $0x130] sm:$0xff]  ;;  %v82_v58 = vld [vmem:[%s629_s1 + $0x128] sm:$0xff]  ;;  %v81_v59 = vld [vmem:[%s629_s1 + $0x120] sm:$0xff] }
  0x15   :  { %128 = vmatpush1.msra.mxu0 %v57_v19  ;;  %314 = vmatpush1.msra.mxu1 %v57_v19  ;;  %v80_v60 = vld [vmem:[%s629_s1 + $0x118] sm:$0xff]  ;;  %v79_v61 = vld [vmem:[%s629_s1 + $0x110] sm:$0xff]  ;;  %v78_v62 = vld [vmem:[%s629_s1 + $0x108] sm:$0xff] }
  0x16   :  { %129 = vmatprep.subr.mxu0 %v56_v20  ;;  %283 = vmatprep.subr.mxu1 %v56_v20  ;;  %v77_v63 = vld [vmem:[%s629_s1 + $0x100] sm:$0xff]  ;;  %v38_v0 = vld [vmem:[%s630_s0 + $0x8] sm:$0xff]  ;;  %v40_v4 = vld [vmem:[%s630_s0 + $0x18] sm:$0xff] }
  0x17   :  { %130 = vmatpush1.msra.mxu0 %v55_v21  ;;  %315 = vmatpush1.msra.mxu1 %v55_v21  ;;  %v42_v1 = vld [vmem:[%s630_s0 + $0x28] sm:$0xff]  ;;  %v37_v2 = vld [vmem:[%s630_s0] sm:$0xff]  ;;  %v44_v5 = vld [vmem:[%s630_s0 + $0x38] sm:$0xff] }
  0x18   :  { %131 = vmatprep.subr.mxu0 %v54_v22  ;;  %284 = vmatprep.subr.mxu1 %v54_v22  ;;  %v41_v3 = vld [vmem:[%s630_s0 + $0x20] sm:$0xff]  ;;  %v39_v6 = vld [vmem:[%s630_s0 + $0x10] sm:$0xff]  ;;  %v246_v22 = vld [vmem:[%s632_s3 + $0x8] sm:$0xff] }
  0x19   :  { %132 = vmatpush1.msra.mxu0 %v53_v23  ;;  %316 = vmatpush1.msra.mxu1 %v53_v23  ;;  %v43_v7 = vld [vmem:[%s630_s0 + $0x30] sm:$0xff]  ;;  %v225_v11 = vld [vmem:[%s631_s2] sm:$0x3] }
  0x1a   :  { %133 = vmatprep.subr.mxu0 %v52_v24  ;;  %285 = vmatprep.subr.mxu1 %v52_v24  ;;  %v230_v13 = vrot.slane %v225_v11, %v229_v10  ;;  %v234_v14 = vrot.slane %v225_v11, %v233_v12  ;;  %v245_v16 = vld [vmem:[%s632_s3] sm:$0xff]  ;;  %v250_v24 = vld [vmem:[%s632_s3 + $0x28] sm:$0xff] }
  0x1b   :  { %134 = vmatpush1.msra.mxu0 %v51_v25  ;;  %317 = vmatpush1.msra.mxu1 %v51_v25  ;;  %v249_v18 = vld [vmem:[%s632_s3 + $0x20] sm:$0xff] }
  0x1c   :  { %135 = vmatprep.subr.mxu0 %v50_v26  ;;  %286 = vmatprep.subr.mxu1 %v50_v26 }
  0x1d   :  { %136 = vmatpush1.msra.mxu0 %v49_v27  ;;  %318 = vmatpush1.msra.mxu1 %v49_v27 }
  0x1e   :  { %137 = vmatprep.subr.mxu0 %v48_v28  ;;  %287 = vmatprep.subr.mxu1 %v48_v28 }
  0x1f   :  { %138 = vmatpush1.msra.mxu0 %v47_v29  ;;  %319 = vmatpush1.msra.mxu1 %v47_v29 }
  0x20   :  { %139 = vmatprep.subr.mxu0 %v46_v30  ;;  %288 = vmatprep.subr.mxu1 %v46_v30  ;;  %v247_v30 = vld [vmem:[%s632_s3 + $0x10] sm:$0xff] }
  0x21   :  { %140 = vmatpush1.msra.mxu0 %v45_v31  ;;  %320 = vmatpush1.msra.mxu1 %v45_v31 }
  0x22   :  { %141 = vmatprep.subr.mxu0 %v108_v32  ;;  %289 = vmatprep.subr.mxu1 %v108_v32  ;;  %v251_v32 = vld [vmem:[%s632_s3 + $0x30] sm:$0xff] }
  0x23   :  { %142 = vmatpush2.msra.mxu0 %v107_v33  ;;  %321 = vmatpush2.msra.mxu1 %v107_v33 }
  0x24   :  { %143 = vmatprep.subr.mxu0 %v106_v34  ;;  %290 = vmatprep.subr.mxu1 %v106_v34 }
  0x25   :  { %144 = vmatpush2.msra.mxu0 %v105_v35  ;;  %322 = vmatpush2.msra.mxu1 %v105_v35 }
  0x26   :  { %145 = vmatprep.subr.mxu0 %v104_v36  ;;  %291 = vmatprep.subr.mxu1 %v104_v36 }
  0x27   :  { %146 = vmatpush2.msra.mxu0 %v103_v37  ;;  %323 = vmatpush2.msra.mxu1 %v103_v37 }
  0x28   :  { %147 = vmatprep.subr.mxu0 %v102_v38  ;;  %292 = vmatprep.subr.mxu1 %v102_v38  ;;  %v248_v38 = vld [vmem:[%s632_s3 + $0x18] sm:$0xff] }
  0x29   :  { %148 = vmatpush2.msra.mxu0 %v101_v39  ;;  %324 = vmatpush2.msra.mxu1 %v101_v39 }
  0x2a   :  { %149 = vmatprep.subr.mxu0 %v100_v40  ;;  %293 = vmatprep.subr.mxu1 %v100_v40  ;;  %v252_v40 = vld [vmem:[%s632_s3 + $0x38] sm:$0xff] }
  0x2b   :  { %150 = vmatpush2.msra.mxu0 %v99_v41  ;;  %325 = vmatpush2.msra.mxu1 %v99_v41 }
  0x2c   :  { %151 = vmatprep.subr.mxu0 %v98_v42  ;;  %294 = vmatprep.subr.mxu1 %v98_v42 }
  0x2d   :  { %152 = vmatpush2.msra.mxu0 %v97_v43  ;;  %326 = vmatpush2.msra.mxu1 %v97_v43 }
  0x2e   :  { %153 = vmatprep.subr.mxu0 %v96_v44  ;;  %295 = vmatprep.subr.mxu1 %v96_v44 }
  0x2f   :  { %154 = vmatpush2.msra.mxu0 %v95_v45  ;;  %327 = vmatpush2.msra.mxu1 %v95_v45 }
  0x30   :  { %155 = vmatprep.subr.mxu0 %v94_v46  ;;  %296 = vmatprep.subr.mxu1 %v94_v46 }
  0x31   :  { %156 = vmatpush2.msra.mxu0 %v93_v47  ;;  %328 = vmatpush2.msra.mxu1 %v93_v47 }
  0x32   :  { %157 = vmatprep.subr.mxu0 %v92_v48  ;;  %297 = vmatprep.subr.mxu1 %v92_v48 }
  0x33   :  { %158 = vmatpush2.msra.mxu0 %v91_v49  ;;  %329 = vmatpush2.msra.mxu1 %v91_v49 }
  0x34   :  { %159 = vmatprep.subr.mxu0 %v90_v50  ;;  %298 = vmatprep.subr.mxu1 %v90_v50 }
  0x35   :  { %160 = vmatpush2.msra.mxu0 %v89_v51  ;;  %330 = vmatpush2.msra.mxu1 %v89_v51 }
  0x36   :  { %161 = vmatprep.subr.mxu0 %v88_v52  ;;  %299 = vmatprep.subr.mxu1 %v88_v52 }
  0x37   :  { %162 = vmatpush2.msra.mxu0 %v87_v53  ;;  %331 = vmatpush2.msra.mxu1 %v87_v53 }
  0x38   :  { %163 = vmatprep.subr.mxu0 %v86_v54  ;;  %300 = vmatprep.subr.mxu1 %v86_v54 }
  0x39   :  { %164 = vmatpush2.msra.mxu0 %v85_v55  ;;  %332 = vmatpush2.msra.mxu1 %v85_v55 }
  0x3a   :  { %165 = vmatprep.subr.mxu0 %v84_v56  ;;  %301 = vmatprep.subr.mxu1 %v84_v56 }
  0x3b   :  { %166 = vmatpush2.msra.mxu0 %v83_v57  ;;  %333 = vmatpush2.msra.mxu1 %v83_v57 }
  0x3c   :  { %167 = vmatprep.subr.mxu0 %v82_v58  ;;  %302 = vmatprep.subr.mxu1 %v82_v58 }
  0x3d   :  { %168 = vmatpush2.msra.mxu0 %v81_v59  ;;  %334 = vmatpush2.msra.mxu1 %v81_v59 }
  0x3e   :  { %169 = vmatprep.subr.mxu0 %v80_v60  ;;  %303 = vmatprep.subr.mxu1 %v80_v60 }
  0x3f   :  { %170 = vmatpush2.msra.mxu0 %v79_v61  ;;  %335 = vmatpush2.msra.mxu1 %v79_v61 }
  0x40   :  { %171 = vmatprep.subr.mxu0 %v78_v62  ;;  %304 = vmatprep.subr.mxu1 %v78_v62 }
  0x41   :  { %172 = vmatpush2.msra.mxu0 %v77_v63  ;;  %336 = vmatpush2.msra.mxu1 %v77_v63 }
  0x42   :  { %173 = vmatprep.mubr.f32.mxu0 %v38_v0  ;;  %185 = vmatprep.mubr.f32.mxu1 %v42_v1 }
  0x43   :  { %174 = vmatmul.mubr.f32.vlgmr.msra.gmra.mxu0 %v37_v2  ;;  %186 = vmatmul.mubr.f32.vlgmr.msra.gmra.mxu1 %v41_v3 }
  0x44   :  { %179 = vmatprep.mubr.f32.mxu0 %v40_v4  ;;  %191 = vmatprep.mubr.f32.mxu1 %v44_v5 }
  0x47   :  { %180 = vmatmul.mubr.f32.gmra.mxu0 %v39_v6  ;;  %192 = vmatmul.mubr.f32.gmra.mxu1 %v43_v7 }
 0x103   :  { %v175_v15 = vpop.f32.mrf.mxu0  ;;  %v187_v17 = vpop.f32.mrf.mxu1 }
 0x104   :  { %v237_v19 = vadd.f32 %v230_v13, %v175_v15  ;;  %v241_v20 = vadd.f32 %v230_v13, %v187_v17 }
 0x105   :  { %v177_v21 = vpop.f32.mrf.mxu0  ;;  %v189_v23 = vpop.f32.mrf.mxu1 }
 0x106   :  { %v253_v25 = vadd.f32 %v245_v16, %v237_v19  ;;  %v257_v26 = vadd.f32 %v249_v18, %v241_v20  ;;  %v238_v27 = vadd.f32 %v234_v14, %v177_v21  ;;  %v242_v28 = vadd.f32 %v234_v14, %v189_v23 }
 0x107   :  { %v181_v29 = vpop.f32.mrf.mxu0  ;;  %v193_v31 = vpop.f32.mrf.mxu1 }
 0x108   :  { %261 = vst [vmem:[%s633_s4] sm:$0xff] %v253_v25  ;;  %265 = vst [vmem:[%s633_s4 + $0x20] sm:$0xff] %v257_v26  ;;  %v254_v33 = vadd.f32 %v246_v22, %v238_v27  ;;  %v258_v34 = vadd.f32 %v250_v24, %v242_v28  ;;  %v239_v35 = vadd.f32 %v230_v13, %v181_v29 }
 0x109   :  { %v243_v36 = vadd.f32 %v230_v13, %v193_v31  ;;  %v183_v37 = vpop.f32.mrf.mxu0  ;;  %v195_v39 = vpop.f32.mrf.mxu1 }
 0x10a   :  { %262 = vst [vmem:[%s633_s4 + $0x8] sm:$0xff] %v254_v33  ;;  %266 = vst [vmem:[%s633_s4 + $0x28] sm:$0xff] %v258_v34  ;;  %v255_v41 = vadd.f32 %v247_v30, %v239_v35  ;;  %v240_v43 = vadd.f32 %v234_v14, %v183_v37  ;;  %v244_v44 = vadd.f32 %v234_v14, %v195_v39 }
 0x10b   :  { %v259_v42 = vadd.f32 %v251_v32, %v243_v36 }
 0x10c   :  { %263 = vst [vmem:[%s633_s4 + $0x10] sm:$0xff] %v255_v41  ;;  %v256_v45 = vadd.f32 %v248_v38, %v240_v43  ;;  %v260_v46 = vadd.f32 %v252_v40, %v244_v44 }
 0x10d   :  { %267 = vst [vmem:[%s633_s4 + $0x30] sm:$0xff] %v259_v42 }
 0x10e   :  { %264 = vst [vmem:[%s633_s4 + $0x18] sm:$0xff] %v256_v45  ;;  %268 = vst [vmem:[%s633_s4 + $0x38] sm:$0xff] %v260_v46 }

// kernel: decoder_layer.14
= control target key start
LH: loop header
LB: loop body
LE: loop exit
PB: predicated region body
PF: predicated region fallthrough
CT: control target
= control target key end

     0   :  { %s2302_s12 = smov 0   ;;  %s2646_s0 = inlined_call_operand.vmem [shape: f32[2,16,256], index: 0, kind: input, shape index: {}]   ;;  %s2647_s1 = inlined_call_operand.vmem [shape: f32[2,16,512], index: 1, kind: input, shape index: {}]   ;;  %s2648_s2 = inlined_call_operand.vmem [shape: s32[2,1,16], index: 2, kind: input, shape index: {}]   ;;  %s2649_s3 = inlined_call_operand.vmem [shape: f32[2,16,256], index: 3, kind: output, shape index: {}]  }
   0x1 LB: > { %s1954_s13 = sadd.s32 4294967295, %s2276_s12   ;;  %p1958_p0 = scmp.ge.s32.totalorder %s2276_s12, 1  ;;  %s2276_s12 = sphi %s2302_s12, %s13_s12  }
   0x2   : > { %p155_p1 = scmp.lt.s32.totalorder %s2276_s12, 3 }
   0x4   : > { %p156_p2 = pnand %p1958_p0, %p155_p1 }
   0x5   : > { %p187_p3 = scmp.lt.s32.totalorder (!%p156_p2), %s1954_s13, 1  ;;  %s2278_s22 = smov (!%p156_p2), 96  }
   0x6   : > { %159 = sbr.rel (%p156_p2) target bundleno = 4491 (0x118b), region = 32  ;;  %s2280_s26 = smov (!%p156_p2), 64  }
   0x7   : > { %s2281_s27 = smov (!%p156_p2), 32  }
   0xb   : > { %s2651_s13 = smov (!%p187_p3, %s1954_s13), 1  ;;  %vm226_vm0 = vcmask 261120   ;;  %v221_v4 = vlaneseq  ;;  %v2279_v8 = vmov 0.0   ;;  %vm314_vm2 = vcmask 130048  }
   0xc   : > { %s2016_s14 = sshll.u32 %s2651_s13, 6  ;;  %s2015_s18 = sshll.u32 %s2651_s13, 5  ;;  %vm1862_vm3 = vcmask 523264   ;;  %vm1865_vm4 = vcmask 785408  }
   0xd   : > { %s2316_s17 = scalar_lea.vmem %s2647_s1, %s2016_s14  ;;  %s2330_s21 = scalar_lea.vmem %s2646_s0, %s2015_s18  ;;  %v222_v6 = vshrl.u32 %v221_v4, 7 }
   0xe   : > { %v2320_v0 = vld [vmem:[%s2316_s17 + $0x20] sm:$0xff]  ;;  %v2346_v3 = vld [vmem:[%s2330_s21 + $0x10] sm:$0xff]  ;;  %s199_s25 = scalar_lea.vmem %s2648_s2, %s2651_s13  ;;  %s2613_s30 = scalar_lea.vmem %s2649_s3, %s2015_s18 }
   0xf   : > { %v2323_v1 = vld [vmem:[%s2316_s17] sm:$0xff]  ;;  %2082 = vmatprep.subr.msk.mxu0 %vm226_vm0, %v2320_v0  ;;  %v223_v7 = vsub.s32 0, %v222_v6  ;;  %v2369_v27 = vld [vmem:[%s2316_s17 + $0x30] sm:$0xff] }
  0x10   : > { %v2335_v2 = vld [vmem:[%s2330_s21] sm:$0xff]  ;;  %2083 = vmatpush3.xpose.msk.msra.mxu0 %vm226_vm0, %v2320_v0  ;;  %422 = vrot.lane.b32.xlu1 %v2323_v1, %s2278_s22  ;;  %v2372_v28 = vld [vmem:[%s2316_s17 + $0x10] sm:$0xff] }
  0x11   : > { %2086 = vmatprep.mubr.msk.f32.mxu0 %vm226_vm0, %v2335_v2  ;;  %2084 = vmatprep.subr.msk.mxu0 %vm226_vm0, %v2323_v1  ;;  %v213_v5 = vld [vmem:[%s199_s25] sm:$0x1] }
  0x12   : > { %vm214_vm1 = vcmp.eq.s32.totalorder %v213_v5, 0  ;;  %2089 = vmatprep.subr.mxu1 %v2369_v27 }
  0x13   : > { %v215_v9 = vsel %vm214_vm1, -1e+09, %v2279_v8  ;;  %2090 = vmatpush3.msra.mxu1 %v2369_v27 }
  0x14   : > { %2085 = vmatpush3.xpose.msk.msra.mxu0 %vm226_vm0, %v2323_v1  ;;  %418 = vrot.lane.b32.xlu1 %v2335_v2, %s2278_s22  ;;  %v2358_v11 = vrot.slane %v215_v9, %v223_v7 }
  0x15   : > { %2091 = vmatprep.subr.mxu1 %v2372_v28 }
  0x16   : > { %2092 = vmatpush3.msra.mxu1 %v2372_v28 }
  0x17   : > { %2087 = vmatmul.mubr.msk.f32.vlgmr.msra.gmra.mxu0 %vm226_vm0, %v2346_v3 }
  0x82   : > { %v423_v30 = vpop.permute.xlu1 %422 }
  0x86   : > { %v419_v31 = vpop.permute.xlu1 %418 }
  0xd7   : > { %v2088_v10 = vpop.f32.mrf.mxu0 }
  0xd8   : > { %v311_v14 = vadd.f32 %v2088_v10, %v2358_v11 }
  0xd9   : > { %v305_v12 = vpop.f32.mrf.mxu0 }
  0xda   : > { %v306_v13 = vadd.f32 %v305_v12, %v2358_v11  ;;  %v318_v16 = vsel %vm314_vm2, %v311_v14, -inf }
  0xdc   : > { %v315_v15 = vsel %vm314_vm2, %v306_v13, -inf }
  0xdd   : > { %316 = vmax.xlane.f32.xlu0 %v315_v15 }
  0xe1   : > { %319 = vmax.xlane.f32.xlu0 %v318_v16 }
  0xf7   : > { %424 = vrot.lane.b32.xlu0 %v2320_v0, %s2278_s22 }
 0x166   : > { %v317_v17 = vpop.xlane.xlu0 %316 }
 0x167   : > { %v321_v18 = vsub.f32 %v306_v13, %v317_v17 }
 0x169   : > { %v323_v21 = vmul.f32 1.442695, %v321_v18 }
 0x16a   : > { %v320_v19 = vpop.xlane.xlu0 %319 }
 0x16b   : > { %v322_v20 = vsub.f32 %v311_v14, %v320_v19 }
 0x16d   : > { %v325_v22 = vmul.f32 1.442695, %v322_v20 }
 0x16e   : > { %v425_v29 = vpop.permute.xlu0 %424 }
 0x16f   : > { %2206 = vpow2.f32 %v325_v22  ;;  %2096 = vmatprep.subr.msk.mxu1 %vm226_vm0, %v425_v29 }
 0x170   : > { %2208 = vpow2.f32 %v323_v21 }
 0x17c   : > { %v2207_v23 = vpop.eup %2206 }
 0x17d   : > { %v330_v24 = vsel %vm314_vm2, %v2207_v23, 0.0  ;;  %v2209_v25 = vpop.eup %2208 }
 0x17e   : > { %331 = vadd.xlane.f32.xlu1 %v330_v24  ;;  %v327_v26 = vsel %vm314_vm2, %v2209_v25, 0.0 }
 0x182   : > { %328 = vadd.xlane.f32.xlu1 %v327_v26 }
 0x193   : > { %420 = vrot.lane.b32.xlu1 %v2346_v3, %s2278_s22 }
 0x207   : > { %v332_v32 = vpop.xlane.xlu1 %331 }
 0x208   : > { %2210 = vrcp.f32 %v332_v32 }
 0x20b   : > { %v329_v33 = vpop.xlane.xlu1 %328 }
 0x20c   : > { %2212 = vrcp.f32 %v329_v33 }
 0x20f   : > { %v421_v38 = vpop.permute.xlu1 %420 }
 0x215   : > { %v2211_v34 = vpop.eup %2210 }
 0x216   : > { %v336_v37 = vmul.f32 %v2211_v34, %v2207_v23 }
 0x219   : > { %v2213_v35 = vpop.eup %2212 }
 0x21a   : > { %v335_v36 = vmul.f32 %v2213_v35, %v2209_v25 }
 0x21c   : > { %2093 = vmatprep.mubr.msk.f32.mxu1 %vm314_vm2, %v335_v36 }
 0x21d   : > { %2094 = vmatmul.mubr.msk.f32.vlgmr.msra.gmra.mxu1 %vm314_vm2, %v336_v37 }
 0x21e   : > { %2097 = vmatpush3.xpose.msk.msra.mxu1 %vm226_vm0, %v425_v29  ;;  %2100 = vmatprep.mubr.msk.f32.mxu1 %vm226_vm0, %v419_v31 }
 0x21f   : > { %2098 = vmatprep.subr.msk.mxu1 %vm226_vm0, %v423_v30 }
 0x222   : > { %2099 = vmatpush3.xpose.msk.msra.mxu1 %vm226_vm0, %v423_v30 }
 0x225   : > { %2101 = vmatmul.mubr.msk.f32.vlgmr.msra.gmra.mxu1 %vm226_vm0, %v421_v38 }
 0x2dd   : > { %v2388_v39 = vpop.f32.mrf.mxu1 }
 0x2df   : > { %v2390_v40 = vpop.f32.mrf.mxu1 }
 0x2e5   : > { %v2102_v41 = vpop.f32.mrf.mxu1 }
 0x2e6   : > { %v506_v42 = vadd.f32 %v2102_v41, %v2358_v11 }
 0x2e7   : > { %v500_v43 = vpop.f32.mrf.mxu1 }
 0x2e8   : > { %v501_v44 = vadd.f32 %v500_v43, %v2358_v11  ;;  %v512_v45 = vsel %vm314_vm2, %v506_v42, -inf }
 0x2e9   : > { %513 = vmax.xlane.f32.xlu1 %v512_v45 }
 0x2ea   : > { %v509_v46 = vsel %vm314_vm2, %v501_v44, -inf }
 0x2eb   : > { %510 = vmax.xlane.f32.xlu0 %v509_v46 }
 0x2fa   : > { %533 = vrot.lane.b32.xlu1 %v2372_v28, %s2278_s22 }
 0x2fe   : > { %626 = vrot.lane.b32.xlu1 %v2320_v0, %s2280_s26 }
 0x302   : > { %624 = vrot.lane.b32.xlu1 %v2323_v1, %s2280_s26 }
 0x306   : > { %622 = vrot.lane.b32.xlu1 %v2346_v3, %s2280_s26 }
 0x372   : > { %v514_v47 = vpop.xlane.xlu1 %513 }
 0x373   : > { %v516_v48 = vsub.f32 %v506_v42, %v514_v47 }
 0x374   : > { %v511_v49 = vpop.xlane.xlu0 %510 }
 0x375   : > { %v519_v50 = vmul.f32 1.442695, %v516_v48  ;;  %v515_v51 = vsub.f32 %v501_v44, %v511_v49 }
 0x376   : > { %v534_v59 = vpop.permute.xlu1 %533 }
 0x377   : > { %2214 = vpow2.f32 %v519_v50  ;;  %v517_v52 = vmul.f32 1.442695, %v515_v51 }
 0x379   : > { %2216 = vpow2.f32 %v517_v52 }
 0x37a   : > { %v627_v61 = vpop.permute.xlu1 %626 }
 0x37e   : > { %v625_v7 = vpop.permute.xlu1 %624 }
 0x382   : > { %v623_v8 = vpop.permute.xlu1 %622 }
 0x384   : > { %v2215_v53 = vpop.eup %2214 }
 0x385   : > { %v524_v54 = vsel %vm314_vm2, %v2215_v53, 0.0 }
 0x386   : > { %v2217_v55 = vpop.eup %2216  ;;  %525 = vadd.xlane.f32.xlu0 %v524_v54 }
 0x387   : > { %v521_v56 = vsel %vm314_vm2, %v2217_v55, 0.0 }
 0x38a   : > { %522 = vadd.xlane.f32.xlu0 %v521_v56 }
 0x3a0   : > { %535 = vrot.lane.b32.xlu0 %v2369_v27, %s2278_s22 }
 0x3a4   : > { %620 = vrot.lane.b32.xlu0 %v2335_v2, %s2280_s26 }
 0x40f   : > { %v526_v57 = vpop.xlane.xlu0 %525 }
 0x410   : > { %2218 = vrcp.f32 %v526_v57 }
 0x413   : > { %v523_v58 = vpop.xlane.xlu0 %522 }
 0x414   : > { %2220 = vrcp.f32 %v523_v58 }
 0x417   : > { %v536_v60 = vpop.permute.xlu0 %535 }
 0x418   : > { %2103 = vmatprep.subr.mxu0 %v536_v60 }
 0x419   : > { %2104 = vmatpush3.msra.mxu0 %v536_v60 }
 0x41a   : > { %2105 = vmatprep.subr.mxu0 %v534_v59 }
 0x41b   : > { %2106 = vmatpush3.msra.mxu0 %v534_v59  ;;  %v621_v6 = vpop.permute.xlu0 %620 }
 0x41c   : > { %2110 = vmatprep.subr.msk.mxu0 %vm226_vm0, %v627_v61 }
 0x41d   : > { %v2219_v62 = vpop.eup %2218 }
 0x41e   : > { %v530_v5 = vmul.f32 %v2219_v62, %v2215_v53 }
 0x421   : > { %v2221_v63 = vpop.eup %2220 }
 0x422   : > { %v529_v4 = vmul.f32 %v2221_v63, %v2217_v55 }
 0x424   : > { %2107 = vmatprep.mubr.msk.f32.mxu0 %vm314_vm2, %v529_v4 }
 0x425   : > { %2108 = vmatmul.mubr.msk.f32.vlgmr.msra.gmra.mxu0 %vm314_vm2, %v530_v5  ;;  %v2468_v5 = vld [vmem:[%s2330_s21 + $0x8] sm:$0xff] }
 0x426   : > { %2111 = vmatpush3.xpose.msk.msra.mxu0 %vm226_vm0, %v627_v61  ;;  %2114 = vmatprep.mubr.msk.f32.mxu0 %vm226_vm0, %v621_v6  ;;  %v2463_v61 = vld [vmem:[%s2316_s17 + $0x28] sm:$0xff] }
 0x427   : > { %2112 = vmatprep.subr.msk.mxu0 %vm226_vm0, %v625_v7  ;;  %v2472_v6 = vld [vmem:[%s2316_s17 + $0x8] sm:$0xff] }
 0x42a   : > { %2113 = vmatpush3.xpose.msk.msra.mxu0 %vm226_vm0, %v625_v7  ;;  %v2484_v7 = vld [vmem:[%s2330_s21 + $0x18] sm:$0xff] }
 0x42d   : > { %2115 = vmatmul.mubr.msk.f32.vlgmr.msra.gmra.mxu0 %vm226_vm0, %v623_v8 }
 0x4e5   : > { %v2418_v9 = vpop.f32.mrf.mxu0 }
 0x4e7   : > { %v2420_v10 = vpop.f32.mrf.mxu0 }
 0x4ed   : > { %v2116_v12 = vpop.f32.mrf.mxu0 }
 0x4ee   : > { %v708_v13 = vadd.f32 %v2116_v12, %v2358_v11 }
 0x4ef   : > { %v702_v14 = vpop.f32.mrf.mxu0 }
 0x4f0   : > { %v703_v15 = vadd.f32 %v702_v14, %v2358_v11  ;;  %v714_v16 = vsel %vm314_vm2, %v708_v13, -inf }
 0x4f1   : > { %715 = vmax.xlane.f32.xlu1 %v714_v16 }
 0x4f2   : > { %v711_v17 = vsel %vm314_vm2, %v703_v15, -inf }
 0x4f3   : > { %712 = vmax.xlane.f32.xlu0 %v711_v17 }
 0x502   : > { %733 = vrot.lane.b32.xlu1 %v2372_v28, %s2280_s26 }
 0x506   : > { %826 = vrot.lane.b32.xlu1 %v2320_v0, %s2281_s27 }
 0x50a   : > { %824 = vrot.lane.b32.xlu1 %v2323_v1, %s2281_s27 }
 0x50e   : > { %822 = vrot.lane.b32.xlu1 %v2346_v3, %s2281_s27 }
 0x57a   : > { %v716_v18 = vpop.xlane.xlu1 %715 }
 0x57b   : > { %v718_v19 = vsub.f32 %v708_v13, %v716_v18 }
 0x57c   : > { %v713_v20 = vpop.xlane.xlu0 %712 }
 0x57d   : > { %v721_v21 = vmul.f32 1.442695, %v718_v19  ;;  %v717_v22 = vsub.f32 %v703_v15, %v713_v20 }
 0x57e   : > { %v734_v29 = vpop.permute.xlu1 %733 }
 0x57f   : > { %2222 = vpow2.f32 %v721_v21  ;;  %v719_v23 = vmul.f32 1.442695, %v717_v22 }
 0x581   : > { %2224 = vpow2.f32 %v719_v23 }
 0x582   : > { %v827_v31 = vpop.permute.xlu1 %826 }
 0x58c   : > { %v2223_v24 = vpop.eup %2222 }
 0x58d   : > { %v726_v25 = vsel %vm314_vm2, %v2223_v24, 0.0 }
 0x58e   : > { %v2225_v26 = vpop.eup %2224  ;;  %727 = vadd.xlane.f32.xlu0 %v726_v25 }
 0x58f   : > { %v723_v0 = vsel %vm314_vm2, %v2225_v26, 0.0 }
 0x592   : > { %724 = vadd.xlane.f32.xlu0 %v723_v0 }
 0x5a8   : > { %735 = vrot.lane.b32.xlu0 %v2369_v27, %s2280_s26 }
 0x5ac   : > { %820 = vrot.lane.b32.xlu0 %v2335_v2, %s2281_s27  ;;  %v825_v2 = vpop.permute.xlu1 %824 }
 0x5b0   : > { %v823_v37 = vpop.permute.xlu1 %822 }
 0x617   : > { %v728_v1 = vpop.xlane.xlu0 %727 }
 0x618   : > { %2226 = vrcp.f32 %v728_v1 }
 0x61b   : > { %v725_v3 = vpop.xlane.xlu0 %724 }
 0x61c   : > { %2228 = vrcp.f32 %v725_v3  ;;  %v2499_v3 = vld [vmem:[%s2316_s17 + $0x38] sm:$0xff] }
 0x61f   : > { %v736_v30 = vpop.permute.xlu0 %735 }
 0x620   : > { %2117 = vmatprep.subr.mxu1 %v736_v30 }
 0x621   : > { %2118 = vmatpush3.msra.mxu1 %v736_v30 }
 0x622   : > { %2119 = vmatprep.subr.mxu1 %v734_v29 }
 0x623   : > { %2120 = vmatpush3.msra.mxu1 %v734_v29  ;;  %v821_v36 = vpop.permute.xlu0 %820  ;;  %v2502_v29 = vld [vmem:[%s2316_s17 + $0x18] sm:$0xff] }
 0x624   : > { %2124 = vmatprep.subr.msk.mxu1 %vm226_vm0, %v827_v31 }
 0x625   : > { %v2227_v32 = vpop.eup %2226 }
 0x626   : > { %v732_v35 = vmul.f32 %v2227_v32, %v2223_v24 }
 0x629   : > { %v2229_v33 = vpop.eup %2228 }
 0x62a   : > { %v731_v34 = vmul.f32 %v2229_v33, %v2225_v26 }
 0x62c   : > { %2121 = vmatprep.mubr.msk.f32.mxu1 %vm314_vm2, %v731_v34 }
 0x62d   : > { %2122 = vmatmul.mubr.msk.f32.vlgmr.msra.gmra.mxu1 %vm314_vm2, %v732_v35 }
 0x62e   : > { %2125 = vmatpush3.xpose.msk.msra.mxu1 %vm226_vm0, %v827_v31  ;;  %2128 = vmatprep.mubr.msk.f32.mxu1 %vm226_vm0, %v821_v36 }
 0x62f   : > { %2126 = vmatprep.subr.msk.mxu1 %vm226_vm0, %v825_v2 }
 0x632   : > { %2127 = vmatpush3.xpose.msk.msra.mxu1 %vm226_vm0, %v825_v2 }
 0x633   : > { %2145 = vmatprep.subr.mxu1 %v2499_v3 }
 0x635   : > { %2129 = vmatmul.mubr.msk.f32.vlgmr.msra.gmra.mxu1 %vm226_vm0, %v823_v37 }
 0x636   : > { %2146 = vmatpush3.msra.mxu1 %v2499_v3 }
 0x637   : > { %2147 = vmatprep.subr.mxu1 %v2502_v29 }
 0x638   : > { %2148 = vmatpush3.msra.mxu1 %v2502_v29 }
 0x6ed   : > { %v2448_v38 = vpop.f32.mrf.mxu1 }
 0x6ef   : > { %v2450_v41 = vpop.f32.mrf.mxu1 }
 0x6f5   : > { %v2130_v42 = vpop.f32.mrf.mxu1 }
 0x6f6   : > { %v908_v43 = vadd.f32 %v2130_v42, %v2358_v11 }
 0x6f7   : > { %v902_v44 = vpop.f32.mrf.mxu1 }
 0x6f8   : > { %v903_v45 = vadd.f32 %v902_v44, %v2358_v11  ;;  %v914_v46 = vsel %vm314_vm2, %v908_v43, -inf }
 0x6f9   : > { %915 = vmax.xlane.f32.xlu1 %v914_v46 }
 0x6fa   : > { %v911_v47 = vsel %vm314_vm2, %v903_v45, -inf }
 0x6fb   : > { %912 = vmax.xlane.f32.xlu0 %v911_v47 }
 0x70a   : > { %933 = vrot.lane.b32.xlu1 %v2372_v28, %s2281_s27 }
 0x782   : > { %v916_v48 = vpop.xlane.xlu1 %915 }
 0x783   : > { %v918_v49 = vsub.f32 %v908_v43, %v916_v48 }
 0x784   : > { %v913_v50 = vpop.xlane.xlu0 %912 }
 0x785   : > { %v921_v51 = vmul.f32 1.442695, %v918_v49  ;;  %v917_v52 = vsub.f32 %v903_v45, %v913_v50 }
 0x786   : > { %v934_v60 = vpop.permute.xlu1 %933 }
 0x787   : > { %2230 = vpow2.f32 %v921_v51  ;;  %v919_v53 = vmul.f32 1.442695, %v917_v52 }
 0x789   : > { %2232 = vpow2.f32 %v919_v53 }
 0x794   : > { %v2231_v54 = vpop.eup %2230 }
 0x795   : > { %v926_v55 = vsel %vm314_vm2, %v2231_v54, 0.0 }
 0x796   : > { %v2233_v56 = vpop.eup %2232  ;;  %927 = vadd.xlane.f32.xlu0 %v926_v55 }
 0x797   : > { %v923_v57 = vsel %vm314_vm2, %v2233_v56, 0.0 }
 0x79a   : > { %924 = vadd.xlane.f32.xlu0 %v923_v57 }
 0x7b0   : > { %935 = vrot.lane.b32.xlu0 %v2369_v27, %s2281_s27 }
 0x81f   : > { %v928_v28 = vpop.xlane.xlu0 %927 }
 0x820   : > { %2234 = vrcp.f32 %v928_v28 }
 0x823   : > { %v925_v58 = vpop.xlane.xlu0 %924 }
 0x824   : > { %2236 = vrcp.f32 %v925_v58 }
 0x827   : > { %v936_v59 = vpop.permute.xlu0 %935 }
 0x828   : > { %2131 = vmatprep.subr.mxu0 %v936_v59 }
 0x829   : > { %2132 = vmatpush3.msra.mxu0 %v936_v59 }
 0x82a   : > { %2133 = vmatprep.subr.mxu0 %v934_v60 }
 0x82b   : > { %2134 = vmatpush3.msra.mxu0 %v934_v60 }
 0x82c   : > { %2138 = vmatprep.subr.msk.mxu0 %vm226_vm0, %v2463_v61 }
 0x82d   : > { %v2235_v62 = vpop.eup %2234 }
 0x82e   : > { %v932_v4 = vmul.f32 %v2235_v62, %v2231_v54 }
 0x831   : > { %v2237_v27 = vpop.eup %2236 }
 0x832   : > { %v931_v63 = vmul.f32 %v2237_v27, %v2233_v56 }
 0x834   : > { %2135 = vmatprep.mubr.msk.f32.mxu0 %vm314_vm2, %v931_v63 }
 0x835   : > { %2136 = vmatmul.mubr.msk.f32.vlgmr.msra.gmra.mxu0 %vm314_vm2, %v932_v4 }
 0x836   : > { %2139 = vmatpush3.xpose.msk.msra.mxu0 %vm226_vm0, %v2463_v61  ;;  %2142 = vmatprep.mubr.msk.f32.mxu0 %vm226_vm0, %v2468_v5 }
 0x837   : > { %2140 = vmatprep.subr.msk.mxu0 %vm226_vm0, %v2472_v6 }
 0x83a   : > { %2141 = vmatpush3.xpose.msk.msra.mxu0 %vm226_vm0, %v2472_v6 }
 0x83d   : > { %2143 = vmatmul.mubr.msk.f32.vlgmr.msra.gmra.mxu0 %vm226_vm0, %v2484_v7 }
 0x8f5   : > { %v2488_v8 = vpop.f32.mrf.mxu0 }
 0x8f7   : > { %v2490_v12 = vpop.f32.mrf.mxu0 }
 0x8fd   : > { %v2144_v13 = vpop.f32.mrf.mxu0 }
 0x8fe   : > { %v1104_v14 = vadd.f32 %v2144_v13, %v2358_v11 }
 0x8ff   : > { %v1098_v15 = vpop.f32.mrf.mxu0 }
 0x900   : > { %v1099_v16 = vadd.f32 %v1098_v15, %v2358_v11  ;;  %v1110_v17 = vsel %vm314_vm2, %v1104_v14, -inf }
 0x901   : > { %1111 = vmax.xlane.f32.xlu0 %v1110_v17 }
 0x902   : > { %v1107_v18 = vsel %vm314_vm2, %v1099_v16, -inf }
 0x903   : > { %1108 = vmax.xlane.f32.xlu1 %v1107_v18 }
 0x98a   : > { %v1112_v19 = vpop.xlane.xlu0 %1111 }
 0x98b   : > { %v1114_v20 = vsub.f32 %v1104_v14, %v1112_v19 }
 0x98c   : > { %v1109_v21 = vpop.xlane.xlu1 %1108 }
 0x98d   : > { %v1117_v22 = vmul.f32 1.442695, %v1114_v20  ;;  %v1113_v23 = vsub.f32 %v1099_v16, %v1109_v21 }
 0x98f   : > { %2238 = vpow2.f32 %v1117_v22  ;;  %v1115_v24 = vmul.f32 1.442695, %v1113_v23 }
 0x991   : > { %2240 = vpow2.f32 %v1115_v24 }
 0x99c   : > { %v2239_v25 = vpop.eup %2238 }
 0x99d   : > { %v1122_v26 = vsel %vm314_vm2, %v2239_v25, 0.0 }
 0x99e   : > { %v2241_v0 = vpop.eup %2240  ;;  %1123 = vadd.xlane.f32.xlu1 %v1122_v26 }
 0x99f   : > { %v1119_v1 = vsel %vm314_vm2, %v2241_v0, 0.0 }
 0x9a0   : > { %1120 = vadd.xlane.f32.xlu0 %v1119_v1 }
 0x9af   : > { %1214 = vrot.lane.b32.xlu1 %v2472_v6, %s2278_s22 }
 0x9b3   : > { %1210 = vrot.lane.b32.xlu1 %v2468_v5, %s2278_s22 }
 0x9b6   : > { %1216 = vrot.lane.b32.xlu0 %v2463_v61, %s2278_s22 }
 0x9b7   : > { %1212 = vrot.lane.b32.xlu1 %v2484_v7, %s2278_s22 }
 0xa27   : > { %v1124_v30 = vpop.xlane.xlu1 %1123 }
 0xa28   : > { %2242 = vrcp.f32 %v1124_v30 }
 0xa29   : > { %v1121_v31 = vpop.xlane.xlu0 %1120 }
 0xa2a   : > { %2244 = vrcp.f32 %v1121_v31 }
 0xa2b   : > { %v1215_v33 = vpop.permute.xlu1 %1214 }
 0xa2d   : > { %v1217_v32 = vpop.permute.xlu0 %1216 }
 0xa2e   : > { %2152 = vmatprep.subr.msk.mxu1 %vm226_vm0, %v1217_v32 }
 0xa2f   : > { %v1211_v37 = vpop.permute.xlu1 %1210 }
 0xa33   : > { %v1213_v42 = vpop.permute.xlu1 %1212 }
 0xa35   : > { %v2243_v34 = vpop.eup %2242 }
 0xa36   : > { %v1128_v2 = vmul.f32 %v2243_v34, %v2239_v25 }
 0xa37   : > { %v2245_v35 = vpop.eup %2244 }
 0xa38   : > { %v1127_v36 = vmul.f32 %v2245_v35, %v2241_v0 }
 0xa3a   : > { %2149 = vmatprep.mubr.msk.f32.mxu1 %vm314_vm2, %v1127_v36 }
 0xa3b   : > { %2150 = vmatmul.mubr.msk.f32.vlgmr.msra.gmra.mxu1 %vm314_vm2, %v1128_v2 }
 0xa3c   : > { %2153 = vmatpush3.xpose.msk.msra.mxu1 %vm226_vm0, %v1217_v32  ;;  %2156 = vmatprep.mubr.msk.f32.mxu1 %vm226_vm0, %v1211_v37 }
 0xa3d   : > { %2154 = vmatprep.subr.msk.mxu1 %vm226_vm0, %v1215_v33 }
 0xa40   : > { %2155 = vmatpush3.xpose.msk.msra.mxu1 %vm226_vm0, %v1215_v33 }
 0xa43   : > { %2157 = vmatmul.mubr.msk.f32.vlgmr.msra.gmra.mxu1 %vm226_vm0, %v1213_v42 }
 0xafb   : > { %v2524_v43 = vpop.f32.mrf.mxu1 }
 0xafd   : > { %v2526_v44 = vpop.f32.mrf.mxu1 }
 0xb03   : > { %v2158_v45 = vpop.f32.mrf.mxu1 }
 0xb04   : > { %v1298_v46 = vadd.f32 %v2158_v45, %v2358_v11 }
 0xb05   : > { %v1292_v47 = vpop.f32.mrf.mxu1 }
 0xb06   : > { %v1293_v48 = vadd.f32 %v1292_v47, %v2358_v11  ;;  %v1304_v49 = vsel %vm314_vm2, %v1298_v46, -inf }
 0xb07   : > { %1305 = vmax.xlane.f32.xlu1 %v1304_v49 }
 0xb08   : > { %v1301_v50 = vsel %vm314_vm2, %v1293_v48, -inf }
 0xb09   : > { %1302 = vmax.xlane.f32.xlu0 %v1301_v50 }
 0xb18   : > { %1325 = vrot.lane.b32.xlu1 %v2502_v29, %s2278_s22 }
 0xb1c   : > { %1418 = vrot.lane.b32.xlu1 %v2463_v61, %s2280_s26 }
 0xb20   : > { %1416 = vrot.lane.b32.xlu1 %v2472_v6, %s2280_s26 }
 0xb24   : > { %1414 = vrot.lane.b32.xlu1 %v2484_v7, %s2280_s26 }
 0xb90   : > { %v1306_v51 = vpop.xlane.xlu1 %1305 }
 0xb91   : > { %v1308_v52 = vsub.f32 %v1298_v46, %v1306_v51 }
 0xb92   : > { %v1303_v53 = vpop.xlane.xlu0 %1302 }
 0xb93   : > { %v1311_v54 = vmul.f32 1.442695, %v1308_v52  ;;  %v1307_v55 = vsub.f32 %v1293_v48, %v1303_v53 }
 0xb94   : > { %v1326_v27 = vpop.permute.xlu1 %1325 }
 0xb95   : > { %2246 = vpow2.f32 %v1311_v54  ;;  %v1309_v56 = vmul.f32 1.442695, %v1307_v55 }
 0xb97   : > { %2248 = vpow2.f32 %v1309_v56 }
 0xb98   : > { %v1419_v4 = vpop.permute.xlu1 %1418 }
 0xb9c   : > { %v1417_v18 = vpop.permute.xlu1 %1416 }
 0xba0   : > { %v1415_v19 = vpop.permute.xlu1 %1414 }
 0xba2   : > { %v2247_v57 = vpop.eup %2246 }
 0xba3   : > { %v1316_v28 = vsel %vm314_vm2, %v2247_v57, 0.0 }
 0xba4   : > { %v2249_v58 = vpop.eup %2248  ;;  %1317 = vadd.xlane.f32.xlu0 %v1316_v28 }
 0xba5   : > { %v1313_v59 = vsel %vm314_vm2, %v2249_v58, 0.0 }
 0xba8   : > { %1314 = vadd.xlane.f32.xlu0 %v1313_v59 }
 0xbbe   : > { %1327 = vrot.lane.b32.xlu0 %v2499_v3, %s2278_s22 }
 0xbc2   : > { %1412 = vrot.lane.b32.xlu0 %v2468_v5, %s2280_s26 }
 0xc2d   : > { %v1318_v60 = vpop.xlane.xlu0 %1317 }
 0xc2e   : > { %2250 = vrcp.f32 %v1318_v60 }
 0xc31   : > { %v1315_v62 = vpop.xlane.xlu0 %1314 }
 0xc32   : > { %2252 = vrcp.f32 %v1315_v62 }
 0xc35   : > { %v1328_v63 = vpop.permute.xlu0 %1327 }
 0xc36   : > { %2159 = vmatprep.subr.mxu0 %v1328_v63 }
 0xc37   : > { %2160 = vmatpush3.msra.mxu0 %v1328_v63 }
 0xc38   : > { %2161 = vmatprep.subr.mxu0 %v1326_v27 }
 0xc39   : > { %2162 = vmatpush3.msra.mxu0 %v1326_v27  ;;  %v1413_v17 = vpop.permute.xlu0 %1412 }
 0xc3a   : > { %2166 = vmatprep.subr.msk.mxu0 %vm226_vm0, %v1419_v4 }
 0xc3b   : > { %v2251_v13 = vpop.eup %2250 }
 0xc3c   : > { %v1322_v16 = vmul.f32 %v2251_v13, %v2247_v57 }
 0xc3f   : > { %v2253_v14 = vpop.eup %2252 }
 0xc40   : > { %v1321_v15 = vmul.f32 %v2253_v14, %v2249_v58 }
 0xc42   : > { %2163 = vmatprep.mubr.msk.f32.mxu0 %vm314_vm2, %v1321_v15 }
 0xc43   : > { %2164 = vmatmul.mubr.msk.f32.vlgmr.msra.gmra.mxu0 %vm314_vm2, %v1322_v16 }
 0xc44   : > { %2167 = vmatpush3.xpose.msk.msra.mxu0 %vm226_vm0, %v1419_v4  ;;  %2170 = vmatprep.mubr.msk.f32.mxu0 %vm226_vm0, %v1413_v17 }
 0xc45   : > { %2168 = vmatprep.subr.msk.mxu0 %vm226_vm0, %v1417_v18 }
 0xc48   : > { %2169 = vmatpush3.xpose.msk.msra.mxu0 %vm226_vm0, %v1417_v18 }
 0xc4b   : > { %2171 = vmatmul.mubr.msk.f32.vlgmr.msra.gmra.mxu0 %vm226_vm0, %v1415_v19 }
 0xd03   : > { %v2554_v20 = vpop.f32.mrf.mxu0 }
 0xd05   : > { %v2556_v21 = vpop.f32.mrf.mxu0 }
 0xd0b   : > { %v2172_v22 = vpop.f32.mrf.mxu0 }
 0xd0c   : > { %v1500_v23 = vadd.f32 %v2172_v22, %v2358_v11 }
 0xd0d   : > { %v1494_v24 = vpop.f32.mrf.mxu0 }
 0xd0e   : > { %v1495_v25 = vadd.f32 %v1494_v24, %v2358_v11  ;;  %v1506_v26 = vsel %vm314_vm2, %v1500_v23, -inf }
 0xd0f   : > { %1507 = vmax.xlane.f32.xlu1 %v1506_v26 }
 0xd10   : > { %v1503_v0 = vsel %vm314_vm2, %v1495_v25, -inf }
 0xd11   : > { %1504 = vmax.xlane.f32.xlu0 %v1503_v0 }
 0xd20   : > { %1525 = vrot.lane.b32.xlu1 %v2502_v29, %s2280_s26 }
 0xd24   : > { %1618 = vrot.lane.b32.xlu1 %v2463_v61, %s2281_s27 }
 0xd28   : > { %1616 = vrot.lane.b32.xlu1 %v2472_v6, %s2281_s27 }
 0xd2c   : > { %1614 = vrot.lane.b32.xlu1 %v2484_v7, %s2281_s27 }
 0xd98   : > { %v1508_v1 = vpop.xlane.xlu1 %1507 }
 0xd99   : > { %v1510_v30 = vsub.f32 %v1500_v23, %v1508_v1 }
 0xd9a   : > { %v1505_v31 = vpop.xlane.xlu0 %1504 }
 0xd9b   : > { %v1513_v32 = vmul.f32 1.442695, %v1510_v30  ;;  %v1509_v33 = vsub.f32 %v1495_v25, %v1505_v31 }
 0xd9c   : > { %v1526_v37 = vpop.permute.xlu1 %1525 }
 0xd9d   : > { %2254 = vpow2.f32 %v1513_v32  ;;  %v1511_v34 = vmul.f32 1.442695, %v1509_v33 }
 0xd9f   : > { %2256 = vpow2.f32 %v1511_v34 }
 0xda0   : > { %v1619_v45 = vpop.permute.xlu1 %1618 }
 0xdaa   : > { %v2255_v35 = vpop.eup %2254 }
 0xdab   : > { %v1518_v36 = vsel %vm314_vm2, %v2255_v35, 0.0 }
 0xdac   : > { %v2257_v2 = vpop.eup %2256  ;;  %1519 = vadd.xlane.f32.xlu0 %v1518_v36 }
 0xdad   : > { %v1515_v61 = vsel %vm314_vm2, %v2257_v2, 0.0 }
 0xdb0   : > { %1516 = vadd.xlane.f32.xlu0 %v1515_v61 }
 0xdc6   : > { %1527 = vrot.lane.b32.xlu0 %v2499_v3, %s2280_s26 }
 0xdca   : > { %1612 = vrot.lane.b32.xlu0 %v2468_v5, %s2281_s27  ;;  %v1617_v5 = vpop.permute.xlu1 %1616 }
 0xdce   : > { %v1615_v51 = vpop.permute.xlu1 %1614 }
 0xe35   : > { %v1520_v6 = vpop.xlane.xlu0 %1519 }
 0xe36   : > { %2258 = vrcp.f32 %v1520_v6 }
 0xe39   : > { %v1517_v7 = vpop.xlane.xlu0 %1516 }
 0xe3a   : > { %2260 = vrcp.f32 %v1517_v7 }
 0xe3d   : > { %v1528_v42 = vpop.permute.xlu0 %1527 }
 0xe3e   : > { %2173 = vmatprep.subr.mxu1 %v1528_v42 }
 0xe3f   : > { %2174 = vmatpush3.msra.mxu1 %v1528_v42 }
 0xe40   : > { %2175 = vmatprep.subr.mxu1 %v1526_v37 }
 0xe41   : > { %2176 = vmatpush3.msra.mxu1 %v1526_v37  ;;  %v1613_v50 = vpop.permute.xlu0 %1612 }
 0xe42   : > { %2180 = vmatprep.subr.msk.mxu1 %vm226_vm0, %v1619_v45 }
 0xe43   : > { %v2259_v46 = vpop.eup %2258 }
 0xe44   : > { %v1524_v49 = vmul.f32 %v2259_v46, %v2255_v35 }
 0xe47   : > { %v2261_v47 = vpop.eup %2260 }
 0xe48   : > { %v1523_v48 = vmul.f32 %v2261_v47, %v2257_v2 }
 0xe4a   : > { %2177 = vmatprep.mubr.msk.f32.mxu1 %vm314_vm2, %v1523_v48 }
 0xe4b   : > { %2178 = vmatmul.mubr.msk.f32.vlgmr.msra.gmra.mxu1 %vm314_vm2, %v1524_v49 }
 0xe4c   : > { %2181 = vmatpush3.xpose.msk.msra.mxu1 %vm226_vm0, %v1619_v45  ;;  %2184 = vmatprep.mubr.msk.f32.mxu1 %vm226_vm0, %v1613_v50 }
 0xe4d   : > { %2182 = vmatprep.subr.msk.mxu1 %vm226_vm0, %v1617_v5 }
 0xe50   : > { %2183 = vmatpush3.xpose.msk.msra.mxu1 %vm226_vm0, %v1617_v5 }
 0xe53   : > { %2185 = vmatmul.mubr.msk.f32.vlgmr.msra.gmra.mxu1 %vm226_vm0, %v1615_v51 }
 0xf0b   : > { %v2179_v52 = vpop.f32.mrf.mxu1 }
 0xf0d   : > { %v1603_v53 = vpop.f32.mrf.mxu1 }
 0xf13   : > { %v2186_v54 = vpop.f32.mrf.mxu1 }
 0xf14   : > { %v1700_v55 = vadd.f32 %v2186_v54, %v2358_v11 }
 0xf15   : > { %v1694_v56 = vpop.f32.mrf.mxu1 }
 0xf16   : > { %v1695_v57 = vadd.f32 %v1694_v56, %v2358_v11  ;;  %v1706_v28 = vsel %vm314_vm2, %v1700_v55, -inf }
 0xf17   : > { %1707 = vmax.xlane.f32.xlu1 %v1706_v28 }
 0xf18   : > { %v1703_v58 = vsel %vm314_vm2, %v1695_v57, -inf }
 0xf19   : > { %1704 = vmax.xlane.f32.xlu0 %v1703_v58 }
 0xf28   : > { %1725 = vrot.lane.b32.xlu1 %v2502_v29, %s2281_s27 }
 0xf2c   : > { %1814 = vrot.lane.b32.xlu1 %v2420_v10, %s2281_s27 }
 0xf30   : > { %1816 = vrot.lane.b32.xlu1 %v2418_v9, %s2281_s27 }
 0xf34   : > { %1840 = vrot.lane.b32.xlu1 %v2554_v20, %s2281_s27 }
 0xf38   : > { %1824 = vrot.lane.b32.xlu1 %v2448_v38, %s2280_s26 }
 0xf3c   : > { %1848 = vrot.lane.b32.xlu1 %v2179_v52, %s2280_s26 }
 0xf40   : > { %1832 = vrot.lane.b32.xlu1 %v2488_v8, %s2278_s22 }
 0xfa0   : > { %v1708_v11 = vpop.xlane.xlu1 %1707 }
 0xfa1   : > { %v1710_v59 = vsub.f32 %v1700_v55, %v1708_v11 }
 0xfa2   : > { %v1705_v29 = vpop.xlane.xlu0 %1704 }
 0xfa3   : > { %v1713_v60 = vmul.f32 1.442695, %v1710_v59  ;;  %v1709_v62 = vsub.f32 %v1695_v57, %v1705_v29 }
 0xfa4   : > { %v1726_v10 = vpop.permute.xlu1 %1725 }
 0xfa5   : > { %2262 = vpow2.f32 %v1713_v60  ;;  %v1711_v27 = vmul.f32 1.442695, %v1709_v62 }
 0xfa7   : > { %2264 = vpow2.f32 %v1711_v27 }
 0xfa8   : > { %v1815_v9 = vpop.permute.xlu1 %1814 }
 0xfa9   : > { %v1860_v31 = vsel %vm226_vm0, %v2390_v40, %v1815_v9 }
 0xfac   : > { %v1817_v63 = vpop.permute.xlu1 %1816 }
 0xfad   : > { %v1861_v19 = vsel %vm226_vm0, %v2388_v39, %v1817_v63 }
 0xfb0   : > { %v1841_v4 = vpop.permute.xlu1 %1840 }
 0xfb1   : > { %v1869_v16 = vsel %vm226_vm0, %v2524_v43, %v1841_v4 }
 0xfb2   : > { %v2263_v13 = vpop.eup %2262 }
 0xfb3   : > { %v1718_v38 = vsel %vm314_vm2, %v2263_v13, 0.0 }
 0xfb4   : > { %v2265_v14 = vpop.eup %2264  ;;  %v1825_v15 = vpop.permute.xlu1 %1824  ;;  %1719 = vadd.xlane.f32.xlu0 %v1718_v38 }
 0xfb5   : > { %v1715_v8 = vsel %vm314_vm2, %v2265_v14, 0.0  ;;  %v1864_v20 = vsel %vm1862_vm3, %v1861_v19, %v1825_v15 }
 0xfb8   : > { %v1849_v17 = vpop.permute.xlu1 %1848  ;;  %1716 = vadd.xlane.f32.xlu0 %v1715_v8 }
 0xfb9   : > { %v1871_v18 = vsel %vm1862_vm3, %v1869_v16, %v1849_v17 }
 0xfbc   : > { %v1833_v22 = vpop.permute.xlu1 %1832 }
 0xfbd   : > { %v1867_v43 = vsel %vm1865_vm4, %v1864_v20, %v1833_v22 }
 0xfbe   : > { %1876 = vst [vmem:[%s2613_s30 + $0x10] sm:$0xff] %v1867_v43 }
 0xfce   : > { %1727 = vrot.lane.b32.xlu0 %v2499_v3, %s2281_s27 }
 0xfd2   : > { %1838 = vrot.lane.b32.xlu0 %v2556_v21, %s2281_s27 }
 0xfd6   : > { %1822 = vrot.lane.b32.xlu0 %v2450_v41, %s2280_s26 }
 0xfda   : > { %1846 = vrot.lane.b32.xlu0 %v1603_v53, %s2280_s26 }
 0xfde   : > { %1830 = vrot.lane.b32.xlu0 %v2490_v12, %s2278_s22 }
0x103d   : > { %v1720_v39 = vpop.xlane.xlu0 %1719 }
0x103e   : > { %2266 = vrcp.f32 %v1720_v39 }
0x1041   : > { %v1717_v23 = vpop.xlane.xlu0 %1716 }
0x1042   : > { %2268 = vrcp.f32 %v1717_v23 }
0x1045   : > { %v1728_v24 = vpop.permute.xlu0 %1727 }
0x1046   : > { %2187 = vmatprep.subr.mxu0 %v1728_v24 }
0x1047   : > { %2188 = vmatpush3.msra.mxu0 %v1728_v24 }
0x1048   : > { %2189 = vmatprep.subr.mxu0 %v1726_v10 }
0x1049   : > { %v1839_v3 = vpop.permute.xlu0 %1838  ;;  %2190 = vmatpush3.msra.mxu0 %v1726_v10 }
0x104a   : > { %v1868_v0 = vsel %vm226_vm0, %v2526_v44, %v1839_v3 }
0x104b   : > { %v2267_v25 = vpop.eup %2266 }
0x104c   : > { %v1724_v12 = vmul.f32 %v2267_v25, %v2263_v13 }
0x104d   : > { %v1823_v21 = vpop.permute.xlu0 %1822 }
0x104e   : > { %v1863_v32 = vsel %vm1862_vm3, %v1860_v31, %v1823_v21 }
0x104f   : > { %v2269_v26 = vpop.eup %2268 }
0x1050   : > { %v1723_v41 = vmul.f32 %v2269_v26, %v2265_v14 }
0x1051   : > { %v1847_v1 = vpop.permute.xlu0 %1846 }
0x1052   : > { %v1870_v30 = vsel %vm1862_vm3, %v1868_v0, %v1847_v1  ;;  %2191 = vmatprep.mubr.msk.f32.mxu0 %vm314_vm2, %v1723_v41 }
0x1053   : > { %2192 = vmatmul.mubr.msk.f32.vlgmr.msra.gmra.mxu0 %vm314_vm2, %v1724_v12 }
0x1055   : > { %v1831_v33 = vpop.permute.xlu0 %1830 }
0x1056   : > { %v1866_v34 = vsel %vm1865_vm4, %v1863_v32, %v1831_v33 }
0x1057   : > { %1874 = vst [vmem:[%s2613_s30] sm:$0xff] %v1866_v34 }
0x1113   : > { %v2193_v44 = vpop.f32.mrf.mxu0 }
0x1114   : > { %1856 = vrot.lane.b32.xlu1 %v2193_v44, %s2278_s22 }
0x1115   : > { %v1803_v35 = vpop.f32.mrf.mxu0 }
0x1116   : > { %1854 = vrot.lane.b32.xlu0 %v1803_v35, %s2278_s22 }
0x1186   : > { %v1857_v36 = vpop.permute.xlu1 %1856 }
0x1187   : > { %v1873_v2 = vsel %vm1865_vm4, %v1871_v18, %v1857_v36 }
0x1188   : > { %1877 = vst [vmem:[%s2613_s30 + $0x18] sm:$0xff] %v1873_v2  ;;  %v1855_v61 = vpop.permute.xlu0 %1854 }
0x1189   : > { %v1872_v6 = vsel %vm1865_vm4, %v1870_v30, %v1855_v61 }
0x118a   : > { %1875 = vst [vmem:[%s2613_s30 + $0x8] sm:$0xff] %v1872_v6 }
0x118b PF: > { %s13_s12 = sadd.s32 1, %s2276_s12  }
0x118c   : > { %p10_p4 = scmp.ge.s32.totalorder %s13_s12, 4  }
0x118e   :  { %12 = sbr.rel (!%p10_p4) target bundleno = 1 (0x1), region = 68 }

// kernel: decoder_layer.12
= control target key start
LH: loop header
LB: loop body
LE: loop exit
PB: predicated region body
PF: predicated region fallthrough
CT: control target
= control target key end

     0   :  { %10 = vsyncpa [#allocation5], 0  ;;  %s955_s0 = inlined_call_operand.vmem [shape: f32[32,256], index: 0, kind: input, shape index: {}]   ;;  %s956_s1 = inlined_call_operand.hbm [shape: f32[1,256], index: 1, kind: input, shape index: {}]   ;;  %s957_s2 = inlined_call_operand.hbm [shape: f32[1,256], index: 2, kind: input, shape index: {}]   ;;  %s958_s3 = inlined_call_operand.vmem [shape: f32[256,256], index: 3, kind: input, shape index: {}]   ;;  %s959_s4 = inlined_call_operand.hbm [shape: f32[1,256], index: 4, kind: input, shape index: {}]   ;;  %s960_s5 = inlined_call_operand.vmem [shape: f32[32,256], index: 5, kind: output, shape index: {}]  }
   0x1   :  { %11 = vsyncpa [#allocation7], 0  ;;  %s601_s18 = smov [#allocation6]   ;;  %s602_s20 = smov [#allocation4]  }
   0x2   :  { %s30_s19 = sshll.u32 %s601_s18, 4  ;;  %s20_s21 = sshll.u32 %s602_s20, 4  ;;  %s31_s19 = int_to_ptr.vmem [resolvable:$true] %s30_s19  ;;  %s21_s21 = int_to_ptr.vmem [resolvable:$true] %s20_s21 }
   0x3   :  { %s545_s22 = scalar_lea.vmem %s31_s19, 32  ;;  %p550_p1 = scmp.lt.s32.totalorder %s31_s19, %s31_s19 }
   0x4   :  { %p546_p0 = scmp.ne.s32.totalorder %s31_s19, %s545_s22  ;;  %p551_p2 = scmp.lt.s32.totalorder %s545_s22, %s545_s22 }
   0x6   :  { %p552_p3 = por %p551_p2, %p550_p1 }
   0x8   :  { %p553_p4 = pnand %p552_p3, %p546_p0 }
   0xa   :  { %556 = shalt.err (!%p553_p4)
}
   0xb   :  { %33 = dma.hbm_to_vmem [thread:$0]  %s957_s2, 32, %s31_s19, [#allocation7]  }
   0xc   :  { %s565_s25 = scalar_lea.vmem %s21_s21, 32  ;;  %p570_p6 = scmp.lt.s32.totalorder %s21_s21, %s21_s21 }
   0xd   :  { %p566_p5 = scmp.ne.s32.totalorder %s21_s21, %s565_s25  ;;  %p571_p7 = scmp.lt.s32.totalorder %s565_s25, %s565_s25 }
   0xf   :  { %p572_p8 = por %p571_p7, %p570_p6 }
  0x11   :  { %p573_p9 = pnand %p572_p8, %p566_p5 }
  0x13   :  { %576 = shalt.err (!%p573_p9)
}
  0x14   :  { %23 = dma.hbm_to_vmem [thread:$0]  %s956_s1, 32, %s21_s21, [#allocation5]  }
  0x15   :  { %s603_s28 = smov [#allocation8]  }
  0x16   :  { %s42_s29 = sshll.u32 %s603_s28, 4  ;;  %s43_s29 = int_to_ptr.vmem [resolvable:$true] %s42_s29 }
  0x17   :  { %s585_s30 = scalar_lea.vmem %s43_s29, 32  ;;  %p590_p11 = scmp.lt.s32.totalorder %s43_s29, %s43_s29 }
  0x18   :  { %p586_p10 = scmp.ne.s32.totalorder %s43_s29, %s585_s30  ;;  %p591_p12 = scmp.lt.s32.totalorder %s585_s30, %s585_s30 }
  0x1a   :  { %p592_p13 = por %p591_p12, %p590_p11 }
  0x1c   :  { %p593_p0 = pnand %p592_p13, %p586_p10 }
  0x1e   :  { %596 = shalt.err (!%p593_p0)
}
  0x1f   :  { %45 = dma.hbm_to_vmem [thread:$0]  %s959_s4, 32, %s43_s29, [#allocation7]  }
  0x20   :  { %597 = dma.done.wait [#allocation5], 32  }
  0x21   :  { %598 = vsyncadd [#allocation5], 4294967264 }
  0x22   :  { %599 = dma.done.wait [#allocation7], 64  }
  0x23   :  { %600 = vsyncadd [#allocation7], 4294967232  ;;  %v646_v0 = vld [vmem:[%s955_s0] sm:$0xff]  ;;  %v651_v1 = vld [vmem:[%s955_s0 + $0x8] sm:$0xff] }
  0x24   :  { %v656_v2 = vld [vmem:[%s955_s0 + $0x10] sm:$0xff]  ;;  %v69_v3 = vadd.f32 %v651_v1, %v646_v0  ;;  %v663_v4 = vld [vmem:[%s955_s0 + $0x18] sm:$0xff]  ;;  %v668_v5 = vld [vmem:[%s955_s0 + $0x20] sm:$0xff] }
  0x25   :  { %v673_v6 = vld [vmem:[%s955_s0 + $0x28] sm:$0xff]  ;;  %v72_v7 = vadd.f32 %v663_v4, %v656_v2  ;;  %v680_v8 = vld [vmem:[%s955_s0 + $0x30] sm:$0xff]  ;;  %v685_v9 = vld [vmem:[%s955_s0 + $0x38] sm:$0xff] }
  0x26   :  { %70 = vadd.xlane.f32.xlu0 %v69_v3  ;;  %v75_v10 = vadd.f32 %v673_v6, %v668_v5  ;;  %v78_v11 = vadd.f32 %v685_v9, %v680_v8  ;;  %v271_v12 = vld [vmem:[%s958_s3 + $0xf8] sm:$0xff]  ;;  %v270_v13 = vld [vmem:[%s958_s3 + $0xf0] sm:$0xff]  ;;  %v269_v14 = vld [vmem:[%s958_s3 + $0xe8] sm:$0xff] }
  0x27   :  { %73 = vadd.xlane.f32.xlu1 %v72_v7  ;;  %304 = vmatprep.subr.mxu0 %v271_v12  ;;  %v268_v15 = vld [vmem:[%s958_s3 + $0xe0] sm:$0xff]  ;;  %v267_v16 = vld [vmem:[%s958_s3 + $0xd8] sm:$0xff]  ;;  %v266_v17 = vld [vmem:[%s958_s3 + $0xd0] sm:$0xff] }
  0x28   :  { %454 = vmatprep.subr.mxu1 %v271_v12  ;;  %305 = vmatpush1.msra.mxu0 %v270_v13  ;;  %v265_v18 = vld [vmem:[%s958_s3 + $0xc8] sm:$0xff]  ;;  %v264_v19 = vld [vmem:[%s958_s3 + $0xc0] sm:$0xff]  ;;  %v263_v20 = vld [vmem:[%s958_s3 + $0xb8] sm:$0xff] }
  0x29   :  { %486 = vmatpush1.msra.mxu1 %v270_v13  ;;  %306 = vmatprep.subr.mxu0 %v269_v14  ;;  %v262_v21 = vld [vmem:[%s958_s3 + $0xb0] sm:$0xff]  ;;  %v261_v22 = vld [vmem:[%s958_s3 + $0xa8] sm:$0xff]  ;;  %v260_v23 = vld [vmem:[%s958_s3 + $0xa0] sm:$0xff] }
  0x2a   :  { %76 = vadd.xlane.f32.xlu0 %v75_v10  ;;  %455 = vmatprep.subr.mxu1 %v269_v14  ;;  %v259_v24 = vld [vmem:[%s958_s3 + $0x98] sm:$0xff]  ;;  %v258_v25 = vld [vmem:[%s958_s3 + $0x90] sm:$0xff]  ;;  %v257_v26 = vld [vmem:[%s958_s3 + $0x88] sm:$0xff] }
  0x2b   :  { %79 = vadd.xlane.f32.xlu1 %v78_v11  ;;  %307 = vmatpush1.msra.mxu0 %v268_v15  ;;  %v256_v27 = vld [vmem:[%s958_s3 + $0x80] sm:$0xff]  ;;  %v255_v28 = vld [vmem:[%s958_s3 + $0x78] sm:$0xff]  ;;  %v254_v29 = vld [vmem:[%s958_s3 + $0x70] sm:$0xff] }
  0x2c   :  { %487 = vmatpush1.msra.mxu1 %v268_v15  ;;  %308 = vmatprep.subr.mxu0 %v267_v16  ;;  %v253_v30 = vld [vmem:[%s958_s3 + $0x68] sm:$0xff]  ;;  %v252_v31 = vld [vmem:[%s958_s3 + $0x60] sm:$0xff]  ;;  %v251_v32 = vld [vmem:[%s958_s3 + $0x58] sm:$0xff] }
  0x2d   :  { %456 = vmatprep.subr.mxu1 %v267_v16  ;;  %309 = vmatpush1.msra.mxu0 %v266_v17  ;;  %v250_v61 = vld [vmem:[%s958_s3 + $0x50] sm:$0xff]  ;;  %v249_v62 = vld [vmem:[%s958_s3 + $0x48] sm:$0xff]  ;;  %v248_v63 = vld [vmem:[%s958_s3 + $0x40] sm:$0xff] }
  0x2e   :  { %488 = vmatpush1.msra.mxu1 %v266_v17  ;;  %310 = vmatprep.subr.mxu0 %v265_v18  ;;  %v244_v3 = vld [vmem:[%s958_s3 + $0x20] sm:$0xff]  ;;  %v301_v10 = vld [vmem:[%s958_s3 + $0x1e8] sm:$0xff]  ;;  %v299_v12 = vld [vmem:[%s958_s3 + $0x1d8] sm:$0xff] }
  0x2f   :  { %457 = vmatprep.subr.mxu1 %v265_v18  ;;  %311 = vmatpush1.msra.mxu0 %v264_v19  ;;  %v240_v7 = vld [vmem:[%s958_s3] sm:$0xff]  ;;  %v298_v13 = vld [vmem:[%s958_s3 + $0x1d0] sm:$0xff]  ;;  %v297_v14 = vld [vmem:[%s958_s3 + $0x1c8] sm:$0xff] }
  0x30   :  { %489 = vmatpush1.msra.mxu1 %v264_v19  ;;  %312 = vmatprep.subr.mxu0 %v263_v20  ;;  %v300_v11 = vld [vmem:[%s958_s3 + $0x1e0] sm:$0xff]  ;;  %v295_v16 = vld [vmem:[%s958_s3 + $0x1b8] sm:$0xff]  ;;  %v294_v17 = vld [vmem:[%s958_s3 + $0x1b0] sm:$0xff] }
  0x31   :  { %458 = vmatprep.subr.mxu1 %v263_v20  ;;  %313 = vmatpush1.msra.mxu0 %v262_v21  ;;  %v296_v15 = vld [vmem:[%s958_s3 + $0x1c0] sm:$0xff]  ;;  %v293_v18 = vld [vmem:[%s958_s3 + $0x1a8] sm:$0xff]  ;;  %v291_v20 = vld [vmem:[%s958_s3 + $0x198] sm:$0xff] }
  0x32   :  { %490 = vmatpush1.msra.mxu1 %v262_v21  ;;  %314 = vmatprep.subr.mxu0 %v261_v22  ;;  %v292_v19 = vld [vmem:[%s958_s3 + $0x1a0] sm:$0xff]  ;;  %v290_v21 = vld [vmem:[%s958_s3 + $0x190] sm:$0xff] }
  0x33   :  { %459 = vmatprep.subr.mxu1 %v261_v22  ;;  %315 = vmatpush1.msra.mxu0 %v260_v23  ;;  %v289_v22 = vld [vmem:[%s958_s3 + $0x188] sm:$0xff] }
  0x34   :  { %491 = vmatpush1.msra.mxu1 %v260_v23  ;;  %316 = vmatprep.subr.mxu0 %v259_v24  ;;  %v288_v23 = vld [vmem:[%s958_s3 + $0x180] sm:$0xff] }
  0x35   :  { %460 = vmatprep.subr.mxu1 %v259_v24  ;;  %317 = vmatpush1.msra.mxu0 %v258_v25  ;;  %v287_v24 = vld [vmem:[%s958_s3 + $0x178] sm:$0xff] }
  0x36   :  { %492 = vmatpush1.msra.mxu1 %v258_v25  ;;  %318 = vmatprep.subr.mxu0 %v257_v26  ;;  %v286_v25 = vld [vmem:[%s958_s3 + $0x170] sm:$0xff] }
  0x37   :  { %461 = vmatprep.subr.mxu1 %v257_v26  ;;  %319 = vmatpush1.msra.mxu0 %v256_v27  ;;  %v285_v26 = vld [vmem:[%s958_s3 + $0x168] sm:$0xff] }
  0x38   :  { %493 = vmatpush1.msra.mxu1 %v256_v27  ;;  %320 = vmatprep.subr.mxu0 %v255_v28  ;;  %v284_v27 = vld [vmem:[%s958_s3 + $0x160] sm:$0xff] }
  0x39   :  { %462 = vmatprep.subr.mxu1 %v255_v28  ;;  %321 = vmatpush1.msra.mxu0 %v254_v29  ;;  %v283_v28 = vld [vmem:[%s958_s3 + $0x158] sm:$0xff] }
  0x3a   :  { %494 = vmatpush1.msra.mxu1 %v254_v29  ;;  %322 = vmatprep.subr.mxu0 %v253_v30  ;;  %v282_v29 = vld [vmem:[%s958_s3 + $0x150] sm:$0xff] }
  0x3b   :  { %463 = vmatprep.subr.mxu1 %v253_v30  ;;  %323 = vmatpush1.msra.mxu0 %v252_v31  ;;  %v281_v30 = vld [vmem:[%s958_s3 + $0x148] sm:$0xff] }
  0x3c   :  { %495 = vmatpush1.msra.mxu1 %v252_v31  ;;  %324 = vmatprep.subr.mxu0 %v251_v32  ;;  %v280_v31 = vld [vmem:[%s958_s3 + $0x140] sm:$0xff] }
  0x3d   :  { %464 = vmatprep.subr.mxu1 %v251_v32  ;;  %325 = vmatpush1.msra.mxu0 %v250_v61  ;;  %v279_v32 = vld [vmem:[%s958_s3 + $0x138] sm:$0xff] }
  0x3e   :  { %496 = vmatpush1.msra.mxu1 %v250_v61  ;;  %326 = vmatprep.subr.mxu0 %v249_v62 }
  0x3f   :  { %465 = vmatprep.subr.mxu1 %v249_v62  ;;  %327 = vmatpush1.msra.mxu0 %v248_v63 }
  0x40   :  { %497 = vmatpush1.msra.mxu1 %v248_v63 }
  0xaf   :  { %v71_v33 = vpop.xlane.xlu0 %70 }
  0xb0   :  { %v82_v34 = vmul.f32 0.00390625, %v71_v33  ;;  %v74_v35 = vpop.xlane.xlu1 %73  ;;  %v278_v33 = vld [vmem:[%s958_s3 + $0x130] sm:$0xff] }
  0xb1   :  { %v83_v36 = vmul.f32 0.00390625, %v74_v35  ;;  %v276_v35 = vld [vmem:[%s958_s3 + $0x120] sm:$0xff] }
  0xb2   :  { %v755_v37 = vsub.f32 %v646_v0, %v82_v34  ;;  %v758_v38 = vsub.f32 %v651_v1, %v82_v34  ;;  %v247_v0 = vld [vmem:[%s958_s3 + $0x38] sm:$0xff]  ;;  %v246_v1 = vld [vmem:[%s958_s3 + $0x30] sm:$0xff]  ;;  %v277_v34 = vld [vmem:[%s958_s3 + $0x128] sm:$0xff] }
  0xb3   :  { %v761_v39 = vsub.f32 %v656_v2, %v83_v36  ;;  %v764_v40 = vsub.f32 %v663_v4, %v83_v36  ;;  %v77_v41 = vpop.xlane.xlu0 %76  ;;  %328 = vmatprep.subr.mxu0 %v247_v0  ;;  %466 = vmatprep.subr.mxu1 %v247_v0  ;;  %v245_v2 = vld [vmem:[%s958_s3 + $0x28] sm:$0xff]  ;;  %v243_v4 = vld [vmem:[%s958_s3 + $0x18] sm:$0xff] }
  0xb4   :  { %v84_v42 = vmul.f32 0.00390625, %v77_v41  ;;  %v80_v43 = vpop.xlane.xlu1 %79  ;;  %v94_v44 = vmul.f32 %v755_v37, %v755_v37  ;;  %v95_v45 = vmul.f32 %v758_v38, %v758_v38  ;;  %329 = vmatpush1.msra.mxu0 %v246_v1  ;;  %498 = vmatpush1.msra.mxu1 %v246_v1  ;;  %v275_v36 = vld [vmem:[%s958_s3 + $0x118] sm:$0xff]  ;;  %v274_v41 = vld [vmem:[%s958_s3 + $0x110] sm:$0xff]  ;;  %v164_v1 = vlaneseq }
  0xb5   :  { %v85_v46 = vmul.f32 0.00390625, %v80_v43  ;;  %v96_v47 = vmul.f32 %v761_v39, %v761_v39  ;;  %v97_v48 = vmul.f32 %v764_v40, %v764_v40  ;;  %330 = vmatprep.subr.mxu0 %v245_v2  ;;  %467 = vmatprep.subr.mxu1 %v245_v2  ;;  %v272_v43 = vld [vmem:[%s958_s3 + $0x100] sm:$0xff] }
  0xb6   :  { %v775_v49 = vsub.f32 %v668_v5, %v84_v42  ;;  %v778_v50 = vsub.f32 %v673_v6, %v84_v42  ;;  %v102_v51 = vadd.f32 %v95_v45, %v94_v44  ;;  %331 = vmatpush1.msra.mxu0 %v244_v3  ;;  %499 = vmatpush1.msra.mxu1 %v244_v3  ;;  %v242_v5 = vld [vmem:[%s958_s3 + $0x10] sm:$0xff]  ;;  %v241_v6 = vld [vmem:[%s958_s3 + $0x8] sm:$0xff] }
  0xb7   :  { %v781_v52 = vsub.f32 %v680_v8, %v85_v46  ;;  %v784_v53 = vsub.f32 %v685_v9, %v85_v46  ;;  %v105_v54 = vadd.f32 %v97_v48, %v96_v47  ;;  %332 = vmatprep.subr.mxu0 %v243_v4  ;;  %468 = vmatprep.subr.mxu1 %v243_v4  ;;  %v303_v8 = vld [vmem:[%s958_s3 + $0x1f8] sm:$0xff]  ;;  %v302_v9 = vld [vmem:[%s958_s3 + $0x1f0] sm:$0xff]  ;;  %v273_v42 = vld [vmem:[%s958_s3 + $0x108] sm:$0xff] }
  0xb8   :  { %103 = vadd.xlane.f32.xlu0 %v102_v51  ;;  %v98_v55 = vmul.f32 %v775_v49, %v775_v49  ;;  %v99_v56 = vmul.f32 %v778_v50, %v778_v50  ;;  %333 = vmatpush1.msra.mxu0 %v242_v5 }
  0xb9   :  { %v100_v57 = vmul.f32 %v781_v52, %v781_v52  ;;  %v101_v58 = vmul.f32 %v784_v53, %v784_v53  ;;  %500 = vmatpush1.msra.mxu1 %v242_v5  ;;  %334 = vmatprep.subr.mxu0 %v241_v6 }
  0xba   :  { %v108_v59 = vadd.f32 %v99_v56, %v98_v55  ;;  %469 = vmatprep.subr.mxu1 %v241_v6  ;;  %335 = vmatpush1.msra.mxu0 %v240_v7 }
  0xbb   :  { %v111_v60 = vadd.f32 %v101_v58, %v100_v57  ;;  %501 = vmatpush1.msra.mxu1 %v240_v7  ;;  %336 = vmatprep.subr.mxu0 %v303_v8 }
  0xbc   :  { %106 = vadd.xlane.f32.xlu0 %v105_v54  ;;  %109 = vadd.xlane.f32.xlu1 %v108_v59 }
  0xbd   :  { %470 = vmatprep.subr.mxu1 %v303_v8  ;;  %337 = vmatpush2.msra.mxu0 %v302_v9 }
  0xbe   :  { %502 = vmatpush2.msra.mxu1 %v302_v9  ;;  %338 = vmatprep.subr.mxu0 %v301_v10 }
  0xbf   :  { %471 = vmatprep.subr.mxu1 %v301_v10  ;;  %339 = vmatpush2.msra.mxu0 %v300_v11 }
  0xc0   :  { %112 = vadd.xlane.f32.xlu1 %v111_v60  ;;  %503 = vmatpush2.msra.mxu1 %v300_v11 }
  0xc1   :  { %340 = vmatprep.subr.mxu0 %v299_v12  ;;  %472 = vmatprep.subr.mxu1 %v299_v12 }
  0xc2   :  { %341 = vmatpush2.msra.mxu0 %v298_v13  ;;  %504 = vmatpush2.msra.mxu1 %v298_v13 }
  0xc3   :  { %342 = vmatprep.subr.mxu0 %v297_v14  ;;  %473 = vmatprep.subr.mxu1 %v297_v14 }
  0xc4   :  { %343 = vmatpush2.msra.mxu0 %v296_v15  ;;  %505 = vmatpush2.msra.mxu1 %v296_v15  ;;  %v165_v15 = vshrl.u32 %v164_v1, 7 }
  0xc5   :  { %344 = vmatprep.subr.mxu0 %v295_v16  ;;  %474 = vmatprep.subr.mxu1 %v295_v16 }
  0xc6   :  { %345 = vmatpush2.msra.mxu0 %v294_v17  ;;  %506 = vmatpush2.msra.mxu1 %v294_v17 }
  0xc7   :  { %346 = vmatprep.subr.mxu0 %v293_v18  ;;  %475 = vmatprep.subr.mxu1 %v293_v18  ;;  %v166_v18 = vsub.s32 0, %v165_v15 }
  0xc8   :  { %347 = vmatpush2.msra.mxu0 %v292_v19  ;;  %507 = vmatpush2.msra.mxu1 %v292_v19  ;;  %v170_v19 = vsub.s32 1, %v165_v15 }
  0xc9   :  { %348 = vmatprep.subr.mxu0 %v291_v20  ;;  %476 = vmatprep.subr.mxu1 %v291_v20  ;;  %v146_v20 = vld [vmem:[#allocation4] sm:$0x3] }
  0xca   :  { %349 = vmatpush2.msra.mxu0 %v290_v21  ;;  %508 = vmatpush2.msra.mxu1 %v290_v21  ;;  %v182_v21 = vld [vmem:[#allocation6] sm:$0x3] }
  0xcb   :  { %350 = vmatprep.subr.mxu0 %v289_v22  ;;  %477 = vmatprep.subr.mxu1 %v289_v22  ;;  %v167_v22 = vrot.slane %v146_v20, %v166_v18 }
  0xcc   :  { %351 = vmatpush2.msra.mxu0 %v288_v23  ;;  %509 = vmatpush2.msra.mxu1 %v288_v23  ;;  %v171_v23 = vrot.slane %v146_v20, %v170_v19 }
  0xcd   :  { %352 = vmatprep.subr.mxu0 %v287_v24  ;;  %478 = vmatprep.subr.mxu1 %v287_v24 }
  0xce   :  { %353 = vmatpush2.msra.mxu0 %v286_v25  ;;  %510 = vmatpush2.msra.mxu1 %v286_v25 }
  0xcf   :  { %354 = vmatprep.subr.mxu0 %v285_v26  ;;  %479 = vmatprep.subr.mxu1 %v285_v26  ;;  %v187_v26 = vrot.slane %v182_v21, %v166_v18 }
  0xd0   :  { %355 = vmatpush2.msra.mxu0 %v284_v27  ;;  %511 = vmatpush2.msra.mxu1 %v284_v27  ;;  %v191_v27 = vrot.slane %v182_v21, %v170_v19 }
  0xd1   :  { %356 = vmatprep.subr.mxu0 %v283_v28  ;;  %480 = vmatprep.subr.mxu1 %v283_v28 }
  0xd2   :  { %357 = vmatpush2.msra.mxu0 %v282_v29  ;;  %512 = vmatpush2.msra.mxu1 %v282_v29 }
  0xd3   :  { %358 = vmatprep.subr.mxu0 %v281_v30  ;;  %481 = vmatprep.subr.mxu1 %v281_v30 }
  0xd4   :  { %359 = vmatpush2.msra.mxu0 %v280_v31  ;;  %513 = vmatpush2.msra.mxu1 %v280_v31 }
  0xd5   :  { %360 = vmatprep.subr.mxu0 %v279_v32  ;;  %482 = vmatprep.subr.mxu1 %v279_v32 }
  0xd6   :  { %361 = vmatpush2.msra.mxu0 %v278_v33  ;;  %514 = vmatpush2.msra.mxu1 %v278_v33 }
  0xd7   :  { %362 = vmatprep.subr.mxu0 %v277_v34  ;;  %483 = vmatprep.subr.mxu1 %v277_v34 }
  0xd8   :  { %363 = vmatpush2.msra.mxu0 %v276_v35  ;;  %515 = vmatpush2.msra.mxu1 %v276_v35 }
  0xd9   :  { %364 = vmatprep.subr.mxu0 %v275_v36  ;;  %484 = vmatprep.subr.mxu1 %v275_v36 }
  0xda   :  { %365 = vmatpush2.msra.mxu0 %v274_v41  ;;  %516 = vmatpush2.msra.mxu1 %v274_v41 }
  0xdb   :  { %366 = vmatprep.subr.mxu0 %v273_v42  ;;  %485 = vmatprep.subr.mxu1 %v273_v42 }
  0xdc   :  { %367 = vmatpush2.msra.mxu0 %v272_v43  ;;  %517 = vmatpush2.msra.mxu1 %v272_v43 }
 0x141   :  { %v104_v44 = vpop.xlane.xlu0 %103 }
 0x142   :  { %v114_v45 = vmul.f32 0.003921569, %v104_v44 }
 0x144   :  { %521 = vrsqrt.f32 %v114_v45  ;;  %vm120_vm0 = vcmp.eq.f32.partialorder %v114_v45, inf  ;;  %v123_v58 = vand.u32 2147483648, %v114_v45  ;;  %vm122_vm1 = vcmp.eq.f32.partialorder %v114_v45, 0.0 }
 0x145   :  { %v110_v46 = vpop.xlane.xlu1 %109  ;;  %v107_v47 = vpop.xlane.xlu0 %106 }
 0x146   :  { %v116_v48 = vmul.f32 0.003921569, %v110_v46  ;;  %v115_v51 = vmul.f32 0.003921569, %v107_v47 }
 0x148   :  { %523 = vrsqrt.f32 %v116_v48  ;;  %vm134_vm2 = vcmp.eq.f32.partialorder %v116_v48, inf  ;;  %vm136_vm3 = vcmp.eq.f32.partialorder %v116_v48, 0.0  ;;  %v137_v2 = vand.u32 2147483648, %v116_v48 }
 0x149   :  { %525 = vrsqrt.f32 %v115_v51  ;;  %v113_v54 = vpop.xlane.xlu1 %112  ;;  %vm127_vm4 = vcmp.eq.f32.partialorder %v115_v51, inf  ;;  %v130_v5 = vand.u32 2147483648, %v115_v51  ;;  %vm129_vm5 = vcmp.eq.f32.partialorder %v115_v51, 0.0 }
 0x14a   :  { %v117_v55 = vmul.f32 0.003921569, %v113_v54 }
 0x14c   :  { %527 = vrsqrt.f32 %v117_v55  ;;  %vm141_vm6 = vcmp.eq.f32.partialorder %v117_v55, inf  ;;  %v144_v13 = vand.u32 2147483648, %v117_v55  ;;  %vm143_vm7 = vcmp.eq.f32.partialorder %v117_v55, 0.0 }
 0x151   :  { %v522_v56 = vpop.eup %521 }
 0x152   :  { %v119_v57 = vmul.f32 %v522_v56, %v114_v45  ;;  %v420_v56 = vld [vmem:[#allocation8] sm:$0x3] }
 0x154   :  { %v121_v59 = vsel %vm120_vm0, %v114_v45, %v119_v57  ;;  %v425_v57 = vrot.slane %v420_v56, %v166_v18 }
 0x155   :  { %v524_v60 = vpop.eup %523  ;;  %v124_v61 = vsel %vm122_vm1, %v123_v58, %v121_v59  ;;  %v429_v58 = vrot.slane %v420_v56, %v170_v19 }
 0x156   :  { %v526_v62 = vpop.eup %525  ;;  %v133_v63 = vmul.f32 %v524_v60, %v116_v48  ;;  %v147_v0 = vadd.f32 1e-06, %v124_v61 }
 0x157   :  { %v126_v3 = vmul.f32 %v526_v62, %v115_v51 }
 0x158   :  { %v135_v4 = vsel %vm134_vm2, %v116_v48, %v133_v63  ;;  %529 = vrcp.f32 %v147_v0 }
 0x159   :  { %v528_v6 = vpop.eup %527  ;;  %v128_v7 = vsel %vm127_vm4, %v115_v51, %v126_v3  ;;  %v138_v8 = vsel %vm136_vm3, %v137_v2, %v135_v4 }
 0x15a   :  { %v131_v9 = vsel %vm129_vm5, %v130_v5, %v128_v7  ;;  %v140_v10 = vmul.f32 %v528_v6, %v117_v55  ;;  %v149_v11 = vadd.f32 1e-06, %v138_v8 }
 0x15b   :  { %v148_v12 = vadd.f32 1e-06, %v131_v9 }
 0x15c   :  { %v142_v14 = vsel %vm141_vm6, %v117_v55, %v140_v10  ;;  %531 = vrcp.f32 %v149_v11 }
 0x15d   :  { %533 = vrcp.f32 %v148_v12  ;;  %v145_v16 = vsel %vm143_vm7, %v144_v13, %v142_v14 }
 0x15e   :  { %v150_v17 = vadd.f32 1e-06, %v145_v16 }
 0x160   :  { %535 = vrcp.f32 %v150_v17 }
 0x165   :  { %v530_v24 = vpop.eup %529 }
 0x166   :  { %v153_v25 = vmul.f32 %v530_v24, %v758_v38  ;;  %v152_v28 = vmul.f32 %v530_v24, %v755_v37 }
 0x168   :  { %v175_v29 = vmul.f32 %v171_v23, %v153_v25  ;;  %v174_v30 = vmul.f32 %v167_v22, %v152_v28 }
 0x169   :  { %v532_v31 = vpop.eup %531 }
 0x16a   :  { %v534_v32 = vpop.eup %533  ;;  %v195_v33 = vadd.f32 %v191_v27, %v175_v29  ;;  %v194_v34 = vadd.f32 %v187_v26, %v174_v30  ;;  %v159_v35 = vmul.f32 %v532_v31, %v778_v50  ;;  %v158_v36 = vmul.f32 %v532_v31, %v775_v49 }
 0x16b   :  { %v156_v41 = vmul.f32 %v534_v32, %v764_v40  ;;  %v155_v42 = vmul.f32 %v534_v32, %v761_v39 }
 0x16c   :  { %368 = vmatprep.mubr.f32.mxu0 %v195_v33  ;;  %v179_v38 = vmul.f32 %v171_v23, %v159_v35  ;;  %v178_v43 = vmul.f32 %v167_v22, %v158_v36 }
 0x16d   :  { %v536_v44 = vpop.eup %535  ;;  %369 = vmatmul.mubr.f32.vlgmr.msra.gmra.mxu0 %v194_v34  ;;  %v177_v37 = vmul.f32 %v171_v23, %v156_v41  ;;  %v176_v45 = vmul.f32 %v167_v22, %v155_v42 }
 0x16e   :  { %v199_v46 = vadd.f32 %v191_v27, %v179_v38  ;;  %v198_v47 = vadd.f32 %v187_v26, %v178_v43  ;;  %v162_v48 = vmul.f32 %v536_v44, %v784_v53  ;;  %v161_v51 = vmul.f32 %v536_v44, %v781_v52 }
 0x16f   :  { %v197_v50 = vadd.f32 %v191_v27, %v177_v37  ;;  %v196_v54 = vadd.f32 %v187_v26, %v176_v45 }
 0x170   :  { %380 = vmatprep.mubr.f32.mxu1 %v199_v46  ;;  %v181_v49 = vmul.f32 %v171_v23, %v162_v48  ;;  %v180_v40 = vmul.f32 %v167_v22, %v161_v51 }
 0x171   :  { %374 = vmatprep.mubr.f32.mxu0 %v197_v50  ;;  %381 = vmatmul.mubr.f32.vlgmr.msra.gmra.mxu1 %v198_v47 }
 0x172   :  { %375 = vmatmul.mubr.f32.gmra.mxu0 %v196_v54  ;;  %v201_v39 = vadd.f32 %v191_v27, %v181_v49  ;;  %v200_v55 = vadd.f32 %v187_v26, %v180_v40 }
 0x174   :  { %386 = vmatprep.mubr.f32.mxu1 %v201_v39 }
 0x175   :  { %387 = vmatmul.mubr.f32.gmra.mxu1 %v200_v55 }
 0x22d   :  { %v370_v59 = vpop.f32.mrf.mxu0 }
 0x22e   :  { %v432_v60 = vadd.f32 %v425_v57, %v370_v59 }
 0x22f   :  { %v372_v53 = vpop.f32.mrf.mxu0 }
 0x230   :  { %440 = vst [vmem:[%s960_s5] sm:$0xff] %v432_v60  ;;  %v433_v52 = vadd.f32 %v429_v58, %v372_v53 }
 0x231   :  { %v382_v61 = vpop.f32.mrf.mxu1 }
 0x232   :  { %441 = vst [vmem:[%s960_s5 + $0x8] sm:$0xff] %v433_v52  ;;  %v376_v62 = vpop.f32.mrf.mxu0  ;;  %v436_v63 = vadd.f32 %v425_v57, %v382_v61 }
 0x233   :  { %v434_v0 = vadd.f32 %v425_v57, %v376_v62  ;;  %v384_v1 = vpop.f32.mrf.mxu1 }
 0x234   :  { %444 = vst [vmem:[%s960_s5 + $0x20] sm:$0xff] %v436_v63  ;;  %v378_v2 = vpop.f32.mrf.mxu0  ;;  %v437_v3 = vadd.f32 %v429_v58, %v384_v1 }
 0x235   :  { %442 = vst [vmem:[%s960_s5 + $0x10] sm:$0xff] %v434_v0  ;;  %v435_v4 = vadd.f32 %v429_v58, %v378_v2  ;;  %v388_v5 = vpop.f32.mrf.mxu1 }
 0x236   :  { %445 = vst [vmem:[%s960_s5 + $0x28] sm:$0xff] %v437_v3  ;;  %v438_v6 = vadd.f32 %v425_v57, %v388_v5 }
 0x237   :  { %443 = vst [vmem:[%s960_s5 + $0x18] sm:$0xff] %v435_v4  ;;  %v390_v7 = vpop.f32.mrf.mxu1 }
 0x238   :  { %446 = vst [vmem:[%s960_s5 + $0x30] sm:$0xff] %v438_v6  ;;  %v439_v8 = vadd.f32 %v429_v58, %v390_v7 }
 0x23a   :  { %447 = vst [vmem:[%s960_s5 + $0x38] sm:$0xff] %v439_v8 }
 0x23b   :  { %452 = vsyncpa [#allocation5], 1 }
 0x23c   :  { %453 = vsyncpa [#allocation7], 1 }

// kernel: decoder_layer.16
= control target key start
LH: loop header
LB: loop body
LE: loop exit
PB: predicated region body
PF: predicated region fallthrough
CT: control target
= control target key end

     0   :  { %s2244_s18 = smov 0   ;;  %s2246_s19 = smov 0   ;;  %s3329_s0 = inlined_call_operand.vmem [shape: f32[32,256], index: 0, kind: input, shape index: {}]   ;;  %s3330_s1 = inlined_call_operand.vmem [shape: f32[1,256], index: 1, kind: input, shape index: {}]   ;;  %s3331_s2 = inlined_call_operand.vmem [shape: f32[1,256], index: 2, kind: input, shape index: {}]   ;;  %s3332_s3 = inlined_call_operand.vmem [shape: f32[256,2048], index: 3, kind: input, shape index: {}]   ;;  %s3333_s4 = inlined_call_operand.vmem [shape: f32[1,2048], index: 4, kind: input, shape index: {}]   ;;  %s3334_s5 = inlined_call_operand.vmem [shape: f32[32,2048], index: 5, kind: output, shape index: {}]  }
   0x1   :  { %s2248_s20 = smov 0   ;;  %s2250_s21 = smov 0  }
   0x2   :  { %s2252_s22 = smov 0  }
   0x3 LB: > { %s30_s23 = sadd.s32 1, %s2208_s21  ;;  %s2097_s24 = sadd.s32 4294967295, %s2212_s22   ;;  %s2212_s22 = sphi %s2252_s22, %s15_s22   ;;  %s2208_s21 = sphi %s2250_s21, %s3339_s21   ;;  %s2204_s20 = sphi %s2248_s20, %s3338_s20   ;;  %s2200_s19 = sphi %s2246_s19, %s3337_s19   ;;  %s2196_s18 = sphi %s2244_s18, %s3336_s18  }
   0x4   : > { %p32_p0 = scmp.ge.s32.totalorder %s30_s23, 2  ;;  %p118_p1 = scmp.ne.s32.totalorder %s2200_s19, %s2196_s18 }
   0x5   : > { %p119_p2 = scmp.eq.s32.totalorder %s2212_s22, 0  ;;  %p176_p4 = scmp.eq.s32.totalorder %s2097_s24, 1 }
   0x6   : > { %s3341_s23 = smov (%p32_p0, %s30_s23), 0  ;;  %s111_s26 = sadd.s32 1, %s2200_s19 }
   0x7   : > { %p120_p3 = por %p119_p2, %p118_p1  ;;  %s107_s25 = ssub.s32 %s2208_s21, %s3341_s23 }
   0x8   : > { %p109_p5 = scmp.eq.s32.totalorder %s107_s25, 0  ;;  %p2279_p6 = por %p176_p4, %p118_p1 }
   0x9   : > { %p2101_p7 = scmp.ge.s32.totalorder %s2212_s22, 2 }
   0xa   : > { %s2284_s28 = scalar_select %p109_p5, %s2200_s19, %s111_s26  }
   0xb   : > { %214 = sbr.rel (%p2101_p7) target bundleno = 148 (0x94), region = 28 }
  0x10   : > { %217 = sbr.rel (!%p120_p3) target bundleno = 148 (0x94), region = 32  ;;  %s219_s29 = sand.u32 (%p120_p3), 1, %s2200_s19  }
  0x11   : > { %s2115_s30 = sshll.u32 (%p120_p3), %s2208_s21, 6  ;;  %s2102_s6 = sshll.u32 (%p120_p3), %s219_s29, 11 }
  0x12   : > { %s2292_s9 = scalar_lea.vmem (%p120_p3), %s3332_s3, %s2115_s30  ;;  %s2297_s10 = scalar_lea.vmem (%p120_p3), [#allocation4], %s2102_s6 }
  0x13   : > { %v240_v0 = vld [vmem:[%s2292_s9] sm:$0xff] (%p120_p3)  ;;  %v242_v1 = vld [vmem:[%s2292_s9 + $0x8] sm:$0xff] (%p120_p3)  ;;  %v244_v2 = vld [vmem:[%s2292_s9 + $0x10] sm:$0xff] (%p120_p3) }
  0x14   : > { %241 = vst [vmem:[%s2297_s10] sm:$0xff] (%p120_p3), %v240_v0  ;;  %243 = vst [vmem:[%s2297_s10 + $0x8] sm:$0xff] (%p120_p3), %v242_v1  ;;  %v246_v3 = vld [vmem:[%s2292_s9 + $0x18] sm:$0xff] (%p120_p3)  ;;  %v248_v4 = vld [vmem:[%s2292_s9 + $0x20] sm:$0xff] (%p120_p3) }
  0x15   : > { %245 = vst [vmem:[%s2297_s10 + $0x10] sm:$0xff] %v244_v2  ;;  %v250_v5 = vld [vmem:[%s2292_s9 + $0x28] sm:$0xff]  ;;  %247 = vst [vmem:[%s2297_s10 + $0x18] sm:$0xff] %v246_v3  ;;  %v252_v6 = vld [vmem:[%s2292_s9 + $0x30] sm:$0xff] }
  0x16   : > { %249 = vst [vmem:[%s2297_s10 + $0x20] sm:$0xff] %v248_v4  ;;  %251 = vst [vmem:[%s2297_s10 + $0x28] sm:$0xff] %v250_v5  ;;  %v254_v7 = vld [vmem:[%s2292_s9 + $0x38] sm:$0xff]  ;;  %v256_v8 = vld [vmem:[%s2292_s9 + $0x80] sm:$0xff] }
  0x17   : > { %253 = vst [vmem:[%s2297_s10 + $0x30] sm:$0xff] %v252_v6  ;;  %255 = vst [vmem:[%s2297_s10 + $0x38] sm:$0xff] %v254_v7  ;;  %v258_v9 = vld [vmem:[%s2292_s9 + $0x88] sm:$0xff]  ;;  %v260_v10 = vld [vmem:[%s2292_s9 + $0x90] sm:$0xff] }
  0x18   : > { %257 = vst [vmem:[%s2297_s10 + $0x40] sm:$0xff] %v256_v8  ;;  %v262_v11 = vld [vmem:[%s2292_s9 + $0x98] sm:$0xff]  ;;  %259 = vst [vmem:[%s2297_s10 + $0x48] sm:$0xff] %v258_v9  ;;  %v264_v12 = vld [vmem:[%s2292_s9 + $0xa0] sm:$0xff] }
  0x19   : > { %261 = vst [vmem:[%s2297_s10 + $0x50] sm:$0xff] %v260_v10  ;;  %263 = vst [vmem:[%s2297_s10 + $0x58] sm:$0xff] %v262_v11  ;;  %v266_v13 = vld [vmem:[%s2292_s9 + $0xa8] sm:$0xff]  ;;  %v268_v14 = vld [vmem:[%s2292_s9 + $0xb0] sm:$0xff] }
  0x1a   : > { %265 = vst [vmem:[%s2297_s10 + $0x60] sm:$0xff] %v264_v12  ;;  %267 = vst [vmem:[%s2297_s10 + $0x68] sm:$0xff] %v266_v13  ;;  %v270_v15 = vld [vmem:[%s2292_s9 + $0xb8] sm:$0xff]  ;;  %v272_v16 = vld [vmem:[%s2292_s9 + $0x100] sm:$0xff] }
  0x1b   : > { %269 = vst [vmem:[%s2297_s10 + $0x70] sm:$0xff] %v268_v14  ;;  %v274_v17 = vld [vmem:[%s2292_s9 + $0x108] sm:$0xff]  ;;  %271 = vst [vmem:[%s2297_s10 + $0x78] sm:$0xff] %v270_v15  ;;  %v276_v18 = vld [vmem:[%s2292_s9 + $0x110] sm:$0xff] }
  0x1c   : > { %273 = vst [vmem:[%s2297_s10 + $0x80] sm:$0xff] %v272_v16  ;;  %275 = vst [vmem:[%s2297_s10 + $0x88] sm:$0xff] %v274_v17  ;;  %v278_v19 = vld [vmem:[%s2292_s9 + $0x118] sm:$0xff]  ;;  %v280_v20 = vld [vmem:[%s2292_s9 + $0x120] sm:$0xff] }
  0x1d   : > { %277 = vst [vmem:[%s2297_s10 + $0x90] sm:$0xff] %v276_v18  ;;  %279 = vst [vmem:[%s2297_s10 + $0x98] sm:$0xff] %v278_v19  ;;  %v282_v21 = vld [vmem:[%s2292_s9 + $0x128] sm:$0xff]  ;;  %v284_v22 = vld [vmem:[%s2292_s9 + $0x130] sm:$0xff] }
  0x1e   : > { %281 = vst [vmem:[%s2297_s10 + $0xa0] sm:$0xff] %v280_v20  ;;  %v286_v23 = vld [vmem:[%s2292_s9 + $0x138] sm:$0xff]  ;;  %283 = vst [vmem:[%s2297_s10 + $0xa8] sm:$0xff] %v282_v21  ;;  %v288_v24 = vld [vmem:[%s2292_s9 + $0x180] sm:$0xff] }
  0x1f   : > { %285 = vst [vmem:[%s2297_s10 + $0xb0] sm:$0xff] %v284_v22  ;;  %287 = vst [vmem:[%s2297_s10 + $0xb8] sm:$0xff] %v286_v23  ;;  %v290_v25 = vld [vmem:[%s2292_s9 + $0x188] sm:$0xff]  ;;  %v292_v26 = vld [vmem:[%s2292_s9 + $0x190] sm:$0xff] }
  0x20   : > { %289 = vst [vmem:[%s2297_s10 + $0xc0] sm:$0xff] %v288_v24  ;;  %291 = vst [vmem:[%s2297_s10 + $0xc8] sm:$0xff] %v290_v25  ;;  %v294_v27 = vld [vmem:[%s2292_s9 + $0x198] sm:$0xff]  ;;  %v296_v28 = vld [vmem:[%s2292_s9 + $0x1a0] sm:$0xff] }
  0x21   : > { %293 = vst [vmem:[%s2297_s10 + $0xd0] sm:$0xff] %v292_v26  ;;  %v298_v29 = vld [vmem:[%s2292_s9 + $0x1a8] sm:$0xff]  ;;  %295 = vst [vmem:[%s2297_s10 + $0xd8] sm:$0xff] %v294_v27  ;;  %v300_v30 = vld [vmem:[%s2292_s9 + $0x1b0] sm:$0xff] }
  0x22   : > { %297 = vst [vmem:[%s2297_s10 + $0xe0] sm:$0xff] %v296_v28  ;;  %299 = vst [vmem:[%s2297_s10 + $0xe8] sm:$0xff] %v298_v29  ;;  %v302_v31 = vld [vmem:[%s2292_s9 + $0x1b8] sm:$0xff]  ;;  %v304_v32 = vld [vmem:[%s2292_s9 + $0x200] sm:$0xff] }
  0x23   : > { %301 = vst [vmem:[%s2297_s10 + $0xf0] sm:$0xff] %v300_v30  ;;  %303 = vst [vmem:[%s2297_s10 + $0xf8] sm:$0xff] %v302_v31  ;;  %v306_v33 = vld [vmem:[%s2292_s9 + $0x208] sm:$0xff]  ;;  %v308_v34 = vld [vmem:[%s2292_s9 + $0x210] sm:$0xff] }
  0x24   : > { %305 = vst [vmem:[%s2297_s10 + $0x100] sm:$0xff] %v304_v32  ;;  %v310_v35 = vld [vmem:[%s2292_s9 + $0x218] sm:$0xff]  ;;  %307 = vst [vmem:[%s2297_s10 + $0x108] sm:$0xff] %v306_v33  ;;  %v312_v36 = vld [vmem:[%s2292_s9 + $0x220] sm:$0xff] }
  0x25   : > { %309 = vst [vmem:[%s2297_s10 + $0x110] sm:$0xff] %v308_v34  ;;  %311 = vst [vmem:[%s2297_s10 + $0x118] sm:$0xff] %v310_v35  ;;  %v314_v37 = vld [vmem:[%s2292_s9 + $0x228] sm:$0xff]  ;;  %v316_v38 = vld [vmem:[%s2292_s9 + $0x230] sm:$0xff] }
  0x26   : > { %313 = vst [vmem:[%s2297_s10 + $0x120] sm:$0xff] %v312_v36  ;;  %315 = vst [vmem:[%s2297_s10 + $0x128] sm:$0xff] %v314_v37  ;;  %v318_v39 = vld [vmem:[%s2292_s9 + $0x238] sm:$0xff]  ;;  %v320_v40 = vld [vmem:[%s2292_s9 + $0x280] sm:$0xff] }
  0x27   : > { %317 = vst [vmem:[%s2297_s10 + $0x130] sm:$0xff] %v316_v38  ;;  %v322_v41 = vld [vmem:[%s2292_s9 + $0x288] sm:$0xff]  ;;  %319 = vst [vmem:[%s2297_s10 + $0x138] sm:$0xff] %v318_v39  ;;  %v324_v42 = vld [vmem:[%s2292_s9 + $0x290] sm:$0xff] }
  0x28   : > { %321 = vst [vmem:[%s2297_s10 + $0x140] sm:$0xff] %v320_v40  ;;  %323 = vst [vmem:[%s2297_s10 + $0x148] sm:$0xff] %v322_v41  ;;  %v326_v43 = vld [vmem:[%s2292_s9 + $0x298] sm:$0xff]  ;;  %v328_v44 = vld [vmem:[%s2292_s9 + $0x2a0] sm:$0xff] }
  0x29   : > { %325 = vst [vmem:[%s2297_s10 + $0x150] sm:$0xff] %v324_v42  ;;  %327 = vst [vmem:[%s2297_s10 + $0x158] sm:$0xff] %v326_v43  ;;  %v330_v45 = vld [vmem:[%s2292_s9 + $0x2a8] sm:$0xff]  ;;  %v332_v46 = vld [vmem:[%s2292_s9 + $0x2b0] sm:$0xff] }
  0x2a   : > { %329 = vst [vmem:[%s2297_s10 + $0x160] sm:$0xff] %v328_v44  ;;  %v334_v47 = vld [vmem:[%s2292_s9 + $0x2b8] sm:$0xff]  ;;  %331 = vst [vmem:[%s2297_s10 + $0x168] sm:$0xff] %v330_v45  ;;  %v336_v48 = vld [vmem:[%s2292_s9 + $0x300] sm:$0xff] }
  0x2b   : > { %333 = vst [vmem:[%s2297_s10 + $0x170] sm:$0xff] %v332_v46  ;;  %335 = vst [vmem:[%s2297_s10 + $0x178] sm:$0xff] %v334_v47  ;;  %v338_v49 = vld [vmem:[%s2292_s9 + $0x308] sm:$0xff]  ;;  %v340_v50 = vld [vmem:[%s2292_s9 + $0x310] sm:$0xff] }
  0x2c   : > { %337 = vst [vmem:[%s2297_s10 + $0x180] sm:$0xff] %v336_v48  ;;  %339 = vst [vmem:[%s2297_s10 + $0x188] sm:$0xff] %v338_v49  ;;  %v342_v51 = vld [vmem:[%s2292_s9 + $0x318] sm:$0xff]  ;;  %v344_v52 = vld [vmem:[%s2292_s9 + $0x320] sm:$0xff] }
  0x2d   : > { %341 = vst [vmem:[%s2297_s10 + $0x190] sm:$0xff] %v340_v50  ;;  %v346_v53 = vld [vmem:[%s2292_s9 + $0x328] sm:$0xff]  ;;  %343 = vst [vmem:[%s2297_s10 + $0x198] sm:$0xff] %v342_v51  ;;  %v348_v54 = vld [vmem:[%s2292_s9 + $0x330] sm:$0xff] }
  0x2e   : > { %345 = vst [vmem:[%s2297_s10 + $0x1a0] sm:$0xff] %v344_v52  ;;  %347 = vst [vmem:[%s2297_s10 + $0x1a8] sm:$0xff] %v346_v53  ;;  %v350_v55 = vld [vmem:[%s2292_s9 + $0x338] sm:$0xff]  ;;  %v352_v56 = vld [vmem:[%s2292_s9 + $0x380] sm:$0xff] }
  0x2f   : > { %349 = vst [vmem:[%s2297_s10 + $0x1b0] sm:$0xff] %v348_v54  ;;  %351 = vst [vmem:[%s2297_s10 + $0x1b8] sm:$0xff] %v350_v55  ;;  %v354_v57 = vld [vmem:[%s2292_s9 + $0x388] sm:$0xff]  ;;  %v356_v58 = vld [vmem:[%s2292_s9 + $0x390] sm:$0xff] }
  0x30   : > { %353 = vst [vmem:[%s2297_s10 + $0x1c0] sm:$0xff] %v352_v56  ;;  %v358_v59 = vld [vmem:[%s2292_s9 + $0x398] sm:$0xff]  ;;  %355 = vst [vmem:[%s2297_s10 + $0x1c8] sm:$0xff] %v354_v57  ;;  %v360_v60 = vld [vmem:[%s2292_s9 + $0x3a0] sm:$0xff] }
  0x31   : > { %357 = vst [vmem:[%s2297_s10 + $0x1d0] sm:$0xff] %v356_v58  ;;  %359 = vst [vmem:[%s2297_s10 + $0x1d8] sm:$0xff] %v358_v59  ;;  %v362_v61 = vld [vmem:[%s2292_s9 + $0x3a8] sm:$0xff]  ;;  %v364_v62 = vld [vmem:[%s2292_s9 + $0x3b0] sm:$0xff] }
  0x32   : > { %361 = vst [vmem:[%s2297_s10 + $0x1e0] sm:$0xff] %v360_v60  ;;  %363 = vst [vmem:[%s2297_s10 + $0x1e8] sm:$0xff] %v362_v61  ;;  %v366_v63 = vld [vmem:[%s2292_s9 + $0x3b8] sm:$0xff]  ;;  %v368_v0 = vld [vmem:[%s2292_s9 + $0x400] sm:$0xff] }
  0x33   : > { %365 = vst [vmem:[%s2297_s10 + $0x1f0] sm:$0xff] %v364_v62  ;;  %v370_v1 = vld [vmem:[%s2292_s9 + $0x408] sm:$0xff]  ;;  %367 = vst [vmem:[%s2297_s10 + $0x1f8] sm:$0xff] %v366_v63  ;;  %v372_v2 = vld [vmem:[%s2292_s9 + $0x410] sm:$0xff] }
  0x34   : > { %369 = vst [vmem:[%s2297_s10 + $0x200] sm:$0xff] %v368_v0  ;;  %371 = vst [vmem:[%s2297_s10 + $0x208] sm:$0xff] %v370_v1  ;;  %v374_v3 = vld [vmem:[%s2292_s9 + $0x418] sm:$0xff]  ;;  %v376_v4 = vld [vmem:[%s2292_s9 + $0x420] sm:$0xff] }
  0x35   : > { %373 = vst [vmem:[%s2297_s10 + $0x210] sm:$0xff] %v372_v2  ;;  %375 = vst [vmem:[%s2297_s10 + $0x218] sm:$0xff] %v374_v3  ;;  %v378_v5 = vld [vmem:[%s2292_s9 + $0x428] sm:$0xff]  ;;  %v380_v6 = vld [vmem:[%s2292_s9 + $0x430] sm:$0xff] }
  0x36   : > { %377 = vst [vmem:[%s2297_s10 + $0x220] sm:$0xff] %v376_v4  ;;  %v382_v7 = vld [vmem:[%s2292_s9 + $0x438] sm:$0xff]  ;;  %379 = vst [vmem:[%s2297_s10 + $0x228] sm:$0xff] %v378_v5  ;;  %v384_v8 = vld [vmem:[%s2292_s9 + $0x480] sm:$0xff] }
  0x37   : > { %381 = vst [vmem:[%s2297_s10 + $0x230] sm:$0xff] %v380_v6  ;;  %383 = vst [vmem:[%s2297_s10 + $0x238] sm:$0xff] %v382_v7  ;;  %v386_v9 = vld [vmem:[%s2292_s9 + $0x488] sm:$0xff]  ;;  %v388_v10 = vld [vmem:[%s2292_s9 + $0x490] sm:$0xff] }
  0x38   : > { %385 = vst [vmem:[%s2297_s10 + $0x240] sm:$0xff] %v384_v8  ;;  %387 = vst [vmem:[%s2297_s10 + $0x248] sm:$0xff] %v386_v9  ;;  %v390_v11 = vld [vmem:[%s2292_s9 + $0x498] sm:$0xff]  ;;  %v392_v12 = vld [vmem:[%s2292_s9 + $0x4a0] sm:$0xff] }
  0x39   : > { %389 = vst [vmem:[%s2297_s10 + $0x250] sm:$0xff] %v388_v10  ;;  %v394_v13 = vld [vmem:[%s2292_s9 + $0x4a8] sm:$0xff]  ;;  %391 = vst [vmem:[%s2297_s10 + $0x258] sm:$0xff] %v390_v11  ;;  %v396_v14 = vld [vmem:[%s2292_s9 + $0x4b0] sm:$0xff] }
  0x3a   : > { %393 = vst [vmem:[%s2297_s10 + $0x260] sm:$0xff] %v392_v12  ;;  %395 = vst [vmem:[%s2297_s10 + $0x268] sm:$0xff] %v394_v13  ;;  %v398_v15 = vld [vmem:[%s2292_s9 + $0x4b8] sm:$0xff]  ;;  %v400_v16 = vld [vmem:[%s2292_s9 + $0x500] sm:$0xff] }
  0x3b   : > { %397 = vst [vmem:[%s2297_s10 + $0x270] sm:$0xff] %v396_v14  ;;  %399 = vst [vmem:[%s2297_s10 + $0x278] sm:$0xff] %v398_v15  ;;  %v402_v17 = vld [vmem:[%s2292_s9 + $0x508] sm:$0xff]  ;;  %v404_v18 = vld [vmem:[%s2292_s9 + $0x510] sm:$0xff] }
  0x3c   : > { %401 = vst [vmem:[%s2297_s10 + $0x280] sm:$0xff] %v400_v16  ;;  %v406_v19 = vld [vmem:[%s2292_s9 + $0x518] sm:$0xff]  ;;  %403 = vst [vmem:[%s2297_s10 + $0x288] sm:$0xff] %v402_v17  ;;  %v408_v20 = vld [vmem:[%s2292_s9 + $0x520] sm:$0xff] }
  0x3d   : > { %405 = vst [vmem:[%s2297_s10 + $0x290] sm:$0xff] %v404_v18  ;;  %407 = vst [vmem:[%s2297_s10 + $0x298] sm:$0xff] %v406_v19  ;;  %v410_v21 = vld [vmem:[%s2292_s9 + $0x528] sm:$0xff]  ;;  %v412_v22 = vld [vmem:[%s2292_s9 + $0x530] sm:$0xff] }
  0x3e   : > { %409 = vst [vmem:[%s2297_s10 + $0x2a0] sm:$0xff] %v408_v20  ;;  %411 = vst [vmem:[%s2297_s10 + $0x2a8] sm:$0xff] %v410_v21  ;;  %v414_v23 = vld [vmem:[%s2292_s9 + $0x538] sm:$0xff]  ;;  %v416_v24 = vld [vmem:[%s2292_s9 + $0x580] sm:$0xff] }
  0x3f   : > { %413 = vst [vmem:[%s2297_s10 + $0x2b0] sm:$0xff] %v412_v22  ;;  %v418_v25 = vld [vmem:[%s2292_s9 + $0x588] sm:$0xff]  ;;  %415 = vst [vmem:[%s2297_s10 + $0x2b8] sm:$0xff] %v414_v23  ;;  %v420_v26 = vld [vmem:[%s2292_s9 + $0x590] sm:$0xff] }
  0x40   : > { %417 = vst [vmem:[%s2297_s10 + $0x2c0] sm:$0xff] %v416_v24  ;;  %419 = vst [vmem:[%s2297_s10 + $0x2c8] sm:$0xff] %v418_v25  ;;  %v422_v27 = vld [vmem:[%s2292_s9 + $0x598] sm:$0xff]  ;;  %v424_v28 = vld [vmem:[%s2292_s9 + $0x5a0] sm:$0xff] }
  0x41   : > { %421 = vst [vmem:[%s2297_s10 + $0x2d0] sm:$0xff] %v420_v26  ;;  %423 = vst [vmem:[%s2297_s10 + $0x2d8] sm:$0xff] %v422_v27  ;;  %v426_v29 = vld [vmem:[%s2292_s9 + $0x5a8] sm:$0xff]  ;;  %v428_v30 = vld [vmem:[%s2292_s9 + $0x5b0] sm:$0xff] }
  0x42   : > { %425 = vst [vmem:[%s2297_s10 + $0x2e0] sm:$0xff] %v424_v28  ;;  %v430_v31 = vld [vmem:[%s2292_s9 + $0x5b8] sm:$0xff]  ;;  %427 = vst [vmem:[%s2297_s10 + $0x2e8] sm:$0xff] %v426_v29  ;;  %v432_v32 = vld [vmem:[%s2292_s9 + $0x600] sm:$0xff] }
  0x43   : > { %429 = vst [vmem:[%s2297_s10 + $0x2f0] sm:$0xff] %v428_v30  ;;  %431 = vst [vmem:[%s2297_s10 + $0x2f8] sm:$0xff] %v430_v31  ;;  %v434_v33 = vld [vmem:[%s2292_s9 + $0x608] sm:$0xff]  ;;  %v436_v34 = vld [vmem:[%s2292_s9 + $0x610] sm:$0xff] }
  0x44   : > { %433 = vst [vmem:[%s2297_s10 + $0x300] sm:$0xff] %v432_v32  ;;  %435 = vst [vmem:[%s2297_s10 + $0x308] sm:$0xff] %v434_v33  ;;  %v438_v35 = vld [vmem:[%s2292_s9 + $0x618] sm:$0xff]  ;;  %v440_v36 = vld [vmem:[%s2292_s9 + $0x620] sm:$0xff] }
  0x45   : > { %437 = vst [vmem:[%s2297_s10 + $0x310] sm:$0xff] %v436_v34  ;;  %v442_v37 = vld [vmem:[%s2292_s9 + $0x628] sm:$0xff]  ;;  %439 = vst [vmem:[%s2297_s10 + $0x318] sm:$0xff] %v438_v35  ;;  %v444_v38 = vld [vmem:[%s2292_s9 + $0x630] sm:$0xff] }
  0x46   : > { %441 = vst [vmem:[%s2297_s10 + $0x320] sm:$0xff] %v440_v36  ;;  %443 = vst [vmem:[%s2297_s10 + $0x328] sm:$0xff] %v442_v37  ;;  %v446_v39 = vld [vmem:[%s2292_s9 + $0x638] sm:$0xff]  ;;  %v448_v40 = vld [vmem:[%s2292_s9 + $0x680] sm:$0xff] }
  0x47   : > { %445 = vst [vmem:[%s2297_s10 + $0x330] sm:$0xff] %v444_v38  ;;  %447 = vst [vmem:[%s2297_s10 + $0x338] sm:$0xff] %v446_v39  ;;  %v450_v41 = vld [vmem:[%s2292_s9 + $0x688] sm:$0xff]  ;;  %v452_v42 = vld [vmem:[%s2292_s9 + $0x690] sm:$0xff] }
  0x48   : > { %449 = vst [vmem:[%s2297_s10 + $0x340] sm:$0xff] %v448_v40  ;;  %v454_v43 = vld [vmem:[%s2292_s9 + $0x698] sm:$0xff]  ;;  %451 = vst [vmem:[%s2297_s10 + $0x348] sm:$0xff] %v450_v41  ;;  %v456_v44 = vld [vmem:[%s2292_s9 + $0x6a0] sm:$0xff] }
  0x49   : > { %453 = vst [vmem:[%s2297_s10 + $0x350] sm:$0xff] %v452_v42  ;;  %455 = vst [vmem:[%s2297_s10 + $0x358] sm:$0xff] %v454_v43  ;;  %v458_v45 = vld [vmem:[%s2292_s9 + $0x6a8] sm:$0xff]  ;;  %v460_v46 = vld [vmem:[%s2292_s9 + $0x6b0] sm:$0xff] }
  0x4a   : > { %457 = vst [vmem:[%s2297_s10 + $0x360] sm:$0xff] %v456_v44  ;;  %459 = vst [vmem:[%s2297_s10 + $0x368] sm:$0xff] %v458_v45  ;;  %v462_v47 = vld [vmem:[%s2292_s9 + $0x6b8] sm:$0xff]  ;;  %v464_v48 = vld [vmem:[%s2292_s9 + $0x700] sm:$0xff] }
  0x4b   : > { %461 = vst [vmem:[%s2297_s10 + $0x370] sm:$0xff] %v460_v46  ;;  %v466_v49 = vld [vmem:[%s2292_s9 + $0x708] sm:$0xff]  ;;  %463 = vst [vmem:[%s2297_s10 + $0x378] sm:$0xff] %v462_v47  ;;  %v468_v50 = vld [vmem:[%s2292_s9 + $0x710] sm:$0xff] }
  0x4c   : > { %465 = vst [vmem:[%s2297_s10 + $0x380] sm:$0xff] %v464_v48  ;;  %467 = vst [vmem:[%s2297_s10 + $0x388] sm:$0xff] %v466_v49  ;;  %v470_v51 = vld [vmem:[%s2292_s9 + $0x718] sm:$0xff]  ;;  %v472_v52 = vld [vmem:[%s2292_s9 + $0x720] sm:$0xff] }
  0x4d   : > { %469 = vst [vmem:[%s2297_s10 + $0x390] sm:$0xff] %v468_v50  ;;  %471 = vst [vmem:[%s2297_s10 + $0x398] sm:$0xff] %v470_v51  ;;  %v474_v53 = vld [vmem:[%s2292_s9 + $0x728] sm:$0xff]  ;;  %v476_v54 = vld [vmem:[%s2292_s9 + $0x730] sm:$0xff] }
  0x4e   : > { %473 = vst [vmem:[%s2297_s10 + $0x3a0] sm:$0xff] %v472_v52  ;;  %v478_v55 = vld [vmem:[%s2292_s9 + $0x738] sm:$0xff]  ;;  %475 = vst [vmem:[%s2297_s10 + $0x3a8] sm:$0xff] %v474_v53  ;;  %v480_v56 = vld [vmem:[%s2292_s9 + $0x780] sm:$0xff] }
  0x4f   : > { %477 = vst [vmem:[%s2297_s10 + $0x3b0] sm:$0xff] %v476_v54  ;;  %479 = vst [vmem:[%s2297_s10 + $0x3b8] sm:$0xff] %v478_v55  ;;  %v482_v57 = vld [vmem:[%s2292_s9 + $0x788] sm:$0xff]  ;;  %v484_v58 = vld [vmem:[%s2292_s9 + $0x790] sm:$0xff] }
  0x50   : > { %481 = vst [vmem:[%s2297_s10 + $0x3c0] sm:$0xff] %v480_v56  ;;  %483 = vst [vmem:[%s2297_s10 + $0x3c8] sm:$0xff] %v482_v57  ;;  %v486_v59 = vld [vmem:[%s2292_s9 + $0x798] sm:$0xff]  ;;  %v488_v60 = vld [vmem:[%s2292_s9 + $0x7a0] sm:$0xff] }
  0x51   : > { %485 = vst [vmem:[%s2297_s10 + $0x3d0] sm:$0xff] %v484_v58  ;;  %v490_v61 = vld [vmem:[%s2292_s9 + $0x7a8] sm:$0xff]  ;;  %487 = vst [vmem:[%s2297_s10 + $0x3d8] sm:$0xff] %v486_v59  ;;  %v492_v62 = vld [vmem:[%s2292_s9 + $0x7b0] sm:$0xff] }
  0x52   : > { %489 = vst [vmem:[%s2297_s10 + $0x3e0] sm:$0xff] %v488_v60  ;;  %491 = vst [vmem:[%s2297_s10 + $0x3e8] sm:$0xff] %v490_v61  ;;  %v494_v63 = vld [vmem:[%s2292_s9 + $0x7b8] sm:$0xff]  ;;  %v496_v0 = vld [vmem:[%s2292_s9 + $0x800] sm:$0xff] }
  0x53   : > { %493 = vst [vmem:[%s2297_s10 + $0x3f0] sm:$0xff] %v492_v62  ;;  %495 = vst [vmem:[%s2297_s10 + $0x3f8] sm:$0xff] %v494_v63  ;;  %v498_v1 = vld [vmem:[%s2292_s9 + $0x808] sm:$0xff]  ;;  %v500_v2 = vld [vmem:[%s2292_s9 + $0x810] sm:$0xff] }
  0x54   : > { %497 = vst [vmem:[%s2297_s10 + $0x400] sm:$0xff] %v496_v0  ;;  %v502_v3 = vld [vmem:[%s2292_s9 + $0x818] sm:$0xff]  ;;  %499 = vst [vmem:[%s2297_s10 + $0x408] sm:$0xff] %v498_v1  ;;  %v504_v4 = vld [vmem:[%s2292_s9 + $0x820] sm:$0xff] }
  0x55   : > { %501 = vst [vmem:[%s2297_s10 + $0x410] sm:$0xff] %v500_v2  ;;  %503 = vst [vmem:[%s2297_s10 + $0x418] sm:$0xff] %v502_v3  ;;  %v506_v5 = vld [vmem:[%s2292_s9 + $0x828] sm:$0xff]  ;;  %v508_v6 = vld [vmem:[%s2292_s9 + $0x830] sm:$0xff] }
  0x56   : > { %505 = vst [vmem:[%s2297_s10 + $0x420] sm:$0xff] %v504_v4  ;;  %507 = vst [vmem:[%s2297_s10 + $0x428] sm:$0xff] %v506_v5  ;;  %v510_v7 = vld [vmem:[%s2292_s9 + $0x838] sm:$0xff]  ;;  %v512_v8 = vld [vmem:[%s2292_s9 + $0x880] sm:$0xff] }
  0x57   : > { %509 = vst [vmem:[%s2297_s10 + $0x430] sm:$0xff] %v508_v6  ;;  %v514_v9 = vld [vmem:[%s2292_s9 + $0x888] sm:$0xff]  ;;  %511 = vst [vmem:[%s2297_s10 + $0x438] sm:$0xff] %v510_v7  ;;  %v516_v10 = vld [vmem:[%s2292_s9 + $0x890] sm:$0xff] }
  0x58   : > { %513 = vst [vmem:[%s2297_s10 + $0x440] sm:$0xff] %v512_v8  ;;  %515 = vst [vmem:[%s2297_s10 + $0x448] sm:$0xff] %v514_v9  ;;  %v518_v11 = vld [vmem:[%s2292_s9 + $0x898] sm:$0xff]  ;;  %v520_v12 = vld [vmem:[%s2292_s9 + $0x8a0] sm:$0xff] }
  0x59   : > { %517 = vst [vmem:[%s2297_s10 + $0x450] sm:$0xff] %v516_v10  ;;  %519 = vst [vmem:[%s2297_s10 + $0x458] sm:$0xff] %v518_v11  ;;  %v522_v13 = vld [vmem:[%s2292_s9 + $0x8a8] sm:$0xff]  ;;  %v524_v14 = vld [vmem:[%s2292_s9 + $0x8b0] sm:$0xff] }
  0x5a   : > { %521 = vst [vmem:[%s2297_s10 + $0x460] sm:$0xff] %v520_v12  ;;  %v526_v15 = vld [vmem:[%s2292_s9 + $0x8b8] sm:$0xff]  ;;  %523 = vst [vmem:[%s2297_s10 + $0x468] sm:$0xff] %v522_v13  ;;  %v528_v16 = vld [vmem:[%s2292_s9 + $0x900] sm:$0xff] }
  0x5b   : > { %525 = vst [vmem:[%s2297_s10 + $0x470] sm:$0xff] %v524_v14  ;;  %527 = vst [vmem:[%s2297_s10 + $0x478] sm:$0xff] %v526_v15  ;;  %v530_v17 = vld [vmem:[%s2292_s9 + $0x908] sm:$0xff]  ;;  %v532_v18 = vld [vmem:[%s2292_s9 + $0x910] sm:$0xff] }
  0x5c   : > { %529 = vst [vmem:[%s2297_s10 + $0x480] sm:$0xff] %v528_v16  ;;  %531 = vst [vmem:[%s2297_s10 + $0x488] sm:$0xff] %v530_v17  ;;  %v534_v19 = vld [vmem:[%s2292_s9 + $0x918] sm:$0xff]  ;;  %v536_v20 = vld [vmem:[%s2292_s9 + $0x920] sm:$0xff] }
  0x5d   : > { %533 = vst [vmem:[%s2297_s10 + $0x490] sm:$0xff] %v532_v18  ;;  %v538_v21 = vld [vmem:[%s2292_s9 + $0x928] sm:$0xff]  ;;  %535 = vst [vmem:[%s2297_s10 + $0x498] sm:$0xff] %v534_v19  ;;  %v540_v22 = vld [vmem:[%s2292_s9 + $0x930] sm:$0xff] }
  0x5e   : > { %537 = vst [vmem:[%s2297_s10 + $0x4a0] sm:$0xff] %v536_v20  ;;  %539 = vst [vmem:[%s2297_s10 + $0x4a8] sm:$0xff] %v538_v21  ;;  %v542_v23 = vld [vmem:[%s2292_s9 + $0x938] sm:$0xff]  ;;  %v544_v24 = vld [vmem:[%s2292_s9 + $0x980] sm:$0xff] }
  0x5f   : > { %541 = vst [vmem:[%s2297_s10 + $0x4b0] sm:$0xff] %v540_v22  ;;  %543 = vst [vmem:[%s2297_s10 + $0x4b8] sm:$0xff] %v542_v23  ;;  %v546_v25 = vld [vmem:[%s2292_s9 + $0x988] sm:$0xff]  ;;  %v548_v26 = vld [vmem:[%s2292_s9 + $0x990] sm:$0xff] }
  0x60   : > { %545 = vst [vmem:[%s2297_s10 + $0x4c0] sm:$0xff] %v544_v24  ;;  %v550_v27 = vld [vmem:[%s2292_s9 + $0x998] sm:$0xff]  ;;  %547 = vst [vmem:[%s2297_s10 + $0x4c8] sm:$0xff] %v546_v25  ;;  %v552_v28 = vld [vmem:[%s2292_s9 + $0x9a0] sm:$0xff] }
  0x61   : > { %549 = vst [vmem:[%s2297_s10 + $0x4d0] sm:$0xff] %v548_v26  ;;  %551 = vst [vmem:[%s2297_s10 + $0x4d8] sm:$0xff] %v550_v27  ;;  %v554_v29 = vld [vmem:[%s2292_s9 + $0x9a8] sm:$0xff]  ;;  %v556_v30 = vld [vmem:[%s2292_s9 + $0x9b0] sm:$0xff] }
  0x62   : > { %553 = vst [vmem:[%s2297_s10 + $0x4e0] sm:$0xff] %v552_v28  ;;  %555 = vst [vmem:[%s2297_s10 + $0x4e8] sm:$0xff] %v554_v29  ;;  %v558_v31 = vld [vmem:[%s2292_s9 + $0x9b8] sm:$0xff]  ;;  %v560_v32 = vld [vmem:[%s2292_s9 + $0xa00] sm:$0xff] }
  0x63   : > { %557 = vst [vmem:[%s2297_s10 + $0x4f0] sm:$0xff] %v556_v30  ;;  %v562_v33 = vld [vmem:[%s2292_s9 + $0xa08] sm:$0xff]  ;;  %559 = vst [vmem:[%s2297_s10 + $0x4f8] sm:$0xff] %v558_v31  ;;  %v564_v34 = vld [vmem:[%s2292_s9 + $0xa10] sm:$0xff] }
  0x64   : > { %561 = vst [vmem:[%s2297_s10 + $0x500] sm:$0xff] %v560_v32  ;;  %563 = vst [vmem:[%s2297_s10 + $0x508] sm:$0xff] %v562_v33  ;;  %v566_v35 = vld [vmem:[%s2292_s9 + $0xa18] sm:$0xff]  ;;  %v568_v36 = vld [vmem:[%s2292_s9 + $0xa20] sm:$0xff] }
  0x65   : > { %565 = vst [vmem:[%s2297_s10 + $0x510] sm:$0xff] %v564_v34  ;;  %567 = vst [vmem:[%s2297_s10 + $0x518] sm:$0xff] %v566_v35  ;;  %v570_v37 = vld [vmem:[%s2292_s9 + $0xa28] sm:$0xff]  ;;  %v572_v38 = vld [vmem:[%s2292_s9 + $0xa30] sm:$0xff] }
  0x66   : > { %569 = vst [vmem:[%s2297_s10 + $0x520] sm:$0xff] %v568_v36  ;;  %v574_v39 = vld [vmem:[%s2292_s9 + $0xa38] sm:$0xff]  ;;  %571 = vst [vmem:[%s2297_s10 + $0x528] sm:$0xff] %v570_v37  ;;  %v576_v40 = vld [vmem:[%s2292_s9 + $0xa80] sm:$0xff] }
  0x67   : > { %573 = vst [vmem:[%s2297_s10 + $0x530] sm:$0xff] %v572_v38  ;;  %575 = vst [vmem:[%s2297_s10 + $0x538] sm:$0xff] %v574_v39  ;;  %v578_v41 = vld [vmem:[%s2292_s9 + $0xa88] sm:$0xff]  ;;  %v580_v42 = vld [vmem:[%s2292_s9 + $0xa90] sm:$0xff] }
  0x68   : > { %577 = vst [vmem:[%s2297_s10 + $0x540] sm:$0xff] %v576_v40  ;;  %579 = vst [vmem:[%s2297_s10 + $0x548] sm:$0xff] %v578_v41  ;;  %v582_v43 = vld [vmem:[%s2292_s9 + $0xa98] sm:$0xff]  ;;  %v584_v44 = vld [vmem:[%s2292_s9 + $0xaa0] sm:$0xff] }
  0x69   : > { %581 = vst [vmem:[%s2297_s10 + $0x550] sm:$0xff] %v580_v42  ;;  %v586_v45 = vld [vmem:[%s2292_s9 + $0xaa8] sm:$0xff]  ;;  %583 = vst [vmem:[%s2297_s10 + $0x558] sm:$0xff] %v582_v43  ;;  %v588_v46 = vld [vmem:[%s2292_s9 + $0xab0] sm:$0xff] }
  0x6a   : > { %585 = vst [vmem:[%s2297_s10 + $0x560] sm:$0xff] %v584_v44  ;;  %587 = vst [vmem:[%s2297_s10 + $0x568] sm:$0xff] %v586_v45  ;;  %v590_v47 = vld [vmem:[%s2292_s9 + $0xab8] sm:$0xff]  ;;  %v592_v48 = vld [vmem:[%s2292_s9 + $0xb00] sm:$0xff] }
  0x6b   : > { %589 = vst [vmem:[%s2297_s10 + $0x570] sm:$0xff] %v588_v46  ;;  %591 = vst [vmem:[%s2297_s10 + $0x578] sm:$0xff] %v590_v47  ;;  %v594_v49 = vld [vmem:[%s2292_s9 + $0xb08] sm:$0xff]  ;;  %v596_v50 = vld [vmem:[%s2292_s9 + $0xb10] sm:$0xff] }
  0x6c   : > { %593 = vst [vmem:[%s2297_s10 + $0x580] sm:$0xff] %v592_v48  ;;  %v598_v51 = vld [vmem:[%s2292_s9 + $0xb18] sm:$0xff]  ;;  %595 = vst [vmem:[%s2297_s10 + $0x588] sm:$0xff] %v594_v49  ;;  %v600_v52 = vld [vmem:[%s2292_s9 + $0xb20] sm:$0xff] }
  0x6d   : > { %597 = vst [vmem:[%s2297_s10 + $0x590] sm:$0xff] %v596_v50  ;;  %599 = vst [vmem:[%s2297_s10 + $0x598] sm:$0xff] %v598_v51  ;;  %v602_v53 = vld [vmem:[%s2292_s9 + $0xb28] sm:$0xff]  ;;  %v604_v54 = vld [vmem:[%s2292_s9 + $0xb30] sm:$0xff] }
  0x6e   : > { %601 = vst [vmem:[%s2297_s10 + $0x5a0] sm:$0xff] %v600_v52  ;;  %603 = vst [vmem:[%s2297_s10 + $0x5a8] sm:$0xff] %v602_v53  ;;  %v606_v55 = vld [vmem:[%s2292_s9 + $0xb38] sm:$0xff]  ;;  %v608_v56 = vld [vmem:[%s2292_s9 + $0xb80] sm:$0xff] }
  0x6f   : > { %605 = vst [vmem:[%s2297_s10 + $0x5b0] sm:$0xff] %v604_v54  ;;  %v610_v57 = vld [vmem:[%s2292_s9 + $0xb88] sm:$0xff]  ;;  %607 = vst [vmem:[%s2297_s10 + $0x5b8] sm:$0xff] %v606_v55  ;;  %v612_v58 = vld [vmem:[%s2292_s9 + $0xb90] sm:$0xff] }
  0x70   : > { %609 = vst [vmem:[%s2297_s10 + $0x5c0] sm:$0xff] %v608_v56  ;;  %611 = vst [vmem:[%s2297_s10 + $0x5c8] sm:$0xff] %v610_v57  ;;  %v614_v59 = vld [vmem:[%s2292_s9 + $0xb98] sm:$0xff]  ;;  %v616_v60 = vld [vmem:[%s2292_s9 + $0xba0] sm:$0xff] }
  0x71   : > { %613 = vst [vmem:[%s2297_s10 + $0x5d0] sm:$0xff] %v612_v58  ;;  %615 = vst [vmem:[%s2297_s10 + $0x5d8] sm:$0xff] %v614_v59  ;;  %v618_v61 = vld [vmem:[%s2292_s9 + $0xba8] sm:$0xff]  ;;  %v620_v62 = vld [vmem:[%s2292_s9 + $0xbb0] sm:$0xff] }
  0x72   : > { %617 = vst [vmem:[%s2297_s10 + $0x5e0] sm:$0xff] %v616_v60  ;;  %v622_v63 = vld [vmem:[%s2292_s9 + $0xbb8] sm:$0xff]  ;;  %619 = vst [vmem:[%s2297_s10 + $0x5e8] sm:$0xff] %v618_v61  ;;  %v624_v0 = vld [vmem:[%s2292_s9 + $0xc00] sm:$0xff] }
  0x73   : > { %621 = vst [vmem:[%s2297_s10 + $0x5f0] sm:$0xff] %v620_v62  ;;  %623 = vst [vmem:[%s2297_s10 + $0x5f8] sm:$0xff] %v622_v63  ;;  %v626_v1 = vld [vmem:[%s2292_s9 + $0xc08] sm:$0xff]  ;;  %v628_v2 = vld [vmem:[%s2292_s9 + $0xc10] sm:$0xff] }
  0x74   : > { %625 = vst [vmem:[%s2297_s10 + $0x600] sm:$0xff] %v624_v0  ;;  %627 = vst [vmem:[%s2297_s10 + $0x608] sm:$0xff] %v626_v1  ;;  %v630_v3 = vld [vmem:[%s2292_s9 + $0xc18] sm:$0xff]  ;;  %v632_v4 = vld [vmem:[%s2292_s9 + $0xc20] sm:$0xff] }
  0x75   : > { %629 = vst [vmem:[%s2297_s10 + $0x610] sm:$0xff] %v628_v2  ;;  %v634_v5 = vld [vmem:[%s2292_s9 + $0xc28] sm:$0xff]  ;;  %631 = vst [vmem:[%s2297_s10 + $0x618] sm:$0xff] %v630_v3  ;;  %v636_v6 = vld [vmem:[%s2292_s9 + $0xc30] sm:$0xff] }
  0x76   : > { %633 = vst [vmem:[%s2297_s10 + $0x620] sm:$0xff] %v632_v4  ;;  %635 = vst [vmem:[%s2297_s10 + $0x628] sm:$0xff] %v634_v5  ;;  %v638_v7 = vld [vmem:[%s2292_s9 + $0xc38] sm:$0xff]  ;;  %v640_v8 = vld [vmem:[%s2292_s9 + $0xc80] sm:$0xff] }
  0x77   : > { %637 = vst [vmem:[%s2297_s10 + $0x630] sm:$0xff] %v636_v6  ;;  %639 = vst [vmem:[%s2297_s10 + $0x638] sm:$0xff] %v638_v7  ;;  %v642_v9 = vld [vmem:[%s2292_s9 + $0xc88] sm:$0xff]  ;;  %v644_v10 = vld [vmem:[%s2292_s9 + $0xc90] sm:$0xff] }
  0x78   : > { %641 = vst [vmem:[%s2297_s10 + $0x640] sm:$0xff] %v640_v8  ;;  %v646_v11 = vld [vmem:[%s2292_s9 + $0xc98] sm:$0xff]  ;;  %643 = vst [vmem:[%s2297_s10 + $0x648] sm:$0xff] %v642_v9  ;;  %v648_v12 = vld [vmem:[%s2292_s9 + $0xca0] sm:$0xff] }
  0x79   : > { %645 = vst [vmem:[%s2297_s10 + $0x650] sm:$0xff] %v644_v10  ;;  %647 = vst [vmem:[%s2297_s10 + $0x658] sm:$0xff] %v646_v11  ;;  %v650_v13 = vld [vmem:[%s2292_s9 + $0xca8] sm:$0xff]  ;;  %v652_v14 = vld [vmem:[%s2292_s9 + $0xcb0] sm:$0xff] }
  0x7a   : > { %649 = vst [vmem:[%s2297_s10 + $0x660] sm:$0xff] %v648_v12  ;;  %651 = vst [vmem:[%s2297_s10 + $0x668] sm:$0xff] %v650_v13  ;;  %v654_v15 = vld [vmem:[%s2292_s9 + $0xcb8] sm:$0xff]  ;;  %v656_v16 = vld [vmem:[%s2292_s9 + $0xd00] sm:$0xff] }
  0x7b   : > { %653 = vst [vmem:[%s2297_s10 + $0x670] sm:$0xff] %v652_v14  ;;  %v658_v17 = vld [vmem:[%s2292_s9 + $0xd08] sm:$0xff]  ;;  %655 = vst [vmem:[%s2297_s10 + $0x678] sm:$0xff] %v654_v15  ;;  %v660_v18 = vld [vmem:[%s2292_s9 + $0xd10] sm:$0xff] }
  0x7c   : > { %657 = vst [vmem:[%s2297_s10 + $0x680] sm:$0xff] %v656_v16  ;;  %659 = vst [vmem:[%s2297_s10 + $0x688] sm:$0xff] %v658_v17  ;;  %v662_v19 = vld [vmem:[%s2292_s9 + $0xd18] sm:$0xff]  ;;  %v664_v20 = vld [vmem:[%s2292_s9 + $0xd20] sm:$0xff] }
  0x7d   : > { %661 = vst [vmem:[%s2297_s10 + $0x690] sm:$0xff] %v660_v18  ;;  %663 = vst [vmem:[%s2297_s10 + $0x698] sm:$0xff] %v662_v19  ;;  %v666_v21 = vld [vmem:[%s2292_s9 + $0xd28] sm:$0xff]  ;;  %v668_v22 = vld [vmem:[%s2292_s9 + $0xd30] sm:$0xff] }
  0x7e   : > { %665 = vst [vmem:[%s2297_s10 + $0x6a0] sm:$0xff] %v664_v20  ;;  %v670_v23 = vld [vmem:[%s2292_s9 + $0xd38] sm:$0xff]  ;;  %667 = vst [vmem:[%s2297_s10 + $0x6a8] sm:$0xff] %v666_v21  ;;  %v672_v24 = vld [vmem:[%s2292_s9 + $0xd80] sm:$0xff] }
  0x7f   : > { %669 = vst [vmem:[%s2297_s10 + $0x6b0] sm:$0xff] %v668_v22  ;;  %671 = vst [vmem:[%s2297_s10 + $0x6b8] sm:$0xff] %v670_v23  ;;  %v674_v25 = vld [vmem:[%s2292_s9 + $0xd88] sm:$0xff]  ;;  %v676_v26 = vld [vmem:[%s2292_s9 + $0xd90] sm:$0xff] }
  0x80   : > { %673 = vst [vmem:[%s2297_s10 + $0x6c0] sm:$0xff] %v672_v24  ;;  %675 = vst [vmem:[%s2297_s10 + $0x6c8] sm:$0xff] %v674_v25  ;;  %v678_v27 = vld [vmem:[%s2292_s9 + $0xd98] sm:$0xff]  ;;  %v680_v28 = vld [vmem:[%s2292_s9 + $0xda0] sm:$0xff] }
  0x81   : > { %677 = vst [vmem:[%s2297_s10 + $0x6d0] sm:$0xff] %v676_v26  ;;  %v682_v29 = vld [vmem:[%s2292_s9 + $0xda8] sm:$0xff]  ;;  %679 = vst [vmem:[%s2297_s10 + $0x6d8] sm:$0xff] %v678_v27  ;;  %v684_v30 = vld [vmem:[%s2292_s9 + $0xdb0] sm:$0xff] }
  0x82   : > { %681 = vst [vmem:[%s2297_s10 + $0x6e0] sm:$0xff] %v680_v28  ;;  %683 = vst [vmem:[%s2297_s10 + $0x6e8] sm:$0xff] %v682_v29  ;;  %v686_v31 = vld [vmem:[%s2292_s9 + $0xdb8] sm:$0xff]  ;;  %v688_v32 = vld [vmem:[%s2292_s9 + $0xe00] sm:$0xff] }
  0x83   : > { %685 = vst [vmem:[%s2297_s10 + $0x6f0] sm:$0xff] %v684_v30  ;;  %687 = vst [vmem:[%s2297_s10 + $0x6f8] sm:$0xff] %v686_v31  ;;  %v690_v33 = vld [vmem:[%s2292_s9 + $0xe08] sm:$0xff]  ;;  %v692_v34 = vld [vmem:[%s2292_s9 + $0xe10] sm:$0xff] }
  0x84   : > { %689 = vst [vmem:[%s2297_s10 + $0x700] sm:$0xff] %v688_v32  ;;  %v694_v35 = vld [vmem:[%s2292_s9 + $0xe18] sm:$0xff]  ;;  %691 = vst [vmem:[%s2297_s10 + $0x708] sm:$0xff] %v690_v33  ;;  %v696_v36 = vld [vmem:[%s2292_s9 + $0xe20] sm:$0xff] }
  0x85   : > { %693 = vst [vmem:[%s2297_s10 + $0x710] sm:$0xff] %v692_v34  ;;  %695 = vst [vmem:[%s2297_s10 + $0x718] sm:$0xff] %v694_v35  ;;  %v698_v37 = vld [vmem:[%s2292_s9 + $0xe28] sm:$0xff]  ;;  %v700_v38 = vld [vmem:[%s2292_s9 + $0xe30] sm:$0xff] }
  0x86   : > { %697 = vst [vmem:[%s2297_s10 + $0x720] sm:$0xff] %v696_v36  ;;  %699 = vst [vmem:[%s2297_s10 + $0x728] sm:$0xff] %v698_v37  ;;  %v702_v39 = vld [vmem:[%s2292_s9 + $0xe38] sm:$0xff]  ;;  %v704_v40 = vld [vmem:[%s2292_s9 + $0xe80] sm:$0xff] }
  0x87   : > { %701 = vst [vmem:[%s2297_s10 + $0x730] sm:$0xff] %v700_v38  ;;  %v706_v41 = vld [vmem:[%s2292_s9 + $0xe88] sm:$0xff]  ;;  %703 = vst [vmem:[%s2297_s10 + $0x738] sm:$0xff] %v702_v39  ;;  %v708_v42 = vld [vmem:[%s2292_s9 + $0xe90] sm:$0xff] }
  0x88   : > { %705 = vst [vmem:[%s2297_s10 + $0x740] sm:$0xff] %v704_v40  ;;  %707 = vst [vmem:[%s2297_s10 + $0x748] sm:$0xff] %v706_v41  ;;  %v710_v43 = vld [vmem:[%s2292_s9 + $0xe98] sm:$0xff]  ;;  %v712_v44 = vld [vmem:[%s2292_s9 + $0xea0] sm:$0xff] }
  0x89   : > { %709 = vst [vmem:[%s2297_s10 + $0x750] sm:$0xff] %v708_v42  ;;  %711 = vst [vmem:[%s2297_s10 + $0x758] sm:$0xff] %v710_v43  ;;  %v714_v45 = vld [vmem:[%s2292_s9 + $0xea8] sm:$0xff]  ;;  %v716_v46 = vld [vmem:[%s2292_s9 + $0xeb0] sm:$0xff] }
  0x8a   : > { %713 = vst [vmem:[%s2297_s10 + $0x760] sm:$0xff] %v712_v44  ;;  %v718_v47 = vld [vmem:[%s2292_s9 + $0xeb8] sm:$0xff]  ;;  %715 = vst [vmem:[%s2297_s10 + $0x768] sm:$0xff] %v714_v45  ;;  %v720_v48 = vld [vmem:[%s2292_s9 + $0xf00] sm:$0xff] }
  0x8b   : > { %717 = vst [vmem:[%s2297_s10 + $0x770] sm:$0xff] %v716_v46  ;;  %719 = vst [vmem:[%s2297_s10 + $0x778] sm:$0xff] %v718_v47  ;;  %v722_v49 = vld [vmem:[%s2292_s9 + $0xf08] sm:$0xff]  ;;  %v724_v50 = vld [vmem:[%s2292_s9 + $0xf10] sm:$0xff] }
  0x8c   : > { %721 = vst [vmem:[%s2297_s10 + $0x780] sm:$0xff] %v720_v48  ;;  %723 = vst [vmem:[%s2297_s10 + $0x788] sm:$0xff] %v722_v49  ;;  %v726_v51 = vld [vmem:[%s2292_s9 + $0xf18] sm:$0xff]  ;;  %v728_v52 = vld [vmem:[%s2292_s9 + $0xf20] sm:$0xff] }
  0x8d   : > { %725 = vst [vmem:[%s2297_s10 + $0x790] sm:$0xff] %v724_v50  ;;  %v730_v53 = vld [vmem:[%s2292_s9 + $0xf28] sm:$0xff]  ;;  %727 = vst [vmem:[%s2297_s10 + $0x798] sm:$0xff] %v726_v51  ;;  %v732_v54 = vld [vmem:[%s2292_s9 + $0xf30] sm:$0xff] }
  0x8e   : > { %729 = vst [vmem:[%s2297_s10 + $0x7a0] sm:$0xff] %v728_v52  ;;  %731 = vst [vmem:[%s2297_s10 + $0x7a8] sm:$0xff] %v730_v53  ;;  %v734_v55 = vld [vmem:[%s2292_s9 + $0xf38] sm:$0xff]  ;;  %v736_v56 = vld [vmem:[%s2292_s9 + $0xf80] sm:$0xff] }
  0x8f   : > { %733 = vst [vmem:[%s2297_s10 + $0x7b0] sm:$0xff] %v732_v54  ;;  %735 = vst [vmem:[%s2297_s10 + $0x7b8] sm:$0xff] %v734_v55  ;;  %v738_v57 = vld [vmem:[%s2292_s9 + $0xf88] sm:$0xff]  ;;  %v740_v58 = vld [vmem:[%s2292_s9 + $0xf90] sm:$0xff] }
  0x90   : > { %737 = vst [vmem:[%s2297_s10 + $0x7c0] sm:$0xff] %v736_v56  ;;  %v742_v59 = vld [vmem:[%s2292_s9 + $0xf98] sm:$0xff]  ;;  %739 = vst [vmem:[%s2297_s10 + $0x7c8] sm:$0xff] %v738_v57  ;;  %v744_v60 = vld [vmem:[%s2292_s9 + $0xfa0] sm:$0xff] }
  0x91   : > { %741 = vst [vmem:[%s2297_s10 + $0x7d0] sm:$0xff] %v740_v58  ;;  %743 = vst [vmem:[%s2297_s10 + $0x7d8] sm:$0xff] %v742_v59  ;;  %v746_v61 = vld [vmem:[%s2292_s9 + $0xfa8] sm:$0xff]  ;;  %v748_v62 = vld [vmem:[%s2292_s9 + $0xfb0] sm:$0xff] }
  0x92   : > { %745 = vst [vmem:[%s2297_s10 + $0x7e0] sm:$0xff] %v744_v60  ;;  %747 = vst [vmem:[%s2297_s10 + $0x7e8] sm:$0xff] %v746_v61  ;;  %v750_v63 = vld [vmem:[%s2292_s9 + $0xfb8] sm:$0xff] }
  0x93   : > { %749 = vst [vmem:[%s2297_s10 + $0x7f0] sm:$0xff] %v748_v62  ;;  %751 = vst [vmem:[%s2297_s10 + $0x7f8] sm:$0xff] %v750_v63 }
  0x94 PF: > { %p2105_p8 = scmp.ge.s32.totalorder %s2212_s22, 1  ;;  %p764_p9 = scmp.lt.s32.totalorder %s2212_s22, 3 }
  0x96   : > { %p765_p10 = pnand %p2105_p8, %p764_p9 }
  0x97   : > { %s771_s11 = sand.u32 (!%p765_p10), 1, %s2196_s18   ;;  %s2108_s12 = sshll.u32 (!%p765_p10), %s2204_s20, 3 }
  0x98   : > { %768 = sbr.rel (%p765_p10) target bundleno = 853 (0x355), region = 59  ;;  %s2106_s13 = sshll.u32 (!%p765_p10), %s771_s11, 11 }
  0x99   : > { %s2107_s14 = sshll.u32 (!%p765_p10), %s771_s11, 8  ;;  %p817_p11 = scmp.lt.s32.totalorder (!%p765_p10), %s2108_s12, 15 }
  0x9a   : > { %p823_p12 = scmp.eq.s32.totalorder (!%p765_p10), %s2204_s20, 0  ;;  %s2819_s24 = scalar_lea.vmem (!%p765_p10), [#allocation4], %s2106_s13 }
  0x9b   : > { %s2821_s25 = scalar_lea.vmem (!%p765_p10), [#allocation5], %s2107_s14 }
  0x9d   : > { %s3343_s12 = smov (!%p817_p11, %s2108_s12), 15  ;;  %828 = sbr.rel (!%p823_p12) target bundleno = 495 (0x1ef), region = 67  ;;  %v829_v0 = vld [vmem:[%s3329_s0] sm:$0xff] (%p823_p12)  ;;  %v830_v1 = vld [vmem:[%s3329_s0 + $0x8] sm:$0xff] (%p823_p12)  ;;  %v831_v5 = vld [vmem:[%s3329_s0 + $0x10] sm:$0xff] (%p823_p12)  ;;  %v932_v55 = vlaneseq (%p823_p12) }
  0x9e   : > { %s819_s17 = scalar_lea.vmem %s3333_s4, %s3343_s12  ;;  %v833_v2 = vld [vmem:[%s3329_s0 + $0x20] sm:$0xff] (%p823_p12)  ;;  %v837_v3 = vadd.f32 (%p823_p12), %v830_v1, %v829_v0  ;;  %v834_v4 = vld [vmem:[%s3329_s0 + $0x28] sm:$0xff] (%p823_p12)  ;;  %v832_v6 = vld [vmem:[%s3329_s0 + $0x18] sm:$0xff] (%p823_p12) }
  0x9f   : > { %v843_v7 = vadd.f32 (%p823_p12), %v834_v4, %v833_v2  ;;  %v835_v8 = vld [vmem:[%s3329_s0 + $0x30] sm:$0xff] (%p823_p12)  ;;  %v836_v9 = vld [vmem:[%s3329_s0 + $0x38] sm:$0xff] (%p823_p12)  ;;  %v840_v10 = vadd.f32 (%p823_p12), %v832_v6, %v831_v5 }
  0xa0   : > { %838 = vadd.xlane.f32.xlu0 (%p823_p12), %v837_v3  ;;  %v846_v11 = vadd.f32 (%p823_p12), %v836_v9, %v835_v8 }
  0xa1   : > { %844 = vadd.xlane.f32.xlu1 (%p823_p12), %v843_v7 }
  0xa4   : > { %841 = vadd.xlane.f32.xlu0 %v840_v10 }
  0xa5   : > { %847 = vadd.xlane.f32.xlu1 %v846_v11 }
 0x129   : > { %v839_v12 = vpop.xlane.xlu0 %838 }
 0x12a   : > { %v850_v13 = vmul.f32 0.00390625, %v839_v12  ;;  %v845_v14 = vpop.xlane.xlu1 %844  ;;  %v914_v12 = vld [vmem:[%s3330_s1] sm:$0x3] }
 0x12b   : > { %v852_v15 = vmul.f32 0.00390625, %v845_v14 }
 0x12c   : > { %v2847_v16 = vsub.f32 %v829_v0, %v850_v13  ;;  %v2849_v17 = vsub.f32 %v830_v1, %v850_v13  ;;  %v950_v13 = vld [vmem:[%s3331_s2] sm:$0x3] }
 0x12d   : > { %v2851_v18 = vsub.f32 %v833_v2, %v852_v15  ;;  %v2853_v19 = vsub.f32 %v834_v4, %v852_v15  ;;  %v842_v20 = vpop.xlane.xlu0 %841 }
 0x12e   : > { %v851_v21 = vmul.f32 0.00390625, %v842_v20  ;;  %v848_v22 = vpop.xlane.xlu1 %847  ;;  %v862_v23 = vmul.f32 %v2847_v16, %v2847_v16  ;;  %v863_v24 = vmul.f32 %v2849_v17, %v2849_v17 }
 0x12f   : > { %v853_v25 = vmul.f32 0.00390625, %v848_v22  ;;  %v866_v26 = vmul.f32 %v2851_v18, %v2851_v18  ;;  %v867_v27 = vmul.f32 %v2853_v19, %v2853_v19 }
 0x130   : > { %v2863_v28 = vsub.f32 %v831_v5, %v851_v21  ;;  %v2865_v29 = vsub.f32 %v832_v6, %v851_v21  ;;  %v870_v30 = vadd.f32 %v863_v24, %v862_v23  ;;  %v933_v6 = vshrl.u32 %v932_v55, 7 }
 0x131   : > { %v2867_v31 = vsub.f32 %v835_v8, %v853_v25  ;;  %v2869_v32 = vsub.f32 %v836_v9, %v853_v25  ;;  %v876_v33 = vadd.f32 %v867_v27, %v866_v26 }
 0x132   : > { %871 = vadd.xlane.f32.xlu0 %v870_v30  ;;  %v864_v34 = vmul.f32 %v2863_v28, %v2863_v28  ;;  %v865_v35 = vmul.f32 %v2865_v29, %v2865_v29  ;;  %v934_v10 = vsub.s32 0, %v933_v6  ;;  %v938_v11 = vsub.s32 1, %v933_v6 }
 0x133   : > { %v868_v36 = vmul.f32 %v2867_v31, %v2867_v31  ;;  %v869_v37 = vmul.f32 %v2869_v32, %v2869_v32 }
 0x134   : > { %v873_v38 = vadd.f32 %v865_v35, %v864_v34  ;;  %v935_v14 = vrot.slane %v914_v12, %v934_v10  ;;  %v939_v15 = vrot.slane %v914_v12, %v938_v11  ;;  %v955_v21 = vrot.slane %v950_v13, %v934_v10 }
 0x135   : > { %v879_v39 = vadd.f32 %v869_v37, %v868_v36  ;;  %v959_v22 = vrot.slane %v950_v13, %v938_v11 }
 0x136   : > { %877 = vadd.xlane.f32.xlu0 %v876_v33  ;;  %874 = vadd.xlane.f32.xlu1 %v873_v38 }
 0x13a   : > { %880 = vadd.xlane.f32.xlu1 %v879_v39 }
 0x1bb   : > { %v872_v40 = vpop.xlane.xlu0 %871 }
 0x1bc   : > { %v882_v41 = vmul.f32 0.003921569, %v872_v40 }
 0x1be   : > { %2158 = vrsqrt.f32 %v882_v41  ;;  %vm888_vm0 = vcmp.eq.f32.partialorder %v882_v41, inf  ;;  %v891_v50 = vand.u32 2147483648, %v882_v41  ;;  %vm890_vm1 = vcmp.eq.f32.partialorder %v882_v41, 0.0 }
 0x1bf   : > { %v875_v42 = vpop.xlane.xlu1 %874  ;;  %v878_v43 = vpop.xlane.xlu0 %877 }
 0x1c0   : > { %v883_v44 = vmul.f32 0.003921569, %v875_v42  ;;  %v884_v45 = vmul.f32 0.003921569, %v878_v43 }
 0x1c2   : > { %2160 = vrsqrt.f32 %v883_v44  ;;  %vm895_vm2 = vcmp.eq.f32.partialorder %v883_v44, inf  ;;  %vm897_vm3 = vcmp.eq.f32.partialorder %v883_v44, 0.0  ;;  %v898_v58 = vand.u32 2147483648, %v883_v44 }
 0x1c3   : > { %2162 = vrsqrt.f32 %v884_v45  ;;  %v881_v46 = vpop.xlane.xlu1 %880  ;;  %vm902_vm4 = vcmp.eq.f32.partialorder %v884_v45, inf  ;;  %v905_v61 = vand.u32 2147483648, %v884_v45  ;;  %vm904_vm5 = vcmp.eq.f32.partialorder %v884_v45, 0.0 }
 0x1c4   : > { %v885_v47 = vmul.f32 0.003921569, %v881_v46 }
 0x1c6   : > { %2164 = vrsqrt.f32 %v885_v47  ;;  %vm909_vm6 = vcmp.eq.f32.partialorder %v885_v47, inf  ;;  %v912_v5 = vand.u32 2147483648, %v885_v47  ;;  %vm911_vm7 = vcmp.eq.f32.partialorder %v885_v47, 0.0 }
 0x1cb   : > { %v2159_v48 = vpop.eup %2158 }
 0x1cc   : > { %v887_v49 = vmul.f32 %v2159_v48, %v882_v41 }
 0x1ce   : > { %v889_v51 = vsel %vm888_vm0, %v882_v41, %v887_v49 }
 0x1cf   : > { %v2161_v52 = vpop.eup %2160  ;;  %v892_v53 = vsel %vm890_vm1, %v891_v50, %v889_v51 }
 0x1d0   : > { %v2163_v54 = vpop.eup %2162  ;;  %v915_v56 = vadd.f32 1e-06, %v892_v53  ;;  %v894_v57 = vmul.f32 %v2161_v52, %v883_v44 }
 0x1d1   : > { %v901_v59 = vmul.f32 %v2163_v54, %v884_v45 }
 0x1d2   : > { %2166 = vrcp.f32 %v915_v56  ;;  %v896_v60 = vsel %vm895_vm2, %v883_v44, %v894_v57 }
 0x1d3   : > { %v2165_v62 = vpop.eup %2164  ;;  %v899_v63 = vsel %vm897_vm3, %v898_v58, %v896_v60  ;;  %v903_v0 = vsel %vm902_vm4, %v884_v45, %v901_v59 }
 0x1d4   : > { %v916_v1 = vadd.f32 1e-06, %v899_v63  ;;  %v906_v2 = vsel %vm904_vm5, %v905_v61, %v903_v0  ;;  %v908_v3 = vmul.f32 %v2165_v62, %v885_v47 }
 0x1d5   : > { %v917_v4 = vadd.f32 1e-06, %v906_v2 }
 0x1d6   : > { %2168 = vrcp.f32 %v916_v1  ;;  %v910_v7 = vsel %vm909_vm6, %v885_v47, %v908_v3 }
 0x1d7   : > { %2170 = vrcp.f32 %v917_v4  ;;  %v913_v8 = vsel %vm911_vm7, %v912_v5, %v910_v7 }
 0x1d8   : > { %v918_v9 = vadd.f32 1e-06, %v913_v8 }
 0x1da   : > { %2172 = vrcp.f32 %v918_v9 }
 0x1df   : > { %v2167_v20 = vpop.eup %2166 }
 0x1e0   : > { %v920_v23 = vmul.f32 %v2167_v20, %v2847_v16  ;;  %v921_v24 = vmul.f32 %v2167_v20, %v2849_v17 }
 0x1e2   : > { %v942_v25 = vmul.f32 %v935_v14, %v920_v23  ;;  %v943_v26 = vmul.f32 %v939_v15, %v921_v24 }
 0x1e3   : > { %v2169_v27 = vpop.eup %2168 }
 0x1e4   : > { %v2171_v30 = vpop.eup %2170  ;;  %v962_v33 = vadd.f32 %v955_v21, %v942_v25  ;;  %v963_v34 = vadd.f32 %v959_v22, %v943_v26  ;;  %v923_v35 = vmul.f32 %v2169_v27, %v2863_v28  ;;  %v924_v36 = vmul.f32 %v2169_v27, %v2865_v29 }
 0x1e5   : > { %v926_v37 = vmul.f32 %v2171_v30, %v2851_v18  ;;  %v927_v38 = vmul.f32 %v2171_v30, %v2853_v19 }
 0x1e6   : > { %970 = vst [vmem:[#allocation2 + $0x30] sm:$0xff] %v962_v33  ;;  %971 = vst [vmem:[#allocation2] sm:$0xff] %v963_v34  ;;  %v944_v39 = vmul.f32 %v935_v14, %v923_v35  ;;  %v945_v16 = vmul.f32 %v939_v15, %v924_v36 }
 0x1e7   : > { %v2173_v40 = vpop.eup %2172  ;;  %v946_v17 = vmul.f32 %v935_v14, %v926_v37  ;;  %v947_v41 = vmul.f32 %v939_v15, %v927_v38 }
 0x1e8   : > { %v964_v42 = vadd.f32 %v955_v21, %v944_v39  ;;  %v965_v43 = vadd.f32 %v959_v22, %v945_v16  ;;  %v929_v44 = vmul.f32 %v2173_v40, %v2867_v31  ;;  %v930_v45 = vmul.f32 %v2173_v40, %v2869_v32 }
 0x1e9   : > { %v966_v28 = vadd.f32 %v955_v21, %v946_v17  ;;  %v967_v46 = vadd.f32 %v959_v22, %v947_v41 }
 0x1ea   : > { %972 = vst [vmem:[#allocation2 + $0x18] sm:$0xff] %v964_v42  ;;  %973 = vst [vmem:[#allocation2 + $0x10] sm:$0xff] %v965_v43  ;;  %v948_v18 = vmul.f32 %v935_v14, %v929_v44  ;;  %v949_v29 = vmul.f32 %v939_v15, %v930_v45 }
 0x1eb   : > { %974 = vst [vmem:[#allocation2 + $0x8] sm:$0xff] %v966_v28  ;;  %975 = vst [vmem:[#allocation2 + $0x20] sm:$0xff] %v967_v46 }
 0x1ec   : > { %v968_v19 = vadd.f32 %v955_v21, %v948_v18  ;;  %v969_v47 = vadd.f32 %v959_v22, %v949_v29 }
 0x1ee   : > { %976 = vst [vmem:[#allocation2 + $0x28] sm:$0xff] %v968_v19  ;;  %977 = vst [vmem:[#allocation2 + $0x38] sm:$0xff] %v969_v47 }
 0x1ef PF: > { %v1177_v31 = vld [vmem:[%s2819_s24 + $0x3c8] sm:$0xff]  ;;  %v1179_v32 = vld [vmem:[%s2819_s24 + $0x3d8] sm:$0xff]  ;;  %v1176_v48 = vld [vmem:[%s2819_s24 + $0x3c0] sm:$0xff]  ;;  %s2117_s12 = sshll.u32 (%p2279_p6), %s2204_s20, 6 }
 0x1f0   : > { %1312 = vmatprep.subr.mxu0 %v1177_v31  ;;  %1401 = vmatprep.subr.mxu1 %v1179_v32  ;;  %v1178_v49 = vld [vmem:[%s2819_s24 + $0x3d0] sm:$0xff]  ;;  %v1169_v50 = vld [vmem:[%s2819_s24 + $0x388] sm:$0xff]  ;;  %v1171_v51 = vld [vmem:[%s2819_s24 + $0x398] sm:$0xff]  ;;  %s3251_s10 = scalar_lea.vmem (%p2279_p6), %s3334_s5, %s2117_s12 }
 0x1f1   : > { %1313 = vmatpush1.msra.mxu0 %v1176_v48  ;;  %1402 = vmatpush1.msra.mxu1 %v1178_v49  ;;  %v1168_v52 = vld [vmem:[%s2819_s24 + $0x380] sm:$0xff]  ;;  %v1170_v53 = vld [vmem:[%s2819_s24 + $0x390] sm:$0xff]  ;;  %v1161_v54 = vld [vmem:[%s2819_s24 + $0x348] sm:$0xff] }
 0x1f2   : > { %1314 = vmatprep.subr.mxu0 %v1169_v50  ;;  %1403 = vmatprep.subr.mxu1 %v1171_v51  ;;  %v1163_v55 = vld [vmem:[%s2819_s24 + $0x358] sm:$0xff]  ;;  %v1160_v56 = vld [vmem:[%s2819_s24 + $0x340] sm:$0xff]  ;;  %v1162_v57 = vld [vmem:[%s2819_s24 + $0x350] sm:$0xff] }
 0x1f3   : > { %1315 = vmatpush1.msra.mxu0 %v1168_v52  ;;  %1404 = vmatpush1.msra.mxu1 %v1170_v53  ;;  %v1153_v58 = vld [vmem:[%s2819_s24 + $0x308] sm:$0xff]  ;;  %v1155_v59 = vld [vmem:[%s2819_s24 + $0x318] sm:$0xff]  ;;  %v1152_v60 = vld [vmem:[%s2819_s24 + $0x300] sm:$0xff] }
 0x1f4   : > { %1316 = vmatprep.subr.mxu0 %v1161_v54  ;;  %1405 = vmatprep.subr.mxu1 %v1163_v55  ;;  %v1154_v61 = vld [vmem:[%s2819_s24 + $0x310] sm:$0xff]  ;;  %v1145_v62 = vld [vmem:[%s2819_s24 + $0x2c8] sm:$0xff]  ;;  %v1147_v63 = vld [vmem:[%s2819_s24 + $0x2d8] sm:$0xff] }
 0x1f5   : > { %1317 = vmatpush1.msra.mxu0 %v1160_v56  ;;  %1406 = vmatpush1.msra.mxu1 %v1162_v57  ;;  %v1144_v0 = vld [vmem:[%s2819_s24 + $0x2c0] sm:$0xff]  ;;  %v1146_v1 = vld [vmem:[%s2819_s24 + $0x2d0] sm:$0xff]  ;;  %v1137_v2 = vld [vmem:[%s2819_s24 + $0x288] sm:$0xff] }
 0x1f6   : > { %1318 = vmatprep.subr.mxu0 %v1153_v58  ;;  %1407 = vmatprep.subr.mxu1 %v1155_v59  ;;  %v1139_v3 = vld [vmem:[%s2819_s24 + $0x298] sm:$0xff]  ;;  %v1136_v4 = vld [vmem:[%s2819_s24 + $0x280] sm:$0xff]  ;;  %v1138_v5 = vld [vmem:[%s2819_s24 + $0x290] sm:$0xff] }
 0x1f7   : > { %1319 = vmatpush1.msra.mxu0 %v1152_v60  ;;  %1408 = vmatpush1.msra.mxu1 %v1154_v61  ;;  %v1129_v6 = vld [vmem:[%s2819_s24 + $0x248] sm:$0xff]  ;;  %v1131_v7 = vld [vmem:[%s2819_s24 + $0x258] sm:$0xff]  ;;  %v1128_v8 = vld [vmem:[%s2819_s24 + $0x240] sm:$0xff] }
 0x1f8   : > { %1320 = vmatprep.subr.mxu0 %v1145_v62  ;;  %1409 = vmatprep.subr.mxu1 %v1147_v63  ;;  %v1130_v9 = vld [vmem:[%s2819_s24 + $0x250] sm:$0xff]  ;;  %v1121_v10 = vld [vmem:[%s2819_s24 + $0x208] sm:$0xff]  ;;  %v1123_v11 = vld [vmem:[%s2819_s24 + $0x218] sm:$0xff] }
 0x1f9   : > { %1321 = vmatpush1.msra.mxu0 %v1144_v0  ;;  %1410 = vmatpush1.msra.mxu1 %v1146_v1  ;;  %v1120_v12 = vld [vmem:[%s2819_s24 + $0x200] sm:$0xff]  ;;  %v1122_v13 = vld [vmem:[%s2819_s24 + $0x210] sm:$0xff]  ;;  %v1113_v14 = vld [vmem:[%s2819_s24 + $0x1c8] sm:$0xff] }
 0x1fa   : > { %1322 = vmatprep.subr.mxu0 %v1137_v2  ;;  %1411 = vmatprep.subr.mxu1 %v1139_v3  ;;  %v1115_v15 = vld [vmem:[%s2819_s24 + $0x1d8] sm:$0xff]  ;;  %v1112_v20 = vld [vmem:[%s2819_s24 + $0x1c0] sm:$0xff]  ;;  %v1114_v21 = vld [vmem:[%s2819_s24 + $0x1d0] sm:$0xff] }
 0x1fb   : > { %1323 = vmatpush1.msra.mxu0 %v1136_v4  ;;  %1412 = vmatpush1.msra.mxu1 %v1138_v5  ;;  %v1105_v22 = vld [vmem:[%s2819_s24 + $0x188] sm:$0xff]  ;;  %v1107_v23 = vld [vmem:[%s2819_s24 + $0x198] sm:$0xff]  ;;  %v1104_v24 = vld [vmem:[%s2819_s24 + $0x180] sm:$0xff] }
 0x1fc   : > { %1324 = vmatprep.subr.mxu0 %v1129_v6  ;;  %1413 = vmatprep.subr.mxu1 %v1131_v7  ;;  %v1106_v25 = vld [vmem:[%s2819_s24 + $0x190] sm:$0xff]  ;;  %v1097_v26 = vld [vmem:[%s2819_s24 + $0x148] sm:$0xff]  ;;  %v1099_v27 = vld [vmem:[%s2819_s24 + $0x158] sm:$0xff] }
 0x1fd   : > { %1325 = vmatpush1.msra.mxu0 %v1128_v8  ;;  %1414 = vmatpush1.msra.mxu1 %v1130_v9  ;;  %v1096_v30 = vld [vmem:[%s2819_s24 + $0x140] sm:$0xff]  ;;  %v1098_v33 = vld [vmem:[%s2819_s24 + $0x150] sm:$0xff]  ;;  %v1089_v34 = vld [vmem:[%s2819_s24 + $0x108] sm:$0xff] }
 0x1fe   : > { %1326 = vmatprep.subr.mxu0 %v1121_v10  ;;  %1415 = vmatprep.subr.mxu1 %v1123_v11  ;;  %v1091_v35 = vld [vmem:[%s2819_s24 + $0x118] sm:$0xff]  ;;  %v1088_v36 = vld [vmem:[%s2819_s24 + $0x100] sm:$0xff]  ;;  %v1090_v37 = vld [vmem:[%s2819_s24 + $0x110] sm:$0xff] }
 0x1ff   : > { %1327 = vmatpush1.msra.mxu0 %v1120_v12  ;;  %1416 = vmatpush1.msra.mxu1 %v1122_v13  ;;  %v1081_v38 = vld [vmem:[%s2819_s24 + $0xc8] sm:$0xff]  ;;  %v1083_v39 = vld [vmem:[%s2819_s24 + $0xd8] sm:$0xff]  ;;  %v1080_v16 = vld [vmem:[%s2819_s24 + $0xc0] sm:$0xff] }
 0x200   : > { %1328 = vmatprep.subr.mxu0 %v1113_v14  ;;  %1417 = vmatprep.subr.mxu1 %v1115_v15  ;;  %v1082_v40 = vld [vmem:[%s2819_s24 + $0xd0] sm:$0xff]  ;;  %v1073_v17 = vld [vmem:[%s2819_s24 + $0x88] sm:$0xff]  ;;  %v1075_v41 = vld [vmem:[%s2819_s24 + $0x98] sm:$0xff] }
 0x201   : > { %1329 = vmatpush1.msra.mxu0 %v1112_v20  ;;  %1418 = vmatpush1.msra.mxu1 %v1114_v21  ;;  %v1072_v42 = vld [vmem:[%s2819_s24 + $0x80] sm:$0xff]  ;;  %v1074_v43 = vld [vmem:[%s2819_s24 + $0x90] sm:$0xff]  ;;  %v1065_v44 = vld [vmem:[%s2819_s24 + $0x48] sm:$0xff] }
 0x202   : > { %1330 = vmatprep.subr.mxu0 %v1105_v22  ;;  %1419 = vmatprep.subr.mxu1 %v1107_v23  ;;  %v1067_v45 = vld [vmem:[%s2819_s24 + $0x58] sm:$0xff]  ;;  %v1064_v28 = vld [vmem:[%s2819_s24 + $0x40] sm:$0xff]  ;;  %v1066_v46 = vld [vmem:[%s2819_s24 + $0x50] sm:$0xff] }
 0x203   : > { %1331 = vmatpush1.msra.mxu0 %v1104_v24  ;;  %1420 = vmatpush1.msra.mxu1 %v1106_v25  ;;  %v1057_v18 = vld [vmem:[%s2819_s24 + $0x8] sm:$0xff]  ;;  %v1059_v29 = vld [vmem:[%s2819_s24 + $0x18] sm:$0xff]  ;;  %v1056_v19 = vld [vmem:[%s2819_s24] sm:$0xff] }
 0x204   : > { %1332 = vmatprep.subr.mxu0 %v1097_v26  ;;  %1421 = vmatprep.subr.mxu1 %v1099_v27  ;;  %v1058_v47 = vld [vmem:[%s2819_s24 + $0x10] sm:$0xff]  ;;  %v1305_v31 = vld [vmem:[%s2819_s24 + $0x7c8] sm:$0xff]  ;;  %v1307_v32 = vld [vmem:[%s2819_s24 + $0x7d8] sm:$0xff] }
 0x205   : > { %1333 = vmatpush1.msra.mxu0 %v1096_v30  ;;  %1422 = vmatpush1.msra.mxu1 %v1098_v33  ;;  %v1304_v48 = vld [vmem:[%s2819_s24 + $0x7c0] sm:$0xff]  ;;  %v1306_v49 = vld [vmem:[%s2819_s24 + $0x7d0] sm:$0xff]  ;;  %v1297_v50 = vld [vmem:[%s2819_s24 + $0x788] sm:$0xff] }
 0x206   : > { %1334 = vmatprep.subr.mxu0 %v1089_v34  ;;  %1423 = vmatprep.subr.mxu1 %v1091_v35  ;;  %v1299_v51 = vld [vmem:[%s2819_s24 + $0x798] sm:$0xff]  ;;  %v1296_v52 = vld [vmem:[%s2819_s24 + $0x780] sm:$0xff]  ;;  %v1298_v53 = vld [vmem:[%s2819_s24 + $0x790] sm:$0xff] }
 0x207   : > { %1335 = vmatpush1.msra.mxu0 %v1088_v36  ;;  %1424 = vmatpush1.msra.mxu1 %v1090_v37  ;;  %v1289_v54 = vld [vmem:[%s2819_s24 + $0x748] sm:$0xff]  ;;  %v1291_v55 = vld [vmem:[%s2819_s24 + $0x758] sm:$0xff]  ;;  %v1288_v56 = vld [vmem:[%s2819_s24 + $0x740] sm:$0xff] }
 0x208   : > { %1336 = vmatprep.subr.mxu0 %v1081_v38  ;;  %1425 = vmatprep.subr.mxu1 %v1083_v39  ;;  %v1290_v57 = vld [vmem:[%s2819_s24 + $0x750] sm:$0xff]  ;;  %v1281_v58 = vld [vmem:[%s2819_s24 + $0x708] sm:$0xff]  ;;  %v1283_v59 = vld [vmem:[%s2819_s24 + $0x718] sm:$0xff] }
 0x209   : > { %1337 = vmatpush1.msra.mxu0 %v1080_v16  ;;  %1426 = vmatpush1.msra.mxu1 %v1082_v40  ;;  %v1280_v60 = vld [vmem:[%s2819_s24 + $0x700] sm:$0xff]  ;;  %v1282_v61 = vld [vmem:[%s2819_s24 + $0x710] sm:$0xff]  ;;  %v1273_v62 = vld [vmem:[%s2819_s24 + $0x6c8] sm:$0xff] }
 0x20a   : > { %1338 = vmatprep.subr.mxu0 %v1073_v17  ;;  %1427 = vmatprep.subr.mxu1 %v1075_v41  ;;  %v1275_v63 = vld [vmem:[%s2819_s24 + $0x6d8] sm:$0xff]  ;;  %v1272_v0 = vld [vmem:[%s2819_s24 + $0x6c0] sm:$0xff]  ;;  %v1274_v1 = vld [vmem:[%s2819_s24 + $0x6d0] sm:$0xff] }
 0x20b   : > { %1339 = vmatpush1.msra.mxu0 %v1072_v42  ;;  %1428 = vmatpush1.msra.mxu1 %v1074_v43  ;;  %v1265_v2 = vld [vmem:[%s2819_s24 + $0x688] sm:$0xff]  ;;  %v1267_v3 = vld [vmem:[%s2819_s24 + $0x698] sm:$0xff]  ;;  %v1264_v4 = vld [vmem:[%s2819_s24 + $0x680] sm:$0xff] }
 0x20c   : > { %1340 = vmatprep.subr.mxu0 %v1065_v44  ;;  %1429 = vmatprep.subr.mxu1 %v1067_v45  ;;  %v1266_v5 = vld [vmem:[%s2819_s24 + $0x690] sm:$0xff]  ;;  %v1257_v6 = vld [vmem:[%s2819_s24 + $0x648] sm:$0xff]  ;;  %v1259_v7 = vld [vmem:[%s2819_s24 + $0x658] sm:$0xff] }
 0x20d   : > { %1341 = vmatpush1.msra.mxu0 %v1064_v28  ;;  %1430 = vmatpush1.msra.mxu1 %v1066_v46  ;;  %v1256_v8 = vld [vmem:[%s2819_s24 + $0x640] sm:$0xff]  ;;  %v1258_v9 = vld [vmem:[%s2819_s24 + $0x650] sm:$0xff]  ;;  %v1249_v10 = vld [vmem:[%s2819_s24 + $0x608] sm:$0xff] }
 0x20e   : > { %1342 = vmatprep.subr.mxu0 %v1057_v18  ;;  %1431 = vmatprep.subr.mxu1 %v1059_v29  ;;  %v1251_v11 = vld [vmem:[%s2819_s24 + $0x618] sm:$0xff]  ;;  %v1248_v12 = vld [vmem:[%s2819_s24 + $0x600] sm:$0xff]  ;;  %v1250_v13 = vld [vmem:[%s2819_s24 + $0x610] sm:$0xff] }
 0x20f   : > { %1343 = vmatpush1.msra.mxu0 %v1056_v19  ;;  %1432 = vmatpush1.msra.mxu1 %v1058_v47  ;;  %v1241_v14 = vld [vmem:[%s2819_s24 + $0x5c8] sm:$0xff]  ;;  %v1243_v15 = vld [vmem:[%s2819_s24 + $0x5d8] sm:$0xff]  ;;  %v1240_v20 = vld [vmem:[%s2819_s24 + $0x5c0] sm:$0xff] }
 0x210   : > { %1344 = vmatprep.subr.mxu0 %v1305_v31  ;;  %1433 = vmatprep.subr.mxu1 %v1307_v32  ;;  %v1242_v21 = vld [vmem:[%s2819_s24 + $0x5d0] sm:$0xff]  ;;  %v1233_v22 = vld [vmem:[%s2819_s24 + $0x588] sm:$0xff]  ;;  %v1235_v23 = vld [vmem:[%s2819_s24 + $0x598] sm:$0xff] }
 0x211   : > { %1345 = vmatpush2.msra.mxu0 %v1304_v48  ;;  %1434 = vmatpush2.msra.mxu1 %v1306_v49  ;;  %v1232_v24 = vld [vmem:[%s2819_s24 + $0x580] sm:$0xff]  ;;  %v1234_v25 = vld [vmem:[%s2819_s24 + $0x590] sm:$0xff]  ;;  %v1225_v26 = vld [vmem:[%s2819_s24 + $0x548] sm:$0xff] }
 0x212   : > { %1346 = vmatprep.subr.mxu0 %v1297_v50  ;;  %1435 = vmatprep.subr.mxu1 %v1299_v51  ;;  %v1227_v27 = vld [vmem:[%s2819_s24 + $0x558] sm:$0xff]  ;;  %v1224_v30 = vld [vmem:[%s2819_s24 + $0x540] sm:$0xff]  ;;  %v1226_v33 = vld [vmem:[%s2819_s24 + $0x550] sm:$0xff] }
 0x213   : > { %1347 = vmatpush2.msra.mxu0 %v1296_v52  ;;  %1436 = vmatpush2.msra.mxu1 %v1298_v53  ;;  %v1217_v34 = vld [vmem:[%s2819_s24 + $0x508] sm:$0xff]  ;;  %v1219_v35 = vld [vmem:[%s2819_s24 + $0x518] sm:$0xff]  ;;  %v1216_v36 = vld [vmem:[%s2819_s24 + $0x500] sm:$0xff] }
 0x214   : > { %1348 = vmatprep.subr.mxu0 %v1289_v54  ;;  %1437 = vmatprep.subr.mxu1 %v1291_v55  ;;  %v1218_v37 = vld [vmem:[%s2819_s24 + $0x510] sm:$0xff]  ;;  %v1209_v38 = vld [vmem:[%s2819_s24 + $0x4c8] sm:$0xff]  ;;  %v1211_v39 = vld [vmem:[%s2819_s24 + $0x4d8] sm:$0xff] }
 0x215   : > { %1349 = vmatpush2.msra.mxu0 %v1288_v56  ;;  %1438 = vmatpush2.msra.mxu1 %v1290_v57  ;;  %v1208_v16 = vld [vmem:[%s2819_s24 + $0x4c0] sm:$0xff]  ;;  %v1210_v40 = vld [vmem:[%s2819_s24 + $0x4d0] sm:$0xff]  ;;  %v1201_v17 = vld [vmem:[%s2819_s24 + $0x488] sm:$0xff] }
 0x216   : > { %1350 = vmatprep.subr.mxu0 %v1281_v58  ;;  %1439 = vmatprep.subr.mxu1 %v1283_v59  ;;  %v1203_v41 = vld [vmem:[%s2819_s24 + $0x498] sm:$0xff]  ;;  %v1200_v42 = vld [vmem:[%s2819_s24 + $0x480] sm:$0xff]  ;;  %v1202_v43 = vld [vmem:[%s2819_s24 + $0x490] sm:$0xff] }
 0x217   : > { %1351 = vmatpush2.msra.mxu0 %v1280_v60  ;;  %1440 = vmatpush2.msra.mxu1 %v1282_v61  ;;  %v1193_v44 = vld [vmem:[%s2819_s24 + $0x448] sm:$0xff]  ;;  %v1195_v45 = vld [vmem:[%s2819_s24 + $0x458] sm:$0xff]  ;;  %v1192_v28 = vld [vmem:[%s2819_s24 + $0x440] sm:$0xff] }
 0x218   : > { %1352 = vmatprep.subr.mxu0 %v1273_v62  ;;  %1441 = vmatprep.subr.mxu1 %v1275_v63  ;;  %v1194_v46 = vld [vmem:[%s2819_s24 + $0x450] sm:$0xff]  ;;  %v1185_v18 = vld [vmem:[%s2819_s24 + $0x408] sm:$0xff]  ;;  %v1187_v29 = vld [vmem:[%s2819_s24 + $0x418] sm:$0xff] }
 0x219   : > { %1353 = vmatpush2.msra.mxu0 %v1272_v0  ;;  %1442 = vmatpush2.msra.mxu1 %v1274_v1  ;;  %v1184_v19 = vld [vmem:[%s2819_s24 + $0x400] sm:$0xff]  ;;  %v1186_v31 = vld [vmem:[%s2819_s24 + $0x410] sm:$0xff]  ;;  %v1181_v48 = vld [vmem:[%s2819_s24 + $0x3e8] sm:$0xff] }
 0x21a   : > { %1354 = vmatprep.subr.mxu0 %v1265_v2  ;;  %1443 = vmatprep.subr.mxu1 %v1267_v3  ;;  %v3020_v47 = vld [vmem:[#allocation2] sm:$0xff]  ;;  %v3023_v32 = vld [vmem:[#allocation2 + $0x30] sm:$0xff]  ;;  %v1183_v49 = vld [vmem:[%s2819_s24 + $0x3f8] sm:$0xff] }
 0x21b   : > { %1355 = vmatpush2.msra.mxu0 %v1264_v4  ;;  %1444 = vmatpush2.msra.mxu1 %v1266_v5  ;;  %v1180_v50 = vld [vmem:[%s2819_s24 + $0x3e0] sm:$0xff]  ;;  %v1182_v51 = vld [vmem:[%s2819_s24 + $0x3f0] sm:$0xff]  ;;  %v1173_v52 = vld [vmem:[%s2819_s24 + $0x3a8] sm:$0xff] }
 0x21c   : > { %1356 = vmatprep.subr.mxu0 %v1257_v6  ;;  %1445 = vmatprep.subr.mxu1 %v1259_v7  ;;  %v1175_v53 = vld [vmem:[%s2819_s24 + $0x3b8] sm:$0xff]  ;;  %v1172_v54 = vld [vmem:[%s2819_s24 + $0x3a0] sm:$0xff]  ;;  %v1174_v55 = vld [vmem:[%s2819_s24 + $0x3b0] sm:$0xff] }
 0x21d   : > { %1357 = vmatpush2.msra.mxu0 %v1256_v8  ;;  %1446 = vmatpush2.msra.mxu1 %v1258_v9  ;;  %v1165_v56 = vld [vmem:[%s2819_s24 + $0x368] sm:$0xff]  ;;  %v1167_v57 = vld [vmem:[%s2819_s24 + $0x378] sm:$0xff]  ;;  %v1164_v58 = vld [vmem:[%s2819_s24 + $0x360] sm:$0xff] }
 0x21e   : > { %1358 = vmatprep.subr.mxu0 %v1249_v10  ;;  %1447 = vmatprep.subr.mxu1 %v1251_v11  ;;  %v1166_v59 = vld [vmem:[%s2819_s24 + $0x370] sm:$0xff]  ;;  %v1157_v60 = vld [vmem:[%s2819_s24 + $0x328] sm:$0xff]  ;;  %v1159_v61 = vld [vmem:[%s2819_s24 + $0x338] sm:$0xff] }
 0x21f   : > { %1359 = vmatpush2.msra.mxu0 %v1248_v12  ;;  %1448 = vmatpush2.msra.mxu1 %v1250_v13  ;;  %v1156_v62 = vld [vmem:[%s2819_s24 + $0x320] sm:$0xff]  ;;  %v1158_v63 = vld [vmem:[%s2819_s24 + $0x330] sm:$0xff]  ;;  %v1149_v0 = vld [vmem:[%s2819_s24 + $0x2e8] sm:$0xff] }
 0x220   : > { %1360 = vmatprep.subr.mxu0 %v1241_v14  ;;  %1449 = vmatprep.subr.mxu1 %v1243_v15  ;;  %v1151_v1 = vld [vmem:[%s2819_s24 + $0x2f8] sm:$0xff]  ;;  %v1148_v2 = vld [vmem:[%s2819_s24 + $0x2e0] sm:$0xff]  ;;  %v1150_v3 = vld [vmem:[%s2819_s24 + $0x2f0] sm:$0xff] }
 0x221   : > { %1361 = vmatpush2.msra.mxu0 %v1240_v20  ;;  %1450 = vmatpush2.msra.mxu1 %v1242_v21  ;;  %v1141_v4 = vld [vmem:[%s2819_s24 + $0x2a8] sm:$0xff]  ;;  %v1143_v5 = vld [vmem:[%s2819_s24 + $0x2b8] sm:$0xff]  ;;  %v1140_v6 = vld [vmem:[%s2819_s24 + $0x2a0] sm:$0xff] }
 0x222   : > { %1362 = vmatprep.subr.mxu0 %v1233_v22  ;;  %1451 = vmatprep.subr.mxu1 %v1235_v23  ;;  %v1142_v7 = vld [vmem:[%s2819_s24 + $0x2b0] sm:$0xff]  ;;  %v1133_v8 = vld [vmem:[%s2819_s24 + $0x268] sm:$0xff]  ;;  %v1135_v9 = vld [vmem:[%s2819_s24 + $0x278] sm:$0xff] }
 0x223   : > { %1363 = vmatpush2.msra.mxu0 %v1232_v24  ;;  %1452 = vmatpush2.msra.mxu1 %v1234_v25  ;;  %v1132_v10 = vld [vmem:[%s2819_s24 + $0x260] sm:$0xff]  ;;  %v1134_v11 = vld [vmem:[%s2819_s24 + $0x270] sm:$0xff]  ;;  %v1125_v12 = vld [vmem:[%s2819_s24 + $0x228] sm:$0xff] }
 0x224   : > { %1364 = vmatprep.subr.mxu0 %v1225_v26  ;;  %1453 = vmatprep.subr.mxu1 %v1227_v27  ;;  %v1127_v13 = vld [vmem:[%s2819_s24 + $0x238] sm:$0xff]  ;;  %v1124_v14 = vld [vmem:[%s2819_s24 + $0x220] sm:$0xff]  ;;  %v1126_v15 = vld [vmem:[%s2819_s24 + $0x230] sm:$0xff] }
 0x225   : > { %1365 = vmatpush2.msra.mxu0 %v1224_v30  ;;  %1454 = vmatpush2.msra.mxu1 %v1226_v33  ;;  %v1117_v20 = vld [vmem:[%s2819_s24 + $0x1e8] sm:$0xff]  ;;  %v1119_v21 = vld [vmem:[%s2819_s24 + $0x1f8] sm:$0xff]  ;;  %v1116_v22 = vld [vmem:[%s2819_s24 + $0x1e0] sm:$0xff] }
 0x226   : > { %1366 = vmatprep.subr.mxu0 %v1217_v34  ;;  %1455 = vmatprep.subr.mxu1 %v1219_v35  ;;  %v1118_v23 = vld [vmem:[%s2819_s24 + $0x1f0] sm:$0xff]  ;;  %v1109_v24 = vld [vmem:[%s2819_s24 + $0x1a8] sm:$0xff]  ;;  %v1111_v25 = vld [vmem:[%s2819_s24 + $0x1b8] sm:$0xff] }
 0x227   : > { %1367 = vmatpush2.msra.mxu0 %v1216_v36  ;;  %1456 = vmatpush2.msra.mxu1 %v1218_v37  ;;  %v1108_v26 = vld [vmem:[%s2819_s24 + $0x1a0] sm:$0xff]  ;;  %v1110_v27 = vld [vmem:[%s2819_s24 + $0x1b0] sm:$0xff]  ;;  %v1101_v30 = vld [vmem:[%s2819_s24 + $0x168] sm:$0xff] }
 0x228   : > { %1368 = vmatprep.subr.mxu0 %v1209_v38  ;;  %1457 = vmatprep.subr.mxu1 %v1211_v39  ;;  %v1103_v33 = vld [vmem:[%s2819_s24 + $0x178] sm:$0xff]  ;;  %v1100_v34 = vld [vmem:[%s2819_s24 + $0x160] sm:$0xff]  ;;  %v1102_v35 = vld [vmem:[%s2819_s24 + $0x170] sm:$0xff] }
 0x229   : > { %1369 = vmatpush2.msra.mxu0 %v1208_v16  ;;  %1458 = vmatpush2.msra.mxu1 %v1210_v40  ;;  %v1093_v36 = vld [vmem:[%s2819_s24 + $0x128] sm:$0xff]  ;;  %v1095_v37 = vld [vmem:[%s2819_s24 + $0x138] sm:$0xff]  ;;  %v1092_v38 = vld [vmem:[%s2819_s24 + $0x120] sm:$0xff] }
 0x22a   : > { %1370 = vmatprep.subr.mxu0 %v1201_v17  ;;  %1459 = vmatprep.subr.mxu1 %v1203_v41  ;;  %v1094_v39 = vld [vmem:[%s2819_s24 + $0x130] sm:$0xff]  ;;  %v1085_v16 = vld [vmem:[%s2819_s24 + $0xe8] sm:$0xff]  ;;  %v1087_v40 = vld [vmem:[%s2819_s24 + $0xf8] sm:$0xff] }
 0x22b   : > { %1371 = vmatpush2.msra.mxu0 %v1200_v42  ;;  %1460 = vmatpush2.msra.mxu1 %v1202_v43  ;;  %v1084_v17 = vld [vmem:[%s2819_s24 + $0xe0] sm:$0xff]  ;;  %v1086_v41 = vld [vmem:[%s2819_s24 + $0xf0] sm:$0xff]  ;;  %v1077_v42 = vld [vmem:[%s2819_s24 + $0xa8] sm:$0xff] }
 0x22c   : > { %1372 = vmatprep.subr.mxu0 %v1193_v44  ;;  %1461 = vmatprep.subr.mxu1 %v1195_v45  ;;  %v1079_v43 = vld [vmem:[%s2819_s24 + $0xb8] sm:$0xff]  ;;  %v1076_v44 = vld [vmem:[%s2819_s24 + $0xa0] sm:$0xff]  ;;  %v1078_v45 = vld [vmem:[%s2819_s24 + $0xb0] sm:$0xff] }
 0x22d   : > { %1373 = vmatpush2.msra.mxu0 %v1192_v28  ;;  %1462 = vmatpush2.msra.mxu1 %v1194_v46  ;;  %v1069_v28 = vld [vmem:[%s2819_s24 + $0x68] sm:$0xff]  ;;  %v1071_v46 = vld [vmem:[%s2819_s24 + $0x78] sm:$0xff] }
 0x22e   : > { %1374 = vmatprep.subr.mxu0 %v1185_v18  ;;  %1463 = vmatprep.subr.mxu1 %v1187_v29  ;;  %v1068_v18 = vld [vmem:[%s2819_s24 + $0x60] sm:$0xff]  ;;  %v1070_v29 = vld [vmem:[%s2819_s24 + $0x70] sm:$0xff] }
 0x22f   : > { %1375 = vmatpush2.msra.mxu0 %v1184_v19  ;;  %1376 = vmatprep.mubr.f32.mxu0 %v3020_v47  ;;  %v1061_v19 = vld [vmem:[%s2819_s24 + $0x28] sm:$0xff] }
 0x230   : > { %1464 = vmatpush2.msra.mxu1 %v1186_v31  ;;  %1465 = vmatprep.mubr.f32.mxu1 %v3020_v47  ;;  %v1063_v31 = vld [vmem:[%s2819_s24 + $0x38] sm:$0xff] }
 0x231   : > { %1377 = vmatmul.mubr.f32.vlgmr.msra.gmra.mxu0 %v3023_v32  ;;  %1466 = vmatmul.mubr.f32.vlgmr.msra.gmra.mxu1 %v3023_v32 }
 0x232   : > { %1490 = vmatprep.subr.mxu0 %v1181_v48  ;;  %1579 = vmatprep.subr.mxu1 %v1183_v49  ;;  %v1060_v48 = vld [vmem:[%s2819_s24 + $0x20] sm:$0xff]  ;;  %v1062_v49 = vld [vmem:[%s2819_s24 + $0x30] sm:$0xff] }
 0x233   : > { %1491 = vmatpush1.msra.mxu0 %v1180_v50  ;;  %1580 = vmatpush1.msra.mxu1 %v1182_v51  ;;  %v1309_v50 = vld [vmem:[%s2819_s24 + $0x7e8] sm:$0xff]  ;;  %v1311_v51 = vld [vmem:[%s2819_s24 + $0x7f8] sm:$0xff] }
 0x234   : > { %1492 = vmatprep.subr.mxu0 %v1173_v52  ;;  %1581 = vmatprep.subr.mxu1 %v1175_v53  ;;  %v1308_v52 = vld [vmem:[%s2819_s24 + $0x7e0] sm:$0xff]  ;;  %v1310_v53 = vld [vmem:[%s2819_s24 + $0x7f0] sm:$0xff] }
 0x235   : > { %1493 = vmatpush1.msra.mxu0 %v1172_v54  ;;  %1582 = vmatpush1.msra.mxu1 %v1174_v55  ;;  %v1301_v54 = vld [vmem:[%s2819_s24 + $0x7a8] sm:$0xff]  ;;  %v1303_v55 = vld [vmem:[%s2819_s24 + $0x7b8] sm:$0xff] }
 0x236   : > { %1494 = vmatprep.subr.mxu0 %v1165_v56  ;;  %1583 = vmatprep.subr.mxu1 %v1167_v57  ;;  %v1300_v56 = vld [vmem:[%s2819_s24 + $0x7a0] sm:$0xff]  ;;  %v1302_v57 = vld [vmem:[%s2819_s24 + $0x7b0] sm:$0xff] }
 0x237   : > { %1495 = vmatpush1.msra.mxu0 %v1164_v58  ;;  %1584 = vmatpush1.msra.mxu1 %v1166_v59  ;;  %v1293_v58 = vld [vmem:[%s2819_s24 + $0x768] sm:$0xff]  ;;  %v1295_v59 = vld [vmem:[%s2819_s24 + $0x778] sm:$0xff] }
 0x238   : > { %1496 = vmatprep.subr.mxu0 %v1157_v60  ;;  %1585 = vmatprep.subr.mxu1 %v1159_v61  ;;  %v1292_v60 = vld [vmem:[%s2819_s24 + $0x760] sm:$0xff]  ;;  %v1294_v61 = vld [vmem:[%s2819_s24 + $0x770] sm:$0xff] }
 0x239   : > { %1497 = vmatpush1.msra.mxu0 %v1156_v62  ;;  %1586 = vmatpush1.msra.mxu1 %v1158_v63  ;;  %v1285_v62 = vld [vmem:[%s2819_s24 + $0x728] sm:$0xff]  ;;  %v1287_v63 = vld [vmem:[%s2819_s24 + $0x738] sm:$0xff] }
 0x23a   : > { %1498 = vmatprep.subr.mxu0 %v1149_v0  ;;  %1587 = vmatprep.subr.mxu1 %v1151_v1  ;;  %v1284_v0 = vld [vmem:[%s2819_s24 + $0x720] sm:$0xff]  ;;  %v1286_v1 = vld [vmem:[%s2819_s24 + $0x730] sm:$0xff] }
 0x23b   : > { %1499 = vmatpush1.msra.mxu0 %v1148_v2  ;;  %1588 = vmatpush1.msra.mxu1 %v1150_v3  ;;  %v1277_v2 = vld [vmem:[%s2819_s24 + $0x6e8] sm:$0xff]  ;;  %v1279_v3 = vld [vmem:[%s2819_s24 + $0x6f8] sm:$0xff] }
 0x23c   : > { %1500 = vmatprep.subr.mxu0 %v1141_v4  ;;  %1589 = vmatprep.subr.mxu1 %v1143_v5  ;;  %v1276_v4 = vld [vmem:[%s2819_s24 + $0x6e0] sm:$0xff]  ;;  %v1278_v5 = vld [vmem:[%s2819_s24 + $0x6f0] sm:$0xff] }
 0x23d   : > { %1501 = vmatpush1.msra.mxu0 %v1140_v6  ;;  %1590 = vmatpush1.msra.mxu1 %v1142_v7  ;;  %v1269_v6 = vld [vmem:[%s2819_s24 + $0x6a8] sm:$0xff]  ;;  %v1271_v7 = vld [vmem:[%s2819_s24 + $0x6b8] sm:$0xff] }
 0x23e   : > { %1502 = vmatprep.subr.mxu0 %v1133_v8  ;;  %1591 = vmatprep.subr.mxu1 %v1135_v9  ;;  %v1268_v8 = vld [vmem:[%s2819_s24 + $0x6a0] sm:$0xff]  ;;  %v1270_v9 = vld [vmem:[%s2819_s24 + $0x6b0] sm:$0xff] }
 0x23f   : > { %1503 = vmatpush1.msra.mxu0 %v1132_v10  ;;  %1592 = vmatpush1.msra.mxu1 %v1134_v11  ;;  %v1261_v10 = vld [vmem:[%s2819_s24 + $0x668] sm:$0xff]  ;;  %v1263_v11 = vld [vmem:[%s2819_s24 + $0x678] sm:$0xff] }
 0x240   : > { %1504 = vmatprep.subr.mxu0 %v1125_v12  ;;  %1593 = vmatprep.subr.mxu1 %v1127_v13  ;;  %v1260_v12 = vld [vmem:[%s2819_s24 + $0x660] sm:$0xff]  ;;  %v1262_v13 = vld [vmem:[%s2819_s24 + $0x670] sm:$0xff] }
 0x241   : > { %1505 = vmatpush1.msra.mxu0 %v1124_v14  ;;  %1594 = vmatpush1.msra.mxu1 %v1126_v15  ;;  %v1253_v14 = vld [vmem:[%s2819_s24 + $0x628] sm:$0xff]  ;;  %v1255_v15 = vld [vmem:[%s2819_s24 + $0x638] sm:$0xff] }
 0x242   : > { %1506 = vmatprep.subr.mxu0 %v1117_v20  ;;  %1595 = vmatprep.subr.mxu1 %v1119_v21  ;;  %v1252_v20 = vld [vmem:[%s2819_s24 + $0x620] sm:$0xff]  ;;  %v1254_v21 = vld [vmem:[%s2819_s24 + $0x630] sm:$0xff] }
 0x243   : > { %1507 = vmatpush1.msra.mxu0 %v1116_v22  ;;  %1596 = vmatpush1.msra.mxu1 %v1118_v23  ;;  %v1245_v22 = vld [vmem:[%s2819_s24 + $0x5e8] sm:$0xff]  ;;  %v1247_v23 = vld [vmem:[%s2819_s24 + $0x5f8] sm:$0xff] }
 0x244   : > { %1508 = vmatprep.subr.mxu0 %v1109_v24  ;;  %1597 = vmatprep.subr.mxu1 %v1111_v25  ;;  %v3127_v24 = vld [vmem:[#allocation2 + $0x10] sm:$0xff]  ;;  %v1244_v25 = vld [vmem:[%s2819_s24 + $0x5e0] sm:$0xff] }
 0x245   : > { %1509 = vmatpush1.msra.mxu0 %v1108_v26  ;;  %1598 = vmatpush1.msra.mxu1 %v1110_v27  ;;  %v1246_v26 = vld [vmem:[%s2819_s24 + $0x5f0] sm:$0xff]  ;;  %v3131_v27 = vld [vmem:[#allocation2 + $0x18] sm:$0xff] }
 0x246   : > { %1510 = vmatprep.subr.mxu0 %v1101_v30  ;;  %1599 = vmatprep.subr.mxu1 %v1103_v33  ;;  %v1237_v30 = vld [vmem:[%s2819_s24 + $0x5a8] sm:$0xff]  ;;  %v1239_v33 = vld [vmem:[%s2819_s24 + $0x5b8] sm:$0xff] }
 0x247   : > { %1511 = vmatpush1.msra.mxu0 %v1100_v34  ;;  %1600 = vmatpush1.msra.mxu1 %v1102_v35  ;;  %v1236_v34 = vld [vmem:[%s2819_s24 + $0x5a0] sm:$0xff]  ;;  %v1238_v35 = vld [vmem:[%s2819_s24 + $0x5b0] sm:$0xff] }
 0x248   : > { %1512 = vmatprep.subr.mxu0 %v1093_v36  ;;  %1601 = vmatprep.subr.mxu1 %v1095_v37  ;;  %v1229_v36 = vld [vmem:[%s2819_s24 + $0x568] sm:$0xff]  ;;  %v1231_v37 = vld [vmem:[%s2819_s24 + $0x578] sm:$0xff] }
 0x249   : > { %1513 = vmatpush1.msra.mxu0 %v1092_v38  ;;  %1602 = vmatpush1.msra.mxu1 %v1094_v39  ;;  %v3143_v38 = vld [vmem:[#allocation2 + $0x20] sm:$0xff] }
 0x24a   : > { %1514 = vmatprep.subr.mxu0 %v1085_v16  ;;  %1603 = vmatprep.subr.mxu1 %v1087_v40  ;;  %v1228_v39 = vld [vmem:[%s2819_s24 + $0x560] sm:$0xff]  ;;  %v1230_v16 = vld [vmem:[%s2819_s24 + $0x570] sm:$0xff]  ;;  %v3147_v40 = vld [vmem:[#allocation2 + $0x8] sm:$0xff] }
 0x24b   : > { %1515 = vmatpush1.msra.mxu0 %v1084_v17  ;;  %1604 = vmatpush1.msra.mxu1 %v1086_v41  ;;  %v1221_v17 = vld [vmem:[%s2819_s24 + $0x528] sm:$0xff]  ;;  %v1223_v41 = vld [vmem:[%s2819_s24 + $0x538] sm:$0xff] }
 0x24c   : > { %1516 = vmatprep.subr.mxu0 %v1077_v42  ;;  %1605 = vmatprep.subr.mxu1 %v1079_v43  ;;  %v1220_v42 = vld [vmem:[%s2819_s24 + $0x520] sm:$0xff]  ;;  %v1222_v43 = vld [vmem:[%s2819_s24 + $0x530] sm:$0xff] }
 0x24d   : > { %1517 = vmatpush1.msra.mxu0 %v1076_v44  ;;  %1606 = vmatpush1.msra.mxu1 %v1078_v45  ;;  %v1213_v44 = vld [vmem:[%s2819_s24 + $0x4e8] sm:$0xff]  ;;  %v1215_v45 = vld [vmem:[%s2819_s24 + $0x4f8] sm:$0xff] }
 0x24e   : > { %1518 = vmatprep.subr.mxu0 %v1069_v28  ;;  %1607 = vmatprep.subr.mxu1 %v1071_v46  ;;  %v1055_v28 = vld [vmem:[#allocation2 + $0x38] sm:$0xff]  ;;  %v1212_v46 = vld [vmem:[%s2819_s24 + $0x4e0] sm:$0xff] }
 0x24f   : > { %1519 = vmatpush1.msra.mxu0 %v1068_v18  ;;  %1608 = vmatpush1.msra.mxu1 %v1070_v29  ;;  %v1214_v18 = vld [vmem:[%s2819_s24 + $0x4f0] sm:$0xff]  ;;  %v1054_v29 = vld [vmem:[#allocation2 + $0x28] sm:$0xff] }
 0x250   : > { %1520 = vmatprep.subr.mxu0 %v1061_v19  ;;  %1609 = vmatprep.subr.mxu1 %v1063_v31  ;;  %v1205_v19 = vld [vmem:[%s2819_s24 + $0x4a8] sm:$0xff]  ;;  %v1207_v31 = vld [vmem:[%s2819_s24 + $0x4b8] sm:$0xff] }
 0x251   : > { %1521 = vmatpush1.msra.mxu0 %v1060_v48  ;;  %1610 = vmatpush1.msra.mxu1 %v1062_v49  ;;  %v1204_v48 = vld [vmem:[%s2819_s24 + $0x4a0] sm:$0xff]  ;;  %v1206_v49 = vld [vmem:[%s2819_s24 + $0x4b0] sm:$0xff] }
 0x252   : > { %1522 = vmatprep.subr.mxu0 %v1309_v50  ;;  %1611 = vmatprep.subr.mxu1 %v1311_v51  ;;  %v1197_v50 = vld [vmem:[%s2819_s24 + $0x468] sm:$0xff]  ;;  %v1199_v51 = vld [vmem:[%s2819_s24 + $0x478] sm:$0xff] }
 0x253   : > { %1523 = vmatpush2.msra.mxu0 %v1308_v52  ;;  %1612 = vmatpush2.msra.mxu1 %v1310_v53  ;;  %v1196_v52 = vld [vmem:[%s2819_s24 + $0x460] sm:$0xff]  ;;  %v1198_v53 = vld [vmem:[%s2819_s24 + $0x470] sm:$0xff] }
 0x254   : > { %1524 = vmatprep.subr.mxu0 %v1301_v54  ;;  %1613 = vmatprep.subr.mxu1 %v1303_v55  ;;  %v1189_v54 = vld [vmem:[%s2819_s24 + $0x428] sm:$0xff]  ;;  %v1191_v55 = vld [vmem:[%s2819_s24 + $0x438] sm:$0xff] }
 0x255   : > { %1525 = vmatpush2.msra.mxu0 %v1300_v56  ;;  %1614 = vmatpush2.msra.mxu1 %v1302_v57  ;;  %v1188_v56 = vld [vmem:[%s2819_s24 + $0x420] sm:$0xff]  ;;  %v1190_v57 = vld [vmem:[%s2819_s24 + $0x430] sm:$0xff] }
 0x256   : > { %1526 = vmatprep.subr.mxu0 %v1293_v58  ;;  %1615 = vmatprep.subr.mxu1 %v1295_v59 }
 0x257   : > { %1527 = vmatpush2.msra.mxu0 %v1292_v60  ;;  %1616 = vmatpush2.msra.mxu1 %v1294_v61  ;;  %v3194_v60 = vld [vmem:[%s819_s17] sm:$0xff] }
 0x258   : > { %1528 = vmatprep.subr.mxu0 %v1285_v62  ;;  %1617 = vmatprep.subr.mxu1 %v1287_v63 }
 0x259   : > { %1529 = vmatpush2.msra.mxu0 %v1284_v0  ;;  %1618 = vmatpush2.msra.mxu1 %v1286_v1 }
 0x25a   : > { %1530 = vmatprep.subr.mxu0 %v1277_v2  ;;  %1619 = vmatprep.subr.mxu1 %v1279_v3 }
 0x25b   : > { %1531 = vmatpush2.msra.mxu0 %v1276_v4  ;;  %1620 = vmatpush2.msra.mxu1 %v1278_v5 }
 0x25c   : > { %1532 = vmatprep.subr.mxu0 %v1269_v6  ;;  %1621 = vmatprep.subr.mxu1 %v1271_v7 }
 0x25d   : > { %1533 = vmatpush2.msra.mxu0 %v1268_v8  ;;  %1622 = vmatpush2.msra.mxu1 %v1270_v9 }
 0x25e   : > { %1534 = vmatprep.subr.mxu0 %v1261_v10  ;;  %1623 = vmatprep.subr.mxu1 %v1263_v11 }
 0x25f   : > { %1535 = vmatpush2.msra.mxu0 %v1260_v12  ;;  %1624 = vmatpush2.msra.mxu1 %v1262_v13 }
 0x260   : > { %1536 = vmatprep.subr.mxu0 %v1253_v14  ;;  %1625 = vmatprep.subr.mxu1 %v1255_v15 }
 0x261   : > { %1537 = vmatpush2.msra.mxu0 %v1252_v20  ;;  %1626 = vmatpush2.msra.mxu1 %v1254_v21 }
 0x262   : > { %1538 = vmatprep.subr.mxu0 %v1245_v22  ;;  %1627 = vmatprep.subr.mxu1 %v1247_v23 }
 0x263   : > { %1382 = vmatprep.mubr.f32.mxu0 %v3127_v24  ;;  %1471 = vmatprep.mubr.f32.mxu1 %v3127_v24 }
 0x264   : > { %1539 = vmatpush2.msra.mxu0 %v1244_v25  ;;  %1628 = vmatpush2.msra.mxu1 %v1246_v26 }
 0x265   : > { %1383 = vmatmul.mubr.f32.gmra.mxu0 %v3131_v27  ;;  %1472 = vmatmul.mubr.f32.gmra.mxu1 %v3131_v27 }
 0x266   : > { %1540 = vmatprep.subr.mxu0 %v1237_v30  ;;  %1629 = vmatprep.subr.mxu1 %v1239_v33 }
 0x267   : > { %1541 = vmatpush2.msra.mxu0 %v1236_v34  ;;  %1630 = vmatpush2.msra.mxu1 %v1238_v35 }
 0x268   : > { %1542 = vmatprep.subr.mxu0 %v1229_v36  ;;  %1631 = vmatprep.subr.mxu1 %v1231_v37 }
 0x269   : > { %1388 = vmatprep.mubr.f32.mxu0 %v3143_v38  ;;  %1477 = vmatprep.mubr.f32.mxu1 %v3143_v38 }
 0x26a   : > { %1543 = vmatpush2.msra.mxu0 %v1228_v39  ;;  %1632 = vmatpush2.msra.mxu1 %v1230_v16 }
 0x26b   : > { %1389 = vmatmul.mubr.f32.gmra.mxu0 %v3147_v40  ;;  %1478 = vmatmul.mubr.f32.gmra.mxu1 %v3147_v40 }
 0x26c   : > { %1544 = vmatprep.subr.mxu0 %v1221_v17  ;;  %1633 = vmatprep.subr.mxu1 %v1223_v41 }
 0x26d   : > { %1545 = vmatpush2.msra.mxu0 %v1220_v42  ;;  %1634 = vmatpush2.msra.mxu1 %v1222_v43 }
 0x26e   : > { %1546 = vmatprep.subr.mxu0 %v1213_v44  ;;  %1635 = vmatprep.subr.mxu1 %v1215_v45 }
 0x26f   : > { %1394 = vmatprep.mubr.f32.mxu0 %v1055_v28  ;;  %1483 = vmatprep.mubr.f32.mxu1 %v1055_v28 }
 0x270   : > { %1547 = vmatpush2.msra.mxu0 %v1212_v46  ;;  %1636 = vmatpush2.msra.mxu1 %v1214_v18 }
 0x271   : > { %1395 = vmatmul.mubr.f32.gmra.mxu0 %v1054_v29  ;;  %1484 = vmatmul.mubr.f32.gmra.mxu1 %v1054_v29 }
 0x272   : > { %1548 = vmatprep.subr.mxu0 %v1205_v19  ;;  %1637 = vmatprep.subr.mxu1 %v1207_v31 }
 0x273   : > { %1549 = vmatpush2.msra.mxu0 %v1204_v48  ;;  %1638 = vmatpush2.msra.mxu1 %v1206_v49 }
 0x274   : > { %1550 = vmatprep.subr.mxu0 %v1197_v50  ;;  %1639 = vmatprep.subr.mxu1 %v1199_v51 }
 0x275   : > { %1551 = vmatpush2.msra.mxu0 %v1196_v52  ;;  %1640 = vmatpush2.msra.mxu1 %v1198_v53 }
 0x276   : > { %1552 = vmatprep.subr.mxu0 %v1189_v54  ;;  %1641 = vmatprep.subr.mxu1 %v1191_v55 }
 0x277   : > { %1553 = vmatpush2.msra.mxu0 %v1188_v56  ;;  %1554 = vmatprep.mubr.f32.mxu0 %v3020_v47 }
 0x278   : > { %1642 = vmatpush2.msra.mxu1 %v1190_v57  ;;  %1643 = vmatprep.mubr.f32.mxu1 %v3020_v47  ;;  %v1769_v47 = vlaneseq }
 0x279   : > { %1555 = vmatmul.mubr.f32.vlgmr.msra.gmra.mxu0 %v3023_v32  ;;  %1644 = vmatmul.mubr.f32.vlgmr.msra.gmra.mxu1 %v3023_v32 }
 0x27a   : > { %1560 = vmatprep.mubr.f32.mxu0 %v3127_v24  ;;  %1649 = vmatprep.mubr.f32.mxu1 %v3127_v24  ;;  %v3185_v32 = vshrl.u32 %v1769_v47, 7 }
 0x27c   : > { %v1771_v58 = vsub.s32 0, %v3185_v32  ;;  %v1779_v59 = vsub.s32 2, %v3185_v32  ;;  %v1775_v61 = vsub.s32 1, %v3185_v32  ;;  %v1783_v62 = vsub.s32 3, %v3185_v32 }
 0x27d   : > { %1561 = vmatmul.mubr.f32.gmra.mxu0 %v3131_v27  ;;  %1650 = vmatmul.mubr.f32.gmra.mxu1 %v3131_v27  ;;  %v1795_v19 = vsub.s32 6, %v3185_v32  ;;  %v1791_v49 = vsub.s32 5, %v3185_v32  ;;  %v1799_v50 = vsub.s32 7, %v3185_v32 }
 0x27e   : > { %1566 = vmatprep.mubr.f32.mxu0 %v3143_v38  ;;  %1655 = vmatprep.mubr.f32.mxu1 %v3143_v38  ;;  %v1772_v63 = vrot.slane %v3194_v60, %v1771_v58  ;;  %v1780_v0 = vrot.slane %v3194_v60, %v1779_v59  ;;  %v1776_v1 = vrot.slane %v3194_v60, %v1775_v61 }
 0x27f   : > { %v1784_v2 = vrot.slane %v3194_v60, %v1783_v62  ;;  %v1796_v47 = vrot.slane %v3194_v60, %v1795_v19  ;;  %v1792_v58 = vrot.slane %v3194_v60, %v1791_v49 }
 0x281   : > { %1567 = vmatmul.mubr.f32.gmra.mxu0 %v3147_v40  ;;  %1656 = vmatmul.mubr.f32.gmra.mxu1 %v3147_v40 }
 0x282   : > { %1572 = vmatprep.mubr.f32.mxu0 %v1055_v28  ;;  %1661 = vmatprep.mubr.f32.mxu1 %v1055_v28 }
 0x285   : > { %1573 = vmatmul.mubr.f32.gmra.mxu0 %v1054_v29  ;;  %1662 = vmatmul.mubr.f32.gmra.mxu1 %v1054_v29  ;;  %v1787_v29 = vsub.s32 4, %v3185_v32  ;;  %v1800_v32 = vrot.slane %v3194_v60, %v1799_v50 }
 0x287   : > { %v1788_v57 = vrot.slane %v3194_v60, %v1787_v29 }
 0x2f1   : > { %v1378_v3 = vpop.f32.mrf.mxu0  ;;  %v1467_v4 = vpop.f32.mrf.mxu1 }
 0x2f2   : > { %v1809_v5 = vadd.f32 %v1772_v63, %v1378_v3  ;;  %v1811_v6 = vadd.f32 %v1780_v0, %v1467_v4 }
 0x2f3   : > { %v1380_v7 = vpop.f32.mrf.mxu0  ;;  %v1469_v8 = vpop.f32.mrf.mxu1 }
 0x2f4   : > { %v1841_v9 = vmax.f32 %v1809_v5, 0.0  ;;  %v1843_v10 = vmax.f32 %v1811_v6, 0.0  ;;  %v1810_v11 = vadd.f32 %v1776_v1, %v1380_v7  ;;  %v1812_v12 = vadd.f32 %v1784_v2, %v1469_v8 }
 0x2f6   : > { %1873 = vst [vmem:[%s2821_s25] sm:$0xff] %v1841_v9  ;;  %1875 = vst [vmem:[%s2821_s25 + $0x10] sm:$0xff] %v1843_v10  ;;  %v1842_v13 = vmax.f32 %v1810_v11, 0.0  ;;  %v1844_v14 = vmax.f32 %v1812_v12, 0.0 }
 0x2f8   : > { %1874 = vst [vmem:[%s2821_s25 + $0x8] sm:$0xff] %v1842_v13  ;;  %1876 = vst [vmem:[%s2821_s25 + $0x18] sm:$0xff] %v1844_v14 }
 0x2fd   : > { %v1930_v29 = vld [vmem:[%s2821_s25] sm:$0xff] (%p2279_p6) }
 0x2fe   : > { %1931 = vst [vmem:[%s3251_s10] sm:$0xff] (%p2279_p6), %v1930_v29 }
 0x2ff   : > { %v1932_v19 = vld [vmem:[%s2821_s25 + $0x8] sm:$0xff] (%p2279_p6) }
 0x300   : > { %1933 = vst [vmem:[%s3251_s10 + $0x8] sm:$0xff] (%p2279_p6), %v1932_v19 }
 0x325   : > { %v1384_v15 = vpop.f32.mrf.mxu0  ;;  %v1473_v20 = vpop.f32.mrf.mxu1 }
 0x326   : > { %v1817_v21 = vadd.f32 %v1772_v63, %v1384_v15  ;;  %v1819_v22 = vadd.f32 %v1780_v0, %v1473_v20 }
 0x327   : > { %v1386_v23 = vpop.f32.mrf.mxu0  ;;  %v1475_v24 = vpop.f32.mrf.mxu1 }
 0x328   : > { %v1849_v25 = vmax.f32 %v1817_v21, 0.0  ;;  %v1851_v26 = vmax.f32 %v1819_v22, 0.0  ;;  %v1818_v27 = vadd.f32 %v1776_v1, %v1386_v23  ;;  %v1820_v30 = vadd.f32 %v1784_v2, %v1475_v24 }
 0x32a   : > { %1881 = vst [vmem:[%s2821_s25 + $0x40] sm:$0xff] %v1849_v25  ;;  %1883 = vst [vmem:[%s2821_s25 + $0x50] sm:$0xff] %v1851_v26  ;;  %v1850_v33 = vmax.f32 %v1818_v27, 0.0  ;;  %v1852_v34 = vmax.f32 %v1820_v30, 0.0 }
 0x32b   : > { %v1390_v35 = vpop.f32.mrf.mxu0  ;;  %v1479_v36 = vpop.f32.mrf.mxu1 }
 0x32c   : > { %1882 = vst [vmem:[%s2821_s25 + $0x48] sm:$0xff] %v1850_v33  ;;  %1884 = vst [vmem:[%s2821_s25 + $0x58] sm:$0xff] %v1852_v34  ;;  %v1825_v37 = vadd.f32 %v1772_v63, %v1390_v35  ;;  %v1827_v38 = vadd.f32 %v1780_v0, %v1479_v36 }
 0x32d   : > { %v1392_v39 = vpop.f32.mrf.mxu0  ;;  %v1481_v16 = vpop.f32.mrf.mxu1 }
 0x32e   : > { %v1857_v40 = vmax.f32 %v1825_v37, 0.0  ;;  %v1859_v17 = vmax.f32 %v1827_v38, 0.0  ;;  %v1826_v41 = vadd.f32 %v1776_v1, %v1392_v39  ;;  %v1828_v42 = vadd.f32 %v1784_v2, %v1481_v16 }
 0x330   : > { %1889 = vst [vmem:[%s2821_s25 + $0x80] sm:$0xff] %v1857_v40  ;;  %1891 = vst [vmem:[%s2821_s25 + $0x90] sm:$0xff] %v1859_v17  ;;  %v1858_v43 = vmax.f32 %v1826_v41, 0.0  ;;  %v1860_v44 = vmax.f32 %v1828_v42, 0.0 }
 0x331   : > { %v1396_v45 = vpop.f32.mrf.mxu0  ;;  %v1485_v28 = vpop.f32.mrf.mxu1 }
 0x332   : > { %1890 = vst [vmem:[%s2821_s25 + $0x88] sm:$0xff] %v1858_v43  ;;  %1892 = vst [vmem:[%s2821_s25 + $0x98] sm:$0xff] %v1860_v44  ;;  %v1833_v46 = vadd.f32 %v1772_v63, %v1396_v45  ;;  %v1835_v18 = vadd.f32 %v1780_v0, %v1485_v28 }
 0x333   : > { %v1398_v31 = vpop.f32.mrf.mxu0  ;;  %v1487_v48 = vpop.f32.mrf.mxu1 }
 0x334   : > { %v1865_v51 = vmax.f32 %v1833_v46, 0.0  ;;  %v1867_v52 = vmax.f32 %v1835_v18, 0.0  ;;  %v1834_v53 = vadd.f32 %v1776_v1, %v1398_v31  ;;  %v1836_v54 = vadd.f32 %v1784_v2, %v1487_v48  ;;  %v1934_v31 = vld [vmem:[%s2821_s25 + $0x10] sm:$0xff] (%p2279_p6)  ;;  %v1936_v48 = vld [vmem:[%s2821_s25 + $0x18] sm:$0xff] (%p2279_p6) }
 0x335   : > { %1935 = vst [vmem:[%s3251_s10 + $0x10] sm:$0xff] (%p2279_p6), %v1934_v31  ;;  %1937 = vst [vmem:[%s3251_s10 + $0x18] sm:$0xff] (%p2279_p6), %v1936_v48 }
 0x336   : > { %1897 = vst [vmem:[%s2821_s25 + $0xc0] sm:$0xff] %v1865_v51  ;;  %1899 = vst [vmem:[%s2821_s25 + $0xd0] sm:$0xff] %v1867_v52  ;;  %v1866_v55 = vmax.f32 %v1834_v53, 0.0  ;;  %v1868_v56 = vmax.f32 %v1836_v54, 0.0  ;;  %v1946_v53 = vld [vmem:[%s2821_s25 + $0x40] sm:$0xff] (%p2279_p6)  ;;  %v1948_v54 = vld [vmem:[%s2821_s25 + $0x48] sm:$0xff] (%p2279_p6) }
 0x337   : > { %1947 = vst [vmem:[%s3251_s10 + $0x80] sm:$0xff] (%p2279_p6), %v1946_v53  ;;  %1949 = vst [vmem:[%s3251_s10 + $0x88] sm:$0xff] (%p2279_p6), %v1948_v54 }
 0x338   : > { %1898 = vst [vmem:[%s2821_s25 + $0xc8] sm:$0xff] %v1866_v55  ;;  %1900 = vst [vmem:[%s2821_s25 + $0xd8] sm:$0xff] %v1868_v56  ;;  %v1950_v55 = vld [vmem:[%s2821_s25 + $0x50] sm:$0xff] (%p2279_p6)  ;;  %v1952_v56 = vld [vmem:[%s2821_s25 + $0x58] sm:$0xff] (%p2279_p6) }
 0x339   : > { %v1556_v59 = vpop.f32.mrf.mxu0  ;;  %v1645_v61 = vpop.f32.mrf.mxu1  ;;  %1951 = vst [vmem:[%s3251_s10 + $0x90] sm:$0xff] (%p2279_p6), %v1950_v55  ;;  %1953 = vst [vmem:[%s3251_s10 + $0x98] sm:$0xff] (%p2279_p6), %v1952_v56 }
 0x33a   : > { %v1813_v62 = vadd.f32 %v1788_v57, %v1556_v59  ;;  %v1815_v63 = vadd.f32 %v1796_v47, %v1645_v61  ;;  %v1962_v59 = vld [vmem:[%s2821_s25 + $0x80] sm:$0xff] (%p2279_p6)  ;;  %v1964_v61 = vld [vmem:[%s2821_s25 + $0x88] sm:$0xff] (%p2279_p6) }
 0x33b   : > { %v1558_v0 = vpop.f32.mrf.mxu0  ;;  %v1647_v1 = vpop.f32.mrf.mxu1  ;;  %1963 = vst [vmem:[%s3251_s10 + $0x100] sm:$0xff] (%p2279_p6), %v1962_v59  ;;  %1965 = vst [vmem:[%s3251_s10 + $0x108] sm:$0xff] (%p2279_p6), %v1964_v61 }
 0x33c   : > { %v1845_v2 = vmax.f32 %v1813_v62, 0.0  ;;  %v1847_v3 = vmax.f32 %v1815_v63, 0.0  ;;  %v1814_v4 = vadd.f32 %v1792_v58, %v1558_v0  ;;  %v1816_v5 = vadd.f32 %v1800_v32, %v1647_v1  ;;  %v1966_v62 = vld [vmem:[%s2821_s25 + $0x90] sm:$0xff] (%p2279_p6)  ;;  %v1968_v63 = vld [vmem:[%s2821_s25 + $0x98] sm:$0xff] (%p2279_p6) }
 0x33d   : > { %v1562_v6 = vpop.f32.mrf.mxu0  ;;  %v1651_v7 = vpop.f32.mrf.mxu1  ;;  %1967 = vst [vmem:[%s3251_s10 + $0x110] sm:$0xff] (%p2279_p6), %v1966_v62  ;;  %1969 = vst [vmem:[%s3251_s10 + $0x118] sm:$0xff] (%p2279_p6), %v1968_v63 }
 0x33e   : > { %1877 = vst [vmem:[%s2821_s25 + $0x20] sm:$0xff] %v1845_v2  ;;  %1879 = vst [vmem:[%s2821_s25 + $0x30] sm:$0xff] %v1847_v3  ;;  %v1846_v8 = vmax.f32 %v1814_v4, 0.0  ;;  %v1848_v60 = vmax.f32 %v1816_v5, 0.0  ;;  %v1821_v9 = vadd.f32 %v1788_v57, %v1562_v6  ;;  %v1823_v10 = vadd.f32 %v1796_v47, %v1651_v7  ;;  %v1978_v4 = vld [vmem:[%s2821_s25 + $0xc0] sm:$0xff] (%p2279_p6)  ;;  %v1982_v6 = vld [vmem:[%s2821_s25 + $0xd0] sm:$0xff] (%p2279_p6) }
 0x33f   : > { %v1564_v11 = vpop.f32.mrf.mxu0  ;;  %v1653_v12 = vpop.f32.mrf.mxu1  ;;  %v1980_v5 = vld [vmem:[%s2821_s25 + $0xc8] sm:$0xff] (%p2279_p6)  ;;  %1979 = vst [vmem:[%s3251_s10 + $0x180] sm:$0xff] (%p2279_p6), %v1978_v4  ;;  %1983 = vst [vmem:[%s3251_s10 + $0x190] sm:$0xff] (%p2279_p6), %v1982_v6  ;;  %v1984_v7 = vld [vmem:[%s2821_s25 + $0xd8] sm:$0xff] (%p2279_p6) }
 0x340   : > { %1878 = vst [vmem:[%s2821_s25 + $0x28] sm:$0xff] %v1846_v8  ;;  %1880 = vst [vmem:[%s2821_s25 + $0x38] sm:$0xff] %v1848_v60  ;;  %v1853_v13 = vmax.f32 %v1821_v9, 0.0  ;;  %v1855_v14 = vmax.f32 %v1823_v10, 0.0  ;;  %v1822_v15 = vadd.f32 %v1792_v58, %v1564_v11  ;;  %v1824_v20 = vadd.f32 %v1800_v32, %v1653_v12 }
 0x341   : > { %v1568_v21 = vpop.f32.mrf.mxu0  ;;  %v1657_v22 = vpop.f32.mrf.mxu1  ;;  %1981 = vst [vmem:[%s3251_s10 + $0x188] sm:$0xff] (%p2279_p6), %v1980_v5  ;;  %1985 = vst [vmem:[%s3251_s10 + $0x198] sm:$0xff] (%p2279_p6), %v1984_v7 }
 0x342   : > { %1885 = vst [vmem:[%s2821_s25 + $0x60] sm:$0xff] %v1853_v13  ;;  %1887 = vst [vmem:[%s2821_s25 + $0x70] sm:$0xff] %v1855_v14  ;;  %v1854_v23 = vmax.f32 %v1822_v15, 0.0  ;;  %v1856_v24 = vmax.f32 %v1824_v20, 0.0  ;;  %v1829_v25 = vadd.f32 %v1788_v57, %v1568_v21  ;;  %v1831_v26 = vadd.f32 %v1796_v47, %v1657_v22 }
 0x343   : > { %v1570_v27 = vpop.f32.mrf.mxu0  ;;  %v1659_v30 = vpop.f32.mrf.mxu1 }
 0x344   : > { %1886 = vst [vmem:[%s2821_s25 + $0x68] sm:$0xff] %v1854_v23  ;;  %1888 = vst [vmem:[%s2821_s25 + $0x78] sm:$0xff] %v1856_v24  ;;  %v1861_v33 = vmax.f32 %v1829_v25, 0.0  ;;  %v1863_v34 = vmax.f32 %v1831_v26, 0.0  ;;  %v1830_v35 = vadd.f32 %v1792_v58, %v1570_v27  ;;  %v1832_v36 = vadd.f32 %v1800_v32, %v1659_v30 }
 0x345   : > { %v1574_v37 = vpop.f32.mrf.mxu0  ;;  %v1663_v38 = vpop.f32.mrf.mxu1  ;;  %v1938_v49 = vld [vmem:[%s2821_s25 + $0x20] sm:$0xff] (%p2279_p6)  ;;  %v1942_v51 = vld [vmem:[%s2821_s25 + $0x30] sm:$0xff] (%p2279_p6) }
 0x346   : > { %1893 = vst [vmem:[%s2821_s25 + $0xa0] sm:$0xff] %v1861_v33  ;;  %1895 = vst [vmem:[%s2821_s25 + $0xb0] sm:$0xff] %v1863_v34  ;;  %v1862_v39 = vmax.f32 %v1830_v35, 0.0  ;;  %v1864_v16 = vmax.f32 %v1832_v36, 0.0  ;;  %v1837_v40 = vadd.f32 %v1788_v57, %v1574_v37  ;;  %v1839_v17 = vadd.f32 %v1796_v47, %v1663_v38 }
 0x347   : > { %v1576_v41 = vpop.f32.mrf.mxu0  ;;  %v1665_v42 = vpop.f32.mrf.mxu1  ;;  %v1940_v50 = vld [vmem:[%s2821_s25 + $0x28] sm:$0xff] (%p2279_p6)  ;;  %1939 = vst [vmem:[%s3251_s10 + $0x20] sm:$0xff] (%p2279_p6), %v1938_v49  ;;  %v1944_v52 = vld [vmem:[%s2821_s25 + $0x38] sm:$0xff] (%p2279_p6)  ;;  %1943 = vst [vmem:[%s3251_s10 + $0x30] sm:$0xff] (%p2279_p6), %v1942_v51 }
 0x348   : > { %1894 = vst [vmem:[%s2821_s25 + $0xa8] sm:$0xff] %v1862_v39  ;;  %1896 = vst [vmem:[%s2821_s25 + $0xb8] sm:$0xff] %v1864_v16  ;;  %v1869_v43 = vmax.f32 %v1837_v40, 0.0  ;;  %v1871_v44 = vmax.f32 %v1839_v17, 0.0  ;;  %v1838_v45 = vadd.f32 %v1792_v58, %v1576_v41  ;;  %v1840_v28 = vadd.f32 %v1800_v32, %v1665_v42  ;;  %1911 = sbr.rel (!%p2279_p6) target bundleno = 853 (0x355), region = 79 }
 0x349   : > { %1941 = vst [vmem:[%s3251_s10 + $0x28] sm:$0xff] (%p2279_p6), %v1940_v50  ;;  %1945 = vst [vmem:[%s3251_s10 + $0x38] sm:$0xff] (%p2279_p6), %v1944_v52  ;;  %v1954_v57 = vld [vmem:[%s2821_s25 + $0x60] sm:$0xff] (%p2279_p6)  ;;  %v1958_v58 = vld [vmem:[%s2821_s25 + $0x70] sm:$0xff] (%p2279_p6) }
 0x34a   : > { %1901 = vst [vmem:[%s2821_s25 + $0xe0] sm:$0xff] %v1869_v43  ;;  %1903 = vst [vmem:[%s2821_s25 + $0xf0] sm:$0xff] %v1871_v44  ;;  %v1870_v46 = vmax.f32 %v1838_v45, 0.0  ;;  %v1872_v18 = vmax.f32 %v1840_v28, 0.0 }
 0x34b   : > { %v1956_v47 = vld [vmem:[%s2821_s25 + $0x68] sm:$0xff] (%p2279_p6)  ;;  %1955 = vst [vmem:[%s3251_s10 + $0xa0] sm:$0xff] (%p2279_p6), %v1954_v57  ;;  %1959 = vst [vmem:[%s3251_s10 + $0xb0] sm:$0xff] (%p2279_p6), %v1958_v58  ;;  %v1960_v32 = vld [vmem:[%s2821_s25 + $0x78] sm:$0xff] (%p2279_p6) }
 0x34c   : > { %1902 = vst [vmem:[%s2821_s25 + $0xe8] sm:$0xff] %v1870_v46  ;;  %1904 = vst [vmem:[%s2821_s25 + $0xf8] sm:$0xff] %v1872_v18 }
 0x34d   : > { %1957 = vst [vmem:[%s3251_s10 + $0xa8] sm:$0xff] %v1956_v47  ;;  %1961 = vst [vmem:[%s3251_s10 + $0xb8] sm:$0xff] %v1960_v32  ;;  %v1970_v0 = vld [vmem:[%s2821_s25 + $0xa0] sm:$0xff]  ;;  %v1974_v2 = vld [vmem:[%s2821_s25 + $0xb0] sm:$0xff] }
 0x34e   : > { %1971 = vst [vmem:[%s3251_s10 + $0x120] sm:$0xff] %v1970_v0  ;;  %1975 = vst [vmem:[%s3251_s10 + $0x130] sm:$0xff] %v1974_v2 }
 0x34f   : > { %v1972_v1 = vld [vmem:[%s2821_s25 + $0xa8] sm:$0xff]  ;;  %v1976_v3 = vld [vmem:[%s2821_s25 + $0xb8] sm:$0xff] }
 0x350   : > { %1973 = vst [vmem:[%s3251_s10 + $0x128] sm:$0xff] %v1972_v1  ;;  %1977 = vst [vmem:[%s3251_s10 + $0x138] sm:$0xff] %v1976_v3 }
 0x351   : > { %v1986_v8 = vld [vmem:[%s2821_s25 + $0xe0] sm:$0xff]  ;;  %v1990_v9 = vld [vmem:[%s2821_s25 + $0xf0] sm:$0xff] }
 0x352   : > { %1987 = vst [vmem:[%s3251_s10 + $0x1a0] sm:$0xff] %v1986_v8  ;;  %1991 = vst [vmem:[%s3251_s10 + $0x1b0] sm:$0xff] %v1990_v9 }
 0x353   : > { %v1988_v60 = vld [vmem:[%s2821_s25 + $0xe8] sm:$0xff]  ;;  %v1992_v10 = vld [vmem:[%s2821_s25 + $0xf8] sm:$0xff] }
 0x354   : > { %1989 = vst [vmem:[%s3251_s10 + $0x1a8] sm:$0xff] %v1988_v60  ;;  %1993 = vst [vmem:[%s3251_s10 + $0x1b8] sm:$0xff] %v1992_v10 }
 0x355 PF: > { %s15_s22 = sadd.s32 1, %s2212_s22   ;;  %s3336_s18 = smov %s2200_s19 }
 0x356   : > { %p12_p13 = scmp.ge.s32.totalorder %s15_s22, 4   ;;  %s3337_s19 = smov %s2284_s28 }
 0x357   : > { %s3338_s20 = smov %s2208_s21  ;;  %s3339_s21 = smov %s3341_s23 }
 0x358   :  { %14 = sbr.rel (!%p12_p13) target bundleno = 3 (0x3), region = 140 }

// kernel: decoder_layer.17
= control target key start
LH: loop header
LB: loop body
LE: loop exit
PB: predicated region body
PF: predicated region fallthrough
CT: control target
= control target key end

     0   :  { %9 = vsyncpa [#allocation5], 0  ;;  %s1083_s15 = smov 0   ;;  %s1085_s16 = smov 0   ;;  %s1361_s0 = inlined_call_operand.vmem [shape: f32[32,2048], index: 0, kind: input, shape index: {}]   ;;  %s1362_s1 = inlined_call_operand.vmem [shape: f32[2048,256], index: 1, kind: input, shape index: {}]   ;;  %s1363_s2 = inlined_call_operand.vmem [shape: f32[1,256], index: 2, kind: input, shape index: {}]   ;;  %s1364_s3 = inlined_call_operand.vmem [shape: f32[32,256], index: 3, kind: input, shape index: {}]   ;;  %s1365_s4 = inlined_call_operand.hbm [shape: f32[32,256], index: 4, kind: output, shape index: {}]  }
   0x1   :  { %s1087_s17 = smov 0   ;;  %s1089_s18 = smov 0  }
   0x2   :  { %s1091_s19 = smov 0  }
   0x3 LB: > { %s915_s20 = sadd.s32 4294967295, %s1052_s19   ;;  %s27_s21 = sadd.s32 1, %s1048_s18  ;;  %s1052_s19 = sphi %s1091_s19, %s15_s19   ;;  %s1048_s18 = sphi %s1089_s18, %s1370_s18   ;;  %s1044_s17 = sphi %s1087_s17, %s1369_s17   ;;  %s1040_s16 = sphi %s1085_s16, %s1368_s16   ;;  %s1036_s15 = sphi %s1083_s15, %s1367_s15  }
   0x4   : > { %p28_p0 = scmp.ge.s32.totalorder %s27_s21, 4  ;;  %p50_p1 = scmp.ne.s32.totalorder %s1040_s16, %s1036_s15 }
   0x5   : > { %p51_p2 = scmp.eq.s32.totalorder %s1052_s19, 0  ;;  %s43_s23 = sadd.s32 1, %s1040_s16 }
   0x6   : > { %s1372_s21 = smov (%p28_p0, %s27_s21), 0  ;;  %p919_p5 = scmp.ge.s32.totalorder %s1052_s19, 4 }
   0x7   : > { %p52_p3 = por %p51_p2, %p50_p1  ;;  %s39_s22 = ssub.s32 %s1048_s18, %s1372_s21 }
   0x8   : > { %p41_p4 = scmp.eq.s32.totalorder %s39_s22, 0  ;;  %209 = sbr.rel (%p919_p5) target bundleno = 25 (0x19), region = 24 }
   0xa   : > { %s1119_s24 = scalar_select %p41_p4, %s1040_s16, %s43_s23  }
   0xd   : > { %212 = sbr.rel (!%p52_p3) target bundleno = 25 (0x19), region = 28  ;;  %s214_s25 = sand.u32 (%p52_p3), 1, %s1040_s16  }
   0xe   : > { %s934_s26 = sshll.u32 (%p52_p3), %s1048_s18, 5  ;;  %s920_s27 = sshll.u32 (%p52_p3), %s214_s25, 7 }
   0xf   : > { %s1127_s30 = scalar_lea.vmem (%p52_p3), %s1361_s0, %s934_s26  ;;  %s216_s5 = scalar_lea.vmem (%p52_p3), [#allocation3], %s920_s27 }
  0x10   : > { %v235_v0 = vld [vmem:[%s1127_s30] sm:$0xff] (%p52_p3)  ;;  %v237_v1 = vld [vmem:[%s1127_s30 + $0x8] sm:$0xff] (%p52_p3)  ;;  %v239_v2 = vld [vmem:[%s1127_s30 + $0x10] sm:$0xff] (%p52_p3) }
  0x11   : > { %236 = vst [vmem:[%s216_s5] sm:$0xff] (%p52_p3), %v235_v0  ;;  %238 = vst [vmem:[%s216_s5 + $0x8] sm:$0xff] (%p52_p3), %v237_v1  ;;  %v241_v3 = vld [vmem:[%s1127_s30 + $0x18] sm:$0xff] (%p52_p3)  ;;  %v243_v4 = vld [vmem:[%s1127_s30 + $0x80] sm:$0xff] (%p52_p3) }
  0x12   : > { %240 = vst [vmem:[%s216_s5 + $0x10] sm:$0xff] %v239_v2  ;;  %v245_v5 = vld [vmem:[%s1127_s30 + $0x88] sm:$0xff]  ;;  %242 = vst [vmem:[%s216_s5 + $0x18] sm:$0xff] %v241_v3  ;;  %v247_v6 = vld [vmem:[%s1127_s30 + $0x90] sm:$0xff] }
  0x13   : > { %244 = vst [vmem:[%s216_s5 + $0x20] sm:$0xff] %v243_v4  ;;  %246 = vst [vmem:[%s216_s5 + $0x28] sm:$0xff] %v245_v5  ;;  %v249_v7 = vld [vmem:[%s1127_s30 + $0x98] sm:$0xff]  ;;  %v251_v8 = vld [vmem:[%s1127_s30 + $0x100] sm:$0xff] }
  0x14   : > { %248 = vst [vmem:[%s216_s5 + $0x30] sm:$0xff] %v247_v6  ;;  %250 = vst [vmem:[%s216_s5 + $0x38] sm:$0xff] %v249_v7  ;;  %v253_v9 = vld [vmem:[%s1127_s30 + $0x108] sm:$0xff]  ;;  %v255_v10 = vld [vmem:[%s1127_s30 + $0x110] sm:$0xff] }
  0x15   : > { %252 = vst [vmem:[%s216_s5 + $0x40] sm:$0xff] %v251_v8  ;;  %v257_v11 = vld [vmem:[%s1127_s30 + $0x118] sm:$0xff]  ;;  %254 = vst [vmem:[%s216_s5 + $0x48] sm:$0xff] %v253_v9  ;;  %v259_v12 = vld [vmem:[%s1127_s30 + $0x180] sm:$0xff] }
  0x16   : > { %256 = vst [vmem:[%s216_s5 + $0x50] sm:$0xff] %v255_v10  ;;  %258 = vst [vmem:[%s216_s5 + $0x58] sm:$0xff] %v257_v11  ;;  %v261_v13 = vld [vmem:[%s1127_s30 + $0x188] sm:$0xff]  ;;  %v263_v14 = vld [vmem:[%s1127_s30 + $0x190] sm:$0xff] }
  0x17   : > { %260 = vst [vmem:[%s216_s5 + $0x60] sm:$0xff] %v259_v12  ;;  %262 = vst [vmem:[%s216_s5 + $0x68] sm:$0xff] %v261_v13  ;;  %v265_v15 = vld [vmem:[%s1127_s30 + $0x198] sm:$0xff] }
  0x18   : > { %264 = vst [vmem:[%s216_s5 + $0x70] sm:$0xff] %v263_v14  ;;  %266 = vst [vmem:[%s216_s5 + $0x78] sm:$0xff] %v265_v15 }
  0x19 PF: > { %p923_p6 = scmp.ge.s32.totalorder %s1052_s19, 1  ;;  %p286_p7 = scmp.lt.s32.totalorder %s1052_s19, 5 }
  0x1b   : > { %p287_p8 = pnand %p923_p6, %p286_p7 }
  0x1c   : > { %s293_s6 = sand.u32 (!%p287_p8), 1, %s1036_s15   ;;  %s925_s7 = sshll.u32 (!%p287_p8), %s1044_s17, 6 }
  0x1d   : > { %290 = sbr.rel (%p287_p8) target bundleno = 355 (0x163), region = 55  ;;  %s924_s8 = sshll.u32 (!%p287_p8), %s293_s6, 7 }
  0x1e   : > { %p341_p9 = scmp.lt.s32.totalorder (!%p287_p8), %s925_s7, 255  ;;  %s1154_s13 = scalar_lea.vmem (!%p287_p8), [#allocation3], %s924_s8 }
  0x1f   : > { %p928_p10 = scmp.ne.s32.totalorder (!%p287_p8), %s1044_s17, 0 }
  0x22   : > { %s1374_s7 = smov (!%p341_p9, %s925_s7), 255  ;;  %373 = sbr.rel (%p928_p10) target bundleno = 44 (0x2c), region = 63 }
  0x23   : > { %s935_s9 = sshll.u32 %s1374_s7, 4 }
  0x24   : > { %s1152_s12 = scalar_lea.vmem %s1362_s1, %s935_s9 }
  0x27   : > { %v1054_v16 = vmov 0.0  }
  0x28   : > { %374 = vst [vmem:[#allocation2 + $0x30] sm:$0xff] %v1054_v16  ;;  %375 = vst [vmem:[#allocation2] sm:$0xff] %v1054_v16 }
  0x29   : > { %376 = vst [vmem:[#allocation2 + $0x18] sm:$0xff] %v1054_v16  ;;  %377 = vst [vmem:[#allocation2 + $0x10] sm:$0xff] %v1054_v16 }
  0x2a   : > { %378 = vst [vmem:[#allocation2 + $0x8] sm:$0xff] %v1054_v16  ;;  %379 = vst [vmem:[#allocation2 + $0x20] sm:$0xff] %v1054_v16 }
  0x2b   : > { %380 = vst [vmem:[#allocation2 + $0x28] sm:$0xff] %v1054_v16  ;;  %381 = vst [vmem:[#allocation2 + $0x38] sm:$0xff] %v1054_v16 }
  0x2c PF: > { %v437_v17 = vld [vmem:[%s1152_s12 + $0xf8] sm:$0xff]  ;;  %v436_v19 = vld [vmem:[%s1152_s12 + $0xf0] sm:$0xff]  ;;  %v435_v21 = vld [vmem:[%s1152_s12 + $0xe8] sm:$0xff]  ;;  %p929_p11 = scmp.ne.s32.totalorder %s1044_s17, 3 }
  0x2d   : > { %v501_v18 = vld [vmem:[%s1152_s12 + $0x2f8] sm:$0xff]  ;;  %534 = vmatprep.subr.mxu0 %v437_v17  ;;  %v500_v20 = vld [vmem:[%s1152_s12 + $0x2f0] sm:$0xff]  ;;  %v499_v22 = vld [vmem:[%s1152_s12 + $0x2e8] sm:$0xff] }
  0x2e   : > { %623 = vmatprep.subr.mxu1 %v501_v18  ;;  %535 = vmatpush1.msra.mxu0 %v436_v19  ;;  %v434_v23 = vld [vmem:[%s1152_s12 + $0xe0] sm:$0xff]  ;;  %v433_v25 = vld [vmem:[%s1152_s12 + $0xd8] sm:$0xff]  ;;  %v432_v27 = vld [vmem:[%s1152_s12 + $0xd0] sm:$0xff] }
  0x2f   : > { %624 = vmatpush1.msra.mxu1 %v500_v20  ;;  %v498_v24 = vld [vmem:[%s1152_s12 + $0x2e0] sm:$0xff]  ;;  %536 = vmatprep.subr.mxu0 %v435_v21  ;;  %v497_v26 = vld [vmem:[%s1152_s12 + $0x2d8] sm:$0xff]  ;;  %v496_v28 = vld [vmem:[%s1152_s12 + $0x2d0] sm:$0xff] }
  0x30   : > { %625 = vmatprep.subr.mxu1 %v499_v22  ;;  %537 = vmatpush1.msra.mxu0 %v434_v23  ;;  %v431_v29 = vld [vmem:[%s1152_s12 + $0xc8] sm:$0xff]  ;;  %v430_v31 = vld [vmem:[%s1152_s12 + $0xc0] sm:$0xff]  ;;  %v429_v33 = vld [vmem:[%s1152_s12 + $0xb8] sm:$0xff] }
  0x31   : > { %626 = vmatpush1.msra.mxu1 %v498_v24  ;;  %v495_v30 = vld [vmem:[%s1152_s12 + $0x2c8] sm:$0xff]  ;;  %538 = vmatprep.subr.mxu0 %v433_v25  ;;  %v494_v32 = vld [vmem:[%s1152_s12 + $0x2c0] sm:$0xff]  ;;  %v493_v34 = vld [vmem:[%s1152_s12 + $0x2b8] sm:$0xff] }
  0x32   : > { %627 = vmatprep.subr.mxu1 %v497_v26  ;;  %539 = vmatpush1.msra.mxu0 %v432_v27  ;;  %v428_v35 = vld [vmem:[%s1152_s12 + $0xb0] sm:$0xff]  ;;  %v427_v37 = vld [vmem:[%s1152_s12 + $0xa8] sm:$0xff]  ;;  %v426_v39 = vld [vmem:[%s1152_s12 + $0xa0] sm:$0xff] }
  0x33   : > { %628 = vmatpush1.msra.mxu1 %v496_v28  ;;  %540 = vmatprep.subr.mxu0 %v431_v29  ;;  %v492_v36 = vld [vmem:[%s1152_s12 + $0x2b0] sm:$0xff]  ;;  %v491_v38 = vld [vmem:[%s1152_s12 + $0x2a8] sm:$0xff]  ;;  %v490_v40 = vld [vmem:[%s1152_s12 + $0x2a0] sm:$0xff] }
  0x34   : > { %629 = vmatprep.subr.mxu1 %v495_v30  ;;  %541 = vmatpush1.msra.mxu0 %v430_v31  ;;  %v425_v41 = vld [vmem:[%s1152_s12 + $0x98] sm:$0xff]  ;;  %v424_v43 = vld [vmem:[%s1152_s12 + $0x90] sm:$0xff]  ;;  %v423_v45 = vld [vmem:[%s1152_s12 + $0x88] sm:$0xff] }
  0x35   : > { %630 = vmatpush1.msra.mxu1 %v494_v32  ;;  %542 = vmatprep.subr.mxu0 %v429_v33  ;;  %v489_v42 = vld [vmem:[%s1152_s12 + $0x298] sm:$0xff]  ;;  %v488_v44 = vld [vmem:[%s1152_s12 + $0x290] sm:$0xff]  ;;  %v487_v46 = vld [vmem:[%s1152_s12 + $0x288] sm:$0xff] }
  0x36   : > { %631 = vmatprep.subr.mxu1 %v493_v34  ;;  %543 = vmatpush1.msra.mxu0 %v428_v35  ;;  %v422_v47 = vld [vmem:[%s1152_s12 + $0x80] sm:$0xff]  ;;  %v421_v49 = vld [vmem:[%s1152_s12 + $0x78] sm:$0xff]  ;;  %v420_v51 = vld [vmem:[%s1152_s12 + $0x70] sm:$0xff] }
  0x37   : > { %632 = vmatpush1.msra.mxu1 %v492_v36  ;;  %544 = vmatprep.subr.mxu0 %v427_v37  ;;  %v486_v48 = vld [vmem:[%s1152_s12 + $0x280] sm:$0xff]  ;;  %v485_v50 = vld [vmem:[%s1152_s12 + $0x278] sm:$0xff]  ;;  %v484_v52 = vld [vmem:[%s1152_s12 + $0x270] sm:$0xff] }
  0x38   : > { %633 = vmatprep.subr.mxu1 %v491_v38  ;;  %545 = vmatpush1.msra.mxu0 %v426_v39  ;;  %v419_v53 = vld [vmem:[%s1152_s12 + $0x68] sm:$0xff]  ;;  %v418_v55 = vld [vmem:[%s1152_s12 + $0x60] sm:$0xff]  ;;  %v417_v57 = vld [vmem:[%s1152_s12 + $0x58] sm:$0xff] }
  0x39   : > { %634 = vmatpush1.msra.mxu1 %v490_v40  ;;  %546 = vmatprep.subr.mxu0 %v425_v41  ;;  %v483_v54 = vld [vmem:[%s1152_s12 + $0x268] sm:$0xff]  ;;  %v482_v56 = vld [vmem:[%s1152_s12 + $0x260] sm:$0xff]  ;;  %v481_v58 = vld [vmem:[%s1152_s12 + $0x258] sm:$0xff] }
  0x3a   : > { %635 = vmatprep.subr.mxu1 %v489_v42  ;;  %547 = vmatpush1.msra.mxu0 %v424_v43  ;;  %v416_v59 = vld [vmem:[%s1152_s12 + $0x50] sm:$0xff]  ;;  %v415_v61 = vld [vmem:[%s1152_s12 + $0x48] sm:$0xff]  ;;  %v414_v63 = vld [vmem:[%s1152_s12 + $0x40] sm:$0xff] }
  0x3b   : > { %636 = vmatpush1.msra.mxu1 %v488_v44  ;;  %548 = vmatprep.subr.mxu0 %v423_v45  ;;  %v480_v60 = vld [vmem:[%s1152_s12 + $0x250] sm:$0xff]  ;;  %v479_v62 = vld [vmem:[%s1152_s12 + $0x248] sm:$0xff]  ;;  %v478_v0 = vld [vmem:[%s1152_s12 + $0x240] sm:$0xff] }
  0x3c   : > { %637 = vmatprep.subr.mxu1 %v487_v46  ;;  %549 = vmatpush1.msra.mxu0 %v422_v47  ;;  %v413_v1 = vld [vmem:[%s1152_s12 + $0x38] sm:$0xff]  ;;  %v412_v3 = vld [vmem:[%s1152_s12 + $0x30] sm:$0xff]  ;;  %v411_v5 = vld [vmem:[%s1152_s12 + $0x28] sm:$0xff] }
  0x3d   : > { %638 = vmatpush1.msra.mxu1 %v486_v48  ;;  %550 = vmatprep.subr.mxu0 %v421_v49  ;;  %v477_v2 = vld [vmem:[%s1152_s12 + $0x238] sm:$0xff]  ;;  %v476_v4 = vld [vmem:[%s1152_s12 + $0x230] sm:$0xff]  ;;  %v475_v6 = vld [vmem:[%s1152_s12 + $0x228] sm:$0xff] }
  0x3e   : > { %639 = vmatprep.subr.mxu1 %v485_v50  ;;  %551 = vmatpush1.msra.mxu0 %v420_v51  ;;  %v410_v7 = vld [vmem:[%s1152_s12 + $0x20] sm:$0xff]  ;;  %v409_v9 = vld [vmem:[%s1152_s12 + $0x18] sm:$0xff]  ;;  %v408_v11 = vld [vmem:[%s1152_s12 + $0x10] sm:$0xff] }
  0x3f   : > { %640 = vmatpush1.msra.mxu1 %v484_v52  ;;  %552 = vmatprep.subr.mxu0 %v419_v53  ;;  %v474_v8 = vld [vmem:[%s1152_s12 + $0x220] sm:$0xff]  ;;  %v473_v10 = vld [vmem:[%s1152_s12 + $0x218] sm:$0xff]  ;;  %v472_v12 = vld [vmem:[%s1152_s12 + $0x210] sm:$0xff] }
  0x40   : > { %641 = vmatprep.subr.mxu1 %v483_v54  ;;  %553 = vmatpush1.msra.mxu0 %v418_v55  ;;  %v407_v13 = vld [vmem:[%s1152_s12 + $0x8] sm:$0xff]  ;;  %v406_v15 = vld [vmem:[%s1152_s12] sm:$0xff]  ;;  %v469_v17 = vld [vmem:[%s1152_s12 + $0x1f8] sm:$0xff] }
  0x41   : > { %642 = vmatpush1.msra.mxu1 %v482_v56  ;;  %554 = vmatprep.subr.mxu0 %v417_v57  ;;  %v471_v14 = vld [vmem:[%s1152_s12 + $0x208] sm:$0xff]  ;;  %v470_v16 = vld [vmem:[%s1152_s12 + $0x200] sm:$0xff]  ;;  %v533_v18 = vld [vmem:[%s1152_s12 + $0x3f8] sm:$0xff] }
  0x42   : > { %643 = vmatprep.subr.mxu1 %v481_v58  ;;  %555 = vmatpush1.msra.mxu0 %v416_v59  ;;  %v468_v19 = vld [vmem:[%s1152_s12 + $0x1f0] sm:$0xff]  ;;  %v467_v21 = vld [vmem:[%s1152_s12 + $0x1e8] sm:$0xff]  ;;  %v466_v23 = vld [vmem:[%s1152_s12 + $0x1e0] sm:$0xff] }
  0x43   : > { %644 = vmatpush1.msra.mxu1 %v480_v60  ;;  %556 = vmatprep.subr.mxu0 %v415_v61  ;;  %v532_v20 = vld [vmem:[%s1152_s12 + $0x3f0] sm:$0xff]  ;;  %v531_v22 = vld [vmem:[%s1152_s12 + $0x3e8] sm:$0xff]  ;;  %v530_v24 = vld [vmem:[%s1152_s12 + $0x3e0] sm:$0xff] }
  0x44   : > { %645 = vmatprep.subr.mxu1 %v479_v62  ;;  %557 = vmatpush1.msra.mxu0 %v414_v63  ;;  %v465_v25 = vld [vmem:[%s1152_s12 + $0x1d8] sm:$0xff]  ;;  %v464_v27 = vld [vmem:[%s1152_s12 + $0x1d0] sm:$0xff]  ;;  %v463_v29 = vld [vmem:[%s1152_s12 + $0x1c8] sm:$0xff] }
  0x45   : > { %646 = vmatpush1.msra.mxu1 %v478_v0  ;;  %558 = vmatprep.subr.mxu0 %v413_v1  ;;  %v529_v26 = vld [vmem:[%s1152_s12 + $0x3d8] sm:$0xff]  ;;  %v528_v28 = vld [vmem:[%s1152_s12 + $0x3d0] sm:$0xff]  ;;  %v527_v30 = vld [vmem:[%s1152_s12 + $0x3c8] sm:$0xff] }
  0x46   : > { %647 = vmatprep.subr.mxu1 %v477_v2  ;;  %559 = vmatpush1.msra.mxu0 %v412_v3  ;;  %v462_v31 = vld [vmem:[%s1152_s12 + $0x1c0] sm:$0xff]  ;;  %v461_v33 = vld [vmem:[%s1152_s12 + $0x1b8] sm:$0xff]  ;;  %v460_v35 = vld [vmem:[%s1152_s12 + $0x1b0] sm:$0xff] }
  0x47   : > { %648 = vmatpush1.msra.mxu1 %v476_v4  ;;  %560 = vmatprep.subr.mxu0 %v411_v5  ;;  %v526_v32 = vld [vmem:[%s1152_s12 + $0x3c0] sm:$0xff]  ;;  %v525_v34 = vld [vmem:[%s1152_s12 + $0x3b8] sm:$0xff]  ;;  %v524_v36 = vld [vmem:[%s1152_s12 + $0x3b0] sm:$0xff] }
  0x48   : > { %649 = vmatprep.subr.mxu1 %v475_v6  ;;  %561 = vmatpush1.msra.mxu0 %v410_v7  ;;  %v459_v37 = vld [vmem:[%s1152_s12 + $0x1a8] sm:$0xff]  ;;  %v458_v39 = vld [vmem:[%s1152_s12 + $0x1a0] sm:$0xff]  ;;  %v457_v41 = vld [vmem:[%s1152_s12 + $0x198] sm:$0xff] }
  0x49   : > { %650 = vmatpush1.msra.mxu1 %v474_v8  ;;  %562 = vmatprep.subr.mxu0 %v409_v9  ;;  %v523_v38 = vld [vmem:[%s1152_s12 + $0x3a8] sm:$0xff]  ;;  %v522_v40 = vld [vmem:[%s1152_s12 + $0x3a0] sm:$0xff]  ;;  %v521_v42 = vld [vmem:[%s1152_s12 + $0x398] sm:$0xff] }
  0x4a   : > { %651 = vmatprep.subr.mxu1 %v473_v10  ;;  %563 = vmatpush1.msra.mxu0 %v408_v11  ;;  %v456_v43 = vld [vmem:[%s1152_s12 + $0x190] sm:$0xff]  ;;  %v455_v45 = vld [vmem:[%s1152_s12 + $0x188] sm:$0xff]  ;;  %v454_v47 = vld [vmem:[%s1152_s12 + $0x180] sm:$0xff] }
  0x4b   : > { %652 = vmatpush1.msra.mxu1 %v472_v12  ;;  %564 = vmatprep.subr.mxu0 %v407_v13  ;;  %v520_v44 = vld [vmem:[%s1152_s12 + $0x390] sm:$0xff]  ;;  %v519_v46 = vld [vmem:[%s1152_s12 + $0x388] sm:$0xff]  ;;  %v518_v48 = vld [vmem:[%s1152_s12 + $0x380] sm:$0xff] }
  0x4c   : > { %653 = vmatprep.subr.mxu1 %v471_v14  ;;  %565 = vmatpush1.msra.mxu0 %v406_v15  ;;  %v453_v49 = vld [vmem:[%s1152_s12 + $0x178] sm:$0xff]  ;;  %v452_v51 = vld [vmem:[%s1152_s12 + $0x170] sm:$0xff]  ;;  %v451_v53 = vld [vmem:[%s1152_s12 + $0x168] sm:$0xff] }
  0x4d   : > { %654 = vmatpush1.msra.mxu1 %v470_v16  ;;  %566 = vmatprep.subr.mxu0 %v469_v17  ;;  %v517_v50 = vld [vmem:[%s1152_s12 + $0x378] sm:$0xff]  ;;  %v516_v52 = vld [vmem:[%s1152_s12 + $0x370] sm:$0xff]  ;;  %v515_v54 = vld [vmem:[%s1152_s12 + $0x368] sm:$0xff] }
  0x4e   : > { %655 = vmatprep.subr.mxu1 %v533_v18  ;;  %567 = vmatpush2.msra.mxu0 %v468_v19  ;;  %v450_v55 = vld [vmem:[%s1152_s12 + $0x160] sm:$0xff]  ;;  %v449_v57 = vld [vmem:[%s1152_s12 + $0x158] sm:$0xff]  ;;  %v448_v59 = vld [vmem:[%s1152_s12 + $0x150] sm:$0xff] }
  0x4f   : > { %656 = vmatpush2.msra.mxu1 %v532_v20  ;;  %568 = vmatprep.subr.mxu0 %v467_v21  ;;  %v514_v56 = vld [vmem:[%s1152_s12 + $0x360] sm:$0xff]  ;;  %v513_v58 = vld [vmem:[%s1152_s12 + $0x358] sm:$0xff]  ;;  %v512_v60 = vld [vmem:[%s1152_s12 + $0x350] sm:$0xff] }
  0x50   : > { %657 = vmatprep.subr.mxu1 %v531_v22  ;;  %569 = vmatpush2.msra.mxu0 %v466_v23  ;;  %v447_v61 = vld [vmem:[%s1152_s12 + $0x148] sm:$0xff]  ;;  %v446_v63 = vld [vmem:[%s1152_s12 + $0x140] sm:$0xff]  ;;  %v445_v1 = vld [vmem:[%s1152_s12 + $0x138] sm:$0xff] }
  0x51   : > { %658 = vmatpush2.msra.mxu1 %v530_v24  ;;  %570 = vmatprep.subr.mxu0 %v465_v25  ;;  %v511_v62 = vld [vmem:[%s1152_s12 + $0x348] sm:$0xff]  ;;  %v510_v0 = vld [vmem:[%s1152_s12 + $0x340] sm:$0xff]  ;;  %v509_v2 = vld [vmem:[%s1152_s12 + $0x338] sm:$0xff] }
  0x52   : > { %659 = vmatprep.subr.mxu1 %v529_v26  ;;  %571 = vmatpush2.msra.mxu0 %v464_v27  ;;  %v444_v3 = vld [vmem:[%s1152_s12 + $0x130] sm:$0xff]  ;;  %v443_v5 = vld [vmem:[%s1152_s12 + $0x128] sm:$0xff]  ;;  %v442_v7 = vld [vmem:[%s1152_s12 + $0x120] sm:$0xff] }
  0x53   : > { %660 = vmatpush2.msra.mxu1 %v528_v28  ;;  %572 = vmatprep.subr.mxu0 %v463_v29  ;;  %v508_v4 = vld [vmem:[%s1152_s12 + $0x330] sm:$0xff]  ;;  %v507_v6 = vld [vmem:[%s1152_s12 + $0x328] sm:$0xff]  ;;  %v506_v8 = vld [vmem:[%s1152_s12 + $0x320] sm:$0xff] }
  0x54   : > { %661 = vmatprep.subr.mxu1 %v527_v30  ;;  %573 = vmatpush2.msra.mxu0 %v462_v31  ;;  %v441_v9 = vld [vmem:[%s1152_s12 + $0x118] sm:$0xff]  ;;  %v440_v11 = vld [vmem:[%s1152_s12 + $0x110] sm:$0xff]  ;;  %v439_v13 = vld [vmem:[%s1152_s12 + $0x108] sm:$0xff] }
  0x55   : > { %662 = vmatpush2.msra.mxu1 %v526_v32  ;;  %574 = vmatprep.subr.mxu0 %v461_v33  ;;  %v505_v10 = vld [vmem:[%s1152_s12 + $0x318] sm:$0xff]  ;;  %v504_v12 = vld [vmem:[%s1152_s12 + $0x310] sm:$0xff]  ;;  %v503_v14 = vld [vmem:[%s1152_s12 + $0x308] sm:$0xff] }
  0x56   : > { %663 = vmatprep.subr.mxu1 %v525_v34  ;;  %575 = vmatpush2.msra.mxu0 %v460_v35  ;;  %v438_v15 = vld [vmem:[%s1152_s12 + $0x100] sm:$0xff]  ;;  %v391_v16 = vld [vmem:[%s1154_s13 + $0x8] sm:$0xff]  ;;  %v393_v18 = vld [vmem:[%s1154_s13 + $0x18] sm:$0xff] }
  0x57   : > { %664 = vmatpush2.msra.mxu1 %v524_v36  ;;  %576 = vmatprep.subr.mxu0 %v459_v37  ;;  %v502_v17 = vld [vmem:[%s1152_s12 + $0x300] sm:$0xff]  ;;  %v392_v20 = vld [vmem:[%s1154_s13 + $0x10] sm:$0xff]  ;;  %v395_v21 = vld [vmem:[%s1154_s13 + $0x28] sm:$0xff] }
  0x58   : > { %665 = vmatprep.subr.mxu1 %v523_v38  ;;  %577 = vmatpush2.msra.mxu0 %v458_v39  ;;  %v390_v19 = vld [vmem:[%s1154_s13] sm:$0xff]  ;;  %v397_v22 = vld [vmem:[%s1154_s13 + $0x38] sm:$0xff]  ;;  %v396_v24 = vld [vmem:[%s1154_s13 + $0x30] sm:$0xff] }
  0x59   : > { %666 = vmatpush2.msra.mxu1 %v522_v40  ;;  %578 = vmatprep.subr.mxu0 %v457_v41  ;;  %v394_v23 = vld [vmem:[%s1154_s13 + $0x20] sm:$0xff]  ;;  %v399_v25 = vld [vmem:[%s1154_s13 + $0x48] sm:$0xff]  ;;  %v401_v26 = vld [vmem:[%s1154_s13 + $0x58] sm:$0xff] }
  0x5a   : > { %667 = vmatprep.subr.mxu1 %v521_v42  ;;  %579 = vmatpush2.msra.mxu0 %v456_v43  ;;  %v398_v27 = vld [vmem:[%s1154_s13 + $0x40] sm:$0xff]  ;;  %v400_v28 = vld [vmem:[%s1154_s13 + $0x50] sm:$0xff]  ;;  %v403_v29 = vld [vmem:[%s1154_s13 + $0x68] sm:$0xff] }
  0x5b   : > { %668 = vmatpush2.msra.mxu1 %v520_v44  ;;  %580 = vmatprep.subr.mxu0 %v455_v45  ;;  %v405_v30 = vld [vmem:[%s1154_s13 + $0x78] sm:$0xff]  ;;  %v402_v31 = vld [vmem:[%s1154_s13 + $0x60] sm:$0xff]  ;;  %v404_v32 = vld [vmem:[%s1154_s13 + $0x70] sm:$0xff] }
  0x5c   : > { %669 = vmatprep.subr.mxu1 %v519_v46  ;;  %581 = vmatpush2.msra.mxu0 %v454_v47  ;;  %v382_v34 = vld [vmem:[#allocation2 + $0x30] sm:$0xff]  ;;  %v383_v38 = vld [vmem:[#allocation2] sm:$0xff]  ;;  %v384_v43 = vld [vmem:[#allocation2 + $0x18] sm:$0xff] }
  0x5d   : > { %670 = vmatpush2.msra.mxu1 %v518_v48  ;;  %582 = vmatprep.subr.mxu0 %v453_v49  ;;  %v385_v48 = vld [vmem:[#allocation2 + $0x10] sm:$0xff] }
  0x5e   : > { %671 = vmatprep.subr.mxu1 %v517_v50  ;;  %583 = vmatpush2.msra.mxu0 %v452_v51 }
  0x5f   : > { %672 = vmatpush2.msra.mxu1 %v516_v52  ;;  %584 = vmatprep.subr.mxu0 %v451_v53  ;;  %v386_v53 = vld [vmem:[#allocation2 + $0x8] sm:$0xff] }
  0x60   : > { %673 = vmatprep.subr.mxu1 %v515_v54  ;;  %585 = vmatpush2.msra.mxu0 %v450_v55 }
  0x61   : > { %674 = vmatpush2.msra.mxu1 %v514_v56  ;;  %586 = vmatprep.subr.mxu0 %v449_v57 }
  0x62   : > { %675 = vmatprep.subr.mxu1 %v513_v58  ;;  %587 = vmatpush2.msra.mxu0 %v448_v59  ;;  %v387_v58 = vld [vmem:[#allocation2 + $0x20] sm:$0xff] }
  0x63   : > { %676 = vmatpush2.msra.mxu1 %v512_v60  ;;  %588 = vmatprep.subr.mxu0 %v447_v61 }
  0x64   : > { %677 = vmatprep.subr.mxu1 %v511_v62  ;;  %589 = vmatpush2.msra.mxu0 %v446_v63  ;;  %v388_v63 = vld [vmem:[#allocation2 + $0x28] sm:$0xff] }
  0x65   : > { %678 = vmatpush2.msra.mxu1 %v510_v0  ;;  %590 = vmatprep.subr.mxu0 %v445_v1 }
  0x66   : > { %679 = vmatprep.subr.mxu1 %v509_v2  ;;  %591 = vmatpush2.msra.mxu0 %v444_v3 }
  0x67   : > { %680 = vmatpush2.msra.mxu1 %v508_v4  ;;  %592 = vmatprep.subr.mxu0 %v443_v5  ;;  %v389_v4 = vld [vmem:[#allocation2 + $0x38] sm:$0xff] }
  0x68   : > { %681 = vmatprep.subr.mxu1 %v507_v6  ;;  %593 = vmatpush2.msra.mxu0 %v442_v7 }
  0x69   : > { %682 = vmatpush2.msra.mxu1 %v506_v8  ;;  %594 = vmatprep.subr.mxu0 %v441_v9 }
  0x6a   : > { %683 = vmatprep.subr.mxu1 %v505_v10  ;;  %595 = vmatpush2.msra.mxu0 %v440_v11 }
  0x6b   : > { %684 = vmatpush2.msra.mxu1 %v504_v12  ;;  %596 = vmatprep.subr.mxu0 %v439_v13 }
  0x6c   : > { %685 = vmatprep.subr.mxu1 %v503_v14  ;;  %597 = vmatpush2.msra.mxu0 %v438_v15 }
  0x6d   : > { %598 = vmatprep.mubr.f32.mxu0 %v391_v16  ;;  %686 = vmatpush2.msra.mxu1 %v502_v17 }
  0x6e   : > { %687 = vmatprep.mubr.f32.mxu1 %v393_v18  ;;  %599 = vmatmul.mubr.f32.vlgmr.msra.gmra.mxu0 %v390_v19 }
  0x6f   : > { %688 = vmatmul.mubr.f32.vlgmr.msra.gmra.mxu1 %v392_v20  ;;  %604 = vmatprep.mubr.f32.mxu0 %v395_v21 }
  0x70   : > { %693 = vmatprep.mubr.f32.mxu1 %v397_v22 }
  0x72   : > { %605 = vmatmul.mubr.f32.gmra.mxu0 %v394_v23 }
  0x73   : > { %694 = vmatmul.mubr.f32.gmra.mxu1 %v396_v24  ;;  %610 = vmatprep.mubr.f32.mxu0 %v399_v25 }
  0x74   : > { %699 = vmatprep.mubr.f32.mxu1 %v401_v26 }
  0x76   : > { %611 = vmatmul.mubr.f32.gmra.mxu0 %v398_v27 }
  0x77   : > { %700 = vmatmul.mubr.f32.gmra.mxu1 %v400_v28  ;;  %616 = vmatprep.mubr.f32.mxu0 %v403_v29 }
  0x78   : > { %705 = vmatprep.mubr.f32.mxu1 %v405_v30 }
  0x7a   : > { %617 = vmatmul.mubr.f32.gmra.mxu0 %v402_v31 }
  0x7b   : > { %706 = vmatmul.mubr.f32.gmra.mxu1 %v404_v32 }
 0x12e   : > { %v600_v33 = vpop.f32.mrf.mxu0 }
 0x12f   : > { %v689_v35 = vpop.f32.mrf.mxu1 }
 0x130   : > { %v690_v36 = vadd.f32 %v689_v35, %v600_v33  ;;  %v602_v37 = vpop.f32.mrf.mxu0 }
 0x131   : > { %v691_v39 = vpop.f32.mrf.mxu1 }
 0x132   : > { %v712_v40 = vadd.f32 %v690_v36, %v382_v34  ;;  %v692_v41 = vadd.f32 %v691_v39, %v602_v37  ;;  %v606_v42 = vpop.f32.mrf.mxu0 }
 0x133   : > { %v695_v44 = vpop.f32.mrf.mxu1 }
 0x134   : > { %720 = vst [vmem:[#allocation2 + $0x30] sm:$0xff] %v712_v40  ;;  %v713_v45 = vadd.f32 %v692_v41, %v383_v38  ;;  %v696_v46 = vadd.f32 %v695_v44, %v606_v42  ;;  %v608_v47 = vpop.f32.mrf.mxu0 }
 0x135   : > { %v697_v49 = vpop.f32.mrf.mxu1 }
 0x136   : > { %721 = vst [vmem:[#allocation2] sm:$0xff] %v713_v45  ;;  %v714_v50 = vadd.f32 %v696_v46, %v384_v43  ;;  %v698_v51 = vadd.f32 %v697_v49, %v608_v47  ;;  %v612_v52 = vpop.f32.mrf.mxu0 }
 0x137   : > { %v701_v54 = vpop.f32.mrf.mxu1 }
 0x138   : > { %722 = vst [vmem:[#allocation2 + $0x18] sm:$0xff] %v714_v50  ;;  %v715_v55 = vadd.f32 %v698_v51, %v385_v48  ;;  %v702_v56 = vadd.f32 %v701_v54, %v612_v52  ;;  %v614_v57 = vpop.f32.mrf.mxu0 }
 0x139   : > { %v703_v59 = vpop.f32.mrf.mxu1 }
 0x13a   : > { %723 = vst [vmem:[#allocation2 + $0x10] sm:$0xff] %v715_v55  ;;  %v716_v60 = vadd.f32 %v702_v56, %v386_v53  ;;  %v704_v61 = vadd.f32 %v703_v59, %v614_v57  ;;  %v618_v62 = vpop.f32.mrf.mxu0 }
 0x13b   : > { %v707_v0 = vpop.f32.mrf.mxu1 }
 0x13c   : > { %724 = vst [vmem:[#allocation2 + $0x8] sm:$0xff] %v716_v60  ;;  %v717_v1 = vadd.f32 %v704_v61, %v387_v58  ;;  %v708_v2 = vadd.f32 %v707_v0, %v618_v62  ;;  %v620_v3 = vpop.f32.mrf.mxu0 }
 0x13d   : > { %v709_v5 = vpop.f32.mrf.mxu1 }
 0x13e   : > { %725 = vst [vmem:[#allocation2 + $0x20] sm:$0xff] %v717_v1  ;;  %v718_v6 = vadd.f32 %v708_v2, %v388_v63  ;;  %v710_v7 = vadd.f32 %v709_v5, %v620_v3  ;;  %731 = sbr.rel (%p929_p11) target bundleno = 339 (0x153), region = 67 }
 0x140   : > { %726 = vst [vmem:[#allocation2 + $0x28] sm:$0xff] %v718_v6  ;;  %v719_v8 = vadd.f32 %v710_v7, %v389_v4 }
 0x142   : > { %727 = vst [vmem:[#allocation2 + $0x38] sm:$0xff] %v719_v8 }
 0x143   : > { %v742_v9 = vlaneseq  ;;  %v740_v11 = vld [vmem:[%s1363_s2] sm:$0x3]  ;;  %v732_v12 = vld [vmem:[#allocation2 + $0x30] sm:$0xff]  ;;  %v761_v17 = vld [vmem:[%s1364_s3 + $0x8] sm:$0xff] }
 0x144   : > { %v733_v14 = vld [vmem:[#allocation2] sm:$0xff]  ;;  %v734_v18 = vld [vmem:[#allocation2 + $0x18] sm:$0xff]  ;;  %v735_v19 = vld [vmem:[#allocation2 + $0x10] sm:$0xff] }
 0x145   : > { %v743_v10 = vshrl.u32 %v742_v9, 7  ;;  %v760_v16 = vld [vmem:[%s1364_s3] sm:$0xff]  ;;  %v736_v20 = vld [vmem:[#allocation2 + $0x8] sm:$0xff]  ;;  %v762_v26 = vld [vmem:[%s1364_s3 + $0x10] sm:$0xff] }
 0x146   : > { %v737_v23 = vld [vmem:[#allocation2 + $0x20] sm:$0xff]  ;;  %v763_v27 = vld [vmem:[%s1364_s3 + $0x18] sm:$0xff]  ;;  %v765_v33 = vld [vmem:[%s1364_s3 + $0x28] sm:$0xff] }
 0x147   : > { %v744_v13 = vsub.s32 0, %v743_v10  ;;  %v748_v15 = vsub.s32 1, %v743_v10  ;;  %v738_v24 = vld [vmem:[#allocation2 + $0x28] sm:$0xff]  ;;  %v764_v28 = vld [vmem:[%s1364_s3 + $0x20] sm:$0xff]  ;;  %v766_v34 = vld [vmem:[%s1364_s3 + $0x30] sm:$0xff] }
 0x148   : > { %v767_v35 = vld [vmem:[%s1364_s3 + $0x38] sm:$0xff] }
 0x149   : > { %v745_v21 = vrot.slane %v740_v11, %v744_v13  ;;  %v749_v22 = vrot.slane %v740_v11, %v748_v15  ;;  %v739_v25 = vld [vmem:[#allocation2 + $0x38] sm:$0xff] }
 0x14b   : > { %v752_v29 = vadd.f32 %v745_v21, %v732_v12  ;;  %v753_v30 = vadd.f32 %v749_v22, %v733_v14  ;;  %v754_v31 = vadd.f32 %v745_v21, %v734_v18  ;;  %v755_v32 = vadd.f32 %v749_v22, %v735_v19 }
 0x14c   : > { %v756_v36 = vadd.f32 %v745_v21, %v736_v20  ;;  %v757_v37 = vadd.f32 %v749_v22, %v737_v23  ;;  %v758_v38 = vadd.f32 %v745_v21, %v738_v24  ;;  %v759_v39 = vadd.f32 %v749_v22, %v739_v25 }
 0x14d   : > { %v768_v40 = vadd.f32 %v760_v16, %v752_v29  ;;  %v769_v41 = vadd.f32 %v761_v17, %v753_v30  ;;  %v770_v42 = vadd.f32 %v762_v26, %v754_v31  ;;  %v771_v43 = vadd.f32 %v763_v27, %v755_v32 }
 0x14e   : > { %v772_v44 = vadd.f32 %v764_v28, %v756_v36  ;;  %v773_v45 = vadd.f32 %v765_v33, %v757_v37  ;;  %v774_v46 = vadd.f32 %v766_v34, %v758_v38  ;;  %v775_v47 = vadd.f32 %v767_v35, %v759_v39 }
 0x14f   : > { %776 = vst [vmem:[#allocation4] sm:$0xff] %v768_v40  ;;  %777 = vst [vmem:[#allocation4 + $0x8] sm:$0xff] %v769_v41 }
 0x150   : > { %778 = vst [vmem:[#allocation4 + $0x10] sm:$0xff] %v770_v42  ;;  %779 = vst [vmem:[#allocation4 + $0x18] sm:$0xff] %v771_v43 }
 0x151   : > { %780 = vst [vmem:[#allocation4 + $0x20] sm:$0xff] %v772_v44  ;;  %781 = vst [vmem:[#allocation4 + $0x28] sm:$0xff] %v773_v45 }
 0x152   : > { %782 = vst [vmem:[#allocation4 + $0x30] sm:$0xff] %v774_v46  ;;  %783 = vst [vmem:[#allocation4 + $0x38] sm:$0xff] %v775_v47 }
 0x153 PF: > { %p1331_p12 = scmp.eq.s32.totalorder %s915_s20, 3  ;;  %s1055_s13 = smov [#allocation4]  }
 0x154   : > { %s796_s14 = sshll.u32 %s1055_s13, 4  ;;  %s797_s14 = int_to_ptr.vmem [resolvable:$true] %s796_s14 }
 0x155   : > { %s986_s15 = scalar_lea.vmem %s797_s14, 1024  ;;  %p993_p2 = scmp.lt.s32.totalorder %s797_s14, %s797_s14 }
 0x156   : > { %p987_p13 = scmp.ne.s32.totalorder %s797_s14, %s986_s15  ;;  %p994_p3 = scmp.lt.s32.totalorder %s986_s15, %s986_s15 }
 0x158   : > { %p988_p0 = pnand %p987_p13, %p1331_p12  ;;  %p995_p4 = por %p994_p3, %p993_p2 }
 0x15a   : > { %p989_p1 = pneg %p988_p0 }
 0x15c   : > { %p996_p5 = pnand %p995_p4, %p989_p1 }
 0x15e   : > { %999 = shalt.err (!%p996_p5)
}
 0x15f   : > { %s1056_s22 = smov 256   ;;  %s1057_s20 = smov 16  }
 0x160   : > { %937 = dma.vmem_to_hbm [thread:$0]  (%p1331_p12), %s797_s14, 1024, %s1365_s4, [#allocation5], %s1056_s22, %s1056_s22, %s1057_s20  }
 0x161   : > { %1031 = dma.done.wait (%p1331_p12), [#allocation5], 1024  }
 0x162   : > { %1033 = vsyncadd (%p1331_p12), [#allocation5], 4294966272 }
 0x163 PF: > { %s15_s19 = sadd.s32 1, %s1052_s19   ;;  %s1367_s15 = smov %s1040_s16 }
 0x164   : > { %p12_p6 = scmp.ge.s32.totalorder %s15_s19, 6   ;;  %s1368_s16 = smov %s1119_s24 }
 0x165   : > { %s1369_s17 = smov %s1048_s18  ;;  %s1370_s18 = smov %s1372_s21 }
 0x166   :  { %14 = sbr.rel (!%p12_p6) target bundleno = 3 (0x3), region = 109 }
 0x16b   :  { %812 = vsyncpa [#allocation5], 1 }
 0x16c   :  { %814 = vsyncpa [#allocation5 + $0x1], 1 }

</bundles_post_ra>
